<compile_context>
chip_gen: v7x
topology: tpu7x:2x2x1
jax: 0.10.0
libtpu: 0.0.40
codegen_flags: <defaults>
</compile_context>

<pallas_src>
import numpy as np
import jax
import jax.numpy as jnp
from jax.experimental import pallas as pl
from jax.experimental.pallas import tpu as pltpu


# ----------------------------- host-side glue ------------------------------
def _digits(b, n, dim):
    return [(b // dim ** (n - 1 - q)) % dim for q in range(n)]


def _index(ds, dim):
    b = 0
    for d in ds:
        b = b * dim + d
    return b


def gellmann(mtx_id, j, k, dim):
    """Generalized Gell-Mann generator (symmetric / antisymmetric / diagonal)."""
    M = np.zeros((dim, dim), dtype=np.complex128)
    if mtx_id == 0:                      # symmetric, levels j<k (1-indexed)
        M[j - 1, k - 1] = 1.0
        M[k - 1, j - 1] = 1.0
    elif mtx_id == 1:                    # antisymmetric
        M[j - 1, k - 1] = -1j
        M[k - 1, j - 1] = 1j
    else:                                # diagonal, index j in [1, dim-1]
        c = np.sqrt(2.0 / (j * (j + 1)))
        for m in range(j):
            M[m, m] = c
        M[j, j] = -j * c
    return M


def rot_matrix(mtx_id, j, k, theta, dim):
    """exp(-i * theta * lambda / 2) via eigendecomposition of the Hermitian generator."""
    G = gellmann(mtx_id, j, k, dim)
    w, V = np.linalg.eigh(G)
    return (V * np.exp(-0.5j * theta * w)) @ V.conj().T


def embed_single(U, index, n, dim):
    full = np.array([[1.0 + 0j]])
    for q in range(n):
        full = np.kron(full, U if q == index else np.eye(dim, dtype=np.complex128))
    return full


def cnot_matrix(ctrl, tgt, n, dim):
    """Qudit CNOT: |c, t> -> |c, (t + c) mod dim>."""
    D = dim ** n
    M = np.zeros((D, D), dtype=np.complex128)
    for b in range(D):
        ds = _digits(b, n, dim)
        ds2 = list(ds)
        ds2[tgt] = (ds[tgt] + ds[ctrl]) % dim
        M[_index(ds2, dim), b] = 1.0
    return M


def build_circuit(n, l, dim, struct_seed=0):
    """Mirror Model1.__init__ structure: per layer, n Rot gates + (n-1) CNOTs."""
    np.random.seed(struct_seed)
    specs = []
    for _ in range(l):
        for j in range(n):
            mdx = int(np.random.choice(3))
            if mdx == 2:
                d1 = int(np.random.choice(dim - 1)) + 1
                specs.append(("rot", mdx, j, d1, 0))
            else:
                d2 = int(np.random.choice(dim - 1)) + 2
                d1 = int(np.random.choice(d2 - 1)) + 1
                specs.append(("rot", mdx, j, d1, d2))
        for j in range(n - 1):
            specs.append(("cnot", j, j + 1))

    n_rot = sum(1 for s in specs if s[0] == "rot")
    thetas = np.asarray(
        jax.random.uniform(jax.random.PRNGKey(0), (n_rot,), minval=0.0, maxval=2 * np.pi)
    )

    gates = []
    ti = 0
    for s in specs:
        if s[0] == "rot":
            _, mdx, idx, d1, d2 = s
            U = rot_matrix(mdx, d1, d2, float(thetas[ti]), dim)
            ti += 1
            gates.append(embed_single(U, idx, n, dim))
        else:
            _, c, t = s
            gates.append(cnot_matrix(c, t, n, dim))
    return gates
    # TODO(synk): torch learnable-parameter / autograd behaviour of ops.Rot is
    # not modelled; angles are fixed deterministic initial values.


def pack_gates_block_real(gates, D, Dp):
    """Pack each complex gate G into the pre-transposed real block matrix B so
    that [re | im]_new = [re | im] @ B, with B = [[Gr^T, Gi^T], [-Gi^T, Gr^T]].
    Only the nonzero DxD blocks are written; padded lanes of psi stay zero."""
    L = len(gates)
    packed = np.zeros((L, 2 * Dp, 2 * Dp), dtype=np.float32)
    for g, G in enumerate(gates):
        GT = G.T
        Gr = GT.real.astype(np.float32)
        Gi = GT.imag.astype(np.float32)
        packed[g, :D, :D] = Gr
        packed[g, :D, Dp:Dp + D] = Gi
        packed[g, Dp:Dp + D, :D] = -Gi
        packed[g, Dp:Dp + D, Dp:Dp + D] = Gr
    return packed


# ------------------------------ Pallas kernel -------------------------------
def circuit_kernel(gates_ref, prob_ref):
    # gates_ref: (L, 2*Dp, 2*Dp) block-real, pre-transposed gates (resident in VMEM)
    # prob_ref : (1, Dp) output probabilities
    L = gates_ref.shape[0]
    two_dp = gates_ref.shape[1]
    dp = prob_ref.shape[1]

    # |0...0> one-hot initial state, packed [real lanes | imag lanes].
    lane = jax.lax.broadcasted_iota(jnp.int32, (1, two_dp), 1)
    psi = jnp.where(lane == 0, 1.0, 0.0).astype(jnp.float32)

    # L is static -> fully unrolled straight-line gate chain; one MXU dot/gate.
    for g in range(L):
        psi = jnp.dot(
            psi,
            gates_ref[g],
            preferred_element_type=jnp.float32,
            precision=jax.lax.Precision.HIGHEST,
        )

    pr = psi[:, :dp]
    pi = psi[:, dp:]
    prob_ref[...] = pr * pr + pi * pi


def run_circuit(gates_packed):
    L, two_dp, _ = gates_packed.shape
    dp = two_dp // 2
    return pl.pallas_call(
        circuit_kernel,
        out_shape=jax.ShapeDtypeStruct((1, dp), jnp.float32),
        grid_spec=pltpu.PrefetchScalarGridSpec(
            num_scalar_prefetch=0,
            grid=(1,),
            in_specs=[
                pl.BlockSpec((L, two_dp, two_dp), lambda i: (0, 0, 0)),
            ],
            out_specs=pl.BlockSpec((1, dp), lambda i: (0, 0)),
        ),
        compiler_params=pltpu.CompilerParams(
            dimension_semantics=("arbitrary",),
        ),
    )(gates_packed)


# ---------------------------------- main ------------------------------------
if __name__ == "__main__":
    n, l, dim = 2, 2, 3            # small config: D = 3**2 = 9 basis states
    D = dim ** n
    Dp = 128                       # pad Hilbert dim to a full lane width

    gates = build_circuit(n, l, dim, struct_seed=0)
    L = len(gates)                 # 6 gates: 1.5 MiB of packed gate data

    gates_packed = pack_gates_block_real(gates, D, Dp)

    probs_pad = run_circuit(jnp.asarray(gates_packed))
    probs_pad = jax.block_until_ready(probs_pad)
    probs = np.asarray(probs_pad)[0, :D]

    # pure numpy reference of the same forward pass
    psi = np.zeros((D,), dtype=np.complex128)
    psi[0] = 1.0
    for G in gates:
        psi = G @ psi
    probs_ref = np.abs(psi) ** 2

    assert np.allclose(probs, probs_ref, atol=1e-5), (probs, probs_ref)
    assert abs(probs.sum() - 1.0) < 1e-5
    print("KERNEL_OK")
</pallas_src>

<mosaic_0001>
module attributes {stable_mosaic.version = 11 : i64} {
  func.func @circuit_kernel(%arg0: i32, %arg1: memref<6x256x256xf32, #tpu.memory_space<vmem>>, %arg2: memref<1x128xf32, #tpu.memory_space<vmem>>) attributes {dimension_semantics = [#tpu.dimension_semantics<arbitrary>], iteration_bounds = array<i64: 1>, scalar_prefetch = 0 : i64, scratch_operands = 0 : i64, tpu.core_type = #tpu.core_type<tc>, window_params = [{pipeline_mode = #tpu.pipeline_mode<synchronous>, transform_indices = @transform_0, window_bounds = array<i64: 6, 256, 256>}, {pipeline_mode = #tpu.pipeline_mode<synchronous>, transform_indices = @transform_1, window_bounds = array<i64: 1, 128>}]} {
    %0 = tpu.iota {dimensions = array<i32: 1>} : vector<1x256xi32>
    %c0_i32 = arith.constant 0 : i32
    %1 = vector.broadcast %c0_i32 : i32 to vector<1x256xi32>
    %2 = arith.cmpi eq, %0, %1 : vector<1x256xi32>
    %cst = arith.constant 1.000000e+00 : f32
    %cst_0 = arith.constant 0.000000e+00 : f32
    %3 = vector.broadcast %cst : f32 to vector<1x256xf32>
    %4 = vector.broadcast %cst_0 : f32 to vector<1x256xf32>
    %5 = arith.select %2, %3, %4 : vector<1x256xi1>, vector<1x256xf32>
    %c0 = arith.constant 0 : index
    %c0_1 = arith.constant 0 : index
    %c0_2 = arith.constant 0 : index
    %6 = vector.load %arg1[%c0, %c0_1, %c0_2] : memref<6x256x256xf32, #tpu.memory_space<vmem>>, vector<1x256x256xf32>
    %7 = vector.shape_cast %6 : vector<1x256x256xf32> to vector<256x256xf32>
    %cst_3 = arith.constant dense<0.000000e+00> : vector<1x256xf32>
    %8 = tpu.matmul %5, %7, %cst_3 {dimension_numbers = #tpu.dot_dimension_numbers<[1], [0], [0], [1], [0, 0, 1, 1], [], []>, precision = #tpu.contract_precision<fp32>} : vector<1x256xf32>, vector<256x256xf32>, vector<1x256xf32> -> vector<1x256xf32>
    %c1 = arith.constant 1 : index
    %c0_4 = arith.constant 0 : index
    %c0_5 = arith.constant 0 : index
    %9 = vector.load %arg1[%c1, %c0_4, %c0_5] : memref<6x256x256xf32, #tpu.memory_space<vmem>>, vector<1x256x256xf32>
    %10 = vector.shape_cast %9 : vector<1x256x256xf32> to vector<256x256xf32>
    %cst_6 = arith.constant dense<0.000000e+00> : vector<1x256xf32>
    %11 = tpu.matmul %8, %10, %cst_6 {dimension_numbers = #tpu.dot_dimension_numbers<[1], [0], [0], [1], [0, 0, 1, 1], [], []>, precision = #tpu.contract_precision<fp32>} : vector<1x256xf32>, vector<256x256xf32>, vector<1x256xf32> -> vector<1x256xf32>
    %c2 = arith.constant 2 : index
    %c0_7 = arith.constant 0 : index
    %c0_8 = arith.constant 0 : index
    %12 = vector.load %arg1[%c2, %c0_7, %c0_8] : memref<6x256x256xf32, #tpu.memory_space<vmem>>, vector<1x256x256xf32>
    %13 = vector.shape_cast %12 : vector<1x256x256xf32> to vector<256x256xf32>
    %cst_9 = arith.constant dense<0.000000e+00> : vector<1x256xf32>
    %14 = tpu.matmul %11, %13, %cst_9 {dimension_numbers = #tpu.dot_dimension_numbers<[1], [0], [0], [1], [0, 0, 1, 1], [], []>, precision = #tpu.contract_precision<fp32>} : vector<1x256xf32>, vector<256x256xf32>, vector<1x256xf32> -> vector<1x256xf32>
    %c3 = arith.constant 3 : index
    %c0_10 = arith.constant 0 : index
    %c0_11 = arith.constant 0 : index
    %15 = vector.load %arg1[%c3, %c0_10, %c0_11] : memref<6x256x256xf32, #tpu.memory_space<vmem>>, vector<1x256x256xf32>
    %16 = vector.shape_cast %15 : vector<1x256x256xf32> to vector<256x256xf32>
    %cst_12 = arith.constant dense<0.000000e+00> : vector<1x256xf32>
    %17 = tpu.matmul %14, %16, %cst_12 {dimension_numbers = #tpu.dot_dimension_numbers<[1], [0], [0], [1], [0, 0, 1, 1], [], []>, precision = #tpu.contract_precision<fp32>} : vector<1x256xf32>, vector<256x256xf32>, vector<1x256xf32> -> vector<1x256xf32>
    %c4 = arith.constant 4 : index
    %c0_13 = arith.constant 0 : index
    %c0_14 = arith.constant 0 : index
    %18 = vector.load %arg1[%c4, %c0_13, %c0_14] : memref<6x256x256xf32, #tpu.memory_space<vmem>>, vector<1x256x256xf32>
    %19 = vector.shape_cast %18 : vector<1x256x256xf32> to vector<256x256xf32>
    %cst_15 = arith.constant dense<0.000000e+00> : vector<1x256xf32>
    %20 = tpu.matmul %17, %19, %cst_15 {dimension_numbers = #tpu.dot_dimension_numbers<[1], [0], [0], [1], [0, 0, 1, 1], [], []>, precision = #tpu.contract_precision<fp32>} : vector<1x256xf32>, vector<256x256xf32>, vector<1x256xf32> -> vector<1x256xf32>
    %c5 = arith.constant 5 : index
    %c0_16 = arith.constant 0 : index
    %c0_17 = arith.constant 0 : index
    %21 = vector.load %arg1[%c5, %c0_16, %c0_17] : memref<6x256x256xf32, #tpu.memory_space<vmem>>, vector<1x256x256xf32>
    %22 = vector.shape_cast %21 : vector<1x256x256xf32> to vector<256x256xf32>
    %cst_18 = arith.constant dense<0.000000e+00> : vector<1x256xf32>
    %23 = tpu.matmul %20, %22, %cst_18 {dimension_numbers = #tpu.dot_dimension_numbers<[1], [0], [0], [1], [0, 0, 1, 1], [], []>, precision = #tpu.contract_precision<fp32>} : vector<1x256xf32>, vector<256x256xf32>, vector<1x256xf32> -> vector<1x256xf32>
    %24 = vector.extract_strided_slice %23 {offsets = [0, 0], sizes = [1, 128], strides = [1, 1]} : vector<1x256xf32> to vector<1x128xf32>
    %25 = vector.extract_strided_slice %23 {offsets = [0, 128], sizes = [1, 128], strides = [1, 1]} : vector<1x256xf32> to vector<1x128xf32>
    %26 = arith.mulf %24, %24 : vector<1x128xf32>
    %27 = arith.mulf %25, %25 : vector<1x128xf32>
    %28 = arith.addf %26, %27 : vector<1x128xf32>
    %c0_19 = arith.constant 0 : index
    %c0_20 = arith.constant 0 : index
    %29 = vector.load %arg2[%c0_19, %c0_20] : memref<1x128xf32, #tpu.memory_space<vmem>>, vector<1x128xf32>
    tpu.vector_store %arg2[%c0_19, %c0_20], %28 {strides = array<i32>} : memref<1x128xf32, #tpu.memory_space<vmem>>, vector<1x128xf32>,
    return
  }
  func.func @transform_0(%arg0: i32) -> (i32, i32, i32) {
    %c0_i32 = arith.constant 0 : i32
    %c0_i32_0 = arith.constant 0 : i32
    %c0_i32_1 = arith.constant 0 : i32
    %c0_i32_2 = arith.constant 0 : i32
    return %c0_i32, %c0_i32_0, %c0_i32_1 : i32, i32, i32
  }
  func.func @transform_1(%arg0: i32) -> (i32, i32) {
    %c0_i32 = arith.constant 0 : i32
    %c0_i32_0 = arith.constant 0 : i32
    %c0_i32_1 = arith.constant 0 : i32
    return %c0_i32, %c0_i32_0 : i32, i32
  }
}

</mosaic_0001>

<bundles_post_ra>
// kernel: tpu_custom_call.1
= control target key start
LH: loop header
LB: loop body
LE: loop exit
PB: predicated region body
PF: predicated region fallthrough
CT: control target
= control target key end

     0   :  { %6 = vsyncpa [#allocation3], 0  ;;  %s16397_s0 = inlined_call_operand.hbm [shape: f32[6,256,256], index: 0, kind: input, shape index: {}]   ;;  %s16398_s1 = inlined_call_operand.hbm [shape: f32[1,128], index: 1, kind: output, shape index: {}]  }
   0x1   :  { %7 = vsyncpa [#allocation4], 0  ;;  %s10551_s6 = smov [#allocation2]   ;;  %s10503_s10 = scalar_lea.hbm %s16397_s0, 49152 }
   0x2   :  { %s13_s7 = sshll.u32 %s10551_s6, 4  ;;  %p10504_p0 = scmp.ne.s32.totalorder %s16397_s0, %s10503_s10  ;;  %s14_s7 = int_to_ptr.vmem [resolvable:$true] %s13_s7 }
   0x3   :  { %p10507_p1 = scmp.lt.u32.totalorder %s10503_s10, %s16397_s0 }
   0x5   :  { %p10509_p2 = pnand %p10507_p1, %p10504_p0 }
   0x7   :  { %10512 = shalt.err (!%p10509_p2)
}
   0x8   :  { %s10513_s15 = scalar_lea.vmem %s14_s7, 49152  ;;  %p10518_p4 = scmp.lt.s32.totalorder %s14_s7, %s14_s7 }
   0x9   :  { %p10514_p3 = scmp.ne.s32.totalorder %s14_s7, %s10513_s15  ;;  %p10519_p5 = scmp.lt.s32.totalorder %s10513_s15, %s10513_s15 }
   0xb   :  { %p10520_p6 = por %p10519_p5, %p10518_p4 }
   0xd   :  { %p10521_p7 = pnand %p10520_p6, %p10514_p3 }
   0xf   :  { %10524 = shalt.err (!%p10521_p7)
}
  0x10   :  { %s10552_s16 = smov 256   ;;  %s10553_s17 = smov 16  }
  0x11   :  { %19 = dma.hbm_to_vmem [thread:$0]  %s16397_s0, 49152, %s14_s7, [#allocation3], %s10552_s16, %s10552_s16, %s10553_s17  }
  0x12   :  { %10547 = dma.done.wait [#allocation3], 49152  }
  0x13   :  { %10548 = vsyncadd [#allocation3], 4294918144  ;;  %v16405_v0 = vmov 0.0   ;;  %v10580_v1 = vld [vmem:[#allocation2 + $0x8] sm:$0xff]  ;;  %v10582_v2 = vld [vmem:[#allocation2 + $0x18] sm:$0xff]  ;;  %v23_v34 = vlaneseq  ;;  %s10556_s0 = smov [#allocation5]  }
  0x14   :  { %226 = vmatprep.mubr.f32.mxu0 %v16405_v0  ;;  %v10584_v3 = vld [vmem:[#allocation2] sm:$0xff]  ;;  %v94_v4 = vand.u32 4294901760, %v10580_v1  ;;  %v98_v5 = vand.u32 4294901760, %v10582_v2  ;;  %v10588_v6 = vld [vmem:[#allocation2 + $0x10] sm:$0xff]  ;;  %v10591_v8 = vld [vmem:[#allocation2 + $0x28] sm:$0xff]  ;;  %s8121_s20 = sshll.u32 %s10556_s0, 4  ;;  %s8122_s20 = int_to_ptr.vmem [resolvable:$true] %s8121_s20 }
  0x15   :  { %v96_v7 = vand.u32 4294901760, %v10584_v3  ;;  %v10593_v9 = vld [vmem:[#allocation2 + $0x38] sm:$0xff]  ;;  %v100_v10 = vand.u32 4294901760, %v10588_v6  ;;  %v102_v11 = vand.u32 4294901760, %v10591_v8  ;;  %v10598_v13 = vld [vmem:[#allocation2 + $0x20] sm:$0xff]  ;;  %v10600_v14 = vld [vmem:[#allocation2 + $0x30] sm:$0xff]  ;;  %p10530_p9 = scmp.lt.s32.totalorder %s8122_s20, %s8122_s20 }
  0x16   :  { %v106_v12 = vand.u32 4294901760, %v10593_v9  ;;  %v10602_v15 = vld [vmem:[#allocation2 + $0x48] sm:$0xff]  ;;  %v10608_v16 = vpack.c.bf16 %v98_v5, %v94_v4  ;;  %v10610_v17 = vld [vmem:[#allocation2 + $0x58] sm:$0xff]  ;;  %v10612_v18 = vld [vmem:[#allocation2 + $0x40] sm:$0xff]  ;;  %v104_v23 = vand.u32 4294901760, %v10598_v13  ;;  %v108_v24 = vand.u32 4294901760, %v10600_v14 }
  0x17   :  { %v10614_v19 = vld [vmem:[#allocation2 + $0x50] sm:$0xff]  ;;  %v10620_v20 = vpack.c.bf16 %v100_v10, %v96_v7  ;;  %v10628_v22 = vld [vmem:[#allocation2 + $0x68] sm:$0xff]  ;;  %v110_v25 = vand.u32 4294901760, %v10602_v15  ;;  %v16417_v26 = vand.u32 4294901760, %v10610_v17  ;;  %v16414_v27 = vand.u32 4294901760, %v10612_v18  ;;  %v10638_v29 = vld [vmem:[#allocation2 + $0x78] sm:$0xff] }
  0x18   :  { %17599 = vst [vmem:[#allocation8_spill] sm:$0xff] %v10608_v16  ;;  %v10626_v21 = vpack.c.bf16 %v106_v12, %v102_v11  ;;  %8134 = vmatprep.subr.bf16.mxu0 %v10608_v16  ;;  %v16413_v28 = vand.u32 4294901760, %v10614_v19  ;;  %v10645_v30 = vpack.c.bf16 %v108_v24, %v104_v23  ;;  %v16410_v31 = vand.u32 4294901760, %v10628_v22  ;;  %v10648_v32 = vld [vmem:[#allocation2 + $0x60] sm:$0xff]  ;;  %v10650_v33 = vld [vmem:[#allocation2 + $0x70] sm:$0xff]  ;;  %v10658_v36 = vld [vmem:[#allocation2 + $0x88] sm:$0xff] }
  0x19   :  { %17600 = vst [vmem:[#allocation9_spill] sm:$0xff] %v10620_v20  ;;  %8136 = vmatpush1.bf16.msra.mxu0 %v10620_v20  ;;  %v10656_v35 = vpack.c.bf16 %v16417_v26, %v110_v25  ;;  %v10660_v37 = vld [vmem:[#allocation2 + $0x98] sm:$0xff]  ;;  %v16407_v38 = vand.u32 4294901760, %v10638_v29  ;;  %v16404_v40 = vand.u32 4294901760, %v10648_v32  ;;  %v16403_v41 = vand.u32 4294901760, %v10650_v33  ;;  %v10681_v45 = vld [vmem:[#allocation2 + $0x80] sm:$0xff] }
  0x1a   :  { %17601 = vst [vmem:[#allocation10_spill] sm:$0xff] %v10626_v21  ;;  %8138 = vmatprep.subr.bf16.mxu0 %v10626_v21  ;;  %17602 = vst [vmem:[#allocation11_spill] sm:$0xff] %v10645_v30  ;;  %v10668_v39 = vpack.c.bf16 %v16413_v28, %v16414_v27  ;;  %v16402_v43 = vand.u32 4294901760, %v10658_v36  ;;  %v16399_v44 = vand.u32 4294901760, %v10660_v37  ;;  %v10683_v46 = vld [vmem:[#allocation2 + $0x90] sm:$0xff]  ;;  %v10685_v47 = vand.u32 127, %v23_v34 }
  0x1b   :  { %17603 = vst [vmem:[#allocation12_spill] sm:$0xff] %v10656_v35  ;;  %v10677_v42 = vpack.c.bf16 %v16407_v38, %v16410_v31  ;;  %v10687_v48 = vld [vmem:[#allocation2 + $0xa8] sm:$0xff]  ;;  %v10689_v49 = vld [vmem:[#allocation2 + $0xb8] sm:$0xff]  ;;  %v10696_v50 = vpack.c.bf16 %v16403_v41, %v16404_v40  ;;  %v16401_v51 = vand.u32 4294901760, %v10681_v45  ;;  %v16400_v52 = vand.u32 4294901760, %v10683_v46  ;;  %v10709_v56 = vld [vmem:[#allocation2 + $0xa0] sm:$0xff] }
  0x1c   :  { %17604 = vst [vmem:[#allocation13_spill] sm:$0xff] %v10668_v39  ;;  %17606 = vst [vmem:[#allocation15_spill] sm:$0xff] %v10685_v47  ;;  %v10705_v53 = vpack.c.bf16 %v16399_v44, %v16402_v43  ;;  %v16409_v54 = vand.u32 4294901760, %v10687_v48  ;;  %v16408_v55 = vand.u32 4294901760, %v10689_v49  ;;  %v10711_v57 = vld [vmem:[#allocation2 + $0xb0] sm:$0xff]  ;;  %vm26_vm0 = vcmp.eq.s32.totalorder %v10685_v47, 0 }
  0x1d   :  { %8140 = vmatpush1.bf16.msra.mxu0 %v10645_v30  ;;  %17605 = vst [vmem:[#allocation14_spill] sm:$0xff] %v10677_v42  ;;  %17607 = vst [vmem:[#allocation16_spill] sm:$0xff] %v10696_v50  ;;  %v10714_v58 = vld [vmem:[#allocation2 + $0xc8] sm:$0xff]  ;;  %v10716_v59 = vld [vmem:[#allocation2 + $0xd8] sm:$0xff]  ;;  %v10723_v60 = vpack.c.bf16 %v16400_v52, %v16401_v51  ;;  %v16412_v61 = vand.u32 4294901760, %v10709_v56  ;;  %v16411_v62 = vand.u32 4294901760, %v10711_v57  ;;  %v10752_v38 = vsub.f32 %v10580_v1, %v94_v4 }
  0x1e   :  { %8142 = vmatprep.subr.bf16.mxu0 %v10656_v35  ;;  %17608 = vst [vmem:[#allocation17_spill] sm:$0xff] %v10705_v53  ;;  %v28_v63 = vsel %vm26_vm0, 1.0, %v16405_v0  ;;  %v10735_v34 = vpack.c.bf16 %v16408_v55, %v16409_v54  ;;  %v16416_v44 = vand.u32 4294901760, %v10714_v58  ;;  %v16415_v52 = vand.u32 4294901760, %v10716_v59  ;;  %v10739_v51 = vld [vmem:[#allocation2 + $0xc0] sm:$0xff]  ;;  %v10741_v43 = vld [vmem:[#allocation2 + $0xd0] sm:$0xff] }
  0x1f   :  { %17609 = vst [vmem:[#allocation18_spill] sm:$0xff] %v10723_v60  ;;  %v10743_v41 = vld [vmem:[#allocation2 + $0xe8] sm:$0xff]  ;;  %v10745_v40 = vld [vmem:[#allocation2 + $0xf8] sm:$0xff]  ;;  %v10747_v0 = vsub.f32 %v28_v63, %v28_v63  ;;  %v10759_v55 = vpack.c.bf16 %v16411_v62, %v16412_v61  ;;  %v144_v54 = vand.u32 4294901760, %v10739_v51  ;;  %v148_v31 = vand.u32 4294901760, %v10741_v43  ;;  %v58_v61 = vld [vmem:[#allocation2 + $0xe0] sm:$0xff] }
  0x20   :  { %17610 = vst [vmem:[#allocation19_spill] sm:$0xff] %v10735_v34  ;;  %v10766_v63 = vsub.f32 %v10582_v2, %v98_v5  ;;  %v10773_v1 = vpack.c.bf16 %v16415_v52, %v16416_v44  ;;  %v150_v4 = vand.u32 4294901760, %v10743_v41  ;;  %v154_v62 = vand.u32 4294901760, %v10745_v40  ;;  %v60_v28 = vld [vmem:[#allocation2 + $0xf0] sm:$0xff]  ;;  %v10797_v44 = vld [vmem:[#allocation2 + $0x108] sm:$0xff]  ;;  %v10799_v26 = vld [vmem:[#allocation2 + $0x118] sm:$0xff] }
  0x21   :  { %8144 = vmatpush1.bf16.msra.mxu0 %v10668_v39  ;;  %17611 = vst [vmem:[#allocation20_spill] sm:$0xff] %v10747_v0  ;;  %17612 = vst [vmem:[#allocation21_spill] sm:$0xff] %v10759_v55  ;;  %v10780_v27 = vsub.f32 %v10584_v3, %v96_v7  ;;  %v10785_v2 = vsub.f32 %v10588_v6, %v100_v10  ;;  %v10790_v5 = vsub.f32 %v10591_v8, %v102_v11  ;;  %v66_v30 = vld [vmem:[#allocation2 + $0x120] sm:$0xff]  ;;  %v71_v47 = vld [vmem:[#allocation2 + $0x148] sm:$0xff]  ;;  %s10525_s21 = scalar_lea.vmem %s8122_s20, 16  ;;  %s10529_s22 = scalar_lea.vmem %s8122_s20, 32 }
  0x22   :  { %8146 = vmatprep.subr.bf16.mxu0 %v10677_v42  ;;  %17613 = vst [vmem:[#allocation22_spill] sm:$0xff] %v10773_v1  ;;  %v10795_v52 = vsub.f32 %v10593_v9, %v106_v12  ;;  %v10804_v3 = vsub.f32 %v10598_v13, %v104_v23  ;;  %v10809_v6 = vsub.f32 %v10600_v14, %v108_v24  ;;  %v17621_v8 = vand.u32 4294901760, %v10610_v17  ;;  %v69_v42 = vld [vmem:[#allocation2 + $0x138] sm:$0xff]  ;;  %p10526_p8 = scmp.ne.s32.totalorder %s8122_s20, %s10525_s21  ;;  %p10531_p10 = scmp.lt.s32.totalorder %s10529_s22, %s10525_s21 }
  0x23   :  { %17614 = vst [vmem:[#allocation23_spill] sm:$0xff] %v10780_v27  ;;  %17615 = vst [vmem:[#allocation24_spill] sm:$0xff] %v10785_v2  ;;  %v10814_v7 = vsub.f32 %v10602_v15, %v110_v25  ;;  %v17622_v10 = vand.u32 4294901760, %v10612_v18  ;;  %v10827_v12 = vpack.c.bf16 %v148_v31, %v144_v54  ;;  %v152_v13 = vand.u32 4294901760, %v58_v61  ;;  %v62_v25 = vld [vmem:[#allocation2 + $0x100] sm:$0xff] }
  0x24   :  { %17616 = vst [vmem:[#allocation25_spill] sm:$0xff] %v10790_v5  ;;  %17617 = vst [vmem:[#allocation26_spill] sm:$0xff] %v10795_v52  ;;  %v10819_v9 = vsub.f32 %v10610_v17, %v17621_v8  ;;  %v156_v14 = vand.u32 4294901760, %v60_v28  ;;  %v17625_v23 = vand.u32 4294901760, %v10614_v19  ;;  %v10835_v17 = vpack.c.bf16 %v154_v62, %v150_v4  ;;  %v64_v8 = vld [vmem:[#allocation2 + $0x110] sm:$0xff]  ;;  %p10532_p11 = por %p10531_p10, %p10530_p9 }
  0x25   :  { %8148 = vmatpush1.bf16.msra.mxu0 %v10696_v50  ;;  %17618 = vst [vmem:[#allocation27_spill] sm:$0xff] %v10804_v3  ;;  %17619 = vst [vmem:[#allocation28_spill] sm:$0xff] %v10809_v6  ;;  %v10824_v11 = vsub.f32 %v10612_v18, %v17622_v10  ;;  %v158_v24 = vand.u32 4294901760, %v10797_v44  ;;  %v162_v18 = vand.u32 4294901760, %v10799_v26  ;;  %v17627_v10 = vand.u32 4294901760, %v10628_v22  ;;  %v67_v50 = vld [vmem:[#allocation2 + $0x128] sm:$0xff] }
  0x26   :  { %8150 = vmatprep.subr.bf16.mxu0 %v10705_v53  ;;  %17620 = vst [vmem:[#allocation29_spill] sm:$0xff] %v10814_v7  ;;  %17624 = vst [vmem:[#allocation31_spill] sm:$0xff] %v10827_v12  ;;  %v10832_v15 = vsub.f32 %v10614_v19, %v17625_v23  ;;  %v17629_v23 = vand.u32 4294901760, %v10648_v32  ;;  %v17638_v39 = vand.u32 4294901760, %v10687_v48  ;;  %v17641_v35 = vand.u32 4294901760, %v10689_v49  ;;  %p10533_p12 = pnand %p10532_p11, %p10526_p8 }
  0x27   :  { %17623 = vst [vmem:[#allocation30_spill] sm:$0xff] %v10824_v11  ;;  %17626 = vst [vmem:[#allocation32_spill] sm:$0xff] %v10835_v17  ;;  %v17646_v21 = vand.u32 4294901760, %v10711_v57 }
  0x29   :  { %8152 = vmatpush1.bf16.msra.mxu0 %v10723_v60  ;;  %v17631_v60 = vand.u32 4294901760, %v10650_v33  ;;  %v10903_v20 = vsub.f32 %v10711_v57, %v17646_v21  ;;  %v10922_v21 = vsub.f32 %v10743_v41, %v150_v4  ;;  %v10925_v57 = vsub.f32 %v10745_v40, %v154_v62  ;;  %v75_v40 = vld [vmem:[#allocation2 + $0x168] sm:$0xff]  ;;  %v77_v62 = vld [vmem:[#allocation2 + $0x178] sm:$0xff] }
  0x2a   :  { %8154 = vmatprep.subr.bf16.mxu0 %v10735_v34  ;;  %v17628_v34 = vand.u32 4294901760, %v10638_v29  ;;  %v174_v41 = vand.u32 4294901760, %v71_v47  ;;  %v10938_v4 = vsub.f32 %v10797_v44, %v158_v24 }
  0x2b   :  { %v10857_v53 = vsub.f32 %v10650_v33, %v17631_v60  ;;  %v17637_v33 = vand.u32 4294901760, %v10683_v46  ;;  %17647 = vst [vmem:[#allocation41_spill] sm:$0xff] %v10903_v20  ;;  %17654 = vst [vmem:[#allocation46_spill] sm:$0xff] %v10922_v21  ;;  %v79_v21 = vld [vmem:[#allocation2 + $0x188] sm:$0xff] }
  0x2c   :  { %v10847_v19 = vsub.f32 %v10638_v29, %v17628_v34  ;;  %v17634_v29 = vand.u32 4294901760, %v10660_v37  ;;  %17655 = vst [vmem:[#allocation47_spill] sm:$0xff] %v10925_v57 }
  0x2d   :  { %8156 = vmatpush1.bf16.msra.mxu0 %v10759_v55  ;;  %v10842_v55 = vsub.f32 %v10628_v22, %v17627_v10  ;;  %v17632_v22 = vand.u32 4294901760, %v10658_v36  ;;  %v10877_v60 = vsub.f32 %v10683_v46, %v17637_v33  ;;  %v10893_v46 = vpack.c.bf16 %v162_v18, %v158_v24 }
  0x2e   :  { %8158 = vmatprep.subr.bf16.mxu0 %v10773_v1  ;;  %v10852_v1 = vsub.f32 %v10648_v32, %v17629_v23  ;;  %v10867_v34 = vsub.f32 %v10660_v37, %v17634_v29  ;;  %v17635_v32 = vand.u32 4294901760, %v10681_v45  ;;  %v160_v37 = vand.u32 4294901760, %v62_v25 }
  0x2f   :  { %v10862_v10 = vsub.f32 %v10658_v36, %v17632_v22  ;;  %v10882_v36 = vsub.f32 %v10687_v48, %v17638_v39  ;;  %v10885_v22 = vpack.c.bf16 %v156_v14, %v152_v13  ;;  %v164_v29 = vand.u32 4294901760, %v64_v8  ;;  %17643 = vst [vmem:[#allocation39_spill] sm:$0xff] %v10893_v46  ;;  %v68_v39 = vld [vmem:[#allocation2 + $0x130] sm:$0xff] }
  0x30   :  { %17630 = vst [vmem:[#allocation33_spill] sm:$0xff] %v10852_v1  ;;  %v10872_v23 = vsub.f32 %v10681_v45, %v17635_v32  ;;  %v10890_v45 = vsub.f32 %v10689_v49, %v17641_v35  ;;  %v166_v32 = vand.u32 4294901760, %v67_v50  ;;  %v170_v33 = vand.u32 4294901760, %v69_v42 }
  0x31   :  { %17633 = vst [vmem:[#allocation34_spill] sm:$0xff] %v10862_v10  ;;  %17639 = vst [vmem:[#allocation36_spill] sm:$0xff] %v10882_v36  ;;  %8160 = vmatpush1.bf16.msra.mxu0 %v10827_v12  ;;  %v17644_v48 = vand.u32 4294901760, %v10709_v56  ;;  %v17648_v35 = vand.u32 4294901760, %v10714_v58  ;;  %v182_v24 = vand.u32 4294901760, %v75_v40 }
  0x32   :  { %17636 = vst [vmem:[#allocation35_spill] sm:$0xff] %v10872_v23  ;;  %17640 = vst [vmem:[#allocation37_spill] sm:$0xff] %v10885_v22  ;;  %8162 = vmatprep.subr.bf16.mxu0 %v10835_v17  ;;  %v17650_v17 = vand.u32 4294901760, %v10716_v59 }
  0x33   :  { %17642 = vst [vmem:[#allocation38_spill] sm:$0xff] %v10890_v45  ;;  %v10898_v12 = vsub.f32 %v10709_v56, %v17644_v48  ;;  %v10908_v49 = vsub.f32 %v10714_v58, %v17648_v35  ;;  %v73_v45 = vld [vmem:[#allocation2 + $0x158] sm:$0xff]  ;;  %v10916_v56 = vsub.f32 %v10739_v51, %v144_v54  ;;  %v10919_v48 = vsub.f32 %v10741_v43, %v148_v31  ;;  %v72_v51 = vld [vmem:[#allocation2 + $0x150] sm:$0xff] }
  0x34   :  { %v10913_v16 = vsub.f32 %v10716_v59, %v17650_v17  ;;  %v10928_v58 = vsub.f32 %v58_v61, %v152_v13  ;;  %v10930_v59 = vpack.c.bf16 %v164_v29, %v160_v37  ;;  %v168_v17 = vand.u32 4294901760, %v66_v30 }
  0x35   :  { %17645 = vst [vmem:[#allocation40_spill] sm:$0xff] %v10898_v12  ;;  %17649 = vst [vmem:[#allocation42_spill] sm:$0xff] %v10908_v49  ;;  %8164 = vmatpush1.bf16.msra.mxu0 %v10885_v22  ;;  %v172_v35 = vand.u32 4294901760, %v68_v39  ;;  %v10932_v54 = vsub.f32 %v60_v28, %v156_v14  ;;  %v10935_v31 = vpack.c.bf16 %v170_v33, %v166_v32  ;;  %v178_v43 = vand.u32 4294901760, %v73_v45  ;;  %v74_v28 = vld [vmem:[#allocation2 + $0x160] sm:$0xff]  ;;  %v76_v14 = vld [vmem:[#allocation2 + $0x170] sm:$0xff] }
  0x36   :  { %17651 = vst [vmem:[#allocation43_spill] sm:$0xff] %v10913_v16  ;;  %17652 = vst [vmem:[#allocation44_spill] sm:$0xff] %v10916_v56  ;;  %v70_v16 = vld [vmem:[#allocation2 + $0x140] sm:$0xff]  ;;  %8166 = vmatprep.subr.bf16.mxu0 %v10893_v46  ;;  %v10941_v61 = vsub.f32 %v10799_v26, %v162_v18  ;;  %v10943_v13 = vsub.f32 %v62_v25, %v160_v37  ;;  %v10945_v22 = vsub.f32 %v64_v8, %v164_v29  ;;  %v80_v8 = vld [vmem:[#allocation2 + $0x190] sm:$0xff] }
  0x37   :  { %17653 = vst [vmem:[#allocation45_spill] sm:$0xff] %v10919_v48  ;;  %17656 = vst [vmem:[#allocation48_spill] sm:$0xff] %v10928_v58  ;;  %v10949_v46 = vsub.f32 %v69_v42, %v170_v33  ;;  %v176_v58 = vand.u32 4294901760, %v70_v16  ;;  %v180_v57 = vand.u32 4294901760, %v72_v51  ;;  %v81_v48 = vld [vmem:[#allocation2 + $0x198] sm:$0xff]  ;;  %v10952_v44 = vpack.c.bf16 %v172_v35, %v168_v17  ;;  %v78_v25 = vld [vmem:[#allocation2 + $0x180] sm:$0xff] }
  0x38   :  { %17657 = vst [vmem:[#allocation49_spill] sm:$0xff] %v10930_v59  ;;  %17658 = vst [vmem:[#allocation50_spill] sm:$0xff] %v10932_v54  ;;  %v10947_v54 = vsub.f32 %v67_v50, %v166_v32  ;;  %v10954_v26 = vsub.f32 %v66_v30, %v168_v17  ;;  %v186_v18 = vand.u32 4294901760, %v77_v62  ;;  %v10957_v50 = vsub.f32 %v68_v39, %v172_v35  ;;  %v83_v30 = vld [vmem:[#allocation2 + $0x1a8] sm:$0xff]  ;;  %v85_v17 = vld [vmem:[#allocation2 + $0x1b8] sm:$0xff] }
  0x39   :  { %17659 = vst [vmem:[#allocation51_spill] sm:$0xff] %v10935_v31  ;;  %17660 = vst [vmem:[#allocation52_spill] sm:$0xff] %v10941_v61  ;;  %8168 = vmatpush1.bf16.msra.mxu0 %v10930_v59  ;;  %v10959_v42 = vpack.c.bf16 %v178_v43, %v174_v41  ;;  %v184_v37 = vand.u32 4294901760, %v74_v28  ;;  %v188_v29 = vand.u32 4294901760, %v76_v14  ;;  %v10961_v32 = vsub.f32 %v71_v47, %v174_v41  ;;  %v82_v39 = vld [vmem:[#allocation2 + $0x1a0] sm:$0xff]  ;;  %v84_v35 = vld [vmem:[#allocation2 + $0x1b0] sm:$0xff] }
  0x3a   :  { %17661 = vst [vmem:[#allocation53_spill] sm:$0xff] %v10943_v13  ;;  %17662 = vst [vmem:[#allocation54_spill] sm:$0xff] %v10945_v22  ;;  %8170 = vmatprep.subr.bf16.mxu0 %v10935_v31  ;;  %v10963_v33 = vsub.f32 %v73_v45, %v178_v43  ;;  %v190_v59 = vand.u32 4294901760, %v79_v21  ;;  %v192_v22 = vand.u32 4294901760, %v78_v25  ;;  %v196_v31 = vand.u32 4294901760, %v80_v8  ;;  %v10983_v13 = vld [vmem:[#allocation2 + $0x1c0] sm:$0xff] }
  0x3b   :  { %17663 = vst [vmem:[#allocation55_spill] sm:$0xff] %v10947_v54  ;;  %17664 = vst [vmem:[#allocation56_spill] sm:$0xff] %v10949_v46  ;;  %v194_v46 = vand.u32 4294901760, %v81_v48  ;;  %v10967_v54 = vsub.f32 %v70_v16, %v176_v58  ;;  %v10972_v47 = vpack.c.bf16 %v186_v18, %v182_v24  ;;  %v10974_v45 = vsub.f32 %v75_v40, %v182_v24 }
  0x3c   :  { %17665 = vst [vmem:[#allocation57_spill] sm:$0xff] %v10952_v44  ;;  %17666 = vst [vmem:[#allocation58_spill] sm:$0xff] %v10954_v26  ;;  %v10965_v26 = vpack.c.bf16 %v180_v57, %v176_v58  ;;  %v10976_v41 = vsub.f32 %v77_v62, %v186_v18  ;;  %v10979_v43 = vpack.c.bf16 %v188_v29, %v184_v37  ;;  %v198_v58 = vand.u32 4294901760, %v83_v30  ;;  %v10989_v62 = vld [vmem:[#allocation2 + $0x1d0] sm:$0xff] }
  0x3d   :  { %17667 = vst [vmem:[#allocation59_spill] sm:$0xff] %v10957_v50  ;;  %17668 = vst [vmem:[#allocation60_spill] sm:$0xff] %v10959_v42  ;;  %8172 = vmatpush1.bf16.msra.mxu0 %v10952_v44  ;;  %v10970_v50 = vsub.f32 %v72_v51, %v180_v57  ;;  %v10981_v16 = vsub.f32 %v74_v28, %v184_v37  ;;  %v10985_v57 = vsub.f32 %v76_v14, %v188_v29 }
  0x3e   :  { %17669 = vst [vmem:[#allocation61_spill] sm:$0xff] %v10961_v32  ;;  %17670 = vst [vmem:[#allocation62_spill] sm:$0xff] %v10963_v33  ;;  %8174 = vmatprep.subr.bf16.mxu0 %v10959_v42  ;;  %v87_v33 = vld [vmem:[#allocation2 + $0x1c8] sm:$0xff]  ;;  %v89_v32 = vld [vmem:[#allocation2 + $0x1d8] sm:$0xff]  ;;  %v10987_v51 = vpack.c.bf16 %v194_v46, %v190_v59  ;;  %v200_v40 = vand.u32 4294901760, %v82_v39  ;;  %v204_v24 = vand.u32 4294901760, %v84_v35  ;;  %v10991_v18 = vsub.f32 %v79_v21, %v190_v59 }
  0x3f   :  { %17671 = vst [vmem:[#allocation63_spill] sm:$0xff] %v10965_v26  ;;  %17672 = vst [vmem:[#allocation64_spill] sm:$0xff] %v10967_v54  ;;  %v202_v54 = vand.u32 4294901760, %v85_v17  ;;  %v10993_v42 = vsub.f32 %v81_v48, %v194_v46  ;;  %v10995_v28 = vpack.c.bf16 %v196_v31, %v192_v22  ;;  %v10997_v37 = vsub.f32 %v78_v25, %v192_v22 }
  0x40   :  { %17673 = vst [vmem:[#allocation65_spill] sm:$0xff] %v10970_v50  ;;  %17674 = vst [vmem:[#allocation66_spill] sm:$0xff] %v10972_v47  ;;  %v11000_v44 = vsub.f32 %v80_v8, %v196_v31  ;;  %v206_v14 = vand.u32 4294901760, %v87_v33  ;;  %v210_v29 = vand.u32 4294901760, %v89_v32  ;;  %v11006_v21 = vsub.f32 %v83_v30, %v198_v58  ;;  %v91_v31 = vld [vmem:[#allocation2 + $0x1e8] sm:$0xff] }
  0x41   :  { %17675 = vst [vmem:[#allocation67_spill] sm:$0xff] %v10974_v45  ;;  %17676 = vst [vmem:[#allocation68_spill] sm:$0xff] %v10979_v43  ;;  %8176 = vmatpush1.bf16.msra.mxu0 %v10965_v26  ;;  %v11008_v46 = vsub.f32 %v85_v17, %v202_v54  ;;  %v212_v48 = vand.u32 4294901760, %v10989_v62  ;;  %v11011_v22 = vpack.c.bf16 %v204_v24, %v200_v40  ;;  %v214_v17 = vand.u32 4294901760, %v91_v31 }
  0x42   :  { %17677 = vst [vmem:[#allocation69_spill] sm:$0xff] %v10981_v16  ;;  %17678 = vst [vmem:[#allocation70_spill] sm:$0xff] %v10985_v57  ;;  %8178 = vmatprep.subr.bf16.mxu0 %v10972_v47  ;;  %v11004_v16 = vpack.c.bf16 %v202_v54, %v198_v58  ;;  %v11013_v59 = vsub.f32 %v82_v39, %v200_v40  ;;  %v11017_v57 = vld [vmem:[#allocation2 + $0x1f8] sm:$0xff]  ;;  %v11024_v58 = vsub.f32 %v84_v35, %v204_v24  ;;  %v11040_v24 = vld [vmem:[#allocation2 + $0x1e0] sm:$0xff] }
  0x43   :  { %17679 = vst [vmem:[#allocation71_spill] sm:$0xff] %v10987_v51  ;;  %17680 = vst [vmem:[#allocation72_spill] sm:$0xff] %v10991_v18  ;;  %v11026_v39 = vpack.c.bf16 %v210_v29, %v206_v14  ;;  %v11031_v25 = vsub.f32 %v87_v33, %v206_v14  ;;  %v11033_v47 = vsub.f32 %v89_v32, %v210_v29  ;;  %v17693_v54 = vand.u32 4294901760, %v10983_v13 }
  0x44   :  { %17681 = vst [vmem:[#allocation73_spill] sm:$0xff] %v10993_v42  ;;  %17682 = vst [vmem:[#allocation74_spill] sm:$0xff] %v10995_v28  ;;  %v17695_v40 = vand.u32 4294901760, %v10752_v38  ;;  %v17696_v33 = vand.u32 4294901760, %v10766_v63  ;;  %v17697_v29 = vand.u32 4294901760, %v10780_v27  ;;  %v17698_v35 = vand.u32 4294901760, %v10785_v2 }
  0x45   :  { %17683 = vst [vmem:[#allocation75_spill] sm:$0xff] %v10997_v37  ;;  %17684 = vst [vmem:[#allocation76_spill] sm:$0xff] %v11004_v16  ;;  %8180 = vmatpush1.bf16.msra.mxu0 %v10979_v43  ;;  %v11037_v30 = vpack.c.bf16 %v212_v48, %v17693_v54  ;;  %v11042_v43 = vld [vmem:[#allocation2 + $0x1f0] sm:$0xff]  ;;  %v17699_v26 = vand.u32 4294901760, %v10790_v5 }
  0x46   :  { %17685 = vst [vmem:[#allocation77_spill] sm:$0xff] %v11006_v21  ;;  %17686 = vst [vmem:[#allocation78_spill] sm:$0xff] %v11008_v46  ;;  %8182 = vmatprep.subr.bf16.mxu0 %v10987_v51  ;;  %v240_v8 = vsub.f32 %v10752_v38, %v17695_v40  ;;  %v252_v32 = vsub.f32 %v10766_v63, %v17696_v33  ;;  %v246_v54 = vsub.f32 %v10780_v27, %v17697_v29 }
  0x47   :  { %17687 = vst [vmem:[#allocation79_spill] sm:$0xff] %v11011_v22  ;;  %17688 = vst [vmem:[#allocation80_spill] sm:$0xff] %v11013_v59  ;;  %v258_v51 = vsub.f32 %v10785_v2, %v17698_v35  ;;  %v17700_v40 = vand.u32 4294901760, %v10795_v52  ;;  %v17701_v33 = vand.u32 4294901760, %v10804_v3  ;;  %v17702_v29 = vand.u32 4294901760, %v10809_v6 }
  0x48   :  { %17689 = vst [vmem:[#allocation81_spill] sm:$0xff] %v11024_v58  ;;  %17690 = vst [vmem:[#allocation82_spill] sm:$0xff] %v11026_v39  ;;  %v17705_v35 = vand.u32 4294901760, %v10747_v0 }
  0x49   :  { %17691 = vst [vmem:[#allocation83_spill] sm:$0xff] %v11031_v25  ;;  %17692 = vst [vmem:[#allocation84_spill] sm:$0xff] %v11033_v47  ;;  %v264_v47 = vsub.f32 %v10790_v5, %v17699_v26  ;;  %v276_v25 = vsub.f32 %v10795_v52, %v17700_v40  ;;  %8184 = vmatpush1.bf16.msra.mxu0 %v10995_v28  ;;  %v270_v14 = vsub.f32 %v10804_v3, %v17701_v33 }
  0x4a   :  { %17694 = vst [vmem:[#allocation85_spill] sm:$0xff] %v11037_v30  ;;  %v282_v58 = vsub.f32 %v10809_v6, %v17702_v29  ;;  %8186 = vmatprep.subr.bf16.mxu0 %v11004_v16  ;;  %v17703_v33 = vand.u32 4294901760, %v11017_v57  ;;  %v241_v5 = vand.u32 4294901760, %v240_v8  ;;  %v253_v29 = vand.u32 4294901760, %v252_v32 }
  0x4b   :  { %v229_v59 = vsub.f32 %v10747_v0, %v17705_v35  ;;  %v247_v6 = vand.u32 4294901760, %v246_v54  ;;  %v259_v16 = vand.u32 4294901760, %v258_v51  ;;  %v265_v2 = vand.u32 4294901760, %v264_v47 }
  0x4c   :  { %v11079_v3 = vpack.c.bf16 %v17703_v33, %v214_v17  ;;  %v277_v26 = vand.u32 4294901760, %v276_v25  ;;  %v271_v40 = vand.u32 4294901760, %v270_v14  ;;  %v283_v28 = vand.u32 4294901760, %v282_v58 }
  0x4d   :  { %8188 = vmatpush1.bf16.msra.mxu0 %v11011_v22  ;;  %v17706_v52 = vand.u32 4294901760, %v10814_v7  ;;  %v17707_v33 = vand.u32 4294901760, %v10819_v9  ;;  %v17708_v32 = vand.u32 4294901760, %v10824_v11  ;;  %v17709_v47 = vand.u32 4294901760, %v10832_v15 }
  0x4e   :  { %17704 = vst [vmem:[#allocation86_spill] sm:$0xff] %v11079_v3  ;;  %8190 = vmatprep.subr.bf16.mxu0 %v11026_v39  ;;  %v11106_v35 = vsub.f32 %v10989_v62, %v212_v48  ;;  %v17714_v39 = vand.u32 4294901760, %v11040_v24  ;;  %v8197_v58 = vpack.c.bf16 %v253_v29, %v241_v5  ;;  %v230_v14 = vand.u32 4294901760, %v229_v59  ;;  %v17720_v29 = vld [vmem:[#allocation38_spill] sm:$0xff]  ;;  %v17721_v59 = vld [vmem:[#allocation43_spill] sm:$0xff] }
  0x4f   :  { %v288_v27 = vsub.f32 %v10814_v7, %v17706_v52  ;;  %v300_v8 = vsub.f32 %v10819_v9, %v17707_v33  ;;  %v294_v51 = vsub.f32 %v10824_v11, %v17708_v32  ;;  %v306_v25 = vsub.f32 %v10832_v15, %v17709_v47  ;;  %v17780_v7 = vld [vmem:[#allocation41_spill] sm:$0xff]  ;;  %v17789_v11 = vld [vmem:[#allocation58_spill] sm:$0xff] }
  0x50   :  { %v17710_v52 = vand.u32 4294901760, %v10983_v13  ;;  %17712 = vst [vmem:[#allocation88_spill] sm:$0xff] %v11106_v35  ;;  %v11108_v33 = vsub.f32 %v91_v31, %v214_v17  ;;  %v17715_v47 = vand.u32 4294901760, %v11042_v43  ;;  %v8199_v0 = vpack.c.bf16 %v259_v16, %v247_v6 }
  0x51   :  { %8192 = vmatpush1.bf16.msra.mxu0 %v11037_v30  ;;  %v301_v62 = vand.u32 4294901760, %v300_v8  ;;  %v295_v48 = vand.u32 4294901760, %v294_v51  ;;  %v307_v31 = vand.u32 4294901760, %v306_v25  ;;  %v17717_v17 = vand.u32 4294901760, %v10842_v55  ;;  %v17732_v30 = vld [vmem:[#allocation46_spill] sm:$0xff] }
  0x52   :  { %v11103_v54 = vsub.f32 %v10983_v13, %v17710_v52  ;;  %17713 = vst [vmem:[#allocation89_spill] sm:$0xff] %v11108_v33  ;;  %v11115_v22 = vpack.c.bf16 %v17715_v47, %v17714_v39  ;;  %v8201_v13 = vpack.c.bf16 %v277_v26, %v265_v2  ;;  %v8203_v52 = vpack.c.bf16 %v283_v28, %v271_v40 }
  0x53   :  { %8194 = vmatprep.subr.bf16.mxu0 %v11079_v3  ;;  %v312_v32 = vsub.f32 %v10842_v55, %v17717_v17  ;;  %v17718_v39 = vand.u32 4294901760, %v10847_v19  ;;  %v17719_v6 = vand.u32 4294901760, %v10852_v1  ;;  %v16515_v2 = vand.u32 4294901760, %v10857_v53  ;;  %v17731_v3 = vld [vmem:[#allocation45_spill] sm:$0xff] }
  0x54   :  { %17711 = vst [vmem:[#allocation87_spill] sm:$0xff] %v11103_v54  ;;  %17716 = vst [vmem:[#allocation90_spill] sm:$0xff] %v11115_v22  ;;  %v289_v54 = vand.u32 4294901760, %v288_v27  ;;  %v16520_v25 = vand.u32 4294901760, %v10898_v12  ;;  %v16530_v17 = vand.u32 4294901760, %v10908_v49  ;;  %v17722_v40 = vand.u32 4294901760, %v10862_v10 }
  0x55   :  { %v324_v5 = vsub.f32 %v10847_v19, %v17718_v39  ;;  %v318_v16 = vsub.f32 %v10852_v1, %v17719_v6  ;;  %8196 = vmatpush1.bf16.msra.mxu0 %v11115_v22  ;;  %v8207_v39 = vpack.c.bf16 %v307_v31, %v295_v48  ;;  %v313_v6 = vand.u32 4294901760, %v312_v32  ;;  %v17795_v1 = vld [vmem:[#allocation84_spill] sm:$0xff] }
  0x56   :  { %v8205_v51 = vpack.c.bf16 %v301_v62, %v289_v54  ;;  %8198 = vmatprep.subr.bf16.mxu0 %v8197_v58  ;;  %v330_v8 = vsub.f32 %v10857_v53, %v16515_v2  ;;  %v336_v54 = vsub.f32 %v10862_v10, %v17722_v40  ;;  %v17723_v62 = vand.u32 4294901760, %v10867_v34 }
  0x57   :  { %v325_v28 = vand.u32 4294901760, %v324_v5  ;;  %v319_v26 = vand.u32 4294901760, %v318_v16  ;;  %v17724_v58 = vand.u32 4294901760, %v10872_v23  ;;  %v17725_v48 = vand.u32 4294901760, %v10877_v60 }
  0x58   :  { %v348_v47 = vsub.f32 %v10867_v34, %v17723_v62  ;;  %231 = vmatmul.mubr.f32.vlgmr.msra.gmra.mrb[0].mxu0 %v230_v14  ;;  %v17726_v5 = vand.u32 4294901760, %v10882_v36  ;;  %v17727_v2 = vand.u32 4294901760, %v17720_v29  ;;  %v366_v14 = vsub.f32 %v10898_v12, %v16520_v25  ;;  %v17733_v12 = vld [vmem:[#allocation47_spill] sm:$0xff] }
  0x59   :  { %v342_v32 = vsub.f32 %v10872_v23, %v17724_v58  ;;  %v354_v31 = vsub.f32 %v10877_v60, %v17725_v48  ;;  %8200 = vmatpush1.bf16.msra.mxu0 %v8199_v0  ;;  %v17728_v62 = vand.u32 4294901760, %v10903_v20  ;;  %v384_v48 = vsub.f32 %v10908_v49, %v16530_v17  ;;  %v17794_v23 = vld [vmem:[#allocation83_spill] sm:$0xff] }
  0x5a   :  { %v360_v16 = vsub.f32 %v10882_v36, %v17726_v5  ;;  %v372_v40 = vsub.f32 %v17720_v29, %v17727_v2  ;;  %v17729_v5 = vmov 0.0   ;;  %8202 = vmatprep.subr.bf16.mxu0 %v8201_v13  ;;  %v8209_v22 = vpack.c.bf16 %v325_v28, %v313_v6 }
  0x5b   :  { %v378_v58 = vsub.f32 %v10903_v20, %v17728_v62  ;;  %621 = vmatprep.mubr.f32.mxu0 %v17729_v5  ;;  %v17730_v0 = vand.u32 4294901760, %v17721_v59  ;;  %v16535_v33 = vand.u32 4294901760, %v17732_v30  ;;  %v331_v35 = vand.u32 4294901760, %v330_v8 }
  0x5c   :  { %v337_v62 = vand.u32 4294901760, %v336_v54  ;;  %v349_v20 = vand.u32 4294901760, %v348_v47  ;;  %v16538_v29 = vand.u32 4294901760, %v17733_v12  ;;  %v343_v17 = vand.u32 4294901760, %v342_v32  ;;  %v17736_v32 = vld [vmem:[#allocation48_spill] sm:$0xff] }
  0x5d   :  { %v396_v2 = vsub.f32 %v17721_v59, %v17730_v0  ;;  %v355_v49 = vand.u32 4294901760, %v354_v31  ;;  %v361_v27 = vand.u32 4294901760, %v360_v16  ;;  %v373_v36 = vand.u32 4294901760, %v372_v40  ;;  %8204 = vmatpush1.bf16.msra.mxu0 %v8203_v52  ;;  %v17790_v59 = vld [vmem:[#allocation59_spill] sm:$0xff] }
  0x5e   :  { %v367_v13 = vand.u32 4294901760, %v366_v14  ;;  %v379_v28 = vand.u32 4294901760, %v378_v58  ;;  %v385_v6 = vand.u32 4294901760, %v384_v48  ;;  %v17734_v5 = vand.u32 4294901760, %v10916_v56  ;;  %8206 = vmatprep.subr.bf16.mxu0 %v8205_v51  ;;  %v17741_v58 = vld [vmem:[#allocation50_spill] sm:$0xff] }
  0x5f   :  { %v397_v25 = vand.u32 4294901760, %v396_v2  ;;  %v17735_v8 = vand.u32 4294901760, %v17731_v3  ;;  %v408_v54 = vsub.f32 %v17732_v30, %v16535_v33  ;;  %v17737_v52 = vand.u32 4294901760, %v11017_v57 }
  0x60   :  { %v390_v0 = vsub.f32 %v10916_v56, %v17734_v5  ;;  %v17739_v40 = vand.u32 4294901760, %v11040_v24  ;;  %v420_v14 = vsub.f32 %v17733_v12, %v16538_v29  ;;  %v17742_v5 = vand.u32 4294901760, %v11042_v43  ;;  %v17792_v56 = vld [vmem:[#allocation62_spill] sm:$0xff] }
  0x61   :  { %v402_v47 = vsub.f32 %v17731_v3, %v17735_v8  ;;  %v11191_v16 = vsub.f32 %v11017_v57, %v17737_v52  ;;  %v8211_v8 = vpack.c.bf16 %v331_v35, %v319_v26  ;;  %v8213_v33 = vpack.c.bf16 %v349_v20, %v337_v62  ;;  %8208 = vmatpush1.bf16.msra.mxu0 %v8207_v39  ;;  %v17746_v26 = vld [vmem:[#allocation53_spill] sm:$0xff]  ;;  %v17749_v39 = vld [vmem:[#allocation56_spill] sm:$0xff] }
  0x62   :  { %v11196_v51 = vsub.f32 %v11040_v24, %v17739_v40  ;;  %v11205_v2 = vsub.f32 %v11042_v43, %v17742_v5  ;;  %v16541_v57 = vand.u32 4294901760, %v10938_v4  ;;  %v8215_v52 = vpack.c.bf16 %v355_v49, %v343_v17  ;;  %8210 = vmatprep.subr.bf16.mxu0 %v8209_v22  ;;  %v17747_v22 = vld [vmem:[#allocation54_spill] sm:$0xff]  ;;  %v17754_v49 = vld [vmem:[#allocation64_spill] sm:$0xff] }
  0x63   :  { %17738 = vst [vmem:[#allocation48_spill] sm:$0xff] %v11191_v16  ;;  %v8217_v31 = vpack.c.bf16 %v373_v36, %v361_v27  ;;  %v8219_v24 = vpack.c.bf16 %v379_v28, %v367_v13  ;;  %v391_v40 = vand.u32 4294901760, %v390_v0  ;;  %v403_v16 = vand.u32 4294901760, %v402_v47  ;;  %v17750_v13 = vld [vmem:[#allocation58_spill] sm:$0xff]  ;;  %v17752_v47 = vld [vmem:[#allocation61_spill] sm:$0xff] }
  0x64   :  { %17740 = vst [vmem:[#allocation91_spill] sm:$0xff] %v11196_v51  ;;  %17743 = vst [vmem:[#allocation50_spill] sm:$0xff] %v11205_v2  ;;  %v8221_v51 = vpack.c.bf16 %v397_v25, %v385_v6  ;;  %v409_v29 = vand.u32 4294901760, %v408_v54  ;;  %v17744_v48 = vand.u32 4294901760, %v17736_v32  ;;  %v421_v30 = vand.u32 4294901760, %v420_v14  ;;  %v17748_v25 = vld [vmem:[#allocation55_spill] sm:$0xff] }
  0x65   :  { %v17745_v43 = vand.u32 4294901760, %v17741_v58  ;;  %v432_v36 = vsub.f32 %v10938_v4, %v16541_v57  ;;  %8212 = vmatpush1.bf16.msra.mxu0 %v8211_v8  ;;  %v17751_v6 = vld [vmem:[#allocation59_spill] sm:$0xff]  ;;  %v17753_v14 = vld [vmem:[#allocation62_spill] sm:$0xff]  ;;  %v8223_v5 = vpack.c.bf16 %v403_v16, %v391_v40  ;;  %v16550_v57 = vand.u32 4294901760, %v17754_v49 }
  0x66   :  { %v414_v12 = vsub.f32 %v17736_v32, %v17744_v48  ;;  %8214 = vmatprep.subr.bf16.mxu0 %v8213_v33  ;;  %v8225_v35 = vpack.c.bf16 %v421_v30, %v409_v29  ;;  %v17755_v62 = vand.u32 4294901760, %v10941_v61  ;;  %v17756_v28 = vand.u32 4294901760, %v17746_v26 }
  0x67   :  { %v426_v20 = vsub.f32 %v17741_v58, %v17745_v43  ;;  %v433_v54 = vand.u32 4294901760, %v432_v36  ;;  %v17757_v48 = vand.u32 4294901760, %v17747_v22  ;;  %v17759_v30 = vand.u32 4294901760, %v17749_v39 }
  0x68   :  { %v415_v43 = vand.u32 4294901760, %v414_v12  ;;  %v444_v8 = vsub.f32 %v10941_v61, %v17755_v62  ;;  %v438_v0 = vsub.f32 %v17746_v26, %v17756_v28  ;;  %v17758_v12 = vand.u32 4294901760, %v17748_v25 }
  0x69   :  { %v427_v17 = vand.u32 4294901760, %v426_v20  ;;  %v450_v33 = vsub.f32 %v17747_v22, %v17757_v48  ;;  %v468_v29 = vsub.f32 %v17749_v39, %v17759_v30  ;;  %8216 = vmatpush1.bf16.msra.mxu0 %v8215_v52  ;;  %v17760_v40 = vand.u32 4294901760, %v17750_v13 }
  0x6a   :  { %v456_v16 = vsub.f32 %v17748_v25, %v17758_v12  ;;  %v17761_v62 = vand.u32 4294901760, %v17751_v6  ;;  %v17762_v28 = vand.u32 4294901760, %v17752_v47  ;;  %v17763_v27 = vand.u32 4294901760, %v17753_v14  ;;  %8218 = vmatprep.subr.bf16.mxu0 %v8217_v31 }
  0x6b   :  { %v462_v20 = vsub.f32 %v17750_v13, %v17760_v40  ;;  %v486_v52 = vsub.f32 %v17754_v49, %v16550_v57  ;;  %v17764_v30 = vand.u32 4294901760, %v10970_v50  ;;  %v445_v13 = vand.u32 4294901760, %v444_v8 }
  0x6c   :  { %v474_v36 = vsub.f32 %v17751_v6, %v17761_v62  ;;  %v480_v48 = vsub.f32 %v17752_v47, %v17762_v28  ;;  %v492_v12 = vsub.f32 %v17753_v14, %v17763_v27  ;;  %v8227_v6 = vpack.c.bf16 %v427_v17, %v415_v43  ;;  %v17765_v47 = vld [vmem:[#allocation69_spill] sm:$0xff]  ;;  %v17766_v14 = vld [vmem:[#allocation70_spill] sm:$0xff] }
  0x6d   :  { %v498_v40 = vsub.f32 %v10970_v50, %v17764_v30  ;;  %v439_v28 = vand.u32 4294901760, %v438_v0  ;;  %v16561_v39 = vand.u32 4294901760, %v17765_v47  ;;  %v451_v25 = vand.u32 4294901760, %v450_v33  ;;  %8220 = vmatpush1.bf16.msra.mxu0 %v8219_v24  ;;  %v17796_v50 = vld [vmem:[#allocation87_spill] sm:$0xff] }
  0x6e   :  { %v457_v27 = vand.u32 4294901760, %v456_v16  ;;  %v469_v31 = vand.u32 4294901760, %v468_v29  ;;  %v16559_v22 = vand.u32 4294901760, %v17766_v14  ;;  %v463_v57 = vand.u32 4294901760, %v462_v20  ;;  %8222 = vmatprep.subr.bf16.mxu0 %v8221_v51 }
  0x6f   :  { %v475_v49 = vand.u32 4294901760, %v474_v36  ;;  %v481_v26 = vand.u32 4294901760, %v480_v48  ;;  %v493_v61 = vand.u32 4294901760, %v492_v12  ;;  %v487_v30 = vand.u32 4294901760, %v486_v52 }
  0x70   :  { %v499_v2 = vand.u32 4294901760, %v498_v40  ;;  %v17767_v62 = vand.u32 4294901760, %v10974_v45  ;;  %v17768_v0 = vand.u32 4294901760, %v10976_v41  ;;  %v8229_v8 = vpack.c.bf16 %v445_v13, %v433_v54 }
  0x71   :  { %v11278_v24 = vsub.f32 %v17765_v47, %v16561_v39  ;;  %v16558_v51 = vand.u32 4294901760, %v10991_v18  ;;  %v16556_v33 = vand.u32 4294901760, %v10993_v42  ;;  %v8231_v16 = vpack.c.bf16 %v451_v25, %v439_v28  ;;  %8224 = vmatpush1.bf16.msra.mxu0 %v8223_v5 }
  0x72   :  { %v11268_v17 = vsub.f32 %v10974_v45, %v17767_v62  ;;  %v11273_v43 = vsub.f32 %v10976_v41, %v17768_v0  ;;  %v11285_v29 = vsub.f32 %v17766_v14, %v16559_v22  ;;  %v16555_v20 = vand.u32 4294901760, %v10997_v37  ;;  %8226 = vmatprep.subr.bf16.mxu0 %v8225_v35  ;;  %v17772_v0 = vld [vmem:[#allocation26_spill] sm:$0xff]  ;;  %v17787_v22 = vld [vmem:[#allocation55_spill] sm:$0xff]  ;;  %v17798_v14 = vld [vmem:[#allocation89_spill] sm:$0xff] }
  0x73   :  { %v16557_v36 = vand.u32 4294901760, %v11000_v44  ;;  %v8233_v13 = vpack.c.bf16 %v469_v31, %v457_v27  ;;  %v8235_v54 = vpack.c.bf16 %v475_v49, %v463_v57  ;;  %v8237_v48 = vpack.c.bf16 %v493_v61, %v481_v26  ;;  %v17769_v49 = vld [vmem:[#allocation23_spill] sm:$0xff]  ;;  %v17770_v27 = vld [vmem:[#allocation24_spill] sm:$0xff]  ;;  %v17778_v31 = vld [vmem:[#allocation81_spill] sm:$0xff] }
  0x74   :  { %v16560_v12 = vand.u32 4294901760, %v11006_v21  ;;  %v11290_v52 = vpack.c.bf16 %v499_v2, %v487_v30  ;;  %v505_v25 = vand.u32 4294901760, %v11268_v17  ;;  %v517_v40 = vand.u32 4294901760, %v11273_v43  ;;  %v17771_v17 = vld [vmem:[#allocation25_spill] sm:$0xff]  ;;  %v17786_v43 = vld [vmem:[#allocation54_spill] sm:$0xff] }
  0x75   :  { %v16562_v62 = vand.u32 4294901760, %v11008_v46  ;;  %v511_v28 = vand.u32 4294901760, %v11278_v24  ;;  %v528_v5 = vsub.f32 %v10991_v18, %v16558_v51  ;;  %v540_v61 = vsub.f32 %v10993_v42, %v16556_v33  ;;  %8228 = vmatpush1.bf16.msra.mxu0 %v8227_v6  ;;  %v17773_v24 = vld [vmem:[#allocation27_spill] sm:$0xff]  ;;  %v17775_v51 = vld [vmem:[#allocation80_spill] sm:$0xff]  ;;  %v17785_v2 = vld [vmem:[#allocation53_spill] sm:$0xff] }
  0x76   :  { %v523_v57 = vand.u32 4294901760, %v11285_v29  ;;  %v11308_v35 = vsub.f32 %v10997_v37, %v16555_v20  ;;  %v11313_v26 = vsub.f32 %v11000_v44, %v16557_v36  ;;  %v552_v30 = vsub.f32 %v11006_v21, %v16560_v12  ;;  %v17774_v29 = vld [vmem:[#allocation28_spill] sm:$0xff]  ;;  %8230 = vmatprep.subr.bf16.mxu0 %v8229_v8  ;;  %v17783_v20 = vld [vmem:[#allocation47_spill] sm:$0xff]  ;;  %v17801_v12 = vld [vmem:[#allocation50_spill] sm:$0xff] }
  0x77   :  { %v564_v36 = vsub.f32 %v11008_v46, %v16562_v62  ;;  %v17784_v62 = vld [vmem:[#allocation52_spill] sm:$0xff]  ;;  %v529_v33 = vand.u32 4294901760, %v528_v5  ;;  %v541_v47 = vand.u32 4294901760, %v540_v61  ;;  %v17800_v42 = vld [vmem:[#allocation91_spill] sm:$0xff]  ;;  %v8241_v39 = vpack.c.bf16 %v517_v40, %v505_v25 }
  0x78   :  { %v17788_v6 = vld [vmem:[#allocation56_spill] sm:$0xff]  ;;  %v16594_v21 = vand.u32 4294901760, %v17794_v23  ;;  %v16593_v3 = vand.u32 4294901760, %v17795_v1  ;;  %v535_v10 = vand.u32 4294901760, %v11308_v35  ;;  %v547_v46 = vand.u32 4294901760, %v11313_v26 }
  0x79   :  { %8232 = vmatpush1.bf16.msra.mxu0 %v8231_v16  ;;  %v17791_v16 = vld [vmem:[#allocation61_spill] sm:$0xff]  ;;  %v17797_v8 = vld [vmem:[#allocation88_spill] sm:$0xff]  ;;  %v553_v45 = vand.u32 4294901760, %v552_v30  ;;  %v17802_v5 = vand.u32 4294901760, %v17775_v51  ;;  %v17803_v18 = vand.u32 4294901760, %v17778_v31  ;;  %v8245_v25 = vpack.c.bf16 %v541_v47, %v529_v33 }
  0x7a   :  { %8234 = vmatprep.subr.bf16.mxu0 %v8233_v13  ;;  %v17799_v13 = vld [vmem:[#allocation48_spill] sm:$0xff]  ;;  %v16597_v40 = vand.u32 4294901760, %v17796_v50  ;;  %v16596_v35 = vand.u32 4294901760, %v17797_v8  ;;  %v588_v26 = vsub.f32 %v17795_v1, %v16593_v3  ;;  %v16595_v30 = vand.u32 4294901760, %v17798_v14 }
  0x7b   :  { %v558_v61 = vsub.f32 %v17775_v51, %v17802_v5  ;;  %v570_v37 = vsub.f32 %v17778_v31, %v17803_v18  ;;  %v16601_v5 = vand.u32 4294901760, %v17800_v42  ;;  %v16600_v3 = vand.u32 4294901760, %v17801_v12 }
  0x7c   :  { %v589_v18 = vand.u32 4294901760, %v588_v26 }
  0x7d   :  { %8236 = vmatpush1.bf16.msra.mxu0 %v8235_v54  ;;  %v565_v54 = vand.u32 4294901760, %v564_v36  ;;  %v576_v36 = vsub.f32 %v17794_v23, %v16594_v21  ;;  %v559_v47 = vand.u32 4294901760, %v558_v61  ;;  %v571_v33 = vand.u32 4294901760, %v570_v37 }
  0x7e   :  { %8238 = vmatprep.subr.bf16.mxu0 %v8237_v48  ;;  %v8243_v48 = vpack.c.bf16 %v523_v57, %v511_v28  ;;  %v594_v57 = vsub.f32 %v17797_v8, %v16596_v35 }
  0x7f   :  { %v8249_v28 = vpack.c.bf16 %v565_v54, %v553_v45  ;;  %v577_v21 = vand.u32 4294901760, %v576_v36  ;;  %v17804_v45 = vand.u32 4294901760, %v17799_v13 }
  0x80   :  { %v595_v61 = vand.u32 4294901760, %v594_v57 }
  0x81   :  { %8240 = vmatpush1.bf16.msra.mxu0 %v11290_v52  ;;  %v8247_v52 = vpack.c.bf16 %v547_v46, %v535_v10  ;;  %v600_v10 = vsub.f32 %v17798_v14, %v16595_v30  ;;  %v612_v37 = vsub.f32 %v17799_v13, %v17804_v45  ;;  %v8251_v46 = vpack.c.bf16 %v571_v33, %v559_v47 }
  0x82   :  { %8242 = vmatprep.subr.bf16.mxu0 %v8241_v39  ;;  %v582_v39 = vsub.f32 %v17796_v50, %v16597_v40  ;;  %v8253_v36 = vpack.c.bf16 %v589_v18, %v577_v21  ;;  %v17805_v33 = vpack.c.bf16 %v10766_v63, %v10752_v38  ;;  %v17807_v21 = vpack.c.bf16 %v17770_v27, %v17769_v49 }
  0x83   :  { %v601_v26 = vand.u32 4294901760, %v600_v10  ;;  %v613_v30 = vand.u32 4294901760, %v612_v37  ;;  %v17808_v18 = vmov 0.0   ;;  %v17813_v10 = vld [vmem:[#allocation30_spill] sm:$0xff] }
  0x84   :  { %v583_v54 = vand.u32 4294901760, %v582_v39  ;;  %v16598_v39 = vmov 1.0   ;;  %v17814_v37 = vpack.c.bf16 %v10832_v15, %v17813_v10 }
  0x85   :  { %8244 = vmatpush1.bf16.msra.mxu0 %v8243_v48  ;;  %v606_v48 = vsub.f32 %v17800_v42, %v16601_v5 }
  0x86   :  { %8246 = vmatprep.subr.bf16.mxu0 %v8245_v25  ;;  %v618_v25 = vsub.f32 %v17801_v12, %v16600_v3  ;;  %v8255_v35 = vpack.c.bf16 %v595_v61, %v583_v54  ;;  %v17816_v54 = vld [vmem:[#allocation33_spill] sm:$0xff]  ;;  %v17842_v3 = vld [vmem:[#allocation64_spill] sm:$0xff] }
  0x87   :  { %v607_v40 = vand.u32 4294901760, %v606_v48  ;;  %v17817_v61 = vpack.c.bf16 %v10857_v53, %v17816_v54  ;;  %v17818_v48 = vld [vmem:[#allocation34_spill] sm:$0xff] }
  0x88   :  { %v619_v45 = vand.u32 4294901760, %v618_v25  ;;  %v17819_v25 = vpack.c.bf16 %v10867_v34, %v17818_v48 }
  0x89   :  { %8248 = vmatpush1.bf16.msra.mxu0 %v8247_v52  ;;  %v8257_v52 = vpack.c.bf16 %v613_v30, %v601_v26  ;;  %v17811_v30 = vld [vmem:[#allocation29_spill] sm:$0xff] }
  0x8a   :  { %8250 = vmatprep.subr.bf16.mxu0 %v8249_v28  ;;  %v8259_v47 = vpack.c.bf16 %v619_v45, %v607_v40  ;;  %v17809_v40 = vpack.c.bf16 %v17772_v0, %v17771_v17  ;;  %v17812_v57 = vpack.c.bf16 %v10819_v9, %v17811_v30  ;;  %v17822_v45 = vld [vmem:[#allocation38_spill] sm:$0xff] }
  0x8d   :  { %8252 = vmatpush1.bf16.msra.mxu0 %v8251_v46  ;;  %v17815_v46 = vpack.c.bf16 %v10847_v19, %v10842_v55 }
  0x8e   :  { %8254 = vmatprep.subr.bf16.mxu0 %v8253_v36  ;;  %v17820_v36 = vld [vmem:[#allocation35_spill] sm:$0xff] }
  0x8f   :  { %v17821_v26 = vpack.c.bf16 %v10877_v60, %v17820_v36 }
  0x91   :  { %8256 = vmatpush1.bf16.msra.mxu0 %v8255_v35  ;;  %v17810_v35 = vpack.c.bf16 %v17774_v29, %v17773_v24 }
  0x92   :  { %8258 = vmatprep.subr.bf16.mxu0 %v8257_v52  ;;  %v17823_v52 = vld [vmem:[#allocation36_spill] sm:$0xff] }
  0x95   :  { %8260 = vmatpush1.bf16.msra.mxu0 %v8259_v47  ;;  %v17824_v47 = vpack.c.bf16 %v17822_v45, %v17823_v52 }
  0x96   :  { %8262 = vmatprep.subr.bf16.mxu0 %v17805_v33  ;;  %v17825_v33 = vld [vmem:[#allocation40_spill] sm:$0xff] }
  0x98   :  { %8130 = vmatmul.mubr.msk.f32.vlgmr.msra.gmra.mrb[0].mxu0 %vm26_vm0, %v16598_v39 }
  0x99   :  { %8264 = vmatpush1.bf16.msra.mxu0 %v17807_v21  ;;  %821 = vmatprep.mubr.f32.mxu0 %v17808_v18  ;;  %v17826_v21 = vpack.c.bf16 %v17780_v7, %v17825_v33 }
  0x9a   :  { %8266 = vmatprep.subr.bf16.mxu0 %v17809_v40  ;;  %v17827_v40 = vld [vmem:[#allocation43_spill] sm:$0xff] }
  0x9d   :  { %8268 = vmatpush1.bf16.msra.mxu0 %v17810_v35  ;;  %v17828_v35 = vld [vmem:[#allocation42_spill] sm:$0xff] }
  0x9e   :  { %8270 = vmatprep.subr.bf16.mxu0 %v17812_v57  ;;  %v17829_v57 = vpack.c.bf16 %v17827_v40, %v17828_v35 }
  0xa1   :  { %8272 = vmatpush1.bf16.msra.mxu0 %v17814_v37  ;;  %v17830_v37 = vld [vmem:[#allocation45_spill] sm:$0xff] }
  0xa2   :  { %8274 = vmatprep.subr.bf16.mxu0 %v17815_v46  ;;  %v17831_v46 = vld [vmem:[#allocation44_spill] sm:$0xff] }
  0xa5   :  { %8276 = vmatpush1.bf16.msra.mxu0 %v17817_v61  ;;  %v17832_v61 = vpack.c.bf16 %v17830_v37, %v17831_v46 }
  0xa6   :  { %8278 = vmatprep.subr.bf16.mxu0 %v17819_v25  ;;  %v17833_v25 = vld [vmem:[#allocation46_spill] sm:$0xff] }
  0xa7   :  { %v17834_v39 = vpack.c.bf16 %v17783_v20, %v17833_v25 }
  0xa9   :  { %8280 = vmatpush1.bf16.msra.mxu0 %v17821_v26  ;;  %v17835_v26 = vpack.c.bf16 %v17741_v58, %v17736_v32 }
  0xaa   :  { %8282 = vmatprep.subr.bf16.mxu0 %v17824_v47  ;;  %v17836_v47 = vpack.c.bf16 %v17784_v62, %v10938_v4 }
  0xad   :  { %8284 = vmatpush1.bf16.msra.mxu0 %v17826_v21  ;;  %v17837_v21 = vpack.c.bf16 %v17786_v43, %v17785_v2  ;;  %v17847_v43 = vld [vmem:[#allocation69_spill] sm:$0xff] }
  0xae   :  { %8286 = vmatprep.subr.bf16.mxu0 %v17829_v57  ;;  %v17838_v57 = vpack.c.bf16 %v17788_v6, %v17787_v22  ;;  %v17850_v22 = vld [vmem:[#allocation72_spill] sm:$0xff] }
  0xb1   :  { %8288 = vmatpush1.bf16.msra.mxu0 %v17832_v61  ;;  %v17839_v61 = vpack.c.bf16 %v17790_v59, %v17789_v11 }
  0xb2   :  { %8290 = vmatprep.subr.bf16.mxu0 %v17834_v39  ;;  %v17840_v39 = vpack.c.bf16 %v17792_v56, %v17791_v16  ;;  %v17855_v16 = vld [vmem:[#allocation77_spill] sm:$0xff] }
  0xb5   :  { %8292 = vmatpush1.bf16.msra.mxu0 %v17835_v26  ;;  %v17841_v26 = vld [vmem:[#allocation65_spill] sm:$0xff] }
  0xb6   :  { %8294 = vmatprep.subr.bf16.mxu0 %v17836_v47  ;;  %v17843_v5 = vpack.c.bf16 %v17841_v26, %v17842_v3  ;;  %v17844_v47 = vld [vmem:[#allocation67_spill] sm:$0xff] }
  0xb7   :  { %v17845_v28 = vpack.c.bf16 %v10976_v41, %v17844_v47 }
  0xb9   :  { %8296 = vmatpush1.bf16.msra.mxu0 %v17837_v21  ;;  %v17846_v21 = vld [vmem:[#allocation70_spill] sm:$0xff] }
  0xba   :  { %8298 = vmatprep.subr.bf16.mxu0 %v17838_v57  ;;  %v17848_v6 = vpack.c.bf16 %v17846_v21, %v17847_v43  ;;  %v17849_v57 = vld [vmem:[#allocation73_spill] sm:$0xff] }
  0xbb   :  { %v17851_v59 = vpack.c.bf16 %v17849_v57, %v17850_v22 }
  0xbd   :  { %8300 = vmatpush1.bf16.msra.mxu0 %v17839_v61  ;;  %v17852_v61 = vld [vmem:[#allocation75_spill] sm:$0xff] }
  0xbe   :  { %8302 = vmatprep.subr.bf16.mxu0 %v17840_v39  ;;  %v17853_v56 = vpack.c.bf16 %v11000_v44, %v17852_v61  ;;  %v17854_v39 = vld [vmem:[#allocation78_spill] sm:$0xff] }
  0xbf   :  { %v17856_v26 = vpack.c.bf16 %v17854_v39, %v17855_v16 }
  0xc1   :  { %8304 = vmatpush1.bf16.msra.mxu0 %v17843_v5  ;;  %v17857_v5 = vpack.c.bf16 %v17778_v31, %v17775_v51  ;;  %v17863_v31 = vld [vmem:[#allocation20_spill] sm:$0xff] }
  0xc2   :  { %8306 = vmatprep.subr.bf16.mxu0 %v17845_v28  ;;  %v17858_v28 = vpack.c.bf16 %v17795_v1, %v17794_v23 }
  0xc5   :  { %8308 = vmatpush1.bf16.msra.mxu0 %v17848_v6  ;;  %v17859_v6 = vpack.c.bf16 %v17797_v8, %v17796_v50  ;;  %v17866_v8 = vld [vmem:[#allocation11_spill] sm:$0xff] }
  0xc6   :  { %8310 = vmatprep.subr.bf16.mxu0 %v17851_v59  ;;  %v17860_v59 = vpack.c.bf16 %v17799_v13, %v17798_v14  ;;  %v17868_v13 = vld [vmem:[#allocation13_spill] sm:$0xff]  ;;  %v17875_v14 = vld [vmem:[#allocation22_spill] sm:$0xff] }
  0xc9   :  { %8312 = vmatpush1.bf16.msra.mxu0 %v17853_v56  ;;  %v17861_v56 = vpack.c.bf16 %v17801_v12, %v17800_v42  ;;  %v17870_v12 = vld [vmem:[#allocation16_spill] sm:$0xff]  ;;  %v17873_v42 = vld [vmem:[#allocation19_spill] sm:$0xff] }
  0xca   :  { %8314 = vmatprep.subr.bf16.mxu0 %v17856_v26  ;;  %v17862_v26 = vld [vmem:[#allocation8_spill] sm:$0xff] }
  0xcd   :  { %8316 = vmatpush1.bf16.msra.mxu0 %v17857_v5  ;;  %v17864_v5 = vld [vmem:[#allocation9_spill] sm:$0xff] }
  0xce   :  { %8318 = vmatprep.subr.bf16.mxu0 %v17858_v28  ;;  %v17865_v28 = vld [vmem:[#allocation10_spill] sm:$0xff] }
  0xd1   :  { %8320 = vmatpush1.bf16.msra.mxu0 %v17859_v6  ;;  %v17867_v6 = vld [vmem:[#allocation12_spill] sm:$0xff] }
  0xd2   :  { %8322 = vmatprep.subr.bf16.mxu0 %v17860_v59  ;;  %v17869_v59 = vld [vmem:[#allocation14_spill] sm:$0xff] }
  0xd5   :  { %8324 = vmatpush1.bf16.msra.mxu0 %v17861_v56  ;;  %v17871_v56 = vld [vmem:[#allocation17_spill] sm:$0xff] }
  0xd6   :  { %8326 = vmatprep.subr.bf16.mxu0 %v17862_v26  ;;  %v17872_v26 = vld [vmem:[#allocation18_spill] sm:$0xff] }
  0xd8   :  { %823 = vmatmul.mubr.f32.vlgmr.msra.gmra.mrb[0].mxu0 %v17863_v31 }
  0xd9   :  { %8328 = vmatpush1.bf16.msra.mxu0 %v17864_v5  ;;  %959 = vmatprep.mubr.f32.mxu0 %v17808_v18  ;;  %v17874_v5 = vld [vmem:[#allocation21_spill] sm:$0xff] }
  0xda   :  { %8330 = vmatprep.subr.bf16.mxu0 %v17865_v28  ;;  %v17876_v28 = vld [vmem:[#allocation31_spill] sm:$0xff] }
  0xdd   :  { %8332 = vmatpush1.bf16.msra.mxu0 %v17866_v8  ;;  %v17877_v8 = vld [vmem:[#allocation32_spill] sm:$0xff] }
  0xde   :  { %8334 = vmatprep.subr.bf16.mxu0 %v17867_v6  ;;  %v17878_v6 = vld [vmem:[#allocation37_spill] sm:$0xff] }
  0xe1   :  { %8336 = vmatpush1.bf16.msra.mxu0 %v17868_v13  ;;  %v17879_v13 = vld [vmem:[#allocation39_spill] sm:$0xff] }
  0xe2   :  { %8338 = vmatprep.subr.bf16.mxu0 %v17869_v59  ;;  %v17880_v59 = vld [vmem:[#allocation49_spill] sm:$0xff] }
  0xe5   :  { %8340 = vmatpush1.bf16.msra.mxu0 %v17870_v12  ;;  %v17881_v12 = vld [vmem:[#allocation51_spill] sm:$0xff] }
  0xe6   :  { %8342 = vmatprep.subr.bf16.mxu0 %v17871_v56  ;;  %v17882_v56 = vld [vmem:[#allocation57_spill] sm:$0xff] }
  0xe9   :  { %8344 = vmatpush1.bf16.msra.mxu0 %v17872_v26  ;;  %v17883_v26 = vld [vmem:[#allocation60_spill] sm:$0xff] }
  0xea   :  { %8346 = vmatprep.subr.bf16.mxu0 %v17873_v42  ;;  %v17884_v42 = vld [vmem:[#allocation63_spill] sm:$0xff] }
  0xed   :  { %8348 = vmatpush1.bf16.msra.mxu0 %v17874_v5  ;;  %v17885_v5 = vld [vmem:[#allocation66_spill] sm:$0xff] }
  0xee   :  { %8350 = vmatprep.subr.bf16.mxu0 %v17875_v14  ;;  %v17886_v14 = vld [vmem:[#allocation68_spill] sm:$0xff] }
  0xf1   :  { %8352 = vmatpush1.bf16.msra.mxu0 %v17876_v28  ;;  %v17887_v28 = vld [vmem:[#allocation71_spill] sm:$0xff] }
  0xf2   :  { %8354 = vmatprep.subr.bf16.mxu0 %v17877_v8  ;;  %v17888_v8 = vld [vmem:[#allocation74_spill] sm:$0xff] }
  0xf5   :  { %8356 = vmatpush1.bf16.msra.mxu0 %v17878_v6  ;;  %v17889_v6 = vld [vmem:[#allocation76_spill] sm:$0xff] }
  0xf6   :  { %8358 = vmatprep.subr.bf16.mxu0 %v17879_v13  ;;  %v17890_v13 = vld [vmem:[#allocation79_spill] sm:$0xff] }
  0xf9   :  { %8360 = vmatpush1.bf16.msra.mxu0 %v17880_v59  ;;  %v17891_v59 = vld [vmem:[#allocation82_spill] sm:$0xff] }
  0xfa   :  { %8362 = vmatprep.subr.bf16.mxu0 %v17881_v12  ;;  %v17892_v12 = vld [vmem:[#allocation85_spill] sm:$0xff] }
  0xfd   :  { %8364 = vmatpush1.bf16.msra.mxu0 %v17882_v56  ;;  %v17893_v56 = vld [vmem:[#allocation86_spill] sm:$0xff] }
  0xfe   :  { %8366 = vmatprep.subr.bf16.mxu0 %v17883_v26 }
 0x101   :  { %8368 = vmatpush1.bf16.msra.mxu0 %v17884_v42  ;;  %v17894_v42 = vand.u32 4294901760, %v10752_v38  ;;  %v17902_v38 = vand.u32 4294901760, %v17774_v29 }
 0x102   :  { %8370 = vmatprep.subr.bf16.mxu0 %v17885_v5  ;;  %v17895_v5 = vand.u32 4294901760, %v10766_v63  ;;  %v17903_v63 = vand.u32 4294901760, %v17811_v30 }
 0x104   :  { %v8389_v26 = vpack.c.bf16 %v17895_v5, %v17894_v42  ;;  %v17904_v42 = vand.u32 4294901760, %v10819_v9  ;;  %v17911_v9 = vand.u32 4294901760, %v10857_v53  ;;  %v17916_v53 = vand.u32 4294901760, %v17823_v52 }
 0x105   :  { %8372 = vmatpush1.bf16.msra.mxu0 %v17886_v14  ;;  %v17896_v14 = vld [vmem:[#allocation90_spill] sm:$0xff] }
 0x106   :  { %8374 = vmatprep.subr.bf16.mxu0 %v17887_v28  ;;  %v17897_v28 = vand.u32 4294901760, %v17769_v49  ;;  %v8397_v5 = vpack.c.bf16 %v17904_v42, %v17903_v63  ;;  %v17905_v49 = vand.u32 4294901760, %v17813_v10  ;;  %v17912_v10 = vand.u32 4294901760, %v17818_v48  ;;  %v1369_v63 = vld [vmem:[#allocation2 + $0x210] sm:$0xff]  ;;  %v1372_v42 = vld [vmem:[#allocation2 + $0x228] sm:$0xff] }
 0x107   :  { %v1437_v52 = vand.u32 4294901760, %v1369_v63 }
 0x109   :  { %8376 = vmatpush1.bf16.msra.mxu0 %v17888_v8  ;;  %v17898_v8 = vand.u32 4294901760, %v17770_v27  ;;  %v17906_v27 = vand.u32 4294901760, %v10832_v15  ;;  %v17913_v15 = vand.u32 4294901760, %v10867_v34 }
 0x10a   :  { %8378 = vmatprep.subr.bf16.mxu0 %v17889_v6 }
 0x10b   :  { %v8391_v6 = vpack.c.bf16 %v17898_v8, %v17897_v28  ;;  %v11584_v8 = vpack.c.bf16 %v17906_v27, %v17905_v49  ;;  %v17918_v49 = vand.u32 4294901760, %v17825_v33  ;;  %v17919_v27 = vand.u32 4294901760, %v17780_v7  ;;  %v1375_v33 = vld [vmem:[#allocation2 + $0x240] sm:$0xff] }
 0x10d   :  { %8380 = vmatpush1.bf16.msra.mxu0 %v17890_v13  ;;  %v17899_v13 = vand.u32 4294901760, %v17771_v17  ;;  %v17907_v17 = vand.u32 4294901760, %v17863_v31  ;;  %v17914_v31 = vand.u32 4294901760, %v17820_v36 }
 0x10e   :  { %8382 = vmatprep.subr.bf16.mxu0 %v17891_v59  ;;  %v17900_v59 = vand.u32 4294901760, %v17772_v0  ;;  %v17908_v0 = vand.u32 4294901760, %v10842_v55  ;;  %v17915_v55 = vand.u32 4294901760, %v10877_v60  ;;  %v1374_v60 = vld [vmem:[#allocation2 + $0x238] sm:$0xff] }
 0x110   :  { %v11610_v28 = vpack.c.bf16 %v17915_v55, %v17914_v31  ;;  %v1377_v55 = vld [vmem:[#allocation2 + $0x250] sm:$0xff] }
 0x111   :  { %8384 = vmatpush1.bf16.msra.mxu0 %v17892_v12  ;;  %v8393_v12 = vpack.c.bf16 %v17900_v59, %v17899_v13  ;;  %v17910_v13 = vand.u32 4294901760, %v17816_v54  ;;  %v1370_v59 = vld [vmem:[#allocation2 + $0x218] sm:$0xff]  ;;  %v17917_v54 = vand.u32 4294901760, %v17822_v45  ;;  %v1443_v45 = vand.u32 4294901760, %v1374_v60 }
 0x112   :  { %8386 = vmatprep.subr.bf16.mxu0 %v17893_v56  ;;  %v17901_v56 = vand.u32 4294901760, %v17773_v24  ;;  %v17909_v24 = vand.u32 4294901760, %v10847_v19  ;;  %v1368_v19 = vld [vmem:[#allocation2 + $0x208] sm:$0xff]  ;;  %v1435_v48 = vand.u32 4294901760, %v1370_v59 }
 0x113   :  { %v11598_v30 = vpack.c.bf16 %v17911_v9, %v17910_v13  ;;  %v1431_v34 = vand.u32 4294901760, %v1368_v19  ;;  %v1376_v13 = vld [vmem:[#allocation2 + $0x248] sm:$0xff] }
 0x114   :  { %v8395_v50 = vpack.c.bf16 %v17902_v38, %v17901_v56  ;;  %v11592_v29 = vpack.c.bf16 %v17909_v24, %v17908_v0  ;;  %v1367_v56 = vld [vmem:[#allocation2 + $0x200] sm:$0xff]  ;;  %v11616_v38 = vpack.c.bf16 %v17917_v54, %v17916_v53  ;;  %v1373_v24 = vld [vmem:[#allocation2 + $0x230] sm:$0xff]  ;;  %v11635_v53 = vsub.f32 %v1369_v63, %v1437_v52 }
 0x115   :  { %8388 = vmatpush1.bf16.msra.mxu0 %v17896_v14  ;;  %v1433_v36 = vand.u32 4294901760, %v1367_v56  ;;  %v1371_v0 = vld [vmem:[#allocation2 + $0x220] sm:$0xff]  ;;  %v11625_v9 = vpack.c.bf16 %v1435_v48, %v1431_v34  ;;  %v1449_v63 = vand.u32 4294901760, %v1375_v33 }
 0x116   :  { %8390 = vmatprep.subr.bf16.mxu0 %v8389_v26  ;;  %v11604_v26 = vpack.c.bf16 %v17913_v15, %v17912_v10  ;;  %v11627_v10 = vsub.f32 %v1368_v19, %v1431_v34  ;;  %v11629_v15 = vsub.f32 %v1370_v59, %v1435_v48  ;;  %17925 = vst [vmem:[#allocation28_spill] sm:$0xff] %v11635_v53  ;;  %v1441_v59 = vand.u32 4294901760, %v1371_v0  ;;  %v1382_v48 = vld [vmem:[#allocation2 + $0x278] sm:$0xff] }
 0x117   :  { %17920 = vst [vmem:[#allocation23_spill] sm:$0xff] %v11625_v9  ;;  %v11631_v31 = vsub.f32 %v1367_v56, %v1433_v36  ;;  %v11633_v7 = vpack.c.bf16 %v1437_v52, %v1433_v36  ;;  %8518 = vmatprep.subr.bf16.mxu1 %v11625_v9  ;;  %v11642_v19 = vsub.f32 %v1374_v60, %v1443_v45  ;;  %v1445_v56 = vand.u32 4294901760, %v1373_v24  ;;  %v1384_v9 = vld [vmem:[#allocation2 + $0x288] sm:$0xff] }
 0x118   :  { %962 = vmatmul.mubr.f32.vlgmr.msra.gmra.mrb[0].mxu0 %v17907_v17  ;;  %v1439_v17 = vand.u32 4294901760, %v1372_v42  ;;  %17921 = vst [vmem:[#allocation24_spill] sm:$0xff] %v11627_v10  ;;  %17922 = vst [vmem:[#allocation25_spill] sm:$0xff] %v11629_v15  ;;  %v1447_v34 = vand.u32 4294901760, %v1376_v13  ;;  %v1453_v52 = vand.u32 4294901760, %v1377_v55  ;;  %v11662_v10 = vsub.f32 %v1375_v33, %v1449_v63 }
 0x119   :  { %8392 = vmatpush1.bf16.msra.mxu0 %v8391_v6  ;;  %1224 = vmatprep.mubr.f32.mxu0 %v17808_v18  ;;  %v11623_v6 = vpack.c.bf16 %v17919_v27, %v17918_v49  ;;  %17923 = vst [vmem:[#allocation26_spill] sm:$0xff] %v11631_v31  ;;  %17924 = vst [vmem:[#allocation27_spill] sm:$0xff] %v11633_v7  ;;  %v1380_v27 = vld [vmem:[#allocation2 + $0x268] sm:$0xff]  ;;  %v1379_v31 = vld [vmem:[#allocation2 + $0x260] sm:$0xff]  ;;  %v11650_v60 = vsub.f32 %v1373_v24, %v1445_v56  ;;  %v1459_v24 = vand.u32 4294901760, %v1382_v48 }
 0x11a   :  { %8394 = vmatprep.subr.bf16.mxu0 %v8393_v12  ;;  %v1378_v12 = vld [vmem:[#allocation2 + $0x258] sm:$0xff]  ;;  %v11637_v54 = vpack.c.bf16 %v1443_v45, %v1439_v17  ;;  %v11639_v49 = vsub.f32 %v1372_v42, %v1439_v17  ;;  %17928 = vst [vmem:[#allocation47_spill] sm:$0xff] %v11642_v19  ;;  %8520 = vmatpush1.bf16.msra.mxu1 %v11633_v7  ;;  %v1455_v53 = vand.u32 4294901760, %v1380_v27  ;;  %v1381_v42 = vld [vmem:[#allocation2 + $0x270] sm:$0xff]  ;;  %v11654_v19 = vld [vmem:[#allocation2 + $0x280] sm:$0xff] }
 0x11b   :  { %v1451_v36 = vand.u32 4294901760, %v1378_v12  ;;  %v11648_v17 = vsub.f32 %v1371_v0, %v1441_v59  ;;  %v11652_v45 = vsub.f32 %v1376_v13, %v1447_v34  ;;  %v11660_v15 = vpack.c.bf16 %v1453_v52, %v1449_v63  ;;  %17932 = vst [vmem:[#allocation83_spill] sm:$0xff] %v11662_v10  ;;  %v1388_v63 = vld [vmem:[#allocation2 + $0x2a8] sm:$0xff] }
 0x11c   :  { %17926 = vst [vmem:[#allocation80_spill] sm:$0xff] %v11637_v54  ;;  %17927 = vst [vmem:[#allocation41_spill] sm:$0xff] %v11639_v49  ;;  %8522 = vmatprep.subr.bf16.mxu1 %v11637_v54  ;;  %v1385_v54 = vld [vmem:[#allocation2 + $0x290] sm:$0xff]  ;;  %v11665_v0 = vsub.f32 %v1377_v55, %v1453_v52  ;;  %v11667_v13 = vsub.f32 %v1380_v27, %v1455_v53  ;;  %v11673_v33 = vpack.c.bf16 %v1459_v24, %v1455_v53  ;;  %v1390_v52 = vld [vmem:[#allocation2 + $0x2b8] sm:$0xff] }
 0x11d   :  { %8396 = vmatpush1.bf16.msra.mxu0 %v8395_v50  ;;  %v11646_v50 = vpack.c.bf16 %v1445_v56, %v1441_v59  ;;  %v11656_v7 = vpack.c.bf16 %v1451_v36, %v1447_v34  ;;  %v11658_v49 = vsub.f32 %v1378_v12, %v1451_v36  ;;  %17931 = vst [vmem:[#allocation58_spill] sm:$0xff] %v11660_v15  ;;  %v1457_v59 = vand.u32 4294901760, %v1379_v31 }
 0x11e   :  { %8398 = vmatprep.subr.bf16.mxu0 %v8397_v5  ;;  %v1386_v5 = vld [vmem:[#allocation2 + $0x298] sm:$0xff]  ;;  %17933 = vst [vmem:[#allocation84_spill] sm:$0xff] %v11665_v0  ;;  %17934 = vst [vmem:[#allocation29_spill] sm:$0xff] %v11667_v13  ;;  %v1461_v56 = vand.u32 4294901760, %v1381_v42  ;;  %v1463_v12 = vand.u32 4294901760, %v1384_v9  ;;  %v1465_v36 = vand.u32 4294901760, %v11654_v19 }
 0x11f   :  { %17929 = vst [vmem:[#allocation52_spill] sm:$0xff] %v11646_v50  ;;  %17930 = vst [vmem:[#allocation53_spill] sm:$0xff] %v11656_v7  ;;  %8524 = vmatpush1.bf16.msra.mxu1 %v11646_v50  ;;  %v1467_v34 = vand.u32 4294901760, %v1386_v5  ;;  %v11677_v55 = vsub.f32 %v1379_v31, %v1457_v59  ;;  %v1469_v27 = vand.u32 4294901760, %v1385_v54  ;;  %v17939_v50 = vand.u32 4294901760, %v17827_v40  ;;  %v1387_v31 = vld [vmem:[#allocation2 + $0x2a0] sm:$0xff] }
 0x120   :  { %8526 = vmatprep.subr.bf16.mxu1 %v11656_v7  ;;  %17935 = vst [vmem:[#allocation30_spill] sm:$0xff] %v11673_v33  ;;  %v17940_v0 = vand.u32 4294901760, %v17831_v46  ;;  %v17941_v10 = vand.u32 4294901760, %v17830_v37  ;;  %v11691_v53 = vsub.f32 %v1381_v42, %v1461_v56  ;;  %v17944_v40 = vand.u32 4294901760, %v17833_v25  ;;  %v11711_v42 = vld [vmem:[#allocation2 + $0x2c0] sm:$0xff] }
 0x121   :  { %8400 = vmatpush1.bf16.msra.mxu0 %v11584_v8  ;;  %v11675_v8 = vsub.f32 %v1382_v48, %v1459_v24  ;;  %17937 = vst [vmem:[#allocation34_spill] sm:$0xff] %v11677_v55  ;;  %v11693_v48 = vsub.f32 %v1384_v9, %v1463_v12  ;;  %v1389_v24 = vld [vmem:[#allocation2 + $0x2b0] sm:$0xff]  ;;  %v11695_v55 = vld [vmem:[#allocation2 + $0x2c8] sm:$0xff]  ;;  %v11704_v46 = vsub.f32 %v1386_v5, %v1467_v34  ;;  %v1394_v9 = vld [vmem:[#allocation2 + $0x2d8] sm:$0xff]  ;;  %v17950_v25 = vand.u32 4294901760, %v17741_v58 }
 0x122   :  { %8402 = vmatprep.subr.bf16.mxu0 %v11592_v29  ;;  %v17938_v29 = vand.u32 4294901760, %v17828_v35  ;;  %v11689_v7 = vpack.c.bf16 %v17941_v10, %v17940_v0  ;;  %17942 = vst [vmem:[#allocation35_spill] sm:$0xff] %v11691_v53  ;;  %v17945_v35 = vand.u32 4294901760, %v17783_v20  ;;  %v11707_v37 = vsub.f32 %v11654_v19, %v1465_v36 }
 0x123   :  { %17936 = vst [vmem:[#allocation33_spill] sm:$0xff] %v11675_v8  ;;  %17943 = vst [vmem:[#allocation38_spill] sm:$0xff] %v11693_v48  ;;  %v11709_v10 = vsub.f32 %v1385_v54, %v1469_v27  ;;  %8528 = vmatpush1.bf16.msra.mxu1 %v11660_v15  ;;  %v11721_v20 = vpack.c.bf16 %v1461_v56, %v1457_v59  ;;  %v1471_v5 = vand.u32 4294901760, %v1388_v63  ;;  %v1475_v19 = vand.u32 4294901760, %v1390_v52  ;;  %v11738_v15 = vld [vmem:[#allocation2 + $0x2e0] sm:$0xff] }
 0x124   :  { %v11683_v13 = vpack.c.bf16 %v17939_v50, %v17938_v29  ;;  %v11702_v50 = vpack.c.bf16 %v17945_v35, %v17944_v40  ;;  %17946 = vst [vmem:[#allocation36_spill] sm:$0xff] %v11704_v46  ;;  %17947 = vst [vmem:[#allocation40_spill] sm:$0xff] %v11707_v37  ;;  %v11723_v29 = vld [vmem:[#allocation2 + $0x2d0] sm:$0xff]  ;;  %8530 = vmatprep.subr.bf16.mxu1 %v11673_v33  ;;  %v11726_v54 = vpack.c.bf16 %v1467_v34, %v1463_v12  ;;  %v11729_v35 = vld [vmem:[#allocation2 + $0x2e8] sm:$0xff] }
 0x125   :  { %8404 = vmatpush1.bf16.msra.mxu0 %v11598_v30  ;;  %17948 = vst [vmem:[#allocation43_spill] sm:$0xff] %v11709_v10  ;;  %v17949_v30 = vand.u32 4294901760, %v17736_v32  ;;  %17951 = vst [vmem:[#allocation42_spill] sm:$0xff] %v11721_v20  ;;  %v1473_v40 = vand.u32 4294901760, %v1387_v31  ;;  %v1479_v32 = vand.u32 4294901760, %v11695_v55  ;;  %v11731_v58 = vsub.f32 %v1388_v63, %v1471_v5  ;;  %v17997_v37 = vld [vmem:[#allocation56_spill] sm:$0xff] }
 0x126   :  { %8406 = vmatprep.subr.bf16.mxu0 %v11604_v26  ;;  %17952 = vst [vmem:[#allocation45_spill] sm:$0xff] %v11726_v54  ;;  %v1477_v26 = vand.u32 4294901760, %v1389_v24  ;;  %v1483_v59 = vand.u32 4294901760, %v1394_v9  ;;  %v1481_v56 = vand.u32 4294901760, %v11711_v42  ;;  %v1485_v63 = vand.u32 4294901760, %v11723_v29 }
 0x127   :  { %v11718_v0 = vpack.c.bf16 %v17950_v25, %v17949_v30  ;;  %17953 = vst [vmem:[#allocation44_spill] sm:$0xff] %v11731_v58  ;;  %v11733_v30 = vsub.f32 %v1390_v52, %v1475_v19  ;;  %v11736_v25 = vld [vmem:[#allocation2 + $0x2f8] sm:$0xff]  ;;  %v11741_v12 = vsub.f32 %v1387_v31, %v1473_v40  ;;  %v11746_v33 = vsub.f32 %v11695_v55, %v1479_v32  ;;  %v11749_v52 = vld [vmem:[#allocation2 + $0x2f0] sm:$0xff] }
 0x128   :  { %v11743_v34 = vsub.f32 %v1389_v24, %v1477_v26  ;;  %8532 = vmatpush1.bf16.msra.mxu1 %v11721_v20  ;;  %v11755_v58 = vpack.c.bf16 %v1469_v27, %v1465_v36  ;;  %v11760_v31 = vsub.f32 %v11711_v42, %v1481_v56  ;;  %v1487_v55 = vand.u32 4294901760, %v11729_v35  ;;  %v11763_v24 = vld [vmem:[#allocation2 + $0x318] sm:$0xff] }
 0x129   :  { %17954 = vst [vmem:[#allocation46_spill] sm:$0xff] %v11733_v30  ;;  %8408 = vmatpush1.bf16.msra.mxu0 %v11610_v28  ;;  %17955 = vst [vmem:[#allocation64_spill] sm:$0xff] %v11741_v12  ;;  %v11751_v30 = vld [vmem:[#allocation2 + $0x308] sm:$0xff]  ;;  %v11757_v28 = vsub.f32 %v1394_v9, %v1483_v59  ;;  %8534 = vmatprep.subr.bf16.mxu1 %v11726_v54  ;;  %v1491_v36 = vand.u32 4294901760, %v11736_v25  ;;  %v16649_v27 = vand.u32 4294901760, %v11738_v15  ;;  %v11775_v9 = vld [vmem:[#allocation2 + $0x310] sm:$0xff] }
 0x12a   :  { %17956 = vst [vmem:[#allocation67_spill] sm:$0xff] %v11743_v34  ;;  %17957 = vst [vmem:[#allocation70_spill] sm:$0xff] %v11746_v33  ;;  %8410 = vmatprep.subr.bf16.mxu0 %v11616_v38  ;;  %v11765_v33 = vld [vmem:[#allocation2 + $0x300] sm:$0xff]  ;;  %v11768_v34 = vpack.c.bf16 %v1475_v19, %v1471_v5  ;;  %v11771_v38 = vsub.f32 %v11723_v29, %v1485_v63  ;;  %v11777_v42 = vpack.c.bf16 %v1477_v26, %v1473_v40  ;;  %v11784_v5 = vld [vmem:[#allocation2 + $0x328] sm:$0xff] }
 0x12b   :  { %17958 = vst [vmem:[#allocation69_spill] sm:$0xff] %v11755_v58  ;;  %17959 = vst [vmem:[#allocation73_spill] sm:$0xff] %v11757_v28  ;;  %v11780_v20 = vsub.f32 %v11729_v35, %v1487_v55  ;;  %v11786_v19 = vld [vmem:[#allocation2 + $0x338] sm:$0xff]  ;;  %v11790_v29 = vsub.f32 %v11736_v25, %v1491_v36  ;;  %v11795_v40 = vsub.f32 %v11738_v15, %v16649_v27  ;;  %v11801_v54 = vld [vmem:[#allocation2 + $0x330] sm:$0xff]  ;;  %v17968_v25 = vand.u32 4294901760, %v11749_v52 }
 0x12c   :  { %17960 = vst [vmem:[#allocation72_spill] sm:$0xff] %v11760_v31  ;;  %17961 = vst [vmem:[#allocation75_spill] sm:$0xff] %v11768_v34  ;;  %v11799_v31 = vld [vmem:[#allocation2 + $0x320] sm:$0xff]  ;;  %8536 = vmatpush1.bf16.msra.mxu1 %v11755_v58  ;;  %v17970_v27 = vand.u32 4294901760, %v11751_v30  ;;  %v17976_v35 = vand.u32 4294901760, %v10938_v4  ;;  %v11848_v58 = vld [vmem:[#allocation2 + $0x350] sm:$0xff]  ;;  %v11853_v4 = vpack.c.bf16 %v1485_v63, %v1481_v56 }
 0x12d   :  { %17962 = vst [vmem:[#allocation78_spill] sm:$0xff] %v11771_v38  ;;  %17963 = vst [vmem:[#allocation77_spill] sm:$0xff] %v11777_v42  ;;  %8412 = vmatpush1.bf16.msra.mxu0 %v11623_v6  ;;  %v11805_v6 = vpack.c.bf16 %v1483_v59, %v1479_v32  ;;  %8538 = vmatprep.subr.bf16.mxu1 %v11768_v34  ;;  %v17974_v59 = vand.u32 4294901760, %v11765_v33  ;;  %v17977_v34 = vand.u32 4294901760, %v17784_v62  ;;  %v17981_v62 = vand.u32 4294901760, %v11784_v5  ;;  %v1418_v28 = vld [vmem:[#allocation2 + $0x398] sm:$0xff] }
 0x12e   :  { %17964 = vst [vmem:[#allocation20_spill] sm:$0xff] %v11780_v20  ;;  %17965 = vst [vmem:[#allocation90_spill] sm:$0xff] %v11790_v29  ;;  %8414 = vmatprep.subr.bf16.mxu0 %v11683_v13  ;;  %v11810_v29 = vsub.f32 %v11749_v52, %v17968_v25  ;;  %v11815_v26 = vsub.f32 %v11751_v30, %v17970_v27  ;;  %v17972_v13 = vand.u32 4294901760, %v11763_v24  ;;  %v17978_v20 = vand.u32 4294901760, %v11775_v9  ;;  %v11850_v27 = vld [vmem:[#allocation2 + $0x368] sm:$0xff]  ;;  %v17995_v12 = vld [vmem:[#allocation55_spill] sm:$0xff] }
 0x12f   :  { %17966 = vst [vmem:[#allocation92_spill] sm:$0xff] %v11795_v40  ;;  %17967 = vst [vmem:[#allocation93_spill] sm:$0xff] %v11805_v6  ;;  %v11818_v40 = vld [vmem:[#allocation2 + $0x348] sm:$0xff]  ;;  %v11829_v25 = vsub.f32 %v11765_v33, %v17974_v59  ;;  %v17986_v56 = vand.u32 4294901760, %v11799_v31  ;;  %v17996_v10 = vand.u32 4294901760, %v17995_v12  ;;  %v17998_v46 = vand.u32 4294901760, %v17997_v37 }
 0x130   :  { %17969 = vst [vmem:[#allocation94_spill] sm:$0xff] %v11810_v29  ;;  %17971 = vst [vmem:[#allocation95_spill] sm:$0xff] %v11815_v26  ;;  %v11824_v32 = vsub.f32 %v11763_v24, %v17972_v13  ;;  %v11833_v26 = vld [vmem:[#allocation2 + $0x358] sm:$0xff]  ;;  %v8421_v29 = vpack.c.bf16 %v17977_v34, %v17976_v35  ;;  %v11842_v13 = vsub.f32 %v11775_v9, %v17978_v20  ;;  %v17983_v20 = vand.u32 4294901760, %v11786_v19 }
 0x131   :  { %17975 = vst [vmem:[#allocation97_spill] sm:$0xff] %v11829_v25  ;;  %v11846_v25 = vld [vmem:[#allocation2 + $0x340] sm:$0xff]  ;;  %8416 = vmatpush1.bf16.msra.mxu0 %v11689_v7  ;;  %17980 = vst [vmem:[#allocation99_spill] sm:$0xff] %v11853_v4  ;;  %v11858_v34 = vsub.f32 %v11784_v5, %v17981_v62  ;;  %v1511_v59 = vand.u32 4294901760, %v11818_v40  ;;  %8540 = vmatpush1.bf16.msra.mxu1 %v11777_v42  ;;  %v11872_v7 = vpack.c.bf16 %v1491_v36, %v1487_v55 }
 0x132   :  { %17973 = vst [vmem:[#allocation96_spill] sm:$0xff] %v11824_v32  ;;  %17979 = vst [vmem:[#allocation98_spill] sm:$0xff] %v11842_v13  ;;  %v11863_v35 = vsub.f32 %v11786_v19, %v17983_v20  ;;  %v11866_v32 = vld [vmem:[#allocation2 + $0x378] sm:$0xff]  ;;  %v11868_v13 = vld [vmem:[#allocation2 + $0x360] sm:$0xff]  ;;  %8418 = vmatprep.subr.bf16.mxu0 %v11702_v50  ;;  %v11877_v63 = vsub.f32 %v11799_v31, %v17986_v56  ;;  %v17988_v62 = vand.u32 4294901760, %v11801_v54  ;;  %8542 = vmatprep.subr.bf16.mxu1 %v11805_v6 }
 0x133   :  { %17982 = vst [vmem:[#allocation100_spill] sm:$0xff] %v11858_v34  ;;  %17985 = vst [vmem:[#allocation102_spill] sm:$0xff] %v11872_v7  ;;  %v11887_v50 = vsub.f32 %v11818_v40, %v1511_v59  ;;  %v1513_v55 = vand.u32 4294901760, %v11846_v25  ;;  %v1517_v36 = vand.u32 4294901760, %v11848_v58  ;;  %v1519_v42 = vand.u32 4294901760, %v11850_v27  ;;  %v1413_v56 = vld [vmem:[#allocation2 + $0x370] sm:$0xff] }
 0x134   :  { %17984 = vst [vmem:[#allocation101_spill] sm:$0xff] %v11863_v35  ;;  %17987 = vst [vmem:[#allocation103_spill] sm:$0xff] %v11877_v63  ;;  %v11882_v20 = vsub.f32 %v11801_v54, %v17988_v62  ;;  %v1515_v35 = vand.u32 4294901760, %v11833_v26  ;;  %v17991_v63 = vand.u32 4294901760, %v17785_v2  ;;  %v17992_v34 = vld [vmem:[#allocation54_spill] sm:$0xff]  ;;  %v1523_v6 = vand.u32 4294901760, %v11866_v32 }
 0x135   :  { %17990 = vst [vmem:[#allocation105_spill] sm:$0xff] %v11887_v50  ;;  %v17993_v38 = vand.u32 4294901760, %v17992_v34  ;;  %v1521_v40 = vand.u32 4294901760, %v11868_v13  ;;  %v1416_v50 = vld [vmem:[#allocation2 + $0x388] sm:$0xff]  ;;  %8420 = vmatpush1.bf16.msra.mxu0 %v11718_v0  ;;  %v8425_v48 = vpack.c.bf16 %v17998_v46, %v17996_v10  ;;  %v11907_v2 = vsub.f32 %v11846_v25, %v1513_v55  ;;  %v1415_v34 = vld [vmem:[#allocation2 + $0x380] sm:$0xff]  ;;  %8544 = vmatpush1.bf16.msra.mxu1 %v11853_v4 }
 0x136   :  { %17989 = vst [vmem:[#allocation104_spill] sm:$0xff] %v11882_v20  ;;  %v11897_v20 = vsub.f32 %v11833_v26, %v1515_v35  ;;  %v11913_v26 = vsub.f32 %v11850_v27, %v1519_v42  ;;  %8422 = vmatprep.subr.bf16.mxu0 %v8421_v29  ;;  %v18002_v0 = vand.u32 4294901760, %v11738_v15  ;;  %v18003_v12 = vand.u32 4294901760, %v11749_v52  ;;  %8546 = vmatprep.subr.bf16.mxu1 %v11872_v7 }
 0x137   :  { %v8423_v62 = vpack.c.bf16 %v17993_v38, %v17991_v63  ;;  %17999 = vst [vmem:[#allocation55_spill] sm:$0xff] %v11907_v2  ;;  %v11910_v38 = vsub.f32 %v11848_v58, %v1517_v36  ;;  %v1417_v63 = vld [vmem:[#allocation2 + $0x390] sm:$0xff]  ;;  %v11923_v46 = vsub.f32 %v11866_v32, %v1523_v6  ;;  %v1525_v10 = vand.u32 4294901760, %v1413_v56 }
 0x138   :  { %17994 = vst [vmem:[#allocation54_spill] sm:$0xff] %v11897_v20  ;;  %18001 = vst [vmem:[#allocation106_spill] sm:$0xff] %v11913_v26  ;;  %v11920_v37 = vpack.c.bf16 %v18003_v12, %v18002_v0  ;;  %v11926_v58 = vsub.f32 %v11868_v13, %v1521_v40  ;;  %v18007_v25 = vand.u32 4294901760, %v11751_v30  ;;  %v18008_v29 = vand.u32 4294901760, %v11763_v24  ;;  %v18013_v26 = vld [vmem:[#allocation61_spill] sm:$0xff] }
 0x139   :  { %18000 = vst [vmem:[#allocation56_spill] sm:$0xff] %v11910_v38  ;;  %18005 = vst [vmem:[#allocation108_spill] sm:$0xff] %v11923_v46  ;;  %v1527_v15 = vand.u32 4294901760, %v1416_v50  ;;  %v1531_v4 = vand.u32 4294901760, %v1418_v28  ;;  %v11935_v52 = vsub.f32 %v1413_v56, %v1525_v10  ;;  %v1529_v0 = vand.u32 4294901760, %v1415_v34  ;;  %8424 = vmatpush1.bf16.msra.mxu0 %v8423_v62  ;;  %v18011_v46 = vld [vmem:[#allocation59_spill] sm:$0xff] }
 0x13a   :  { %18004 = vst [vmem:[#allocation107_spill] sm:$0xff] %v11920_v37  ;;  %18006 = vst [vmem:[#allocation109_spill] sm:$0xff] %v11926_v58  ;;  %v11933_v27 = vpack.c.bf16 %v18008_v29, %v18007_v25  ;;  %v1533_v12 = vand.u32 4294901760, %v1417_v63  ;;  %v18010_v32 = vand.u32 4294901760, %v17789_v11  ;;  %v18012_v13 = vand.u32 4294901760, %v18011_v46  ;;  %v18015_v38 = vld [vmem:[#allocation62_spill] sm:$0xff]  ;;  %8426 = vmatprep.subr.bf16.mxu0 %v8425_v48  ;;  %8548 = vmatpush1.bf16.msra.mxu1 %v11920_v37 }
 0x13b   :  { %v18014_v7 = vand.u32 4294901760, %v18013_v26  ;;  %v18016_v30 = vand.u32 4294901760, %v18015_v38  ;;  %v11945_v24 = vsub.f32 %v1416_v50, %v1527_v15  ;;  %v11947_v25 = vsub.f32 %v1418_v28, %v1531_v4 }
 0x13c   :  { %18009 = vst [vmem:[#allocation110_spill] sm:$0xff] %v11933_v27  ;;  %v8427_v58 = vpack.c.bf16 %v18012_v13, %v18010_v32  ;;  %v18017_v56 = vand.u32 4294901760, %v11765_v33  ;;  %v18018_v62 = vand.u32 4294901760, %v11775_v9  ;;  %v11956_v46 = vsub.f32 %v1415_v34, %v1529_v0  ;;  %8550 = vmatprep.subr.bf16.mxu1 %v11933_v27  ;;  %v18026_v33 = vld [vmem:[#allocation65_spill] sm:$0xff] }
 0x13d   :  { %v8429_v2 = vpack.c.bf16 %v18016_v30, %v18014_v7  ;;  %v11958_v29 = vsub.f32 %v1417_v63, %v1533_v12  ;;  %v18022_v7 = vand.u32 4294901760, %v11784_v5  ;;  %v18023_v28 = vand.u32 4294901760, %v11786_v19 }
 0x13e   :  { %v11954_v11 = vpack.c.bf16 %v18018_v62, %v18017_v56  ;;  %18020 = vst [vmem:[#allocation61_spill] sm:$0xff] %v11956_v46  ;;  %8428 = vmatpush1.bf16.msra.mxu0 %v8427_v58  ;;  %v18025_v48 = vand.u32 4294901760, %v17842_v3  ;;  %v18027_v38 = vand.u32 4294901760, %v18026_v33  ;;  %v18028_v26 = vand.u32 4294901760, %v17844_v47 }
 0x13f   :  { %18021 = vst [vmem:[#allocation62_spill] sm:$0xff] %v11958_v29  ;;  %v11965_v50 = vpack.c.bf16 %v18023_v28, %v18022_v7  ;;  %8430 = vmatprep.subr.bf16.mxu0 %v8429_v2  ;;  %v18029_v34 = vand.u32 4294901760, %v10976_v41  ;;  %v18030_v5 = vand.u32 4294901760, %v11799_v31  ;;  %v18031_v19 = vand.u32 4294901760, %v11801_v54  ;;  %v18056_v7 = vld [vmem:[#allocation89_spill] sm:$0xff] }
 0x140   :  { %18019 = vst [vmem:[#allocation59_spill] sm:$0xff] %v11954_v11  ;;  %v8431_v9 = vpack.c.bf16 %v18027_v38, %v18025_v48  ;;  %8552 = vmatpush1.bf16.msra.mxu1 %v11954_v11  ;;  %v11983_v3 = vpack.c.bf16 %v1515_v35, %v1511_v59  ;;  %v18034_v2 = vand.u32 4294901760, %v17847_v43  ;;  %v18035_v47 = vand.u32 4294901760, %v17846_v21  ;;  %v18058_v48 = vld [vmem:[#allocation48_spill] sm:$0xff] }
 0x141   :  { %18024 = vst [vmem:[#allocation111_spill] sm:$0xff] %v11965_v50  ;;  %v8433_v63 = vpack.c.bf16 %v18029_v34, %v18028_v26  ;;  %v11980_v32 = vpack.c.bf16 %v18031_v19, %v18030_v5  ;;  %8554 = vmatprep.subr.bf16.mxu1 %v11965_v50  ;;  %v18036_v41 = vand.u32 4294901760, %v17850_v22  ;;  %v18037_v13 = vand.u32 4294901760, %v17849_v57  ;;  %v18064_v26 = vld [vmem:[#allocation8_spill] sm:$0xff]  ;;  %v18067_v5 = vld [vmem:[#allocation9_spill] sm:$0xff]  ;;  %v18068_v19 = vld [vmem:[#allocation10_spill] sm:$0xff] }
 0x142   :  { %18033 = vst [vmem:[#allocation112_spill] sm:$0xff] %v11983_v3  ;;  %8432 = vmatpush1.bf16.msra.mxu0 %v8431_v9  ;;  %v8435_v58 = vpack.c.bf16 %v18035_v47, %v18034_v2  ;;  %v11994_v54 = vpack.c.bf16 %v1517_v36, %v1513_v55  ;;  %v11997_v59 = vpack.c.bf16 %v1523_v6, %v1519_v42  ;;  %v18040_v43 = vand.u32 4294901760, %v17852_v61  ;;  %v18047_v6 = vld [vmem:[#allocation81_spill] sm:$0xff]  ;;  %v18069_v2 = vld [vmem:[#allocation11_spill] sm:$0xff]  ;;  %v18070_v47 = vld [vmem:[#allocation12_spill] sm:$0xff] }
 0x143   :  { %18032 = vst [vmem:[#allocation65_spill] sm:$0xff] %v11980_v32  ;;  %8434 = vmatprep.subr.bf16.mxu0 %v8433_v63  ;;  %v8437_v31 = vpack.c.bf16 %v18037_v13, %v18036_v41  ;;  %v18041_v21 = vand.u32 4294901760, %v11000_v44  ;;  %v18042_v22 = vand.u32 4294901760, %v17855_v16  ;;  %v18043_v57 = vand.u32 4294901760, %v17854_v39  ;;  %v18072_v41 = vld [vmem:[#allocation14_spill] sm:$0xff]  ;;  %v18073_v13 = vld [vmem:[#allocation16_spill] sm:$0xff] }
 0x144   :  { %8556 = vmatpush1.bf16.msra.mxu1 %v11980_v32  ;;  %18038 = vst [vmem:[#allocation113_spill] sm:$0xff] %v11994_v54  ;;  %18039 = vst [vmem:[#allocation114_spill] sm:$0xff] %v11997_v59  ;;  %v12008_v55 = vpack.c.bf16 %v1525_v10, %v1521_v40  ;;  %v12011_v42 = vpack.c.bf16 %v1531_v4, %v1527_v15  ;;  %v18046_v61 = vand.u32 4294901760, %v17775_v51  ;;  %v18048_v44 = vand.u32 4294901760, %v18047_v6  ;;  %v18052_v4 = vld [vmem:[#allocation87_spill] sm:$0xff]  ;;  %v18054_v15 = vld [vmem:[#allocation88_spill] sm:$0xff] }
 0x145   :  { %8558 = vmatprep.subr.bf16.mxu1 %v11983_v3  ;;  %v8439_v35 = vpack.c.bf16 %v18041_v21, %v18040_v43  ;;  %v8441_v30 = vpack.c.bf16 %v18043_v57, %v18042_v22  ;;  %v18049_v16 = vand.u32 4294901760, %v17794_v23  ;;  %v18050_v39 = vand.u32 4294901760, %v17795_v1  ;;  %v18060_v1 = vld [vmem:[#allocation91_spill] sm:$0xff]  ;;  %v18075_v43 = vld [vmem:[#allocation18_spill] sm:$0xff]  ;;  %v18080_v57 = vld [vmem:[#allocation32_spill] sm:$0xff] }
 0x146   :  { %8436 = vmatpush1.bf16.msra.mxu0 %v8435_v58  ;;  %18044 = vst [vmem:[#allocation115_spill] sm:$0xff] %v12008_v55  ;;  %18045 = vst [vmem:[#allocation116_spill] sm:$0xff] %v12011_v42  ;;  %v8443_v36 = vpack.c.bf16 %v18048_v44, %v18046_v61  ;;  %v12022_v40 = vpack.c.bf16 %v1533_v12, %v1529_v0  ;;  %v18053_v10 = vand.u32 4294901760, %v18052_v4  ;;  %v18055_v51 = vand.u32 4294901760, %v18054_v15  ;;  %v18062_v12 = vld [vmem:[#allocation50_spill] sm:$0xff]  ;;  %v18071_v58 = vld [vmem:[#allocation13_spill] sm:$0xff] }
 0x147   :  { %8438 = vmatprep.subr.bf16.mxu0 %v8437_v31  ;;  %v8445_v56 = vpack.c.bf16 %v18050_v39, %v18049_v16  ;;  %v18057_v28 = vand.u32 4294901760, %v18056_v7  ;;  %v18059_v23 = vand.u32 4294901760, %v18058_v48  ;;  %v18061_v0 = vand.u32 4294901760, %v18060_v1  ;;  %v18074_v31 = vld [vmem:[#allocation17_spill] sm:$0xff]  ;;  %v18076_v21 = vld [vmem:[#allocation19_spill] sm:$0xff]  ;;  %v18086_v16 = vld [vmem:[#allocation60_spill] sm:$0xff] }
 0x148   :  { %8560 = vmatpush1.bf16.msra.mxu1 %v11994_v54  ;;  %18051 = vst [vmem:[#allocation81_spill] sm:$0xff] %v12022_v40  ;;  %v8447_v62 = vpack.c.bf16 %v18055_v51, %v18053_v10  ;;  %v18063_v38 = vand.u32 4294901760, %v18062_v12  ;;  %v18065_v34 = vmov 1.0   ;;  %v18079_v22 = vld [vmem:[#allocation31_spill] sm:$0xff]  ;;  %v18083_v6 = vld [vmem:[#allocation49_spill] sm:$0xff]  ;;  %v18089_v4 = vld [vmem:[#allocation68_spill] sm:$0xff] }
 0x149   :  { %8562 = vmatprep.subr.bf16.mxu1 %v11997_v59  ;;  %v8449_v33 = vpack.c.bf16 %v18059_v23, %v18057_v28  ;;  %v18082_v61 = vld [vmem:[#allocation39_spill] sm:$0xff]  ;;  %v18091_v15 = vld [vmem:[#allocation74_spill] sm:$0xff]  ;;  %v18092_v51 = vld [vmem:[#allocation76_spill] sm:$0xff] }
 0x14a   :  { %8440 = vmatpush1.bf16.msra.mxu0 %v8439_v35  ;;  %v8451_v9 = vpack.c.bf16 %v18063_v38, %v18061_v0  ;;  %v18077_v35 = vld [vmem:[#allocation21_spill] sm:$0xff]  ;;  %v18084_v44 = vld [vmem:[#allocation51_spill] sm:$0xff]  ;;  %v18094_v7 = vld [vmem:[#allocation82_spill] sm:$0xff] }
 0x14b   :  { %8442 = vmatprep.subr.bf16.mxu0 %v8441_v30  ;;  %v18081_v30 = vld [vmem:[#allocation37_spill] sm:$0xff]  ;;  %v18087_v39 = vld [vmem:[#allocation63_spill] sm:$0xff]  ;;  %v18096_v48 = vld [vmem:[#allocation86_spill] sm:$0xff] }
 0x14c   :  { %8564 = vmatpush1.bf16.msra.mxu1 %v12008_v55  ;;  %v18090_v10 = vld [vmem:[#allocation71_spill] sm:$0xff]  ;;  %v18095_v28 = vld [vmem:[#allocation85_spill] sm:$0xff]  ;;  %v18128_v54 = vld [vmem:[#allocation34_spill] sm:$0xff] }
 0x14d   :  { %8566 = vmatprep.subr.bf16.mxu1 %v12011_v42  ;;  %v1420_v23 = vld [vmem:[#allocation2 + $0x3a8] sm:$0xff]  ;;  %v1419_v12 = vld [vmem:[#allocation2 + $0x3a0] sm:$0xff]  ;;  %v1421_v38 = vld [vmem:[#allocation2 + $0x3b0] sm:$0xff] }
 0x14e   :  { %8444 = vmatpush1.bf16.msra.mxu0 %v8443_v36  ;;  %v18085_v36 = vld [vmem:[#allocation57_spill] sm:$0xff]  ;;  %v1535_v1 = vand.u32 4294901760, %v1420_v23  ;;  %v1423_v63 = vld [vmem:[#allocation2 + $0x3c0] sm:$0xff]  ;;  %v18129_v32 = vld [vmem:[#allocation38_spill] sm:$0xff] }
 0x14f   :  { %8446 = vmatprep.subr.bf16.mxu0 %v8445_v56  ;;  %v18088_v56 = vld [vmem:[#allocation66_spill] sm:$0xff] }
 0x150   :  { %8568 = vmatpush1.bf16.msra.mxu1 %v12022_v40  ;;  %v18134_v40 = vld [vmem:[#allocation43_spill] sm:$0xff] }
 0x151   :  { %v16736_v37 = vand.u32 4294901760, %v18134_v40 }
 0x152   :  { %8448 = vmatpush1.bf16.msra.mxu0 %v8447_v62  ;;  %v18093_v62 = vld [vmem:[#allocation79_spill] sm:$0xff] }
 0x153   :  { %8450 = vmatprep.subr.bf16.mxu0 %v8449_v33  ;;  %v1422_v33 = vld [vmem:[#allocation2 + $0x3b8] sm:$0xff] }
 0x154   :  { %v1539_v0 = vand.u32 4294901760, %v1422_v33 }
 0x156   :  { %8452 = vmatpush1.bf16.msra.mxu0 %v8451_v9  ;;  %v1537_v9 = vand.u32 4294901760, %v1419_v12 }
 0x157   :  { %8454 = vmatprep.subr.bf16.mxu0 %v18064_v26  ;;  %v1541_v26 = vand.u32 4294901760, %v1421_v38 }
 0x159   :  { %8131 = vmatmul.mubr.msk.f32.vlgmr.msra.gmra.mrb[0].mxu0 %vm26_vm0, %v18065_v34 }
 0x15a   :  { %8456 = vmatpush1.bf16.msra.mxu0 %v18067_v5  ;;  %1359 = vmatprep.mubr.f32.mxu0 %v17808_v18  ;;  %v18078_v18 = vld [vmem:[#allocation22_spill] sm:$0xff]  ;;  %v12077_v5 = vpack.c.bf16 %v1539_v0, %v1535_v1 }
 0x15b   :  { %8458 = vmatprep.subr.bf16.mxu0 %v18068_v19  ;;  %v12079_v19 = vpack.c.bf16 %v1541_v26, %v1537_v9 }
 0x15c   :  { %18097 = vst [vmem:[#allocation87_spill] sm:$0xff] %v12077_v5  ;;  %8570 = vmatprep.subr.bf16.mxu1 %v12077_v5 }
 0x15d   :  { %18098 = vst [vmem:[#allocation88_spill] sm:$0xff] %v12079_v19  ;;  %8572 = vmatpush1.bf16.msra.mxu1 %v12079_v19 }
 0x15e   :  { %8460 = vmatpush1.bf16.msra.mxu0 %v18069_v2  ;;  %v1424_v2 = vld [vmem:[#allocation2 + $0x3c8] sm:$0xff] }
 0x15f   :  { %8462 = vmatprep.subr.bf16.mxu0 %v18070_v47  ;;  %v1426_v47 = vld [vmem:[#allocation2 + $0x3d8] sm:$0xff] }
 0x162   :  { %8464 = vmatpush1.bf16.msra.mxu0 %v18071_v58  ;;  %v1547_v58 = vand.u32 4294901760, %v1426_v47 }
 0x163   :  { %8466 = vmatprep.subr.bf16.mxu0 %v18072_v41  ;;  %v1545_v41 = vand.u32 4294901760, %v1423_v63 }
 0x166   :  { %8468 = vmatpush1.bf16.msra.mxu0 %v18073_v13 }
 0x167   :  { %8470 = vmatprep.subr.bf16.mxu0 %v18074_v31 }
 0x16a   :  { %8472 = vmatpush1.bf16.msra.mxu0 %v18075_v43 }
 0x16b   :  { %8474 = vmatprep.subr.bf16.mxu0 %v18076_v21  ;;  %v1428_v21 = vld [vmem:[#allocation2 + $0x3e8] sm:$0xff] }
 0x16e   :  { %8476 = vmatpush1.bf16.msra.mxu0 %v18077_v35  ;;  %v1430_v35 = vld [vmem:[#allocation2 + $0x3f8] sm:$0xff] }
 0x16f   :  { %8478 = vmatprep.subr.bf16.mxu0 %v18078_v18  ;;  %v1551_v18 = vand.u32 4294901760, %v1428_v21 }
 0x172   :  { %8480 = vmatpush1.bf16.msra.mxu0 %v18079_v22  ;;  %v1555_v22 = vand.u32 4294901760, %v1430_v35 }
 0x173   :  { %8482 = vmatprep.subr.bf16.mxu0 %v18080_v57  ;;  %v1427_v57 = vld [vmem:[#allocation2 + $0x3e0] sm:$0xff] }
 0x176   :  { %8484 = vmatpush1.bf16.msra.mxu0 %v18081_v30  ;;  %v18101_v30 = vld [vmem:[#allocation24_spill] sm:$0xff] }
 0x177   :  { %8486 = vmatprep.subr.bf16.mxu0 %v18082_v61  ;;  %v16690_v61 = vand.u32 4294901760, %v18101_v30 }
 0x17a   :  { %8488 = vmatpush1.bf16.msra.mxu0 %v18083_v6  ;;  %v18102_v6 = vld [vmem:[#allocation25_spill] sm:$0xff] }
 0x17b   :  { %8490 = vmatprep.subr.bf16.mxu0 %v18084_v44  ;;  %v16689_v44 = vand.u32 4294901760, %v18102_v6 }
 0x17e   :  { %8492 = vmatpush1.bf16.msra.mxu0 %v18085_v36  ;;  %v12090_v36 = vsub.f32 %v1420_v23, %v1535_v1  ;;  %v1553_v23 = vand.u32 4294901760, %v1427_v57  ;;  %v1579_v1 = vsub.f32 %v18101_v30, %v16690_v61 }
 0x17f   :  { %8494 = vmatprep.subr.bf16.mxu0 %v18086_v16  ;;  %v12092_v16 = vsub.f32 %v1422_v33, %v1539_v0  ;;  %v1591_v0 = vsub.f32 %v18102_v6, %v16689_v44 }
 0x180   :  { %18103 = vst [vmem:[#allocation91_spill] sm:$0xff] %v12090_v36 }
 0x182   :  { %8496 = vmatpush1.bf16.msra.mxu0 %v18087_v39  ;;  %v12094_v39 = vsub.f32 %v1419_v12, %v1537_v9  ;;  %v12120_v12 = vsub.f32 %v1427_v57, %v1553_v23 }
 0x183   :  { %8498 = vmatprep.subr.bf16.mxu0 %v18088_v56  ;;  %v12096_v56 = vsub.f32 %v1421_v38, %v1541_v26  ;;  %v1580_v26 = vand.u32 4294901760, %v1579_v1 }
 0x184   :  { %18109 = vst [vmem:[#allocation11_spill] sm:$0xff] %v12120_v12 }
 0x185   :  { %18104 = vst [vmem:[#allocation50_spill] sm:$0xff] %v12096_v56 }
 0x186   :  { %8500 = vmatpush1.bf16.msra.mxu0 %v18089_v4  ;;  %v1429_v4 = vld [vmem:[#allocation2 + $0x3f0] sm:$0xff] }
 0x187   :  { %8502 = vmatprep.subr.bf16.mxu0 %v18090_v10  ;;  %v1557_v33 = vand.u32 4294901760, %v1429_v4 }
 0x189   :  { %v12122_v38 = vpack.c.bf16 %v1557_v33, %v1553_v23  ;;  %v12124_v9 = vsub.f32 %v1429_v4, %v1557_v33 }
 0x18a   :  { %8504 = vmatpush1.bf16.msra.mxu0 %v18091_v15  ;;  %v12101_v15 = vsub.f32 %v1426_v47, %v1547_v58 }
 0x18b   :  { %8506 = vmatprep.subr.bf16.mxu0 %v18092_v51  ;;  %v12103_v51 = vsub.f32 %v1423_v63, %v1545_v41  ;;  %18110 = vst [vmem:[#allocation12_spill] sm:$0xff] %v12122_v38  ;;  %18111 = vst [vmem:[#allocation13_spill] sm:$0xff] %v12124_v9  ;;  %v18113_v63 = vld [vmem:[#allocation28_spill] sm:$0xff] }
 0x18e   :  { %8508 = vmatpush1.bf16.msra.mxu0 %v18093_v62 }
 0x18f   :  { %8510 = vmatprep.subr.bf16.mxu0 %v18094_v7  ;;  %v12107_v7 = vpack.c.bf16 %v1555_v22, %v1551_v18 }
 0x191   :  { %18106 = vst [vmem:[#allocation15_spill] sm:$0xff] %v12107_v7 }
 0x192   :  { %8512 = vmatpush1.bf16.msra.mxu0 %v18095_v28  ;;  %v12109_v28 = vsub.f32 %v1428_v21, %v1551_v18  ;;  %v18115_v21 = vld [vmem:[#allocation47_spill] sm:$0xff] }
 0x193   :  { %8514 = vmatprep.subr.bf16.mxu0 %v18096_v48  ;;  %v12111_v48 = vsub.f32 %v1430_v35, %v1555_v22  ;;  %v16691_v35 = vand.u32 4294901760, %v18115_v21 }
 0x194   :  { %18107 = vst [vmem:[#allocation9_spill] sm:$0xff] %v12109_v28 }
 0x195   :  { %18108 = vst [vmem:[#allocation10_spill] sm:$0xff] %v12111_v48  ;;  %v1615_v23 = vsub.f32 %v18115_v21, %v16691_v35 }
 0x196   :  { %8516 = vmatpush1.bf16.msra.mxu0 %v17896_v14  ;;  %v1543_v14 = vand.u32 4294901760, %v1424_v2 }
 0x198   :  { %v12083_v31 = vpack.c.bf16 %v1547_v58, %v1543_v14  ;;  %v12099_v10 = vsub.f32 %v1424_v2, %v1543_v14  ;;  %v1592_v2 = vand.u32 4294901760, %v1591_v0  ;;  %v18112_v14 = vld [vmem:[#allocation26_spill] sm:$0xff]  ;;  %v18124_v0 = vand.u32 4294901760, %v11658_v49 }
 0x199   :  { %8132 = vmatmul.mubr.msk.f32.vlgmr.msra.gmra.mrb[0].mxu0 %vm26_vm0, %v18065_v34  ;;  %v1425_v34 = vld [vmem:[#allocation2 + $0x3d0] sm:$0xff]  ;;  %v16687_v58 = vand.u32 4294901760, %v18112_v14 }
 0x19a   :  { %v1549_v13 = vand.u32 4294901760, %v1425_v34  ;;  %18099 = vst [vmem:[#allocation89_spill] sm:$0xff] %v12083_v31  ;;  %8574 = vmatprep.subr.bf16.mxu1 %v12083_v31  ;;  %v8581_v47 = vpack.c.bf16 %v1592_v2, %v1580_v26  ;;  %v18121_v31 = vand.u32 4294901760, %v11648_v17  ;;  %v1639_v19 = vsub.f32 %v11658_v49, %v18124_v0 }
 0x19b   :  { %v1585_v18 = vsub.f32 %v18112_v14, %v16687_v58 }
 0x19c   :  { %v12085_v43 = vpack.c.bf16 %v1549_v13, %v1545_v41  ;;  %v12105_v62 = vsub.f32 %v1425_v34, %v1549_v13  ;;  %v16686_v34 = vand.u32 4294901760, %v18113_v63  ;;  %v18114_v41 = vld [vmem:[#allocation41_spill] sm:$0xff]  ;;  %v1640_v11 = vand.u32 4294901760, %v1639_v19 }
 0x19d   :  { %v16688_v13 = vand.u32 4294901760, %v18114_v41 }
 0x19e   :  { %18100 = vst [vmem:[#allocation48_spill] sm:$0xff] %v12085_v43  ;;  %8576 = vmatpush1.bf16.msra.mxu1 %v12085_v43  ;;  %18105 = vst [vmem:[#allocation8_spill] sm:$0xff] %v12105_v62  ;;  %v1597_v22 = vsub.f32 %v18113_v63, %v16686_v34  ;;  %v1586_v34 = vand.u32 4294901760, %v1585_v18  ;;  %v18120_v43 = vld [vmem:[#allocation84_spill] sm:$0xff]  ;;  %v1609_v18 = vsub.f32 %v11648_v17, %v18121_v31  ;;  %v18125_v31 = vld [vmem:[#allocation29_spill] sm:$0xff] }
 0x19f   :  { %8578 = vmatprep.subr.bf16.mxu1 %v12107_v7  ;;  %v1603_v57 = vsub.f32 %v18114_v41, %v16688_v13  ;;  %v18119_v7 = vld [vmem:[#allocation83_spill] sm:$0xff] }
 0x1a0   :  { %v1598_v58 = vand.u32 4294901760, %v1597_v22  ;;  %v18122_v22 = vand.u32 4294901760, %v11650_v60  ;;  %v18126_v42 = vand.u32 4294901760, %v18119_v7  ;;  %v1610_v55 = vand.u32 4294901760, %v1609_v18 }
 0x1a1   :  { %v1604_v44 = vand.u32 4294901760, %v1603_v57 }
 0x1a2   :  { %8580 = vmatpush1.bf16.msra.mxu1 %v12122_v38  ;;  %v1616_v38 = vand.u32 4294901760, %v1615_v23  ;;  %v1621_v57 = vsub.f32 %v11650_v60, %v18122_v22  ;;  %v8583_v61 = vpack.c.bf16 %v1598_v58, %v1586_v34  ;;  %v1633_v58 = vsub.f32 %v18119_v7, %v18126_v42 }
 0x1a3   :  { %8582 = vmatprep.subr.bf16.mxu1 %v8581_v47  ;;  %v18127_v34 = vand.u32 4294901760, %v18120_v43  ;;  %v18131_v42 = vand.u32 4294901760, %v18125_v31 }
 0x1a4   :  { %v1622_v59 = vand.u32 4294901760, %v1621_v57  ;;  %v1634_v57 = vand.u32 4294901760, %v1633_v58  ;;  %v18139_v58 = vand.u32 4294901760, %v18129_v32 }
 0x1a5   :  { %v1651_v27 = vsub.f32 %v18125_v31, %v18131_v42  ;;  %v18137_v42 = vld [vmem:[#allocation46_spill] sm:$0xff] }
 0x1a6   :  { %v8587_v50 = vpack.c.bf16 %v1622_v59, %v1610_v55 }
 0x26c   :  { %v1361_v4 = vpop.f32.mrb[0].mxu0 }
 0x26d   :  { %v12143_v33 = vand.u32 4294901760, %v1361_v4  ;;  %v1363_v1 = vpop.f32.mrb[1].mxu0 }
 0x26e   :  { %v12148_v47 = vand.u32 4294901760, %v1363_v1 }
 0x26f   :  { %18116 = vst [vmem:[#allocation14_spill] sm:$0xff] %v12143_v33  ;;  %v12151_v13 = vsub.f32 %v1361_v4, %v12143_v33  ;;  %v18123_v4 = vand.u32 4294901760, %v11652_v45 }
 0x270   :  { %18117 = vst [vmem:[#allocation16_spill] sm:$0xff] %v12148_v47  ;;  %v12155_v35 = vsub.f32 %v1363_v1, %v12148_v47 }
 0x271   :  { %18118 = vst [vmem:[#allocation17_spill] sm:$0xff] %v12151_v13  ;;  %v16708_v2 = vand.u32 4294901760, %v12151_v13  ;;  %v1627_v1 = vsub.f32 %v11652_v45, %v18123_v4  ;;  %v8585_v4 = vpack.c.bf16 %v1616_v38, %v1604_v44  ;;  %v18136_v44 = vld [vmem:[#allocation44_spill] sm:$0xff] }
 0x272   :  { %v16721_v23 = vand.u32 4294901760, %v12155_v35 }
 0x273   :  { %v1568_v26 = vsub.f32 %v12151_v13, %v16708_v2  ;;  %v1645_v2 = vsub.f32 %v18120_v43, %v18127_v34  ;;  %v1628_v0 = vand.u32 4294901760, %v1627_v1  ;;  %v18132_v34 = vand.u32 4294901760, %v11675_v8 }
 0x274   :  { %v1562_v22 = vsub.f32 %v12155_v35, %v16721_v23  ;;  %v18130_v23 = vld [vmem:[#allocation36_spill] sm:$0xff] }
 0x275   :  { %v1569_v38 = vand.u32 4294901760, %v1568_v26  ;;  %v1663_v18 = vsub.f32 %v11675_v8, %v18132_v34  ;;  %v1646_v1 = vand.u32 4294901760, %v1645_v2  ;;  %v18135_v26 = vand.u32 4294901760, %v18128_v54 }
 0x276   :  { %v1563_v3 = vand.u32 4294901760, %v1562_v22  ;;  %v18133_v22 = vld [vmem:[#allocation40_spill] sm:$0xff]  ;;  %v18140_v59 = vand.u32 4294901760, %v18130_v23  ;;  %v8589_v34 = vpack.c.bf16 %v1640_v11, %v1628_v0  ;;  %v18144_v0 = vld [vmem:[#allocation67_spill] sm:$0xff] }
 0x277   :  { %v16734_v5 = vand.u32 4294901760, %v18133_v22  ;;  %v1657_v19 = vsub.f32 %v18128_v54, %v18135_v26  ;;  %v1652_v26 = vand.u32 4294901760, %v1651_v27  ;;  %v1664_v13 = vand.u32 4294901760, %v1663_v18  ;;  %v18143_v11 = vld [vmem:[#allocation64_spill] sm:$0xff] }
 0x278   :  { %1564 = vmatprep.mubr.f32.mxu1 %v1563_v3  ;;  %v18138_v3 = vand.u32 4294901760, %v11691_v53  ;;  %v1687_v55 = vsub.f32 %v18130_v23, %v18140_v59  ;;  %v8591_v31 = vpack.c.bf16 %v1646_v1, %v1634_v57  ;;  %v16749_v18 = vand.u32 4294901760, %v18144_v0  ;;  %v18146_v23 = vld [vmem:[#allocation73_spill] sm:$0xff]  ;;  %v18147_v54 = vld [vmem:[#allocation72_spill] sm:$0xff] }
 0x279   :  { %1570 = vmatmul.mubr.f32.vlgmr.msra.gmra.mrb[0].mxu1 %v1569_v38  ;;  %v1675_v38 = vsub.f32 %v18129_v32, %v18139_v58  ;;  %v18142_v32 = vand.u32 4294901760, %v18137_v42  ;;  %v1658_v57 = vand.u32 4294901760, %v1657_v19  ;;  %v16752_v8 = vand.u32 4294901760, %v18147_v54 }
 0x27a   :  { %8584 = vmatpush1.bf16.msra.mxu1 %v8583_v61  ;;  %1961 = vmatprep.mubr.f32.mxu1 %v12148_v47  ;;  %v1669_v2 = vsub.f32 %v11691_v53, %v18138_v3  ;;  %v1681_v61 = vsub.f32 %v18133_v22, %v16734_v5  ;;  %v1693_v3 = vsub.f32 %v18134_v40, %v16736_v37  ;;  %v18141_v47 = vand.u32 4294901760, %v18136_v44  ;;  %v18145_v37 = vld [vmem:[#allocation70_spill] sm:$0xff] }
 0x27b   :  { %8586 = vmatprep.subr.bf16.mxu1 %v8585_v4  ;;  %v1711_v4 = vsub.f32 %v18137_v42, %v18142_v32  ;;  %v1676_v59 = vand.u32 4294901760, %v1675_v38  ;;  %v1688_v5 = vand.u32 4294901760, %v1687_v55  ;;  %v8593_v22 = vpack.c.bf16 %v1664_v13, %v1652_v26  ;;  %v18148_v32 = vld [vmem:[#allocation78_spill] sm:$0xff]  ;;  %v18150_v26 = vld [vmem:[#allocation20_spill] sm:$0xff] }
 0x27c   :  { %v1699_v58 = vsub.f32 %v18136_v44, %v18141_v47  ;;  %v1670_v1 = vand.u32 4294901760, %v1669_v2  ;;  %v16748_v40 = vand.u32 4294901760, %v18145_v37  ;;  %v16747_v53 = vand.u32 4294901760, %v18146_v23 }
 0x27d   :  { %v1682_v47 = vand.u32 4294901760, %v1681_v61  ;;  %v1694_v44 = vand.u32 4294901760, %v1693_v3  ;;  %v16754_v42 = vand.u32 4294901760, %v18148_v32  ;;  %v1712_v43 = vand.u32 4294901760, %v1711_v4  ;;  %v18151_v3 = vld [vmem:[#allocation90_spill] sm:$0xff] }
 0x27e   :  { %8588 = vmatpush1.bf16.msra.mxu1 %v8587_v50  ;;  %v1700_v27 = vand.u32 4294901760, %v1699_v58  ;;  %v18149_v50 = vand.u32 4294901760, %v18143_v11  ;;  %v1717_v13 = vsub.f32 %v18144_v0, %v16749_v18  ;;  %v8595_v2 = vpack.c.bf16 %v1670_v1, %v1658_v57  ;;  %v18154_v18 = vld [vmem:[#allocation95_spill] sm:$0xff]  ;;  %v18155_v58 = vld [vmem:[#allocation96_spill] sm:$0xff] }
 0x27f   :  { %8590 = vmatprep.subr.bf16.mxu1 %v8589_v34  ;;  %v8597_v38 = vpack.c.bf16 %v1688_v5, %v1676_v59  ;;  %v1723_v55 = vsub.f32 %v18145_v37, %v16748_v40  ;;  %v1735_v34 = vsub.f32 %v18146_v23, %v16747_v53  ;;  %v1729_v4 = vsub.f32 %v18147_v54, %v16752_v8  ;;  %v18152_v59 = vld [vmem:[#allocation92_spill] sm:$0xff]  ;;  %v18153_v53 = vld [vmem:[#allocation94_spill] sm:$0xff] }
 0x280   :  { %v1705_v19 = vsub.f32 %v18143_v11, %v18149_v50  ;;  %v1741_v5 = vsub.f32 %v18148_v32, %v16754_v42  ;;  %v1718_v1 = vand.u32 4294901760, %v1717_v13  ;;  %v18156_v54 = vand.u32 4294901760, %v18150_v26  ;;  %v18160_v50 = vld [vmem:[#allocation100_spill] sm:$0xff] }
 0x281   :  { %v1724_v37 = vand.u32 4294901760, %v1723_v55  ;;  %v1736_v8 = vand.u32 4294901760, %v1735_v34  ;;  %v18162_v34 = vand.u32 4294901760, %v18152_v59  ;;  %v18165_v40 = vand.u32 4294901760, %v18155_v58 }
 0x282   :  { %8592 = vmatpush1.bf16.msra.mxu1 %v8591_v31  ;;  %v8599_v31 = vpack.c.bf16 %v1694_v44, %v1682_v47  ;;  %v1706_v57 = vand.u32 4294901760, %v1705_v19  ;;  %v1747_v42 = vsub.f32 %v18150_v26, %v18156_v54  ;;  %v1742_v47 = vand.u32 4294901760, %v1741_v5  ;;  %v18158_v19 = vld [vmem:[#allocation97_spill] sm:$0xff] }
 0x283   :  { %8594 = vmatprep.subr.bf16.mxu1 %v8593_v22  ;;  %v8601_v22 = vpack.c.bf16 %v1712_v43, %v1700_v27  ;;  %v18157_v43 = vand.u32 4294901760, %v18151_v3  ;;  %v1730_v27 = vand.u32 4294901760, %v1729_v4  ;;  %v16759_v13 = vand.u32 4294901760, %v18158_v19 }
 0x284   :  { %v8603_v61 = vpack.c.bf16 %v1718_v1, %v1706_v57  ;;  %v1753_v54 = vsub.f32 %v18152_v59, %v18162_v34  ;;  %v18163_v26 = vand.u32 4294901760, %v18153_v53  ;;  %v18164_v4 = vand.u32 4294901760, %v18154_v18 }
 0x285   :  { %v1759_v44 = vsub.f32 %v18151_v3, %v18157_v43  ;;  %v1783_v57 = vsub.f32 %v18155_v58, %v18165_v40  ;;  %v8605_v1 = vpack.c.bf16 %v1736_v8, %v1724_v37  ;;  %v1748_v55 = vand.u32 4294901760, %v1747_v42  ;;  %v18169_v8 = vld [vmem:[#allocation103_spill] sm:$0xff]  ;;  %v18170_v42 = vld [vmem:[#allocation104_spill] sm:$0xff] }
 0x286   :  { %8596 = vmatpush1.bf16.msra.mxu1 %v8595_v2  ;;  %v18159_v2 = vld [vmem:[#allocation98_spill] sm:$0xff]  ;;  %v1765_v43 = vsub.f32 %v18153_v53, %v18163_v26  ;;  %v1771_v5 = vsub.f32 %v18154_v18, %v18164_v4  ;;  %v8607_v23 = vpack.c.bf16 %v1742_v47, %v1730_v27  ;;  %v1777_v34 = vsub.f32 %v18158_v19, %v16759_v13  ;;  %v18172_v3 = vld [vmem:[#allocation55_spill] sm:$0xff] }
 0x287   :  { %8598 = vmatprep.subr.bf16.mxu1 %v8597_v38  ;;  %v18161_v38 = vld [vmem:[#allocation101_spill] sm:$0xff]  ;;  %v18166_v59 = vand.u32 4294901760, %v18159_v2  ;;  %v18167_v53 = vand.u32 4294901760, %v18160_v50  ;;  %v1784_v13 = vand.u32 4294901760, %v1783_v57  ;;  %v16768_v58 = vand.u32 4294901760, %v11897_v20 }
 0x288   :  { %v18168_v18 = vand.u32 4294901760, %v18161_v38  ;;  %v1766_v27 = vand.u32 4294901760, %v1765_v43  ;;  %v1772_v47 = vand.u32 4294901760, %v1771_v5  ;;  %v16771_v32 = vand.u32 4294901760, %v18172_v3 }
 0x289   :  { %v1789_v26 = vsub.f32 %v18159_v2, %v18166_v59  ;;  %v1795_v4 = vsub.f32 %v18160_v50, %v18167_v53  ;;  %v18171_v59 = vld [vmem:[#allocation105_spill] sm:$0xff]  ;;  %v1778_v53 = vand.u32 4294901760, %v1777_v34 }
 0x28a   :  { %8600 = vmatpush1.bf16.msra.mxu1 %v8599_v31  ;;  %v1760_v31 = vand.u32 4294901760, %v1759_v44  ;;  %v1807_v40 = vsub.f32 %v18161_v38, %v18168_v18  ;;  %v1754_v44 = vand.u32 4294901760, %v1753_v54  ;;  %v16769_v2 = vand.u32 4294901760, %v18171_v59  ;;  %v18173_v18 = vld [vmem:[#allocation56_spill] sm:$0xff] }
 0x28b   :  { %8602 = vmatprep.subr.bf16.mxu1 %v8601_v22  ;;  %v16770_v22 = vand.u32 4294901760, %v18170_v42  ;;  %v1790_v50 = vand.u32 4294901760, %v1789_v26  ;;  %v16772_v38 = vand.u32 4294901760, %v18173_v18  ;;  %v1796_v37 = vand.u32 4294901760, %v1795_v4  ;;  %v18176_v26 = vld [vmem:[#allocation108_spill] sm:$0xff] }
 0x28c   :  { %v8609_v19 = vpack.c.bf16 %v1760_v31, %v1748_v55  ;;  %v1808_v0 = vand.u32 4294901760, %v1807_v40  ;;  %v8611_v43 = vpack.c.bf16 %v1766_v27, %v1754_v44  ;;  %v8613_v5 = vpack.c.bf16 %v1784_v13, %v1772_v47  ;;  %v18175_v31 = vld [vmem:[#allocation106_spill] sm:$0xff]  ;;  %v18177_v47 = vld [vmem:[#allocation109_spill] sm:$0xff] }
 0x28d   :  { %v1813_v55 = vsub.f32 %v18170_v42, %v16770_v22  ;;  %v1819_v57 = vsub.f32 %v18171_v59, %v16769_v2  ;;  %v16773_v34 = vand.u32 4294901760, %v18175_v31  ;;  %v1825_v40 = vsub.f32 %v18172_v3, %v16771_v32 }
 0x28e   :  { %8604 = vmatpush1.bf16.msra.mxu1 %v8603_v61  ;;  %v18174_v61 = vand.u32 4294901760, %v18169_v8  ;;  %v8617_v13 = vpack.c.bf16 %v1808_v0, %v1796_v37  ;;  %v16776_v2 = vand.u32 4294901760, %v11945_v24  ;;  %v18178_v0 = vand.u32 4294901760, %v18176_v26 }
 0x28f   :  { %8606 = vmatprep.subr.bf16.mxu1 %v8605_v1  ;;  %v1831_v1 = vsub.f32 %v11897_v20, %v16768_v58  ;;  %v1814_v27 = vand.u32 4294901760, %v1813_v55  ;;  %v16775_v58 = vand.u32 4294901760, %v11935_v52  ;;  %v1820_v4 = vand.u32 4294901760, %v1819_v57 }
 0x290   :  { %v1801_v54 = vsub.f32 %v18169_v8, %v18174_v61  ;;  %v16774_v61 = vand.u32 4294901760, %v18177_v47  ;;  %v1826_v37 = vand.u32 4294901760, %v1825_v40  ;;  %v16777_v55 = vand.u32 4294901760, %v11958_v29 }
 0x291   :  { %v1832_v32 = vand.u32 4294901760, %v1831_v1  ;;  %v16779_v22 = vand.u32 4294901760, %v12090_v36  ;;  %v1861_v1 = vsub.f32 %v11935_v52, %v16775_v58  ;;  %v1867_v40 = vsub.f32 %v11945_v24, %v16776_v2 }
 0x292   :  { %8608 = vmatpush1.bf16.msra.mxu1 %v8607_v23  ;;  %v1837_v23 = vsub.f32 %v18173_v18, %v16772_v38  ;;  %v1802_v44 = vand.u32 4294901760, %v1801_v54  ;;  %v1843_v38 = vsub.f32 %v18175_v31, %v16773_v34  ;;  %v16778_v54 = vand.u32 4294901760, %v11956_v46 }
 0x293   :  { %8610 = vmatprep.subr.bf16.mxu1 %v8609_v19  ;;  %v8615_v19 = vpack.c.bf16 %v1790_v50, %v1778_v53  ;;  %v1855_v50 = vsub.f32 %v18176_v26, %v18178_v0  ;;  %v1849_v57 = vsub.f32 %v18177_v47, %v16774_v61  ;;  %v1885_v58 = vsub.f32 %v11958_v29, %v16777_v55 }
 0x294   :  { %v1838_v53 = vand.u32 4294901760, %v1837_v23  ;;  %v18179_v23 = vand.u32 4294901760, %v11947_v25  ;;  %v1844_v0 = vand.u32 4294901760, %v1843_v38  ;;  %v1873_v61 = vsub.f32 %v11956_v46, %v16778_v54 }
 0x295   :  { %v1891_v2 = vsub.f32 %v12090_v36, %v16779_v22  ;;  %v16795_v38 = vand.u32 4294901760, %v12096_v56  ;;  %v16794_v55 = vand.u32 4294901760, %v12099_v10  ;;  %v16787_v54 = vand.u32 4294901760, %v12101_v15 }
 0x296   :  { %8612 = vmatpush1.bf16.msra.mxu1 %v8611_v43  ;;  %v8619_v43 = vpack.c.bf16 %v1814_v27, %v1802_v44  ;;  %v1879_v44 = vsub.f32 %v11947_v25, %v18179_v23  ;;  %v8621_v27 = vpack.c.bf16 %v1832_v32, %v1820_v4  ;;  %v8623_v34 = vpack.c.bf16 %v1838_v53, %v1826_v37 }
 0x297   :  { %8614 = vmatprep.subr.bf16.mxu1 %v8613_v5  ;;  %v16786_v5 = vand.u32 4294901760, %v12092_v16  ;;  %v16796_v32 = vand.u32 4294901760, %v12094_v39  ;;  %v1850_v4 = vand.u32 4294901760, %v1849_v57  ;;  %v1868_v37 = vand.u32 4294901760, %v1867_v40 }
 0x298   :  { %v1880_v53 = vand.u32 4294901760, %v1879_v44  ;;  %v1874_v22 = vand.u32 4294901760, %v1873_v61  ;;  %v1886_v36 = vand.u32 4294901760, %v1885_v58  ;;  %v1892_v29 = vand.u32 4294901760, %v1891_v2 }
 0x299   :  { %v16793_v40 = vand.u32 4294901760, %v12103_v51  ;;  %v16789_v44 = vand.u32 4294901760, %v12105_v62  ;;  %v1915_v58 = vsub.f32 %v12099_v10, %v16794_v55  ;;  %v1927_v2 = vsub.f32 %v12101_v15, %v16787_v54 }
 0x29a   :  { %8616 = vmatpush1.bf16.msra.mxu1 %v8615_v19  ;;  %v1856_v19 = vand.u32 4294901760, %v1855_v50  ;;  %v1862_v50 = vand.u32 4294901760, %v1861_v1  ;;  %v8629_v1 = vpack.c.bf16 %v1880_v53, %v1868_v37  ;;  %v16788_v61 = vand.u32 4294901760, %v12109_v28 }
 0x29b   :  { %8618 = vmatprep.subr.bf16.mxu1 %v8617_v13  ;;  %v1903_v13 = vsub.f32 %v12092_v16, %v16786_v5  ;;  %v1897_v5 = vsub.f32 %v12094_v39, %v16796_v32  ;;  %v16792_v37 = vand.u32 4294901760, %v12120_v12  ;;  %v16791_v53 = vand.u32 4294901760, %v12124_v9 }
 0x29c   :  { %v8625_v23 = vpack.c.bf16 %v1856_v19, %v1844_v0  ;;  %v8627_v57 = vpack.c.bf16 %v1862_v50, %v1850_v4  ;;  %v1921_v4 = vsub.f32 %v12103_v51, %v16793_v40  ;;  %v1933_v50 = vsub.f32 %v12105_v62, %v16789_v44  ;;  %v18197_v40 = vld [vmem:[#allocation90_spill] sm:$0xff] }
 0x29d   :  { %v1904_v46 = vand.u32 4294901760, %v1903_v13  ;;  %v1898_v19 = vand.u32 4294901760, %v1897_v5  ;;  %v1928_v54 = vand.u32 4294901760, %v1927_v2 }
 0x29e   :  { %8620 = vmatpush1.bf16.msra.mxu1 %v8619_v43  ;;  %v1909_v43 = vsub.f32 %v12096_v56, %v16795_v38  ;;  %v1934_v5 = vand.u32 4294901760, %v1933_v50  ;;  %v18181_v50 = vld [vmem:[#allocation29_spill] sm:$0xff]  ;;  %v18199_v38 = vld [vmem:[#allocation94_spill] sm:$0xff] }
 0x29f   :  { %8622 = vmatprep.subr.bf16.mxu1 %v8621_v27  ;;  %v16790_v27 = vand.u32 4294901760, %v12111_v48  ;;  %v8633_v0 = vpack.c.bf16 %v1904_v46, %v1892_v29  ;;  %v1939_v46 = vsub.f32 %v12109_v28, %v16788_v61 }
 0x2a0   :  { %v1910_v13 = vand.u32 4294901760, %v1909_v43  ;;  %v1945_v43 = vsub.f32 %v12120_v12, %v16792_v37 }
 0x2a1   :  { %v1951_v29 = vsub.f32 %v12111_v48, %v16790_v27 }
 0x2a2   :  { %8624 = vmatpush1.bf16.msra.mxu1 %v8623_v34  ;;  %v8631_v34 = vpack.c.bf16 %v1886_v36, %v1874_v22  ;;  %v8635_v36 = vpack.c.bf16 %v1910_v13, %v1898_v19  ;;  %v1922_v22 = vand.u32 4294901760, %v1921_v4  ;;  %v1946_v44 = vand.u32 4294901760, %v1945_v43  ;;  %v18186_v43 = vld [vmem:[#allocation36_spill] sm:$0xff] }
 0x2a3   :  { %8626 = vmatprep.subr.bf16.mxu1 %v8625_v23  ;;  %v1916_v23 = vand.u32 4294901760, %v1915_v58  ;;  %v1940_v58 = vand.u32 4294901760, %v1939_v46  ;;  %v1952_v2 = vand.u32 4294901760, %v1951_v29  ;;  %v8645_v13 = vpack.c.bf16 %v18102_v6, %v18101_v30  ;;  %v18183_v29 = vld [vmem:[#allocation34_spill] sm:$0xff] }
 0x2a4   :  { %v8639_v61 = vpack.c.bf16 %v1934_v5, %v1922_v22  ;;  %v8647_v4 = vpack.c.bf16 %v18113_v63, %v18112_v14  ;;  %v18185_v5 = vld [vmem:[#allocation38_spill] sm:$0xff] }
 0x2a6   :  { %8628 = vmatpush1.bf16.msra.mxu1 %v8627_v57  ;;  %v1957_v57 = vsub.f32 %v12124_v9, %v16791_v53  ;;  %v18195_v53 = vld [vmem:[#allocation78_spill] sm:$0xff] }
 0x2a7   :  { %8630 = vmatprep.subr.bf16.mxu1 %v8629_v1  ;;  %v8637_v1 = vpack.c.bf16 %v1928_v54, %v1916_v23  ;;  %v8649_v54 = vpack.c.bf16 %v18115_v21, %v18114_v41  ;;  %v18182_v23 = vld [vmem:[#allocation33_spill] sm:$0xff] }
 0x2a8   :  { %v1958_v27 = vand.u32 4294901760, %v1957_v57  ;;  %v8657_v46 = vpack.c.bf16 %v18182_v23, %v18181_v50  ;;  %v8661_v57 = vpack.c.bf16 %v18186_v43, %v18185_v5 }
 0x2aa   :  { %8632 = vmatpush1.bf16.msra.mxu1 %v8631_v34  ;;  %v8641_v34 = vpack.c.bf16 %v1952_v2, %v1940_v58  ;;  %v8643_v19 = vpack.c.bf16 %v1958_v27, %v1946_v44  ;;  %v8651_v44 = vpack.c.bf16 %v11650_v60, %v11648_v17  ;;  %v18180_v27 = vld [vmem:[#allocation84_spill] sm:$0xff]  ;;  %v18188_v58 = vld [vmem:[#allocation43_spill] sm:$0xff] }
 0x2ab   :  { %8634 = vmatprep.subr.bf16.mxu1 %v8633_v0  ;;  %v8655_v0 = vpack.c.bf16 %v18180_v27, %v18119_v7 }
 0x2ae   :  { %8636 = vmatpush1.bf16.msra.mxu1 %v8635_v36  ;;  %v18184_v36 = vld [vmem:[#allocation35_spill] sm:$0xff] }
 0x2af   :  { %8638 = vmatprep.subr.bf16.mxu1 %v8637_v1  ;;  %v8659_v22 = vpack.c.bf16 %v18184_v36, %v18183_v29  ;;  %v18187_v1 = vld [vmem:[#allocation40_spill] sm:$0xff] }
 0x2b0   :  { %v8663_v2 = vpack.c.bf16 %v18188_v58, %v18187_v1 }
 0x2b2   :  { %8640 = vmatpush1.bf16.msra.mxu1 %v8639_v61  ;;  %v8653_v61 = vpack.c.bf16 %v11658_v49, %v11652_v45 }
 0x2b3   :  { %8642 = vmatprep.subr.bf16.mxu1 %v8641_v34  ;;  %v18189_v34 = vld [vmem:[#allocation44_spill] sm:$0xff] }
 0x2b6   :  { %8644 = vmatpush1.bf16.msra.mxu1 %v8643_v19  ;;  %v18190_v19 = vld [vmem:[#allocation46_spill] sm:$0xff] }
 0x2b7   :  { %8646 = vmatprep.subr.bf16.mxu1 %v8645_v13  ;;  %v8665_v13 = vpack.c.bf16 %v18190_v19, %v18189_v34 }
 0x2b9   :  { %1963 = vmatmul.mubr.f32.vlgmr.msra.gmra.mrb[0].mxu1 %v12143_v33  ;;  %v18201_v33 = vld [vmem:[#allocation96_spill] sm:$0xff] }
 0x2ba   :  { %8648 = vmatpush1.bf16.msra.mxu1 %v8647_v4  ;;  %2163 = vmatprep.mubr.f32.mxu1 %v12155_v35  ;;  %v18191_v4 = vld [vmem:[#allocation67_spill] sm:$0xff] }
 0x2bb   :  { %8650 = vmatprep.subr.bf16.mxu1 %v8649_v54  ;;  %v8667_v54 = vpack.c.bf16 %v18191_v4, %v18143_v11  ;;  %v18203_v11 = vld [vmem:[#allocation98_spill] sm:$0xff] }
 0x2be   :  { %8652 = vmatpush1.bf16.msra.mxu1 %v8651_v44  ;;  %v18192_v44 = vld [vmem:[#allocation70_spill] sm:$0xff] }
 0x2bf   :  { %8654 = vmatprep.subr.bf16.mxu1 %v8653_v61  ;;  %v18193_v61 = vld [vmem:[#allocation73_spill] sm:$0xff] }
 0x2c2   :  { %8656 = vmatpush1.bf16.msra.mxu1 %v8655_v0  ;;  %v8669_v0 = vpack.c.bf16 %v18193_v61, %v18192_v44  ;;  %v18205_v44 = vld [vmem:[#allocation101_spill] sm:$0xff] }
 0x2c3   :  { %8658 = vmatprep.subr.bf16.mxu1 %v8657_v46  ;;  %v18194_v46 = vld [vmem:[#allocation72_spill] sm:$0xff] }
 0x2c4   :  { %v8671_v37 = vpack.c.bf16 %v18195_v53, %v18194_v46 }
 0x2c6   :  { %8660 = vmatpush1.bf16.msra.mxu1 %v8659_v22  ;;  %v18196_v22 = vld [vmem:[#allocation20_spill] sm:$0xff] }
 0x2c7   :  { %8662 = vmatprep.subr.bf16.mxu1 %v8661_v57  ;;  %v8673_v55 = vpack.c.bf16 %v18197_v40, %v18196_v22  ;;  %v18198_v57 = vld [vmem:[#allocation92_spill] sm:$0xff] }
 0x2c8   :  { %v8675_v32 = vpack.c.bf16 %v18199_v38, %v18198_v57 }
 0x2ca   :  { %8664 = vmatpush1.bf16.msra.mxu1 %v8663_v2  ;;  %v18200_v2 = vld [vmem:[#allocation95_spill] sm:$0xff] }
 0x2cb   :  { %8666 = vmatprep.subr.bf16.mxu1 %v8665_v13  ;;  %v8677_v4 = vpack.c.bf16 %v18201_v33, %v18200_v2  ;;  %v18202_v13 = vld [vmem:[#allocation97_spill] sm:$0xff] }
 0x2cc   :  { %v8679_v61 = vpack.c.bf16 %v18203_v11, %v18202_v13 }
 0x2ce   :  { %8668 = vmatpush1.bf16.msra.mxu1 %v8667_v54  ;;  %v18204_v54 = vld [vmem:[#allocation100_spill] sm:$0xff] }
 0x2cf   :  { %8670 = vmatprep.subr.bf16.mxu1 %v8669_v0  ;;  %v8681_v53 = vpack.c.bf16 %v18205_v44, %v18204_v54  ;;  %v8683_v0 = vpack.c.bf16 %v18170_v42, %v18169_v8  ;;  %v18207_v42 = vld [vmem:[#allocation62_spill] sm:$0xff] }
 0x2d2   :  { %8672 = vmatpush1.bf16.msra.mxu1 %v8671_v37  ;;  %v8685_v37 = vpack.c.bf16 %v11897_v20, %v18171_v59 }
 0x2d3   :  { %8674 = vmatprep.subr.bf16.mxu1 %v8673_v55  ;;  %v8687_v55 = vpack.c.bf16 %v18173_v18, %v18172_v3 }
 0x2d6   :  { %8676 = vmatpush1.bf16.msra.mxu1 %v8675_v32  ;;  %v8689_v32 = vpack.c.bf16 %v18176_v26, %v18175_v31 }
 0x2d7   :  { %8678 = vmatprep.subr.bf16.mxu1 %v8677_v4  ;;  %v8691_v4 = vpack.c.bf16 %v11935_v52, %v18177_v47 }
 0x2da   :  { %8680 = vmatpush1.bf16.msra.mxu1 %v8679_v61  ;;  %v8693_v61 = vpack.c.bf16 %v11947_v25, %v11945_v24 }
 0x2db   :  { %8682 = vmatprep.subr.bf16.mxu1 %v8681_v53  ;;  %v18206_v53 = vld [vmem:[#allocation61_spill] sm:$0xff] }
 0x2dc   :  { %v8695_v20 = vpack.c.bf16 %v18207_v42, %v18206_v53 }
 0x2de   :  { %8684 = vmatpush1.bf16.msra.mxu1 %v8683_v0  ;;  %v18208_v0 = vld [vmem:[#allocation91_spill] sm:$0xff] }
 0x2df   :  { %8686 = vmatprep.subr.bf16.mxu1 %v8685_v37  ;;  %v8697_v18 = vpack.c.bf16 %v12092_v16, %v18208_v0  ;;  %v8699_v37 = vpack.c.bf16 %v12096_v56, %v12094_v39  ;;  %v18211_v56 = vld [vmem:[#allocation27_spill] sm:$0xff] }
 0x2e2   :  { %8688 = vmatpush1.bf16.msra.mxu1 %v8687_v55  ;;  %v8701_v55 = vpack.c.bf16 %v12101_v15, %v12099_v10 }
 0x2e3   :  { %8690 = vmatprep.subr.bf16.mxu1 %v8689_v32  ;;  %v8703_v32 = vpack.c.bf16 %v12105_v62, %v12103_v51  ;;  %v18213_v62 = vld [vmem:[#allocation80_spill] sm:$0xff] }
 0x2e6   :  { %8692 = vmatpush1.bf16.msra.mxu1 %v8691_v4  ;;  %v8705_v4 = vpack.c.bf16 %v12111_v48, %v12109_v28  ;;  %v18215_v48 = vld [vmem:[#allocation53_spill] sm:$0xff] }
 0x2e7   :  { %8694 = vmatprep.subr.bf16.mxu1 %v8693_v61  ;;  %v8707_v61 = vpack.c.bf16 %v12124_v9, %v12120_v12  ;;  %v18217_v9 = vld [vmem:[#allocation30_spill] sm:$0xff]  ;;  %v2729_v28 = vld [vmem:[#allocation2 + $0x468] sm:$0xff] }
 0x2ea   :  { %8696 = vmatpush1.bf16.msra.mxu1 %v8695_v20  ;;  %v18209_v20 = vld [vmem:[#allocation23_spill] sm:$0xff] }
 0x2eb   :  { %8698 = vmatprep.subr.bf16.mxu1 %v8697_v18  ;;  %v18210_v18 = vld [vmem:[#allocation17_spill] sm:$0xff] }
 0x2ee   :  { %8700 = vmatpush1.bf16.msra.mxu1 %v8699_v37  ;;  %v18212_v37 = vand.u32 4294901760, %v12155_v35  ;;  %v18222_v35 = vld [vmem:[#allocation77_spill] sm:$0xff] }
 0x2ef   :  { %8702 = vmatprep.subr.bf16.mxu1 %v8701_v55  ;;  %v18214_v55 = vld [vmem:[#allocation52_spill] sm:$0xff] }
 0x2f2   :  { %8704 = vmatpush1.bf16.msra.mxu1 %v8703_v32  ;;  %v18216_v32 = vld [vmem:[#allocation58_spill] sm:$0xff] }
 0x2f3   :  { %8706 = vmatprep.subr.bf16.mxu1 %v8705_v4  ;;  %v18218_v4 = vld [vmem:[#allocation42_spill] sm:$0xff] }
 0x2f6   :  { %8708 = vmatpush1.bf16.msra.mxu1 %v8707_v61  ;;  %v18219_v61 = vld [vmem:[#allocation45_spill] sm:$0xff] }
 0x2f7   :  { %8710 = vmatprep.subr.bf16.mxu1 %v18209_v20  ;;  %v18220_v20 = vld [vmem:[#allocation69_spill] sm:$0xff] }
 0x2f9   :  { %2166 = vmatmul.mubr.f32.vlgmr.msra.gmra.mrb[0].mxu1 %v18210_v18 }
 0x2fa   :  { %8712 = vmatpush1.bf16.msra.mxu1 %v18211_v56  ;;  %2303 = vmatprep.mubr.f32.mxu1 %v18212_v37  ;;  %v18221_v56 = vld [vmem:[#allocation75_spill] sm:$0xff]  ;;  %v18223_v37 = vld [vmem:[#allocation93_spill] sm:$0xff] }
 0x2fb   :  { %8714 = vmatprep.subr.bf16.mxu1 %v18213_v62  ;;  %v18224_v62 = vld [vmem:[#allocation99_spill] sm:$0xff] }
 0x2fe   :  { %8716 = vmatpush1.bf16.msra.mxu1 %v18214_v55  ;;  %v18225_v55 = vld [vmem:[#allocation102_spill] sm:$0xff] }
 0x2ff   :  { %8718 = vmatprep.subr.bf16.mxu1 %v18215_v48  ;;  %v18226_v48 = vld [vmem:[#allocation107_spill] sm:$0xff] }
 0x302   :  { %8720 = vmatpush1.bf16.msra.mxu1 %v18216_v32  ;;  %v18227_v32 = vld [vmem:[#allocation110_spill] sm:$0xff] }
 0x303   :  { %8722 = vmatprep.subr.bf16.mxu1 %v18217_v9  ;;  %v18228_v9 = vld [vmem:[#allocation59_spill] sm:$0xff] }
 0x306   :  { %8724 = vmatpush1.bf16.msra.mxu1 %v18218_v4  ;;  %v18229_v4 = vld [vmem:[#allocation111_spill] sm:$0xff] }
 0x307   :  { %8726 = vmatprep.subr.bf16.mxu1 %v18219_v61  ;;  %v18230_v61 = vld [vmem:[#allocation65_spill] sm:$0xff] }
 0x30a   :  { %8728 = vmatpush1.bf16.msra.mxu1 %v18220_v20  ;;  %v18231_v20 = vld [vmem:[#allocation112_spill] sm:$0xff] }
 0x30b   :  { %8730 = vmatprep.subr.bf16.mxu1 %v18221_v56  ;;  %v18232_v56 = vld [vmem:[#allocation113_spill] sm:$0xff] }
 0x30e   :  { %8732 = vmatpush1.bf16.msra.mxu1 %v18222_v35  ;;  %v18233_v35 = vld [vmem:[#allocation114_spill] sm:$0xff] }
 0x30f   :  { %8734 = vmatprep.subr.bf16.mxu1 %v18223_v37  ;;  %v18234_v37 = vld [vmem:[#allocation115_spill] sm:$0xff] }
 0x312   :  { %8736 = vmatpush1.bf16.msra.mxu1 %v18224_v62  ;;  %v18235_v62 = vld [vmem:[#allocation116_spill] sm:$0xff] }
 0x313   :  { %8738 = vmatprep.subr.bf16.mxu1 %v18225_v55  ;;  %v18236_v55 = vld [vmem:[#allocation81_spill] sm:$0xff] }
 0x316   :  { %8740 = vmatpush1.bf16.msra.mxu1 %v18226_v48  ;;  %v18237_v48 = vld [vmem:[#allocation87_spill] sm:$0xff] }
 0x317   :  { %8742 = vmatprep.subr.bf16.mxu1 %v18227_v32  ;;  %v18238_v32 = vld [vmem:[#allocation88_spill] sm:$0xff] }
 0x31a   :  { %8744 = vmatpush1.bf16.msra.mxu1 %v18228_v9  ;;  %v18239_v9 = vld [vmem:[#allocation89_spill] sm:$0xff] }
 0x31b   :  { %8746 = vmatprep.subr.bf16.mxu1 %v18229_v4  ;;  %v18240_v4 = vld [vmem:[#allocation48_spill] sm:$0xff] }
 0x31e   :  { %8748 = vmatpush1.bf16.msra.mxu1 %v18230_v61  ;;  %v18241_v61 = vld [vmem:[#allocation15_spill] sm:$0xff] }
 0x31f   :  { %8750 = vmatprep.subr.bf16.mxu1 %v18231_v20 }
 0x322   :  { %8752 = vmatpush1.bf16.msra.mxu1 %v18232_v56  ;;  %v18242_v56 = vand.u32 4294901760, %v18101_v30  ;;  %v18250_v30 = vand.u32 4294901760, %v11650_v60 }
 0x323   :  { %8754 = vmatprep.subr.bf16.mxu1 %v18233_v35  ;;  %v18243_v35 = vand.u32 4294901760, %v18102_v6  ;;  %v18251_v6 = vand.u32 4294901760, %v11652_v45  ;;  %v18258_v45 = vand.u32 4294901760, %v18183_v29  ;;  %v18264_v29 = vld [vmem:[#allocation16_spill] sm:$0xff] }
 0x325   :  { %v8773_v20 = vpack.c.bf16 %v18243_v35, %v18242_v56  ;;  %v18252_v56 = vand.u32 4294901760, %v11658_v49  ;;  %v18259_v49 = vand.u32 4294901760, %v18184_v36  ;;  %v18265_v36 = vand.u32 4294901760, %v18189_v34 }
 0x326   :  { %8756 = vmatpush1.bf16.msra.mxu1 %v18234_v37  ;;  %v18244_v37 = vld [vmem:[#allocation12_spill] sm:$0xff] }
 0x327   :  { %8758 = vmatprep.subr.bf16.mxu1 %v18235_v62  ;;  %v18245_v62 = vand.u32 4294901760, %v18112_v14  ;;  %v8781_v35 = vpack.c.bf16 %v18252_v56, %v18251_v6  ;;  %v18253_v14 = vand.u32 4294901760, %v18119_v7  ;;  %v18260_v7 = vand.u32 4294901760, %v18185_v5  ;;  %v2718_v56 = vld [vmem:[#allocation2 + $0x410] sm:$0xff] }
 0x328   :  { %v18266_v5 = vand.u32 4294901760, %v18190_v19  ;;  %v2722_v19 = vld [vmem:[#allocation2 + $0x430] sm:$0xff] }
 0x32a   :  { %8760 = vmatpush1.bf16.msra.mxu1 %v18236_v55  ;;  %v18246_v55 = vand.u32 4294901760, %v18113_v63 }
 0x32b   :  { %8762 = vmatprep.subr.bf16.mxu1 %v18237_v48 }
 0x32c   :  { %v8775_v48 = vpack.c.bf16 %v18246_v55, %v18245_v62  ;;  %v18254_v62 = vand.u32 4294901760, %v18180_v27  ;;  %v18261_v27 = vand.u32 4294901760, %v18186_v43 }
 0x32e   :  { %8764 = vmatpush1.bf16.msra.mxu1 %v18238_v32  ;;  %v18247_v32 = vand.u32 4294901760, %v18114_v41  ;;  %v12519_v63 = vpack.c.bf16 %v18254_v62, %v18253_v14  ;;  %v18255_v41 = vand.u32 4294901760, %v18210_v18  ;;  %v18262_v18 = vand.u32 4294901760, %v18187_v1  ;;  %v2721_v14 = vld [vmem:[#allocation2 + $0x428] sm:$0xff] }
 0x32f   :  { %8766 = vmatprep.subr.bf16.mxu1 %v18239_v9  ;;  %v18248_v9 = vand.u32 4294901760, %v18115_v21  ;;  %v12533_v21 = vpack.c.bf16 %v18259_v49, %v18258_v45  ;;  %v18267_v62 = vld [vmem:[#allocation64_spill] sm:$0xff]  ;;  %v2786_v45 = vand.u32 4294901760, %v2718_v56  ;;  %v2788_v49 = vand.u32 4294901760, %v2721_v14 }
 0x332   :  { %8768 = vmatpush1.bf16.msra.mxu1 %v18240_v4  ;;  %v8777_v4 = vpack.c.bf16 %v18248_v9, %v18247_v32  ;;  %v18256_v9 = vand.u32 4294901760, %v18181_v50  ;;  %v18263_v50 = vand.u32 4294901760, %v18188_v58  ;;  %v2719_v32 = vld [vmem:[#allocation2 + $0x418] sm:$0xff] }
 0x333   :  { %8770 = vmatprep.subr.bf16.mxu1 %v18241_v61  ;;  %v18249_v61 = vand.u32 4294901760, %v11648_v17  ;;  %v18257_v17 = vand.u32 4294901760, %v18182_v23  ;;  %v2717_v23 = vld [vmem:[#allocation2 + $0x408] sm:$0xff]  ;;  %v2784_v6 = vand.u32 4294901760, %v2719_v32  ;;  %v2723_v58 = vld [vmem:[#allocation2 + $0x438] sm:$0xff] }
 0x334   :  { %v12545_v55 = vpack.c.bf16 %v18263_v50, %v18262_v18  ;;  %v2780_v43 = vand.u32 4294901760, %v2717_v23  ;;  %v2792_v34 = vand.u32 4294901760, %v2723_v58 }
 0x335   :  { %v8779_v12 = vpack.c.bf16 %v18250_v30, %v18249_v61  ;;  %v12527_v60 = vpack.c.bf16 %v18257_v17, %v18256_v9  ;;  %v2716_v61 = vld [vmem:[#allocation2 + $0x400] sm:$0xff]  ;;  %v12552_v30 = vpack.c.bf16 %v18266_v5, %v18265_v36  ;;  %v12564_v36 = vsub.f32 %v2719_v32, %v2784_v6 }
 0x336   :  { %8772 = vmatpush1.bf16.msra.mxu1 %v18244_v37  ;;  %v2782_v1 = vand.u32 4294901760, %v2716_v61  ;;  %v18269_v9 = vld [vmem:[#allocation67_spill] sm:$0xff]  ;;  %v12560_v18 = vpack.c.bf16 %v2784_v6, %v2780_v43  ;;  %v12562_v50 = vsub.f32 %v2717_v23, %v2780_v43  ;;  %v2726_v37 = vld [vmem:[#allocation2 + $0x450] sm:$0xff]  ;;  %v12577_v23 = vsub.f32 %v2723_v58, %v2792_v34 }
 0x337   :  { %8774 = vmatprep.subr.bf16.mxu1 %v8773_v20  ;;  %v12539_v20 = vpack.c.bf16 %v18261_v27, %v18260_v7  ;;  %v18270_v17 = vand.u32 4294901760, %v18269_v9  ;;  %v2720_v7 = vld [vmem:[#allocation2 + $0x420] sm:$0xff]  ;;  %v2725_v27 = vld [vmem:[#allocation2 + $0x448] sm:$0xff]  ;;  %18273 = vst [vmem:[#allocation21_spill] sm:$0xff] %v12564_v36  ;;  %v2731_v6 = vld [vmem:[#allocation2 + $0x478] sm:$0xff] }
 0x338   :  { %18271 = vst [vmem:[#allocation18_spill] sm:$0xff] %v12560_v18  ;;  %18272 = vst [vmem:[#allocation19_spill] sm:$0xff] %v12562_v50  ;;  %v12566_v5 = vsub.f32 %v2716_v61, %v2782_v1  ;;  %v12568_v9 = vpack.c.bf16 %v2786_v45, %v2782_v1  ;;  %8902 = vmatprep.subr.bf16.mxu0 %v12560_v18  ;;  %v2790_v32 = vand.u32 4294901760, %v2720_v7  ;;  %v2794_v61 = vand.u32 4294901760, %v2722_v19  ;;  %v2733_v18 = vld [vmem:[#allocation2 + $0x488] sm:$0xff] }
 0x339   :  { %2307 = vmatmul.mubr.f32.vlgmr.msra.gmra.mrb[0].mxu1 %v18255_v41  ;;  %v18268_v41 = vand.u32 4294901760, %v18267_v62  ;;  %v2724_v62 = vld [vmem:[#allocation2 + $0x440] sm:$0xff]  ;;  %18279 = vst [vmem:[#allocation49_spill] sm:$0xff] %v12577_v23  ;;  %v2796_v43 = vand.u32 4294901760, %v2725_v27 }
 0x33a   :  { %8776 = vmatpush1.bf16.msra.mxu1 %v8775_v48  ;;  %2570 = vmatprep.mubr.f32.mxu1 %v18264_v29  ;;  %18274 = vst [vmem:[#allocation22_spill] sm:$0xff] %v12566_v5  ;;  %18275 = vst [vmem:[#allocation31_spill] sm:$0xff] %v12568_v9  ;;  %v12574_v29 = vsub.f32 %v2721_v14, %v2788_v49  ;;  %v2728_v5 = vld [vmem:[#allocation2 + $0x460] sm:$0xff]  ;;  %v2730_v14 = vld [vmem:[#allocation2 + $0x470] sm:$0xff]  ;;  %v12585_v58 = vsub.f32 %v2722_v19, %v2794_v61  ;;  %v2808_v19 = vand.u32 4294901760, %v2731_v6 }
 0x33b   :  { %8778 = vmatprep.subr.bf16.mxu1 %v8777_v4  ;;  %v12558_v48 = vpack.c.bf16 %v18270_v17, %v18268_v41  ;;  %v2727_v4 = vld [vmem:[#allocation2 + $0x458] sm:$0xff]  ;;  %v12570_v41 = vsub.f32 %v2718_v56, %v2786_v45  ;;  %v12572_v17 = vpack.c.bf16 %v2792_v34, %v2788_v49  ;;  %8904 = vmatpush1.bf16.msra.mxu0 %v12568_v9  ;;  %v2798_v56 = vand.u32 4294901760, %v2724_v62  ;;  %v12589_v23 = vld [vmem:[#allocation2 + $0x480] sm:$0xff] }
 0x33c   :  { %18278 = vst [vmem:[#allocation39_spill] sm:$0xff] %v12574_v29  ;;  %v2800_v1 = vand.u32 4294901760, %v2727_v4  ;;  %v2802_v45 = vand.u32 4294901760, %v2726_v37  ;;  %v12583_v49 = vsub.f32 %v2720_v7, %v2790_v32  ;;  %18281 = vst [vmem:[#allocation57_spill] sm:$0xff] %v12585_v58  ;;  %v12587_v34 = vsub.f32 %v2725_v27, %v2796_v43 }
 0x33d   :  { %18276 = vst [vmem:[#allocation32_spill] sm:$0xff] %v12570_v41  ;;  %18277 = vst [vmem:[#allocation37_spill] sm:$0xff] %v12572_v17  ;;  %v2804_v41 = vand.u32 4294901760, %v2729_v28  ;;  %8906 = vmatprep.subr.bf16.mxu0 %v12572_v17  ;;  %v12597_v50 = vsub.f32 %v2724_v62, %v2798_v56  ;;  %v2734_v17 = vld [vmem:[#allocation2 + $0x490] sm:$0xff] }
 0x33e   :  { %8780 = vmatpush1.bf16.msra.mxu1 %v8779_v12  ;;  %v12581_v12 = vpack.c.bf16 %v2794_v61, %v2790_v32  ;;  %18282 = vst [vmem:[#allocation60_spill] sm:$0xff] %v12587_v34  ;;  %v12591_v9 = vpack.c.bf16 %v2800_v1, %v2796_v43  ;;  %v12593_v29 = vsub.f32 %v2727_v4, %v2800_v1  ;;  %v2806_v32 = vand.u32 4294901760, %v2728_v5  ;;  %v18297_v34 = vld [vmem:[#allocation78_spill] sm:$0xff] }
 0x33f   :  { %8782 = vmatprep.subr.bf16.mxu1 %v8781_v35  ;;  %v2735_v35 = vld [vmem:[#allocation2 + $0x498] sm:$0xff]  ;;  %v12595_v36 = vpack.c.bf16 %v2802_v45, %v2798_v56  ;;  %18286 = vst [vmem:[#allocation71_spill] sm:$0xff] %v12597_v50  ;;  %v12600_v7 = vsub.f32 %v2726_v37, %v2802_v45  ;;  %v12602_v27 = vsub.f32 %v2729_v28, %v2804_v41  ;;  %v2810_v61 = vand.u32 4294901760, %v2730_v14  ;;  %v2737_v56 = vld [vmem:[#allocation2 + $0x4a8] sm:$0xff] }
 0x340   :  { %18280 = vst [vmem:[#allocation51_spill] sm:$0xff] %v12581_v12  ;;  %18283 = vst [vmem:[#allocation63_spill] sm:$0xff] %v12591_v9  ;;  %8908 = vmatpush1.bf16.msra.mxu0 %v12581_v12  ;;  %v2812_v4 = vand.u32 4294901760, %v2733_v18  ;;  %v2816_v43 = vand.u32 4294901760, %v2735_v35  ;;  %v2814_v1 = vand.u32 4294901760, %v12589_v23  ;;  %v12608_v62 = vpack.c.bf16 %v2808_v19, %v2804_v41  ;;  %v2739_v45 = vld [vmem:[#allocation2 + $0x4b8] sm:$0xff] }
 0x341   :  { %18284 = vst [vmem:[#allocation66_spill] sm:$0xff] %v12593_v29  ;;  %18285 = vst [vmem:[#allocation68_spill] sm:$0xff] %v12595_v36  ;;  %8910 = vmatprep.subr.bf16.mxu0 %v12591_v9  ;;  %v12612_v37 = vsub.f32 %v2728_v5, %v2806_v32  ;;  %v2818_v28 = vand.u32 4294901760, %v2734_v17  ;;  %v18296_v29 = vand.u32 4294901760, %v18194_v46  ;;  %v18298_v58 = vand.u32 4294901760, %v18297_v34  ;;  %v2736_v5 = vld [vmem:[#allocation2 + $0x4a0] sm:$0xff] }
 0x342   :  { %8784 = vmatpush1.bf16.msra.mxu1 %v12519_v63  ;;  %18287 = vst [vmem:[#allocation74_spill] sm:$0xff] %v12600_v7  ;;  %18288 = vst [vmem:[#allocation76_spill] sm:$0xff] %v12602_v27  ;;  %v12610_v63 = vsub.f32 %v2731_v6, %v2808_v19  ;;  %v18292_v27 = vld [vmem:[#allocation70_spill] sm:$0xff]  ;;  %v18294_v7 = vld [vmem:[#allocation73_spill] sm:$0xff]  ;;  %v12626_v41 = vsub.f32 %v2730_v14, %v2810_v61  ;;  %v12628_v6 = vsub.f32 %v2733_v18, %v2812_v4 }
 0x343   :  { %8786 = vmatprep.subr.bf16.mxu1 %v12527_v60  ;;  %18289 = vst [vmem:[#allocation79_spill] sm:$0xff] %v12608_v62  ;;  %18291 = vst [vmem:[#allocation85_spill] sm:$0xff] %v12612_v37  ;;  %v18293_v60 = vand.u32 4294901760, %v18292_v27  ;;  %v18295_v12 = vand.u32 4294901760, %v18294_v7  ;;  %v12624_v9 = vpack.c.bf16 %v18298_v58, %v18296_v29  ;;  %v2738_v19 = vld [vmem:[#allocation2 + $0x4b0] sm:$0xff]  ;;  %v12630_v37 = vld [vmem:[#allocation2 + $0x4c8] sm:$0xff]  ;;  %v12639_v46 = vsub.f32 %v2735_v35, %v2816_v43 }
 0x344   :  { %18290 = vst [vmem:[#allocation82_spill] sm:$0xff] %v12610_v63  ;;  %18299 = vst [vmem:[#allocation86_spill] sm:$0xff] %v12626_v41  ;;  %v18301_v7 = vand.u32 4294901760, %v18196_v22  ;;  %v12642_v29 = vsub.f32 %v12589_v23, %v2814_v1  ;;  %v12644_v14 = vsub.f32 %v2734_v17, %v2818_v28  ;;  %v2743_v18 = vld [vmem:[#allocation2 + $0x4d8] sm:$0xff]  ;;  %v12646_v58 = vld [vmem:[#allocation2 + $0x4c0] sm:$0xff]  ;;  %v18307_v22 = vand.u32 4294901760, %v18199_v38  ;;  %8912 = vmatpush1.bf16.msra.mxu0 %v12595_v36 }
 0x345   :  { %v12618_v50 = vpack.c.bf16 %v18295_v12, %v18293_v60  ;;  %18300 = vst [vmem:[#allocation24_spill] sm:$0xff] %v12628_v6  ;;  %v18302_v12 = vand.u32 4294901760, %v18197_v40  ;;  %18303 = vst [vmem:[#allocation25_spill] sm:$0xff] %v12639_v46  ;;  %v12656_v40 = vpack.c.bf16 %v2810_v61, %v2806_v32  ;;  %v2820_v35 = vand.u32 4294901760, %v2737_v56  ;;  %v12658_v60 = vld [vmem:[#allocation2 + $0x4d0] sm:$0xff]  ;;  %8914 = vmatprep.subr.bf16.mxu0 %v12608_v62  ;;  %v12673_v36 = vld [vmem:[#allocation2 + $0x4e0] sm:$0xff] }
 0x346   :  { %8788 = vmatpush1.bf16.msra.mxu1 %v12533_v21  ;;  %18304 = vst [vmem:[#allocation26_spill] sm:$0xff] %v12642_v29  ;;  %18305 = vst [vmem:[#allocation28_spill] sm:$0xff] %v12644_v14  ;;  %v18306_v21 = vand.u32 4294901760, %v18198_v57  ;;  %v2824_v23 = vand.u32 4294901760, %v2739_v45  ;;  %v12661_v17 = vpack.c.bf16 %v2816_v43, %v2812_v4  ;;  %v2828_v57 = vand.u32 4294901760, %v12630_v37 }
 0x347   :  { %v12637_v27 = vpack.c.bf16 %v18302_v12, %v18301_v7  ;;  %8790 = vmatprep.subr.bf16.mxu1 %v12539_v20  ;;  %18308 = vst [vmem:[#allocation41_spill] sm:$0xff] %v12656_v40  ;;  %v2822_v7 = vand.u32 4294901760, %v2736_v5  ;;  %v2826_v20 = vand.u32 4294901760, %v2738_v19  ;;  %v12664_v12 = vld [vmem:[#allocation2 + $0x4e8] sm:$0xff]  ;;  %v12666_v38 = vsub.f32 %v2737_v56, %v2820_v35 }
 0x348   :  { %v12653_v34 = vpack.c.bf16 %v18307_v22, %v18306_v21  ;;  %18309 = vst [vmem:[#allocation47_spill] sm:$0xff] %v12661_v17  ;;  %v12668_v21 = vsub.f32 %v2739_v45, %v2824_v23  ;;  %v2832_v32 = vand.u32 4294901760, %v2743_v18  ;;  %v2830_v61 = vand.u32 4294901760, %v12646_v58  ;;  %v12671_v22 = vld [vmem:[#allocation2 + $0x4f8] sm:$0xff]  ;;  %v12684_v45 = vld [vmem:[#allocation2 + $0x4f0] sm:$0xff]  ;;  %8916 = vmatpush1.bf16.msra.mxu0 %v12656_v40 }
 0x349   :  { %18310 = vst [vmem:[#allocation83_spill] sm:$0xff] %v12666_v38  ;;  %v12676_v4 = vsub.f32 %v2736_v5, %v2822_v7  ;;  %v12678_v43 = vsub.f32 %v2738_v19, %v2826_v20  ;;  %v12681_v62 = vsub.f32 %v12630_v37, %v2828_v57  ;;  %v2834_v56 = vand.u32 4294901760, %v12658_v60  ;;  %v12698_v19 = vld [vmem:[#allocation2 + $0x518] sm:$0xff]  ;;  %8918 = vmatprep.subr.bf16.mxu0 %v12661_v17  ;;  %v12736_v17 = vld [vmem:[#allocation2 + $0x530] sm:$0xff] }
 0x34a   :  { %18311 = vst [vmem:[#allocation103_spill] sm:$0xff] %v12668_v21  ;;  %8792 = vmatpush1.bf16.msra.mxu1 %v12545_v55  ;;  %v12686_v21 = vld [vmem:[#allocation2 + $0x508] sm:$0xff]  ;;  %v12690_v38 = vpack.c.bf16 %v2818_v28, %v2814_v1  ;;  %v12692_v55 = vsub.f32 %v2743_v18, %v2832_v32  ;;  %v12695_v5 = vsub.f32 %v12646_v58, %v2830_v61  ;;  %v2836_v37 = vand.u32 4294901760, %v12664_v12  ;;  %v12710_v18 = vld [vmem:[#allocation2 + $0x510] sm:$0xff] }
 0x34b   :  { %18312 = vst [vmem:[#allocation105_spill] sm:$0xff] %v12676_v4  ;;  %18313 = vst [vmem:[#allocation55_spill] sm:$0xff] %v12678_v43  ;;  %8794 = vmatprep.subr.bf16.mxu1 %v12552_v30  ;;  %v12703_v43 = vpack.c.bf16 %v2824_v23, %v2820_v35  ;;  %v12706_v30 = vsub.f32 %v12658_v60, %v2834_v56  ;;  %v2840_v1 = vand.u32 4294901760, %v12671_v22  ;;  %v16846_v28 = vand.u32 4294901760, %v12673_v36  ;;  %v12719_v35 = vld [vmem:[#allocation2 + $0x528] sm:$0xff]  ;;  %v12721_v23 = vld [vmem:[#allocation2 + $0x538] sm:$0xff] }
 0x34c   :  { %18314 = vst [vmem:[#allocation106_spill] sm:$0xff] %v12681_v62  ;;  %18315 = vst [vmem:[#allocation108_spill] sm:$0xff] %v12690_v38  ;;  %v12700_v62 = vld [vmem:[#allocation2 + $0x500] sm:$0xff]  ;;  %v12712_v58 = vpack.c.bf16 %v2826_v20, %v2822_v7  ;;  %v12715_v40 = vsub.f32 %v12664_v12, %v2836_v37  ;;  %8920 = vmatpush1.bf16.msra.mxu0 %v12690_v38  ;;  %v18333_v12 = vand.u32 4294901760, %v18200_v2  ;;  %v12783_v38 = vld [vmem:[#allocation2 + $0x550] sm:$0xff]  ;;  %v18352_v4 = vand.u32 4294901760, %v18205_v44 }
 0x34d   :  { %18316 = vst [vmem:[#allocation109_spill] sm:$0xff] %v12692_v55  ;;  %18317 = vst [vmem:[#allocation84_spill] sm:$0xff] %v12695_v5  ;;  %v12725_v60 = vsub.f32 %v12671_v22, %v2840_v1  ;;  %v12730_v7 = vsub.f32 %v12673_v36, %v16846_v28  ;;  %v12734_v5 = vld [vmem:[#allocation2 + $0x520] sm:$0xff]  ;;  %v18325_v22 = vand.u32 4294901760, %v12684_v45  ;;  %v18327_v28 = vand.u32 4294901760, %v12686_v21  ;;  %8922 = vmatprep.subr.bf16.mxu0 %v12703_v43 }
 0x34e   :  { %18318 = vst [vmem:[#allocation29_spill] sm:$0xff] %v12703_v43  ;;  %18319 = vst [vmem:[#allocation33_spill] sm:$0xff] %v12706_v30  ;;  %8796 = vmatpush1.bf16.msra.mxu1 %v12558_v48  ;;  %v12740_v48 = vpack.c.bf16 %v2832_v32, %v2828_v57  ;;  %v18331_v32 = vand.u32 4294901760, %v12700_v62  ;;  %v18334_v43 = vand.u32 4294901760, %v18201_v33  ;;  %v12788_v2 = vpack.c.bf16 %v2834_v56, %v2830_v61  ;;  %v2767_v30 = vld [vmem:[#allocation2 + $0x598] sm:$0xff] }
 0x34f   :  { %18320 = vst [vmem:[#allocation34_spill] sm:$0xff] %v12712_v58  ;;  %18321 = vst [vmem:[#allocation35_spill] sm:$0xff] %v12715_v40  ;;  %8798 = vmatprep.subr.bf16.mxu1 %v12618_v50  ;;  %v12750_v20 = vsub.f32 %v12686_v21, %v18327_v28  ;;  %v18329_v50 = vand.u32 4294901760, %v12698_v19  ;;  %v18335_v40 = vand.u32 4294901760, %v12710_v18  ;;  %v12785_v28 = vld [vmem:[#allocation2 + $0x568] sm:$0xff]  ;;  %v18338_v33 = vand.u32 4294901760, %v12719_v35 }
 0x350   :  { %18322 = vst [vmem:[#allocation38_spill] sm:$0xff] %v12725_v60  ;;  %18323 = vst [vmem:[#allocation36_spill] sm:$0xff] %v12730_v7  ;;  %v12745_v60 = vsub.f32 %v12684_v45, %v18325_v22  ;;  %v12753_v7 = vld [vmem:[#allocation2 + $0x548] sm:$0xff]  ;;  %v12764_v22 = vsub.f32 %v12700_v62, %v18331_v32  ;;  %8924 = vmatpush1.bf16.msra.mxu0 %v12712_v58  ;;  %v18343_v61 = vand.u32 4294901760, %v12734_v5  ;;  %v2868_v58 = vand.u32 4294901760, %v12785_v28 }
 0x351   :  { %18324 = vst [vmem:[#allocation40_spill] sm:$0xff] %v12740_v48  ;;  %18328 = vst [vmem:[#allocation44_spill] sm:$0xff] %v12750_v20  ;;  %v12759_v57 = vsub.f32 %v12698_v19, %v18329_v50  ;;  %v12768_v20 = vld [vmem:[#allocation2 + $0x558] sm:$0xff]  ;;  %v12777_v50 = vsub.f32 %v12710_v18, %v18335_v40  ;;  %v18340_v40 = vand.u32 4294901760, %v12721_v23  ;;  %v2860_v32 = vand.u32 4294901760, %v12753_v7  ;;  %8926 = vmatprep.subr.bf16.mxu0 %v12740_v48 }
 0x352   :  { %18326 = vst [vmem:[#allocation43_spill] sm:$0xff] %v12745_v60  ;;  %18332 = vst [vmem:[#allocation72_spill] sm:$0xff] %v12764_v22  ;;  %v8805_v60 = vpack.c.bf16 %v18334_v43, %v18333_v12  ;;  %v12781_v22 = vld [vmem:[#allocation2 + $0x540] sm:$0xff]  ;;  %8800 = vmatpush1.bf16.msra.mxu1 %v12624_v9  ;;  %v12793_v43 = vsub.f32 %v12719_v35, %v18338_v33  ;;  %v12807_v9 = vpack.c.bf16 %v2840_v1, %v2836_v37 }
 0x353   :  { %18330 = vst [vmem:[#allocation46_spill] sm:$0xff] %v12759_v57  ;;  %18336 = vst [vmem:[#allocation20_spill] sm:$0xff] %v12777_v50  ;;  %v12798_v12 = vsub.f32 %v12721_v23, %v18340_v40  ;;  %v12801_v57 = vld [vmem:[#allocation2 + $0x578] sm:$0xff]  ;;  %v12803_v50 = vld [vmem:[#allocation2 + $0x560] sm:$0xff]  ;;  %8802 = vmatprep.subr.bf16.mxu1 %v12637_v27  ;;  %v12812_v56 = vsub.f32 %v12734_v5, %v18343_v61  ;;  %v18345_v33 = vand.u32 4294901760, %v12736_v17  ;;  %v2862_v37 = vand.u32 4294901760, %v12781_v22 }
 0x354   :  { %18337 = vst [vmem:[#allocation90_spill] sm:$0xff] %v12788_v2  ;;  %18339 = vst [vmem:[#allocation92_spill] sm:$0xff] %v12793_v43  ;;  %v12822_v27 = vsub.f32 %v12753_v7, %v2860_v32  ;;  %v2866_v1 = vand.u32 4294901760, %v12783_v38  ;;  %v2762_v61 = vld [vmem:[#allocation2 + $0x570] sm:$0xff]  ;;  %v18349_v43 = vand.u32 4294901760, %v18203_v11  ;;  %v2872_v48 = vand.u32 4294901760, %v12801_v57  ;;  %8928 = vmatpush1.bf16.msra.mxu0 %v12788_v2 }
 0x355   :  { %18341 = vst [vmem:[#allocation94_spill] sm:$0xff] %v12798_v12  ;;  %18342 = vst [vmem:[#allocation95_spill] sm:$0xff] %v12807_v9  ;;  %v12817_v40 = vsub.f32 %v12736_v17, %v18345_v33  ;;  %v2864_v12 = vand.u32 4294901760, %v12768_v20  ;;  %v2870_v7 = vand.u32 4294901760, %v12803_v50  ;;  %v18351_v55 = vand.u32 4294901760, %v18204_v54  ;;  %8930 = vmatprep.subr.bf16.mxu0 %v12807_v9 }
 0x356   :  { %18344 = vst [vmem:[#allocation96_spill] sm:$0xff] %v12812_v56  ;;  %18347 = vst [vmem:[#allocation98_spill] sm:$0xff] %v12822_v27  ;;  %v18348_v56 = vand.u32 4294901760, %v18202_v13  ;;  %v2765_v27 = vld [vmem:[#allocation2 + $0x588] sm:$0xff]  ;;  %8804 = vmatpush1.bf16.msra.mxu1 %v12653_v34  ;;  %v12842_v13 = vsub.f32 %v12781_v22, %v2862_v37  ;;  %v12845_v11 = vsub.f32 %v12783_v38, %v2866_v1  ;;  %v18355_v34 = vand.u32 4294901760, %v12673_v36 }
 0x357   :  { %18346 = vst [vmem:[#allocation97_spill] sm:$0xff] %v12817_v40  ;;  %v12832_v40 = vsub.f32 %v12768_v20, %v2864_v12  ;;  %v8809_v14 = vpack.c.bf16 %v18352_v4, %v18351_v55  ;;  %v12848_v20 = vsub.f32 %v12785_v28, %v2868_v58  ;;  %8806 = vmatprep.subr.bf16.mxu1 %v8805_v60  ;;  %v18356_v54 = vand.u32 4294901760, %v12684_v45 }
 0x358   :  { %v8807_v33 = vpack.c.bf16 %v18349_v43, %v18348_v56  ;;  %18353 = vst [vmem:[#allocation101_spill] sm:$0xff] %v12845_v11  ;;  %v2764_v43 = vld [vmem:[#allocation2 + $0x580] sm:$0xff]  ;;  %v2766_v56 = vld [vmem:[#allocation2 + $0x590] sm:$0xff]  ;;  %v12858_v4 = vsub.f32 %v12801_v57, %v2872_v48  ;;  %v2874_v55 = vand.u32 4294901760, %v2762_v61  ;;  %v12861_v38 = vsub.f32 %v12803_v50, %v2870_v7 }
 0x359   :  { %18350 = vst [vmem:[#allocation100_spill] sm:$0xff] %v12832_v40  ;;  %18354 = vst [vmem:[#allocation61_spill] sm:$0xff] %v12848_v20  ;;  %v12855_v44 = vpack.c.bf16 %v18356_v54, %v18355_v34  ;;  %v18360_v22 = vand.u32 4294901760, %v12686_v21  ;;  %v18361_v60 = vand.u32 4294901760, %v12698_v19  ;;  %v2876_v36 = vand.u32 4294901760, %v2765_v27  ;;  %v18367_v20 = vld [vmem:[#allocation54_spill] sm:$0xff] }
 0x35a   :  { %18358 = vst [vmem:[#allocation91_spill] sm:$0xff] %v12858_v4  ;;  %18359 = vst [vmem:[#allocation17_spill] sm:$0xff] %v12861_v38  ;;  %v2880_v2 = vand.u32 4294901760, %v2767_v30  ;;  %v12870_v45 = vsub.f32 %v2762_v61, %v2874_v55  ;;  %v2878_v34 = vand.u32 4294901760, %v2764_v43  ;;  %v2882_v54 = vand.u32 4294901760, %v2766_v56  ;;  %8808 = vmatpush1.bf16.msra.mxu1 %v8807_v33  ;;  %v18364_v4 = vld [vmem:[#allocation104_spill] sm:$0xff] }
 0x35b   :  { %18357 = vst [vmem:[#allocation62_spill] sm:$0xff] %v12855_v44  ;;  %v12868_v28 = vpack.c.bf16 %v18361_v60, %v18360_v22  ;;  %v18363_v57 = vand.u32 4294901760, %v18169_v8  ;;  %v18365_v50 = vand.u32 4294901760, %v18364_v4  ;;  %v18366_v9 = vand.u32 4294901760, %v18171_v59  ;;  %8810 = vmatprep.subr.bf16.mxu1 %v8809_v14  ;;  %8932 = vmatpush1.bf16.msra.mxu0 %v12855_v44 }
 0x35c   :  { %v18368_v21 = vand.u32 4294901760, %v18367_v20  ;;  %v12880_v19 = vsub.f32 %v2765_v27, %v2876_v36  ;;  %v12882_v22 = vsub.f32 %v2767_v30, %v2880_v2  ;;  %v18369_v61 = vand.u32 4294901760, %v12700_v62  ;;  %v18378_v62 = vld [vmem:[#allocation56_spill] sm:$0xff] }
 0x35d   :  { %18362 = vst [vmem:[#allocation64_spill] sm:$0xff] %v12868_v28  ;;  %v8811_v38 = vpack.c.bf16 %v18365_v50, %v18363_v57  ;;  %v18370_v33 = vand.u32 4294901760, %v12710_v18  ;;  %v12891_v4 = vsub.f32 %v2764_v43, %v2878_v34  ;;  %v12893_v60 = vsub.f32 %v2766_v56, %v2882_v54  ;;  %8934 = vmatprep.subr.bf16.mxu0 %v12868_v28 }
 0x35e   :  { %v8813_v11 = vpack.c.bf16 %v18368_v21, %v18366_v9  ;;  %v18374_v59 = vand.u32 4294901760, %v12719_v35  ;;  %v18375_v30 = vand.u32 4294901760, %v12721_v23  ;;  %v18377_v14 = vand.u32 4294901760, %v18172_v3 }
 0x35f   :  { %v12889_v8 = vpack.c.bf16 %v18370_v33, %v18369_v61  ;;  %18372 = vst [vmem:[#allocation70_spill] sm:$0xff] %v12891_v4  ;;  %18373 = vst [vmem:[#allocation73_spill] sm:$0xff] %v12893_v60  ;;  %8812 = vmatpush1.bf16.msra.mxu1 %v8811_v38  ;;  %v18379_v27 = vand.u32 4294901760, %v18378_v62  ;;  %v18380_v20 = vand.u32 4294901760, %v18175_v31  ;;  %v18381_v43 = vand.u32 4294901760, %v18176_v26  ;;  %v18407_v33 = vld [vmem:[#allocation9_spill] sm:$0xff] }
 0x360   :  { %v12900_v9 = vpack.c.bf16 %v18375_v30, %v18374_v59  ;;  %8814 = vmatprep.subr.bf16.mxu1 %v8813_v11  ;;  %v18382_v35 = vand.u32 4294901760, %v12734_v5  ;;  %v18383_v23 = vand.u32 4294901760, %v12736_v17  ;;  %v12918_v3 = vpack.c.bf16 %v2864_v12, %v2860_v32  ;;  %v18409_v30 = vld [vmem:[#allocation10_spill] sm:$0xff] }
 0x361   :  { %18371 = vst [vmem:[#allocation67_spill] sm:$0xff] %v12889_v8  ;;  %v8815_v18 = vpack.c.bf16 %v18379_v27, %v18377_v14  ;;  %v8817_v56 = vpack.c.bf16 %v18381_v43, %v18380_v20  ;;  %8936 = vmatpush1.bf16.msra.mxu0 %v12889_v8  ;;  %v18386_v11 = vand.u32 4294901760, %v18177_v47  ;;  %v18387_v31 = vand.u32 4294901760, %v11935_v52  ;;  %v18417_v20 = vld [vmem:[#allocation27_spill] sm:$0xff]  ;;  %v18418_v43 = vld [vmem:[#allocation16_spill] sm:$0xff]  ;;  %v18482_v8 = vld [vmem:[#allocation85_spill] sm:$0xff] }
 0x362   :  { %18376 = vst [vmem:[#allocation78_spill] sm:$0xff] %v12900_v9  ;;  %v12915_v57 = vpack.c.bf16 %v18383_v23, %v18382_v35  ;;  %8938 = vmatprep.subr.bf16.mxu0 %v12900_v9  ;;  %18385 = vst [vmem:[#allocation54_spill] sm:$0xff] %v12918_v3  ;;  %v18388_v26 = vand.u32 4294901760, %v11945_v24  ;;  %v18389_v50 = vand.u32 4294901760, %v11947_v25  ;;  %v12929_v17 = vpack.c.bf16 %v2866_v1, %v2862_v37  ;;  %v18420_v35 = vld [vmem:[#allocation52_spill] sm:$0xff]  ;;  %v18421_v23 = vld [vmem:[#allocation53_spill] sm:$0xff] }
 0x363   :  { %8816 = vmatpush1.bf16.msra.mxu1 %v8815_v18  ;;  %v8819_v38 = vpack.c.bf16 %v18387_v31, %v18386_v11  ;;  %v12932_v32 = vpack.c.bf16 %v2872_v48, %v2868_v58  ;;  %v18392_v47 = vand.u32 4294901760, %v18206_v53  ;;  %v18393_v52 = vand.u32 4294901760, %v18207_v42  ;;  %v18399_v48 = vld [vmem:[#allocation50_spill] sm:$0xff] }
 0x364   :  { %18384 = vst [vmem:[#allocation104_spill] sm:$0xff] %v12915_v57  ;;  %8818 = vmatprep.subr.bf16.mxu1 %v8817_v56  ;;  %v8821_v5 = vpack.c.bf16 %v18389_v50, %v18388_v26  ;;  %18390 = vst [vmem:[#allocation56_spill] sm:$0xff] %v12929_v17  ;;  %v18394_v24 = vand.u32 4294901760, %v18208_v0  ;;  %v18395_v25 = vand.u32 4294901760, %v12092_v16  ;;  %v12943_v37 = vpack.c.bf16 %v2874_v55, %v2870_v7  ;;  %v18405_v55 = vld [vmem:[#allocation8_spill] sm:$0xff]  ;;  %v18416_v18 = vld [vmem:[#allocation14_spill] sm:$0xff] }
 0x365   :  { %8940 = vmatpush1.bf16.msra.mxu0 %v12915_v57  ;;  %18391 = vst [vmem:[#allocation117_spill] sm:$0xff] %v12932_v32  ;;  %v8823_v12 = vpack.c.bf16 %v18393_v52, %v18392_v47  ;;  %v12946_v58 = vpack.c.bf16 %v2880_v2, %v2876_v36  ;;  %v18398_v53 = vand.u32 4294901760, %v12094_v39  ;;  %v18400_v42 = vand.u32 4294901760, %v18399_v48  ;;  %v18419_v56 = vld [vmem:[#allocation80_spill] sm:$0xff]  ;;  %v18422_v11 = vld [vmem:[#allocation58_spill] sm:$0xff]  ;;  %v18425_v26 = vld [vmem:[#allocation45_spill] sm:$0xff] }
 0x366   :  { %8942 = vmatprep.subr.bf16.mxu0 %v12918_v3  ;;  %v8825_v21 = vpack.c.bf16 %v18395_v25, %v18394_v24  ;;  %18396 = vst [vmem:[#allocation118_spill] sm:$0xff] %v12943_v37  ;;  %v18401_v0 = vand.u32 4294901760, %v12099_v10  ;;  %v18402_v16 = vand.u32 4294901760, %v12101_v15  ;;  %v12957_v7 = vpack.c.bf16 %v2882_v54, %v2878_v34  ;;  %v18411_v15 = vld [vmem:[#allocation11_spill] sm:$0xff]  ;;  %v18413_v54 = vld [vmem:[#allocation13_spill] sm:$0xff]  ;;  %v18423_v31 = vld [vmem:[#allocation30_spill] sm:$0xff] }
 0x367   :  { %8820 = vmatpush1.bf16.msra.mxu1 %v8819_v38  ;;  %18397 = vst [vmem:[#allocation119_spill] sm:$0xff] %v12946_v58  ;;  %v8827_v1 = vpack.c.bf16 %v18400_v42, %v18398_v53  ;;  %v18404_v2 = vand.u32 4294901760, %v12103_v51  ;;  %v18406_v39 = vand.u32 4294901760, %v18405_v55  ;;  %v18408_v59 = vand.u32 4294901760, %v18407_v33  ;;  %v18415_v51 = vld [vmem:[#allocation23_spill] sm:$0xff]  ;;  %v18424_v38 = vld [vmem:[#allocation42_spill] sm:$0xff] }
 0x368   :  { %8822 = vmatprep.subr.bf16.mxu1 %v8821_v5  ;;  %v8829_v61 = vpack.c.bf16 %v18402_v16, %v18401_v0  ;;  %18403 = vst [vmem:[#allocation50_spill] sm:$0xff] %v12957_v7  ;;  %v18410_v10 = vand.u32 4294901760, %v18409_v30  ;;  %v18412_v34 = vand.u32 4294901760, %v18411_v15  ;;  %v18414_v62 = vand.u32 4294901760, %v18413_v54  ;;  %v18426_v50 = vld [vmem:[#allocation69_spill] sm:$0xff]  ;;  %v18427_v5 = vld [vmem:[#allocation75_spill] sm:$0xff] }
 0x369   :  { %8944 = vmatpush1.bf16.msra.mxu0 %v12929_v17  ;;  %v8831_v36 = vpack.c.bf16 %v18406_v39, %v18404_v2  ;;  %v18428_v47 = vld [vmem:[#allocation77_spill] sm:$0xff]  ;;  %v18431_v24 = vld [vmem:[#allocation102_spill] sm:$0xff]  ;;  %v18432_v25 = vld [vmem:[#allocation107_spill] sm:$0xff] }
 0x36a   :  { %8946 = vmatprep.subr.bf16.mxu0 %v12932_v32  ;;  %v8833_v14 = vpack.c.bf16 %v18410_v10, %v18408_v59  ;;  %v8835_v27 = vpack.c.bf16 %v18414_v62, %v18412_v34  ;;  %v18429_v52 = vld [vmem:[#allocation93_spill] sm:$0xff]  ;;  %v18434_v53 = vld [vmem:[#allocation59_spill] sm:$0xff]  ;;  %v18439_v16 = vld [vmem:[#allocation114_spill] sm:$0xff] }
 0x36b   :  { %8824 = vmatpush1.bf16.msra.mxu1 %v8823_v12  ;;  %v18430_v12 = vld [vmem:[#allocation99_spill] sm:$0xff]  ;;  %v18436_v42 = vld [vmem:[#allocation65_spill] sm:$0xff]  ;;  %v18441_v2 = vld [vmem:[#allocation116_spill] sm:$0xff] }
 0x36c   :  { %8826 = vmatprep.subr.bf16.mxu1 %v8825_v21  ;;  %v18433_v21 = vld [vmem:[#allocation110_spill] sm:$0xff]  ;;  %v18435_v48 = vld [vmem:[#allocation111_spill] sm:$0xff]  ;;  %v18438_v0 = vld [vmem:[#allocation113_spill] sm:$0xff] }
 0x36d   :  { %8948 = vmatpush1.bf16.msra.mxu0 %v12943_v37  ;;  %v18442_v55 = vld [vmem:[#allocation81_spill] sm:$0xff]  ;;  %v18443_v39 = vld [vmem:[#allocation87_spill] sm:$0xff]  ;;  %v18446_v59 = vld [vmem:[#allocation48_spill] sm:$0xff] }
 0x36e   :  { %8950 = vmatprep.subr.bf16.mxu0 %v12946_v58  ;;  %v18445_v33 = vld [vmem:[#allocation89_spill] sm:$0xff]  ;;  %v18447_v30 = vld [vmem:[#allocation15_spill] sm:$0xff]  ;;  %v18448_v10 = vld [vmem:[#allocation12_spill] sm:$0xff] }
 0x36f   :  { %8828 = vmatpush1.bf16.msra.mxu1 %v8827_v1  ;;  %v18437_v1 = vld [vmem:[#allocation112_spill] sm:$0xff]  ;;  %v2771_v15 = vld [vmem:[#allocation2 + $0x5b8] sm:$0xff] }
 0x370   :  { %8830 = vmatprep.subr.bf16.mxu1 %v8829_v61  ;;  %v18440_v61 = vld [vmem:[#allocation115_spill] sm:$0xff]  ;;  %v2888_v54 = vand.u32 4294901760, %v2771_v15  ;;  %v18479_v17 = vld [vmem:[#allocation76_spill] sm:$0xff] }
 0x371   :  { %8952 = vmatpush1.bf16.msra.mxu0 %v12957_v7  ;;  %v2768_v62 = vld [vmem:[#allocation2 + $0x5a0] sm:$0xff] }
 0x373   :  { %8832 = vmatpush1.bf16.msra.mxu1 %v8831_v36  ;;  %v18444_v36 = vld [vmem:[#allocation88_spill] sm:$0xff] }
 0x374   :  { %8834 = vmatprep.subr.bf16.mxu1 %v8833_v14  ;;  %v2769_v14 = vld [vmem:[#allocation2 + $0x5a8] sm:$0xff] }
 0x375   :  { %v2884_v34 = vand.u32 4294901760, %v2769_v14 }
 0x377   :  { %8836 = vmatpush1.bf16.msra.mxu1 %v8835_v27  ;;  %v2770_v27 = vld [vmem:[#allocation2 + $0x5b0] sm:$0xff] }
 0x378   :  { %8838 = vmatprep.subr.bf16.mxu1 %v18415_v51  ;;  %v2886_v51 = vand.u32 4294901760, %v2768_v62 }
 0x37a   :  { %2572 = vmatmul.mubr.f32.vlgmr.msra.gmra.mrb[0].mxu1 %v18416_v18 }
 0x37b   :  { %8840 = vmatpush1.bf16.msra.mxu1 %v18417_v20  ;;  %2707 = vmatprep.mubr.f32.mxu1 %v18418_v43  ;;  %v2890_v20 = vand.u32 4294901760, %v2770_v27  ;;  %v13008_v43 = vpack.c.bf16 %v2888_v54, %v2884_v34 }
 0x37c   :  { %8842 = vmatprep.subr.bf16.mxu1 %v18419_v56 }
 0x37d   :  { %18449 = vst [vmem:[#allocation8_spill] sm:$0xff] %v13008_v43  ;;  %v13010_v56 = vpack.c.bf16 %v2890_v20, %v2886_v51  ;;  %8954 = vmatprep.subr.bf16.mxu0 %v13008_v43 }
 0x37f   :  { %8844 = vmatpush1.bf16.msra.mxu1 %v18420_v35  ;;  %18450 = vst [vmem:[#allocation9_spill] sm:$0xff] %v13010_v56  ;;  %v2773_v35 = vld [vmem:[#allocation2 + $0x5c8] sm:$0xff]  ;;  %8956 = vmatpush1.bf16.msra.mxu0 %v13010_v56 }
 0x380   :  { %8846 = vmatprep.subr.bf16.mxu1 %v18421_v23  ;;  %v2775_v23 = vld [vmem:[#allocation2 + $0x5d8] sm:$0xff] }
 0x383   :  { %8848 = vmatpush1.bf16.msra.mxu1 %v18422_v11  ;;  %v2892_v11 = vand.u32 4294901760, %v2773_v35 }
 0x384   :  { %8850 = vmatprep.subr.bf16.mxu1 %v18423_v31  ;;  %v2896_v31 = vand.u32 4294901760, %v2775_v23 }
 0x386   :  { %v13044_v56 = vsub.f32 %v2775_v23, %v2896_v31 }
 0x387   :  { %8852 = vmatpush1.bf16.msra.mxu1 %v18424_v38  ;;  %v2772_v38 = vld [vmem:[#allocation2 + $0x5c0] sm:$0xff] }
 0x388   :  { %8854 = vmatprep.subr.bf16.mxu1 %v18425_v26  ;;  %v2894_v26 = vand.u32 4294901760, %v2772_v38 }
 0x38b   :  { %8856 = vmatpush1.bf16.msra.mxu1 %v18426_v50 }
 0x38c   :  { %8858 = vmatprep.subr.bf16.mxu1 %v18427_v5  ;;  %v13014_v5 = vpack.c.bf16 %v2896_v31, %v2892_v11 }
 0x38e   :  { %18451 = vst [vmem:[#allocation10_spill] sm:$0xff] %v13014_v5  ;;  %8958 = vmatprep.subr.bf16.mxu0 %v13014_v5  ;;  %v13039_v5 = vsub.f32 %v2770_v27, %v2890_v20 }
 0x38f   :  { %8860 = vmatpush1.bf16.msra.mxu1 %v18428_v47 }
 0x390   :  { %8862 = vmatprep.subr.bf16.mxu1 %v18429_v52  ;;  %v2777_v52 = vld [vmem:[#allocation2 + $0x5e8] sm:$0xff]  ;;  %18458 = vst [vmem:[#allocation27_spill] sm:$0xff] %v13039_v5 }
 0x393   :  { %8864 = vmatpush1.bf16.msra.mxu1 %v18430_v12  ;;  %v2779_v12 = vld [vmem:[#allocation2 + $0x5f8] sm:$0xff] }
 0x394   :  { %8866 = vmatprep.subr.bf16.mxu1 %v18431_v24  ;;  %v2900_v24 = vand.u32 4294901760, %v2777_v52 }
 0x397   :  { %8868 = vmatpush1.bf16.msra.mxu1 %v18432_v25  ;;  %v2904_v25 = vand.u32 4294901760, %v2779_v12 }
 0x398   :  { %8870 = vmatprep.subr.bf16.mxu1 %v18433_v21  ;;  %v2776_v21 = vld [vmem:[#allocation2 + $0x5e0] sm:$0xff] }
 0x39b   :  { %8872 = vmatpush1.bf16.msra.mxu1 %v18434_v53  ;;  %v2778_v53 = vld [vmem:[#allocation2 + $0x5f0] sm:$0xff] }
 0x39c   :  { %8874 = vmatprep.subr.bf16.mxu1 %v18435_v48  ;;  %v18453_v48 = vld [vmem:[#allocation19_spill] sm:$0xff] }
 0x39f   :  { %8876 = vmatpush1.bf16.msra.mxu1 %v18436_v42  ;;  %v16883_v42 = vand.u32 4294901760, %v18453_v48 }
 0x3a0   :  { %8878 = vmatprep.subr.bf16.mxu1 %v18437_v1  ;;  %v18454_v1 = vld [vmem:[#allocation21_spill] sm:$0xff] }
 0x3a3   :  { %8880 = vmatpush1.bf16.msra.mxu1 %v18438_v0  ;;  %v16886_v0 = vand.u32 4294901760, %v18454_v1 }
 0x3a4   :  { %8882 = vmatprep.subr.bf16.mxu1 %v18439_v16  ;;  %v2902_v16 = vand.u32 4294901760, %v2776_v21 }
 0x3a7   :  { %8884 = vmatpush1.bf16.msra.mxu1 %v18440_v61  ;;  %v2906_v61 = vand.u32 4294901760, %v2778_v53 }
 0x3a8   :  { %8886 = vmatprep.subr.bf16.mxu1 %v18441_v2  ;;  %v13022_v2 = vpack.c.bf16 %v2904_v25, %v2900_v24 }
 0x3aa   :  { %18455 = vst [vmem:[#allocation13_spill] sm:$0xff] %v13022_v2 }
 0x3ab   :  { %8888 = vmatpush1.bf16.msra.mxu1 %v18442_v55  ;;  %v2928_v55 = vsub.f32 %v18453_v48, %v16883_v42  ;;  %v13042_v42 = vsub.f32 %v2773_v35, %v2892_v11  ;;  %v18466_v11 = vld [vmem:[#allocation39_spill] sm:$0xff] }
 0x3ac   :  { %8890 = vmatprep.subr.bf16.mxu1 %v18443_v39  ;;  %v2940_v39 = vsub.f32 %v18454_v1, %v16886_v0  ;;  %v13046_v0 = vsub.f32 %v2772_v38, %v2894_v26  ;;  %v16893_v31 = vand.u32 4294901760, %v18466_v11  ;;  %v18467_v38 = vld [vmem:[#allocation49_spill] sm:$0xff] }
 0x3af   :  { %8892 = vmatpush1.bf16.msra.mxu1 %v18444_v36  ;;  %v13030_v36 = vpack.c.bf16 %v2906_v61, %v2902_v16 }
 0x3b0   :  { %8894 = vmatprep.subr.bf16.mxu1 %v18445_v33  ;;  %v2929_v33 = vand.u32 4294901760, %v2928_v55  ;;  %v13050_v55 = vsub.f32 %v2777_v52, %v2900_v24  ;;  %v18469_v24 = vld [vmem:[#allocation57_spill] sm:$0xff] }
 0x3b1   :  { %18456 = vst [vmem:[#allocation23_spill] sm:$0xff] %v13030_v36 }
 0x3b2   :  { %18460 = vst [vmem:[#allocation80_spill] sm:$0xff] %v13050_v55 }
 0x3b3   :  { %8896 = vmatpush1.bf16.msra.mxu1 %v18446_v59  ;;  %v2941_v59 = vand.u32 4294901760, %v2940_v39 }
 0x3b4   :  { %8898 = vmatprep.subr.bf16.mxu1 %v18447_v30  ;;  %v13033_v30 = vsub.f32 %v2769_v14, %v2884_v34  ;;  %v13052_v14 = vsub.f32 %v2779_v12, %v2904_v25  ;;  %v13056_v34 = vsub.f32 %v2778_v53, %v2906_v61  ;;  %v18475_v53 = vld [vmem:[#allocation74_spill] sm:$0xff] }
 0x3b6   :  { %18457 = vst [vmem:[#allocation14_spill] sm:$0xff] %v13033_v30  ;;  %18461 = vst [vmem:[#allocation52_spill] sm:$0xff] %v13052_v14 }
 0x3b7   :  { %8900 = vmatpush1.bf16.msra.mxu1 %v18448_v10  ;;  %v13035_v10 = vsub.f32 %v2771_v15, %v2888_v54  ;;  %v13054_v15 = vsub.f32 %v2776_v21, %v2902_v16  ;;  %18463 = vst [vmem:[#allocation58_spill] sm:$0xff] %v13056_v34  ;;  %v8965_v54 = vpack.c.bf16 %v2941_v59, %v2929_v33  ;;  %v18470_v21 = vld [vmem:[#allocation60_spill] sm:$0xff]  ;;  %v18471_v16 = vld [vmem:[#allocation66_spill] sm:$0xff] }
 0x3b8   :  { %v18477_v7 = vand.u32 4294901760, %v18470_v21 }
 0x3b9   :  { %18462 = vst [vmem:[#allocation53_spill] sm:$0xff] %v13054_v15 }
 0x3ba   :  { %2709 = vmatmul.mubr.f32.vlgmr.msra.gmra.mrb[0].mxu1 %v18416_v18  ;;  %v2774_v18 = vld [vmem:[#allocation2 + $0x5d0] sm:$0xff] }
 0x3bb   :  { %v2898_v50 = vand.u32 4294901760, %v2774_v18 }
 0x3bd   :  { %v13016_v47 = vpack.c.bf16 %v2898_v50, %v2894_v26  ;;  %v13048_v43 = vsub.f32 %v2774_v18, %v2898_v50  ;;  %v16898_v18 = vand.u32 4294901760, %v18467_v38  ;;  %v16901_v50 = vand.u32 4294901760, %v12583_v49 }
 0x3bf   :  { %18452 = vst [vmem:[#allocation11_spill] sm:$0xff] %v13016_v47  ;;  %8960 = vmatpush1.bf16.msra.mxu0 %v13016_v47  ;;  %v13037_v47 = vsub.f32 %v2768_v62, %v2886_v51  ;;  %18459 = vst [vmem:[#allocation16_spill] sm:$0xff] %v13048_v43  ;;  %v18464_v62 = vld [vmem:[#allocation22_spill] sm:$0xff]  ;;  %v18465_v51 = vld [vmem:[#allocation32_spill] sm:$0xff]  ;;  %v2958_v61 = vsub.f32 %v12583_v49, %v16901_v50 }
 0x3c0   :  { %8962 = vmatprep.subr.bf16.mxu0 %v13022_v2  ;;  %v16890_v27 = vand.u32 4294901760, %v18464_v62  ;;  %v16889_v20 = vand.u32 4294901760, %v18465_v51 }
 0x3c1   :  { %v2959_v57 = vand.u32 4294901760, %v2958_v61 }
 0x3c2   :  { %v2934_v35 = vsub.f32 %v18464_v62, %v16890_v27  ;;  %v2946_v23 = vsub.f32 %v18465_v51, %v16889_v20  ;;  %v2964_v27 = vsub.f32 %v18467_v38, %v16898_v18  ;;  %v2976_v18 = vsub.f32 %v18470_v21, %v18477_v7 }
 0x3c3   :  { %8964 = vmatpush1.bf16.msra.mxu0 %v13030_v36 }
 0x3c4   :  { %8966 = vmatprep.subr.bf16.mxu0 %v8965_v54  ;;  %v2935_v33 = vand.u32 4294901760, %v2934_v35  ;;  %v2947_v59 = vand.u32 4294901760, %v2946_v23  ;;  %v2952_v54 = vsub.f32 %v18466_v11, %v16893_v31  ;;  %v18474_v35 = vld [vmem:[#allocation71_spill] sm:$0xff]  ;;  %v2965_v32 = vand.u32 4294901760, %v2964_v27 }
 0x3c6   :  { %v8967_v37 = vpack.c.bf16 %v2947_v59, %v2935_v33  ;;  %v2953_v23 = vand.u32 4294901760, %v2952_v54  ;;  %v18481_v33 = vand.u32 4294901760, %v18475_v53 }
 0x3c8   :  { %v2994_v59 = vsub.f32 %v18475_v53, %v18481_v33  ;;  %v18484_v33 = vand.u32 4294901760, %v12610_v63 }
 0x48d   :  { %v2710_v26 = vpop.f32.mrb[0].mxu1 }
 0x48e   :  { %v13069_v52 = vand.u32 4294901760, %v2710_v26  ;;  %v2712_v12 = vpop.f32.mrb[1].mxu1 }
 0x48f   :  { %v13074_v39 = vand.u32 4294901760, %v2712_v12 }
 0x490   :  { %18468 = vst [vmem:[#allocation30_spill] sm:$0xff] %v13069_v52  ;;  %v13080_v20 = vsub.f32 %v2710_v26, %v13069_v52  ;;  %v18476_v26 = vand.u32 4294901760, %v18469_v24 }
 0x491   :  { %18472 = vst [vmem:[#allocation42_spill] sm:$0xff] %v13074_v39  ;;  %v13086_v25 = vsub.f32 %v2712_v12, %v13074_v39  ;;  %v18478_v12 = vand.u32 4294901760, %v18471_v16 }
 0x492   :  { %18473 = vst [vmem:[#allocation45_spill] sm:$0xff] %v13080_v20  ;;  %v16914_v31 = vand.u32 4294901760, %v13080_v20  ;;  %v2970_v2 = vsub.f32 %v18469_v24, %v18476_v26  ;;  %v18485_v26 = vld [vmem:[#allocation28_spill] sm:$0xff] }
 0x493   :  { %v2988_v58 = vsub.f32 %v18471_v16, %v18478_v12  ;;  %v16921_v50 = vand.u32 4294901760, %v13086_v25  ;;  %v18480_v12 = vand.u32 4294901760, %v18474_v35  ;;  %v16933_v3 = vand.u32 4294901760, %v18485_v26 }
 0x494   :  { %v2917_v36 = vsub.f32 %v13080_v20, %v16914_v31  ;;  %v2971_v54 = vand.u32 4294901760, %v2970_v2  ;;  %v2977_v31 = vand.u32 4294901760, %v2976_v18  ;;  %v8969_v20 = vpack.c.bf16 %v2965_v32, %v2953_v23  ;;  %v18487_v23 = vld [vmem:[#allocation83_spill] sm:$0xff] }
 0x495   :  { %v2911_v7 = vsub.f32 %v13086_v25, %v16921_v50  ;;  %v2982_v9 = vsub.f32 %v18474_v35, %v18480_v12  ;;  %v2989_v27 = vand.u32 4294901760, %v2988_v58  ;;  %v18483_v12 = vand.u32 4294901760, %v18479_v17 }
 0x496   :  { %v2918_v50 = vand.u32 4294901760, %v2917_v36  ;;  %v3012_v2 = vsub.f32 %v12610_v63, %v18484_v33  ;;  %v2995_v18 = vand.u32 4294901760, %v2994_v59  ;;  %v8971_v44 = vpack.c.bf16 %v2971_v54, %v2959_v57 }
 0x497   :  { %v2912_v28 = vand.u32 4294901760, %v2911_v7  ;;  %v3000_v35 = vsub.f32 %v18479_v17, %v18483_v12  ;;  %v2983_v58 = vand.u32 4294901760, %v2982_v9  ;;  %v16930_v7 = vand.u32 4294901760, %v12642_v29  ;;  %v18488_v12 = vld [vmem:[#allocation103_spill] sm:$0xff] }
 0x498   :  { %v18486_v36 = vand.u32 4294901760, %v18482_v8  ;;  %v18490_v59 = vand.u32 4294901760, %v12628_v6  ;;  %v18491_v57 = vand.u32 4294901760, %v12639_v46  ;;  %v8973_v33 = vpack.c.bf16 %v2989_v27, %v2977_v31  ;;  %v18494_v31 = vld [vmem:[#allocation105_spill] sm:$0xff]  ;;  %v18495_v27 = vld [vmem:[#allocation55_spill] sm:$0xff] }
 0x499   :  { %2913 = vmatprep.mubr.f32.mxu0 %v2912_v28  ;;  %v18489_v28 = vand.u32 4294901760, %v12626_v41  ;;  %v3013_v61 = vand.u32 4294901760, %v3012_v2  ;;  %v8975_v17 = vpack.c.bf16 %v2995_v18, %v2983_v58  ;;  %v16947_v2 = vand.u32 4294901760, %v18495_v27 }
 0x49a   :  { %2919 = vmatmul.mubr.f32.vlgmr.msra.gmra.mrb[2].mxu0 %v2918_v50  ;;  %v3006_v32 = vsub.f32 %v18482_v8, %v18486_v36  ;;  %v3024_v50 = vsub.f32 %v12628_v6, %v18490_v59  ;;  %v3036_v54 = vsub.f32 %v12639_v46, %v18491_v57  ;;  %v3001_v36 = vand.u32 4294901760, %v3000_v35  ;;  %v18497_v46 = vld [vmem:[#allocation109_spill] sm:$0xff]  ;;  %v18498_v8 = vld [vmem:[#allocation84_spill] sm:$0xff] }
 0x49b   :  { %8968 = vmatpush1.bf16.msra.mxu0 %v8967_v37  ;;  %3310 = vmatprep.mubr.f32.mxu0 %v13074_v39  ;;  %v3018_v9 = vsub.f32 %v12626_v41, %v18489_v28  ;;  %v3030_v37 = vsub.f32 %v12642_v29, %v16930_v7  ;;  %v3042_v28 = vsub.f32 %v18485_v26, %v16933_v3  ;;  %v18492_v39 = vand.u32 4294901760, %v18487_v23  ;;  %v18496_v3 = vld [vmem:[#allocation106_spill] sm:$0xff] }
 0x49c   :  { %8970 = vmatprep.subr.bf16.mxu0 %v8969_v20  ;;  %v18493_v6 = vand.u32 4294901760, %v18488_v12  ;;  %v3007_v58 = vand.u32 4294901760, %v3006_v32  ;;  %v3025_v57 = vand.u32 4294901760, %v3024_v50  ;;  %v3037_v7 = vand.u32 4294901760, %v3036_v54 }
 0x49d   :  { %v3048_v59 = vsub.f32 %v18487_v23, %v18492_v39  ;;  %v3019_v18 = vand.u32 4294901760, %v3018_v9  ;;  %v8977_v29 = vpack.c.bf16 %v3013_v61, %v3001_v36  ;;  %v16946_v26 = vand.u32 4294901760, %v18496_v3  ;;  %v18501_v36 = vld [vmem:[#allocation35_spill] sm:$0xff] }
 0x49e   :  { %v3060_v20 = vsub.f32 %v18488_v12, %v18493_v6  ;;  %v16945_v41 = vand.u32 4294901760, %v18497_v46  ;;  %v3031_v39 = vand.u32 4294901760, %v3030_v37  ;;  %v3043_v23 = vand.u32 4294901760, %v3042_v28  ;;  %v18499_v6 = vld [vmem:[#allocation33_spill] sm:$0xff]  ;;  %v18502_v28 = vld [vmem:[#allocation38_spill] sm:$0xff] }
 0x49f   :  { %8972 = vmatpush1.bf16.msra.mxu0 %v8971_v44  ;;  %v16950_v63 = vand.u32 4294901760, %v18498_v8  ;;  %v16952_v12 = vand.u32 4294901760, %v18499_v6  ;;  %v3049_v35 = vand.u32 4294901760, %v3048_v59  ;;  %v18500_v44 = vand.u32 4294901760, %v18494_v31  ;;  %v18506_v59 = vld [vmem:[#allocation46_spill] sm:$0xff] }
 0x4a0   :  { %8974 = vmatprep.subr.bf16.mxu0 %v8973_v33  ;;  %v3061_v53 = vand.u32 4294901760, %v3060_v20  ;;  %v3066_v61 = vsub.f32 %v18495_v27, %v16947_v2  ;;  %v8979_v9 = vpack.c.bf16 %v3019_v18, %v3007_v58  ;;  %v8981_v50 = vpack.c.bf16 %v3037_v7, %v3025_v57  ;;  %v18503_v57 = vld [vmem:[#allocation36_spill] sm:$0xff] }
 0x4a1   :  { %v3054_v32 = vsub.f32 %v18494_v31, %v18500_v44  ;;  %v3072_v54 = vsub.f32 %v18496_v3, %v16946_v26  ;;  %v3084_v33 = vsub.f32 %v18497_v46, %v16945_v41  ;;  %v3078_v20 = vsub.f32 %v18498_v8, %v16950_v63  ;;  %v18504_v41 = vld [vmem:[#allocation43_spill] sm:$0xff]  ;;  %v18505_v2 = vld [vmem:[#allocation44_spill] sm:$0xff] }
 0x4a2   :  { %v8985_v7 = vpack.c.bf16 %v3061_v53, %v3049_v35  ;;  %v3067_v18 = vand.u32 4294901760, %v3066_v61  ;;  %v18507_v8 = vand.u32 4294901760, %v18501_v36  ;;  %v18508_v53 = vand.u32 4294901760, %v18502_v28  ;;  %v18511_v44 = vld [vmem:[#allocation92_spill] sm:$0xff] }
 0x4a3   :  { %8976 = vmatpush1.bf16.msra.mxu0 %v8975_v17  ;;  %v8983_v17 = vpack.c.bf16 %v3043_v23, %v3031_v39  ;;  %v3055_v58 = vand.u32 4294901760, %v3054_v32  ;;  %v3073_v3 = vand.u32 4294901760, %v3072_v54  ;;  %v3085_v63 = vand.u32 4294901760, %v3084_v33  ;;  %v18509_v32 = vld [vmem:[#allocation72_spill] sm:$0xff] }
 0x4a4   :  { %8978 = vmatprep.subr.bf16.mxu0 %v8977_v29  ;;  %v3090_v29 = vsub.f32 %v18499_v6, %v16952_v12  ;;  %v3096_v12 = vsub.f32 %v18501_v36, %v18507_v8  ;;  %v3108_v23 = vsub.f32 %v18502_v28, %v18508_v53  ;;  %v3079_v35 = vand.u32 4294901760, %v3078_v20 }
 0x4a5   :  { %v16957_v61 = vand.u32 4294901760, %v18509_v32  ;;  %v8987_v37 = vpack.c.bf16 %v3067_v18, %v3055_v58  ;;  %v18513_v33 = vand.u32 4294901760, %v18503_v57  ;;  %v18514_v36 = vand.u32 4294901760, %v18504_v41 }
 0x4a6   :  { %v3091_v39 = vand.u32 4294901760, %v3090_v29  ;;  %v18515_v20 = vand.u32 4294901760, %v18505_v2  ;;  %v18516_v26 = vand.u32 4294901760, %v18506_v59  ;;  %v8989_v18 = vpack.c.bf16 %v3085_v63, %v3073_v3  ;;  %v18520_v63 = vld [vmem:[#allocation96_spill] sm:$0xff] }
 0x4a7   :  { %8980 = vmatpush1.bf16.msra.mxu0 %v8979_v9  ;;  %v18510_v9 = vld [vmem:[#allocation20_spill] sm:$0xff]  ;;  %v3102_v8 = vsub.f32 %v18503_v57, %v18513_v33  ;;  %v3114_v53 = vsub.f32 %v18504_v41, %v18514_v36  ;;  %v3097_v54 = vand.u32 4294901760, %v3096_v12  ;;  %v3126_v33 = vsub.f32 %v18509_v32, %v16957_v61  ;;  %v18521_v12 = vld [vmem:[#allocation97_spill] sm:$0xff] }
 0x4a8   :  { %8982 = vmatprep.subr.bf16.mxu0 %v8981_v50  ;;  %v18512_v50 = vld [vmem:[#allocation94_spill] sm:$0xff]  ;;  %v3120_v29 = vsub.f32 %v18505_v2, %v18515_v20  ;;  %v3132_v58 = vsub.f32 %v18506_v59, %v18516_v26  ;;  %v8991_v46 = vpack.c.bf16 %v3091_v39, %v3079_v35  ;;  %v18517_v57 = vand.u32 4294901760, %v18510_v9 }
 0x4a9   :  { %v18518_v41 = vand.u32 4294901760, %v18511_v44  ;;  %v18519_v2 = vand.u32 4294901760, %v18512_v50  ;;  %v3115_v35 = vand.u32 4294901760, %v3114_v53  ;;  %v16965_v59 = vand.u32 4294901760, %v12832_v40 }
 0x4aa   :  { %v3138_v36 = vsub.f32 %v18510_v9, %v18517_v57  ;;  %v3121_v39 = vand.u32 4294901760, %v3120_v29  ;;  %v3133_v61 = vand.u32 4294901760, %v3132_v58  ;;  %v18522_v57 = vld [vmem:[#allocation98_spill] sm:$0xff]  ;;  %v16968_v28 = vand.u32 4294901760, %v12842_v13 }
 0x4ab   :  { %8984 = vmatpush1.bf16.msra.mxu0 %v8983_v17  ;;  %v3109_v17 = vand.u32 4294901760, %v3108_v23  ;;  %v3144_v20 = vsub.f32 %v18511_v44, %v18518_v41  ;;  %v3156_v26 = vsub.f32 %v18512_v50, %v18519_v2  ;;  %v3103_v23 = vand.u32 4294901760, %v3102_v8  ;;  %v18523_v2 = vld [vmem:[#allocation101_spill] sm:$0xff] }
 0x4ac   :  { %8986 = vmatprep.subr.bf16.mxu0 %v8985_v7  ;;  %v16967_v7 = vand.u32 4294901760, %v18521_v12  ;;  %v16966_v9 = vand.u32 4294901760, %v18522_v57  ;;  %v3127_v41 = vand.u32 4294901760, %v3126_v33  ;;  %v3139_v44 = vand.u32 4294901760, %v3138_v36  ;;  %v18526_v36 = vld [vmem:[#allocation91_spill] sm:$0xff] }
 0x4ad   :  { %v8993_v32 = vpack.c.bf16 %v3109_v17, %v3097_v54  ;;  %v16969_v50 = vand.u32 4294901760, %v18523_v2  ;;  %v3145_v3 = vand.u32 4294901760, %v3144_v20  ;;  %v3157_v6 = vand.u32 4294901760, %v3156_v26  ;;  %v18525_v17 = vld [vmem:[#allocation61_spill] sm:$0xff] }
 0x4ae   :  { %v3162_v54 = vsub.f32 %v18521_v12, %v16967_v7  ;;  %v8995_v53 = vpack.c.bf16 %v3115_v35, %v3103_v23  ;;  %v8997_v29 = vpack.c.bf16 %v3133_v61, %v3121_v39  ;;  %v3168_v58 = vsub.f32 %v18522_v57, %v16966_v9  ;;  %v18527_v39 = vld [vmem:[#allocation17_spill] sm:$0xff] }
 0x4af   :  { %8988 = vmatpush1.bf16.msra.mxu0 %v8987_v37  ;;  %v18524_v37 = vand.u32 4294901760, %v18520_v63  ;;  %v16970_v33 = vand.u32 4294901760, %v18525_v17  ;;  %v3174_v26 = vsub.f32 %v12842_v13, %v16968_v28  ;;  %v9001_v61 = vpack.c.bf16 %v3157_v6, %v3145_v3 }
 0x4b0   :  { %8990 = vmatprep.subr.bf16.mxu0 %v8989_v18  ;;  %v3180_v18 = vsub.f32 %v12832_v40, %v16965_v59  ;;  %v3163_v35 = vand.u32 4294901760, %v3162_v54  ;;  %v16972_v59 = vand.u32 4294901760, %v12870_v45  ;;  %v16973_v9 = vand.u32 4294901760, %v12880_v19 }
 0x4b1   :  { %v3150_v8 = vsub.f32 %v18520_v63, %v18524_v37  ;;  %v16971_v37 = vand.u32 4294901760, %v18527_v39  ;;  %v3169_v20 = vand.u32 4294901760, %v3168_v58  ;;  %v18528_v6 = vand.u32 4294901760, %v18526_v36 }
 0x4b2   :  { %v3181_v28 = vand.u32 4294901760, %v3180_v18  ;;  %v3175_v3 = vand.u32 4294901760, %v3174_v26  ;;  %v16974_v54 = vand.u32 4294901760, %v12893_v60  ;;  %v16976_v7 = vand.u32 4294901760, %v13033_v30 }
 0x4b3   :  { %8992 = vmatpush1.bf16.msra.mxu0 %v8991_v46  ;;  %v3186_v46 = vsub.f32 %v18523_v2, %v16969_v50  ;;  %v3151_v23 = vand.u32 4294901760, %v3150_v8  ;;  %v3192_v50 = vsub.f32 %v18525_v17, %v16970_v33  ;;  %v16975_v8 = vand.u32 4294901760, %v12891_v4 }
 0x4b4   :  { %8994 = vmatprep.subr.bf16.mxu0 %v8993_v32  ;;  %v8999_v32 = vpack.c.bf16 %v3139_v44, %v3127_v41  ;;  %v3204_v44 = vsub.f32 %v18526_v36, %v18528_v6  ;;  %v3198_v58 = vsub.f32 %v18527_v39, %v16971_v37  ;;  %v3210_v18 = vsub.f32 %v12870_v45, %v16972_v59 }
 0x4b5   :  { %v3187_v41 = vand.u32 4294901760, %v3186_v46  ;;  %v3216_v26 = vsub.f32 %v12880_v19, %v16973_v9  ;;  %v18529_v46 = vand.u32 4294901760, %v12882_v22  ;;  %v3193_v6 = vand.u32 4294901760, %v3192_v50 }
 0x4b6   :  { %v3222_v37 = vsub.f32 %v12891_v4, %v16975_v8  ;;  %v3234_v59 = vsub.f32 %v12893_v60, %v16974_v54  ;;  %v3240_v9 = vsub.f32 %v13033_v30, %v16976_v7  ;;  %v16992_v50 = vand.u32 4294901760, %v13039_v5 }
 0x4b7   :  { %8996 = vmatpush1.bf16.msra.mxu0 %v8995_v53  ;;  %v9003_v53 = vpack.c.bf16 %v3163_v35, %v3151_v23  ;;  %v3228_v23 = vsub.f32 %v12882_v22, %v18529_v46  ;;  %v9005_v35 = vpack.c.bf16 %v3181_v28, %v3169_v20  ;;  %v9007_v33 = vpack.c.bf16 %v3187_v41, %v3175_v3 }
 0x4b8   :  { %8998 = vmatprep.subr.bf16.mxu0 %v8997_v29  ;;  %v16983_v29 = vand.u32 4294901760, %v13035_v10  ;;  %v16993_v28 = vand.u32 4294901760, %v13037_v47  ;;  %v3199_v20 = vand.u32 4294901760, %v3198_v58  ;;  %v3217_v3 = vand.u32 4294901760, %v3216_v26 }
 0x4b9   :  { %v3229_v41 = vand.u32 4294901760, %v3228_v23  ;;  %v16991_v54 = vand.u32 4294901760, %v13042_v42  ;;  %v16984_v8 = vand.u32 4294901760, %v13044_v56  ;;  %v3223_v7 = vand.u32 4294901760, %v3222_v37 }
 0x4ba   :  { %v3235_v30 = vand.u32 4294901760, %v3234_v59  ;;  %v3241_v60 = vand.u32 4294901760, %v3240_v9  ;;  %v16990_v26 = vand.u32 4294901760, %v13046_v0  ;;  %v16986_v23 = vand.u32 4294901760, %v13048_v43 }
 0x4bb   :  { %9000 = vmatpush1.bf16.msra.mxu0 %v8999_v32  ;;  %v3205_v32 = vand.u32 4294901760, %v3204_v44  ;;  %v3211_v44 = vand.u32 4294901760, %v3210_v18  ;;  %v9013_v18 = vpack.c.bf16 %v3229_v41, %v3217_v3  ;;  %v3264_v59 = vsub.f32 %v13042_v42, %v16991_v54 }
 0x4bc   :  { %9002 = vmatprep.subr.bf16.mxu0 %v9001_v61  ;;  %v3252_v61 = vsub.f32 %v13035_v10, %v16983_v29  ;;  %v3246_v29 = vsub.f32 %v13037_v47, %v16993_v28  ;;  %v3276_v9 = vsub.f32 %v13044_v56, %v16984_v8  ;;  %v16985_v37 = vand.u32 4294901760, %v13050_v55 }
 0x4bd   :  { %v9009_v46 = vpack.c.bf16 %v3205_v32, %v3193_v6  ;;  %v9011_v58 = vpack.c.bf16 %v3211_v44, %v3199_v20  ;;  %v3270_v20 = vsub.f32 %v13046_v0, %v16990_v26  ;;  %v3282_v44 = vsub.f32 %v13048_v43, %v16986_v23  ;;  %v18547_v26 = vld [vmem:[#allocation38_spill] sm:$0xff] }
 0x4be   :  { %v3253_v4 = vand.u32 4294901760, %v3252_v61  ;;  %v3247_v32 = vand.u32 4294901760, %v3246_v29  ;;  %v16989_v3 = vand.u32 4294901760, %v13054_v15  ;;  %v16988_v41 = vand.u32 4294901760, %v13056_v34 }
 0x4bf   :  { %9004 = vmatpush1.bf16.msra.mxu0 %v9003_v53  ;;  %v3258_v53 = vsub.f32 %v13039_v5, %v16992_v50  ;;  %v3277_v8 = vand.u32 4294901760, %v3276_v9  ;;  %v3283_v29 = vand.u32 4294901760, %v3282_v44  ;;  %v18549_v50 = vld [vmem:[#allocation43_spill] sm:$0xff] }
 0x4c0   :  { %9006 = vmatprep.subr.bf16.mxu0 %v9005_v35  ;;  %v16987_v35 = vand.u32 4294901760, %v13052_v14  ;;  %v9017_v6 = vpack.c.bf16 %v3253_v4, %v3241_v60  ;;  %v3288_v4 = vsub.f32 %v13050_v55, %v16985_v37 }
 0x4c1   :  { %v3259_v61 = vand.u32 4294901760, %v3258_v53  ;;  %v3294_v53 = vsub.f32 %v13054_v15, %v16989_v3 }
 0x4c2   :  { %v3300_v60 = vsub.f32 %v13052_v14, %v16987_v35 }
 0x4c3   :  { %9008 = vmatpush1.bf16.msra.mxu0 %v9007_v33  ;;  %v9015_v33 = vpack.c.bf16 %v3235_v30, %v3223_v7  ;;  %v9019_v30 = vpack.c.bf16 %v3259_v61, %v3247_v32  ;;  %v3271_v7 = vand.u32 4294901760, %v3270_v20  ;;  %v3295_v23 = vand.u32 4294901760, %v3294_v53  ;;  %v18536_v53 = vld [vmem:[#allocation24_spill] sm:$0xff] }
 0x4c4   :  { %9010 = vmatprep.subr.bf16.mxu0 %v9009_v46  ;;  %v3265_v46 = vand.u32 4294901760, %v3264_v59  ;;  %v3289_v59 = vand.u32 4294901760, %v3288_v4  ;;  %v3301_v9 = vand.u32 4294901760, %v3300_v60  ;;  %v9029_v61 = vpack.c.bf16 %v18454_v1, %v18453_v48  ;;  %v18533_v4 = vld [vmem:[#allocation82_spill] sm:$0xff] }
 0x4c5   :  { %v9023_v37 = vpack.c.bf16 %v3283_v29, %v3271_v7  ;;  %v9031_v20 = vpack.c.bf16 %v18465_v51, %v18464_v62  ;;  %v18535_v7 = vld [vmem:[#allocation86_spill] sm:$0xff] }
 0x4c7   :  { %9012 = vmatpush1.bf16.msra.mxu0 %v9011_v58  ;;  %v3306_v58 = vsub.f32 %v13056_v34, %v16988_v41  ;;  %v18545_v41 = vld [vmem:[#allocation33_spill] sm:$0xff] }
 0x4c8   :  { %9014 = vmatprep.subr.bf16.mxu0 %v9013_v18  ;;  %v9021_v18 = vpack.c.bf16 %v3277_v8, %v3265_v46  ;;  %v9033_v8 = vpack.c.bf16 %v18467_v38, %v18466_v11  ;;  %v18532_v46 = vld [vmem:[#allocation76_spill] sm:$0xff] }
 0x4c9   :  { %v3307_v35 = vand.u32 4294901760, %v3306_v58  ;;  %v9041_v60 = vpack.c.bf16 %v18533_v4, %v18532_v46  ;;  %v18537_v58 = vld [vmem:[#allocation25_spill] sm:$0xff] }
 0x4cb   :  { %9016 = vmatpush1.bf16.msra.mxu0 %v9015_v33  ;;  %v9025_v33 = vpack.c.bf16 %v3301_v9, %v3289_v59  ;;  %v9027_v32 = vpack.c.bf16 %v3307_v35, %v3295_v23  ;;  %v9035_v23 = vpack.c.bf16 %v18469_v24, %v12583_v49  ;;  %v18530_v35 = vld [vmem:[#allocation71_spill] sm:$0xff]  ;;  %v18538_v59 = vld [vmem:[#allocation26_spill] sm:$0xff]  ;;  %v18539_v9 = vld [vmem:[#allocation28_spill] sm:$0xff] }
 0x4cc   :  { %9018 = vmatprep.subr.bf16.mxu0 %v9017_v6  ;;  %v18531_v6 = vld [vmem:[#allocation74_spill] sm:$0xff] }
 0x4cd   :  { %v9039_v44 = vpack.c.bf16 %v18531_v6, %v18530_v35 }
 0x4cf   :  { %9020 = vmatpush1.bf16.msra.mxu0 %v9019_v30  ;;  %v18534_v30 = vld [vmem:[#allocation85_spill] sm:$0xff] }
 0x4d0   :  { %9022 = vmatprep.subr.bf16.mxu0 %v9021_v18  ;;  %v9043_v29 = vpack.c.bf16 %v18535_v7, %v18534_v30  ;;  %v9045_v18 = vpack.c.bf16 %v18537_v58, %v18536_v53 }
 0x4d3   :  { %9024 = vmatpush1.bf16.msra.mxu0 %v9023_v37  ;;  %v9037_v37 = vpack.c.bf16 %v18471_v16, %v18470_v21 }
 0x4d4   :  { %9026 = vmatprep.subr.bf16.mxu0 %v9025_v33  ;;  %v9047_v33 = vpack.c.bf16 %v18539_v9, %v18538_v59 }
 0x4d7   :  { %9028 = vmatpush1.bf16.msra.mxu0 %v9027_v32  ;;  %v18540_v32 = vld [vmem:[#allocation83_spill] sm:$0xff] }
 0x4d8   :  { %9030 = vmatprep.subr.bf16.mxu0 %v9029_v61  ;;  %v18541_v61 = vld [vmem:[#allocation103_spill] sm:$0xff] }
 0x4da   :  { %3312 = vmatmul.mubr.f32.vlgmr.msra.gmra.mrb[2].mxu0 %v13069_v52  ;;  %v18551_v52 = vld [vmem:[#allocation46_spill] sm:$0xff] }
 0x4db   :  { %9032 = vmatpush1.bf16.msra.mxu0 %v9031_v20  ;;  %3512 = vmatprep.mubr.f32.mxu0 %v13086_v25  ;;  %v9049_v20 = vpack.c.bf16 %v18541_v61, %v18540_v32 }
 0x4dc   :  { %9034 = vmatprep.subr.bf16.mxu0 %v9033_v8  ;;  %v9051_v8 = vpack.c.bf16 %v18495_v27, %v18494_v31  ;;  %v18553_v31 = vld [vmem:[#allocation20_spill] sm:$0xff] }
 0x4df   :  { %9036 = vmatpush1.bf16.msra.mxu0 %v9035_v23  ;;  %v18542_v23 = vld [vmem:[#allocation106_spill] sm:$0xff] }
 0x4e0   :  { %9038 = vmatprep.subr.bf16.mxu0 %v9037_v37  ;;  %v18543_v37 = vld [vmem:[#allocation109_spill] sm:$0xff] }
 0x4e3   :  { %9040 = vmatpush1.bf16.msra.mxu0 %v9039_v44  ;;  %v9053_v44 = vpack.c.bf16 %v18543_v37, %v18542_v23  ;;  %v18555_v23 = vld [vmem:[#allocation94_spill] sm:$0xff] }
 0x4e4   :  { %9042 = vmatprep.subr.bf16.mxu0 %v9041_v60  ;;  %v18544_v60 = vld [vmem:[#allocation84_spill] sm:$0xff] }
 0x4e5   :  { %v9055_v3 = vpack.c.bf16 %v18545_v41, %v18544_v60 }
 0x4e7   :  { %9044 = vmatpush1.bf16.msra.mxu0 %v9043_v29  ;;  %v18546_v29 = vld [vmem:[#allocation35_spill] sm:$0xff] }
 0x4e8   :  { %9046 = vmatprep.subr.bf16.mxu0 %v9045_v18  ;;  %v9057_v54 = vpack.c.bf16 %v18547_v26, %v18546_v29  ;;  %v18548_v18 = vld [vmem:[#allocation36_spill] sm:$0xff] }
 0x4e9   :  { %v9059_v28 = vpack.c.bf16 %v18549_v50, %v18548_v18 }
 0x4eb   :  { %9048 = vmatpush1.bf16.msra.mxu0 %v9047_v33  ;;  %v18550_v33 = vld [vmem:[#allocation44_spill] sm:$0xff] }
 0x4ec   :  { %9050 = vmatprep.subr.bf16.mxu0 %v9049_v20  ;;  %v9061_v27 = vpack.c.bf16 %v18551_v52, %v18550_v33  ;;  %v18552_v20 = vld [vmem:[#allocation72_spill] sm:$0xff] }
 0x4ed   :  { %v9063_v37 = vpack.c.bf16 %v18553_v31, %v18552_v20 }
 0x4ef   :  { %9052 = vmatpush1.bf16.msra.mxu0 %v9051_v8  ;;  %v18554_v8 = vld [vmem:[#allocation92_spill] sm:$0xff] }
 0x4f0   :  { %9054 = vmatprep.subr.bf16.mxu0 %v9053_v44  ;;  %v9065_v41 = vpack.c.bf16 %v18555_v23, %v18554_v8  ;;  %v9067_v44 = vpack.c.bf16 %v18521_v12, %v18520_v63  ;;  %v18557_v12 = vld [vmem:[#allocation73_spill] sm:$0xff] }
 0x4f3   :  { %9056 = vmatpush1.bf16.msra.mxu0 %v9055_v3  ;;  %v9069_v3 = vpack.c.bf16 %v12832_v40, %v18522_v57 }
 0x4f4   :  { %9058 = vmatprep.subr.bf16.mxu0 %v9057_v54  ;;  %v9071_v54 = vpack.c.bf16 %v18523_v2, %v12842_v13 }
 0x4f7   :  { %9060 = vmatpush1.bf16.msra.mxu0 %v9059_v28  ;;  %v9073_v28 = vpack.c.bf16 %v18526_v36, %v18525_v17 }
 0x4f8   :  { %9062 = vmatprep.subr.bf16.mxu0 %v9061_v27  ;;  %v9075_v27 = vpack.c.bf16 %v12870_v45, %v18527_v39 }
 0x4fb   :  { %9064 = vmatpush1.bf16.msra.mxu0 %v9063_v37  ;;  %v9077_v37 = vpack.c.bf16 %v12882_v22, %v12880_v19 }
 0x4fc   :  { %9066 = vmatprep.subr.bf16.mxu0 %v9065_v41  ;;  %v18556_v41 = vld [vmem:[#allocation70_spill] sm:$0xff] }
 0x4fd   :  { %v9079_v40 = vpack.c.bf16 %v18557_v12, %v18556_v41 }
 0x4ff   :  { %9068 = vmatpush1.bf16.msra.mxu0 %v9067_v44  ;;  %v18558_v44 = vld [vmem:[#allocation14_spill] sm:$0xff] }
 0x500   :  { %9070 = vmatprep.subr.bf16.mxu0 %v9069_v3  ;;  %v9081_v2 = vpack.c.bf16 %v13035_v10, %v18558_v44  ;;  %v9083_v3 = vpack.c.bf16 %v13039_v5, %v13037_v47  ;;  %v18561_v5 = vld [vmem:[#allocation31_spill] sm:$0xff] }
 0x503   :  { %9072 = vmatpush1.bf16.msra.mxu0 %v9071_v54  ;;  %v9085_v54 = vpack.c.bf16 %v13044_v56, %v13042_v42 }
 0x504   :  { %9074 = vmatprep.subr.bf16.mxu0 %v9073_v28  ;;  %v9087_v28 = vpack.c.bf16 %v13048_v43, %v13046_v0  ;;  %v18563_v43 = vld [vmem:[#allocation37_spill] sm:$0xff] }
 0x507   :  { %9076 = vmatpush1.bf16.msra.mxu0 %v9075_v27  ;;  %v9089_v27 = vpack.c.bf16 %v13052_v14, %v13050_v55  ;;  %v18565_v14 = vld [vmem:[#allocation63_spill] sm:$0xff]  ;;  %v4078_v55 = vld [vmem:[#allocation2 + $0x668] sm:$0xff] }
 0x508   :  { %9078 = vmatprep.subr.bf16.mxu0 %v9077_v37  ;;  %v9091_v37 = vpack.c.bf16 %v13056_v34, %v13054_v15  ;;  %v18567_v34 = vld [vmem:[#allocation79_spill] sm:$0xff] }
 0x50b   :  { %9080 = vmatpush1.bf16.msra.mxu0 %v9079_v40  ;;  %v18559_v40 = vld [vmem:[#allocation18_spill] sm:$0xff] }
 0x50c   :  { %9082 = vmatprep.subr.bf16.mxu0 %v9081_v2  ;;  %v18560_v2 = vld [vmem:[#allocation45_spill] sm:$0xff] }
 0x50f   :  { %9084 = vmatpush1.bf16.msra.mxu0 %v9083_v3  ;;  %v18562_v3 = vand.u32 4294901760, %v13086_v25  ;;  %v18572_v25 = vld [vmem:[#allocation34_spill] sm:$0xff] }
 0x510   :  { %9086 = vmatprep.subr.bf16.mxu0 %v9085_v54  ;;  %v18564_v54 = vld [vmem:[#allocation51_spill] sm:$0xff] }
 0x513   :  { %9088 = vmatpush1.bf16.msra.mxu0 %v9087_v28  ;;  %v18566_v28 = vld [vmem:[#allocation68_spill] sm:$0xff] }
 0x514   :  { %9090 = vmatprep.subr.bf16.mxu0 %v9089_v27  ;;  %v18568_v27 = vld [vmem:[#allocation41_spill] sm:$0xff] }
 0x517   :  { %9092 = vmatpush1.bf16.msra.mxu0 %v9091_v37  ;;  %v18569_v37 = vld [vmem:[#allocation47_spill] sm:$0xff] }
 0x518   :  { %9094 = vmatprep.subr.bf16.mxu0 %v18559_v40  ;;  %v18570_v40 = vld [vmem:[#allocation108_spill] sm:$0xff] }
 0x51a   :  { %3515 = vmatmul.mubr.f32.vlgmr.msra.gmra.mrb[2].mxu0 %v18560_v2 }
 0x51b   :  { %9096 = vmatpush1.bf16.msra.mxu0 %v18561_v5  ;;  %3652 = vmatprep.mubr.f32.mxu0 %v18562_v3  ;;  %v18571_v5 = vld [vmem:[#allocation29_spill] sm:$0xff]  ;;  %v18573_v3 = vld [vmem:[#allocation40_spill] sm:$0xff] }
 0x51c   :  { %9098 = vmatprep.subr.bf16.mxu0 %v18563_v43  ;;  %v18574_v43 = vld [vmem:[#allocation90_spill] sm:$0xff] }
 0x51f   :  { %9100 = vmatpush1.bf16.msra.mxu0 %v18564_v54  ;;  %v18575_v54 = vld [vmem:[#allocation95_spill] sm:$0xff] }
 0x520   :  { %9102 = vmatprep.subr.bf16.mxu0 %v18565_v14  ;;  %v18576_v14 = vld [vmem:[#allocation62_spill] sm:$0xff] }
 0x523   :  { %9104 = vmatpush1.bf16.msra.mxu0 %v18566_v28  ;;  %v18577_v28 = vld [vmem:[#allocation64_spill] sm:$0xff] }
 0x524   :  { %9106 = vmatprep.subr.bf16.mxu0 %v18567_v34  ;;  %v18578_v34 = vld [vmem:[#allocation67_spill] sm:$0xff] }
 0x527   :  { %9108 = vmatpush1.bf16.msra.mxu0 %v18568_v27  ;;  %v18579_v27 = vld [vmem:[#allocation78_spill] sm:$0xff] }
 0x528   :  { %9110 = vmatprep.subr.bf16.mxu0 %v18569_v37  ;;  %v18580_v37 = vld [vmem:[#allocation104_spill] sm:$0xff] }
 0x52b   :  { %9112 = vmatpush1.bf16.msra.mxu0 %v18570_v40  ;;  %v18581_v40 = vld [vmem:[#allocation54_spill] sm:$0xff] }
 0x52c   :  { %9114 = vmatprep.subr.bf16.mxu0 %v18571_v5  ;;  %v18582_v5 = vld [vmem:[#allocation56_spill] sm:$0xff] }
 0x52f   :  { %9116 = vmatpush1.bf16.msra.mxu0 %v18572_v25  ;;  %v18583_v25 = vld [vmem:[#allocation117_spill] sm:$0xff] }
 0x530   :  { %9118 = vmatprep.subr.bf16.mxu0 %v18573_v3  ;;  %v18584_v3 = vld [vmem:[#allocation118_spill] sm:$0xff] }
 0x533   :  { %9120 = vmatpush1.bf16.msra.mxu0 %v18574_v43  ;;  %v18585_v43 = vld [vmem:[#allocation119_spill] sm:$0xff] }
 0x534   :  { %9122 = vmatprep.subr.bf16.mxu0 %v18575_v54  ;;  %v18586_v54 = vld [vmem:[#allocation50_spill] sm:$0xff] }
 0x537   :  { %9124 = vmatpush1.bf16.msra.mxu0 %v18576_v14  ;;  %v18587_v14 = vld [vmem:[#allocation8_spill] sm:$0xff] }
 0x538   :  { %9126 = vmatprep.subr.bf16.mxu0 %v18577_v28  ;;  %v18588_v28 = vld [vmem:[#allocation9_spill] sm:$0xff] }
 0x53b   :  { %9128 = vmatpush1.bf16.msra.mxu0 %v18578_v34  ;;  %v18589_v34 = vld [vmem:[#allocation10_spill] sm:$0xff] }
 0x53c   :  { %9130 = vmatprep.subr.bf16.mxu0 %v18579_v27  ;;  %v18590_v27 = vld [vmem:[#allocation11_spill] sm:$0xff] }
 0x53f   :  { %9132 = vmatpush1.bf16.msra.mxu0 %v18580_v37  ;;  %v18591_v37 = vld [vmem:[#allocation13_spill] sm:$0xff] }
 0x540   :  { %9134 = vmatprep.subr.bf16.mxu0 %v18581_v40 }
 0x543   :  { %9136 = vmatpush1.bf16.msra.mxu0 %v18582_v5  ;;  %v18592_v5 = vand.u32 4294901760, %v18453_v48  ;;  %v18600_v48 = vand.u32 4294901760, %v18469_v24  ;;  %v18608_v24 = vand.u32 4294901760, %v18534_v30  ;;  %v18614_v30 = vld [vmem:[#allocation42_spill] sm:$0xff] }
 0x544   :  { %9138 = vmatprep.subr.bf16.mxu0 %v18583_v25  ;;  %v18593_v25 = vand.u32 4294901760, %v18454_v1  ;;  %v18602_v1 = vand.u32 4294901760, %v18471_v16 }
 0x546   :  { %v9157_v40 = vpack.c.bf16 %v18593_v25, %v18592_v5  ;;  %v18601_v5 = vand.u32 4294901760, %v18470_v21  ;;  %v18609_v21 = vand.u32 4294901760, %v18535_v7  ;;  %v18615_v7 = vand.u32 4294901760, %v18540_v32 }
 0x547   :  { %9140 = vmatpush1.bf16.msra.mxu0 %v18584_v3  ;;  %v18594_v3 = vld [vmem:[#allocation23_spill] sm:$0xff] }
 0x548   :  { %9142 = vmatprep.subr.bf16.mxu0 %v18585_v43  ;;  %v18595_v43 = vand.u32 4294901760, %v18464_v62  ;;  %v9165_v25 = vpack.c.bf16 %v18602_v1, %v18601_v5  ;;  %v18603_v62 = vand.u32 4294901760, %v18530_v35  ;;  %v13464_v16 = vpack.c.bf16 %v18609_v21, %v18608_v24  ;;  %v4067_v1 = vld [vmem:[#allocation2 + $0x610] sm:$0xff] }
 0x549   :  { %v18610_v35 = vand.u32 4294901760, %v18536_v53  ;;  %v18616_v53 = vand.u32 4294901760, %v18541_v61  ;;  %v4135_v24 = vand.u32 4294901760, %v4067_v1  ;;  %v4071_v61 = vld [vmem:[#allocation2 + $0x630] sm:$0xff] }
 0x54b   :  { %9144 = vmatpush1.bf16.msra.mxu0 %v18586_v54  ;;  %v18596_v54 = vand.u32 4294901760, %v18465_v51 }
 0x54c   :  { %9146 = vmatprep.subr.bf16.mxu0 %v18587_v14 }
 0x54d   :  { %v9159_v14 = vpack.c.bf16 %v18596_v54, %v18595_v43  ;;  %v18604_v43 = vand.u32 4294901760, %v18531_v6  ;;  %v18611_v6 = vand.u32 4294901760, %v18537_v58 }
 0x54f   :  { %9148 = vmatpush1.bf16.msra.mxu0 %v18588_v28  ;;  %v18597_v28 = vand.u32 4294901760, %v18466_v11  ;;  %v13450_v51 = vpack.c.bf16 %v18604_v43, %v18603_v62  ;;  %v18605_v11 = vand.u32 4294901760, %v18560_v2  ;;  %v18612_v2 = vand.u32 4294901760, %v18538_v59  ;;  %v4070_v62 = vld [vmem:[#allocation2 + $0x628] sm:$0xff] }
 0x550   :  { %9150 = vmatprep.subr.bf16.mxu0 %v18589_v34  ;;  %v18598_v34 = vand.u32 4294901760, %v18467_v38  ;;  %v18617_v43 = vld [vmem:[#allocation105_spill] sm:$0xff]  ;;  %v4137_v21 = vand.u32 4294901760, %v4070_v62 }
 0x553   :  { %9152 = vmatpush1.bf16.msra.mxu0 %v18590_v27  ;;  %v9161_v27 = vpack.c.bf16 %v18598_v34, %v18597_v28  ;;  %v18606_v34 = vand.u32 4294901760, %v18532_v46  ;;  %v18613_v46 = vand.u32 4294901760, %v18539_v9  ;;  %v4068_v28 = vld [vmem:[#allocation2 + $0x618] sm:$0xff] }
 0x554   :  { %9154 = vmatprep.subr.bf16.mxu0 %v18591_v37  ;;  %v18599_v37 = vand.u32 4294901760, %v12583_v49  ;;  %v18607_v49 = vand.u32 4294901760, %v18533_v4  ;;  %v4066_v4 = vld [vmem:[#allocation2 + $0x608] sm:$0xff]  ;;  %v4133_v5 = vand.u32 4294901760, %v4068_v28  ;;  %v4072_v9 = vld [vmem:[#allocation2 + $0x638] sm:$0xff] }
 0x555   :  { %v13476_v54 = vpack.c.bf16 %v18613_v46, %v18612_v2  ;;  %v4129_v58 = vand.u32 4294901760, %v4066_v4  ;;  %v4141_v32 = vand.u32 4294901760, %v4072_v9 }
 0x556   :  { %v9163_v15 = vpack.c.bf16 %v18600_v48, %v18599_v37  ;;  %v13458_v38 = vpack.c.bf16 %v18607_v49, %v18606_v34  ;;  %v4065_v37 = vld [vmem:[#allocation2 + $0x600] sm:$0xff]  ;;  %v13483_v48 = vpack.c.bf16 %v18616_v53, %v18615_v7  ;;  %v13495_v7 = vsub.f32 %v4068_v28, %v4133_v5 }
 0x557   :  { %9156 = vmatpush1.bf16.msra.mxu0 %v18594_v3  ;;  %v4131_v59 = vand.u32 4294901760, %v4065_v37  ;;  %v18619_v34 = vld [vmem:[#allocation55_spill] sm:$0xff]  ;;  %v13491_v2 = vpack.c.bf16 %v4133_v5, %v4129_v58  ;;  %v13493_v46 = vsub.f32 %v4066_v4, %v4129_v58  ;;  %v4075_v3 = vld [vmem:[#allocation2 + $0x650] sm:$0xff]  ;;  %v13508_v4 = vsub.f32 %v4072_v9, %v4141_v32 }
 0x558   :  { %9158 = vmatprep.subr.bf16.mxu0 %v9157_v40  ;;  %v13470_v40 = vpack.c.bf16 %v18611_v6, %v18610_v35  ;;  %v18620_v49 = vand.u32 4294901760, %v18619_v34  ;;  %v4069_v35 = vld [vmem:[#allocation2 + $0x620] sm:$0xff]  ;;  %v4074_v6 = vld [vmem:[#allocation2 + $0x648] sm:$0xff]  ;;  %18623 = vst [vmem:[#allocation77_spill] sm:$0xff] %v13495_v7  ;;  %v4080_v5 = vld [vmem:[#allocation2 + $0x678] sm:$0xff] }
 0x559   :  { %18621 = vst [vmem:[#allocation69_spill] sm:$0xff] %v13491_v2  ;;  %18622 = vst [vmem:[#allocation75_spill] sm:$0xff] %v13493_v46  ;;  %v13497_v53 = vsub.f32 %v4065_v37, %v4131_v59  ;;  %v13499_v34 = vpack.c.bf16 %v4135_v24, %v4131_v59  ;;  %9286 = vmatprep.subr.bf16.mxu1 %v13491_v2  ;;  %v4139_v28 = vand.u32 4294901760, %v4069_v35  ;;  %v4143_v37 = vand.u32 4294901760, %v4071_v61  ;;  %v4082_v2 = vld [vmem:[#allocation2 + $0x688] sm:$0xff] }
 0x55a   :  { %3656 = vmatmul.mubr.f32.vlgmr.msra.gmra.mrb[2].mxu0 %v18605_v11  ;;  %v18618_v11 = vand.u32 4294901760, %v18617_v43  ;;  %v4073_v43 = vld [vmem:[#allocation2 + $0x640] sm:$0xff]  ;;  %18629 = vst [vmem:[#allocation59_spill] sm:$0xff] %v13508_v4  ;;  %v4145_v58 = vand.u32 4294901760, %v4074_v6 }
 0x55b   :  { %9160 = vmatpush1.bf16.msra.mxu0 %v9159_v14  ;;  %3919 = vmatprep.mubr.f32.mxu0 %v18614_v30  ;;  %18624 = vst [vmem:[#allocation93_spill] sm:$0xff] %v13497_v53  ;;  %18625 = vst [vmem:[#allocation99_spill] sm:$0xff] %v13499_v34  ;;  %v13505_v30 = vsub.f32 %v4070_v62, %v4137_v21  ;;  %v4077_v53 = vld [vmem:[#allocation2 + $0x660] sm:$0xff]  ;;  %v4079_v62 = vld [vmem:[#allocation2 + $0x670] sm:$0xff]  ;;  %v13516_v9 = vsub.f32 %v4071_v61, %v4143_v37  ;;  %v4157_v61 = vand.u32 4294901760, %v4080_v5 }
 0x55c   :  { %9162 = vmatprep.subr.bf16.mxu0 %v9161_v27  ;;  %v13489_v14 = vpack.c.bf16 %v18620_v49, %v18618_v11  ;;  %v4076_v27 = vld [vmem:[#allocation2 + $0x658] sm:$0xff]  ;;  %v13501_v11 = vsub.f32 %v4067_v1, %v4135_v24  ;;  %v13503_v49 = vpack.c.bf16 %v4141_v32, %v4137_v21  ;;  %9288 = vmatpush1.bf16.msra.mxu1 %v13499_v34  ;;  %v4147_v1 = vand.u32 4294901760, %v4073_v43  ;;  %v13520_v4 = vld [vmem:[#allocation2 + $0x680] sm:$0xff] }
 0x55d   :  { %18628 = vst [vmem:[#allocation110_spill] sm:$0xff] %v13505_v30  ;;  %v4149_v59 = vand.u32 4294901760, %v4076_v27  ;;  %v4151_v24 = vand.u32 4294901760, %v4075_v3  ;;  %v13514_v21 = vsub.f32 %v4069_v35, %v4139_v28  ;;  %18631 = vst [vmem:[#allocation65_spill] sm:$0xff] %v13516_v9  ;;  %v13518_v32 = vsub.f32 %v4074_v6, %v4145_v58 }
 0x55e   :  { %18626 = vst [vmem:[#allocation102_spill] sm:$0xff] %v13501_v11  ;;  %18627 = vst [vmem:[#allocation107_spill] sm:$0xff] %v13503_v49  ;;  %v4153_v11 = vand.u32 4294901760, %v4078_v55  ;;  %9290 = vmatprep.subr.bf16.mxu1 %v13503_v49  ;;  %v13528_v46 = vsub.f32 %v4073_v43, %v4147_v1  ;;  %v4083_v49 = vld [vmem:[#allocation2 + $0x690] sm:$0xff] }
 0x55f   :  { %9164 = vmatpush1.bf16.msra.mxu0 %v9163_v15  ;;  %v13512_v15 = vpack.c.bf16 %v4143_v37, %v4139_v28  ;;  %18632 = vst [vmem:[#allocation112_spill] sm:$0xff] %v13518_v32  ;;  %v13522_v34 = vpack.c.bf16 %v4149_v59, %v4145_v58  ;;  %v13524_v30 = vsub.f32 %v4076_v27, %v4149_v59  ;;  %v4155_v28 = vand.u32 4294901760, %v4077_v53  ;;  %v18647_v32 = vld [vmem:[#allocation33_spill] sm:$0xff] }
 0x560   :  { %9166 = vmatprep.subr.bf16.mxu0 %v9165_v25  ;;  %v4084_v25 = vld [vmem:[#allocation2 + $0x698] sm:$0xff]  ;;  %v13526_v7 = vpack.c.bf16 %v4151_v24, %v4147_v1  ;;  %18636 = vst [vmem:[#allocation116_spill] sm:$0xff] %v13528_v46  ;;  %v13531_v35 = vsub.f32 %v4075_v3, %v4151_v24  ;;  %v13533_v6 = vsub.f32 %v4078_v55, %v4153_v11  ;;  %v4159_v37 = vand.u32 4294901760, %v4079_v62  ;;  %v4086_v1 = vld [vmem:[#allocation2 + $0x6a8] sm:$0xff] }
 0x561   :  { %18630 = vst [vmem:[#allocation111_spill] sm:$0xff] %v13512_v15  ;;  %18633 = vst [vmem:[#allocation113_spill] sm:$0xff] %v13522_v34  ;;  %9292 = vmatpush1.bf16.msra.mxu1 %v13512_v15  ;;  %v4161_v27 = vand.u32 4294901760, %v4082_v2  ;;  %v4165_v58 = vand.u32 4294901760, %v4084_v25  ;;  %v4163_v59 = vand.u32 4294901760, %v13520_v4  ;;  %v13539_v43 = vpack.c.bf16 %v4157_v61, %v4153_v11  ;;  %v4088_v24 = vld [vmem:[#allocation2 + $0x6b8] sm:$0xff] }
 0x562   :  { %18634 = vst [vmem:[#allocation114_spill] sm:$0xff] %v13524_v30  ;;  %18635 = vst [vmem:[#allocation115_spill] sm:$0xff] %v13526_v7  ;;  %9294 = vmatprep.subr.bf16.mxu1 %v13522_v34  ;;  %v13543_v3 = vsub.f32 %v4077_v53, %v4155_v28  ;;  %v4167_v55 = vand.u32 4294901760, %v4083_v49  ;;  %v18646_v30 = vand.u32 4294901760, %v18544_v60  ;;  %v18648_v9 = vand.u32 4294901760, %v18647_v32  ;;  %v4085_v53 = vld [vmem:[#allocation2 + $0x6a0] sm:$0xff] }
 0x563   :  { %9168 = vmatpush1.bf16.msra.mxu0 %v13450_v51  ;;  %18637 = vst [vmem:[#allocation81_spill] sm:$0xff] %v13531_v35  ;;  %18638 = vst [vmem:[#allocation87_spill] sm:$0xff] %v13533_v6  ;;  %v13541_v51 = vsub.f32 %v4080_v5, %v4157_v61  ;;  %v18642_v6 = vld [vmem:[#allocation106_spill] sm:$0xff]  ;;  %v18644_v35 = vld [vmem:[#allocation109_spill] sm:$0xff]  ;;  %v13557_v11 = vsub.f32 %v4079_v62, %v4159_v37  ;;  %v13559_v5 = vsub.f32 %v4082_v2, %v4161_v27 }
 0x564   :  { %9170 = vmatprep.subr.bf16.mxu0 %v13458_v38  ;;  %18639 = vst [vmem:[#allocation88_spill] sm:$0xff] %v13539_v43  ;;  %18641 = vst [vmem:[#allocation48_spill] sm:$0xff] %v13543_v3  ;;  %v18643_v38 = vand.u32 4294901760, %v18642_v6  ;;  %v18645_v15 = vand.u32 4294901760, %v18644_v35  ;;  %v13555_v34 = vpack.c.bf16 %v18648_v9, %v18646_v30  ;;  %v4087_v61 = vld [vmem:[#allocation2 + $0x6b0] sm:$0xff]  ;;  %v13561_v3 = vld [vmem:[#allocation2 + $0x6c8] sm:$0xff]  ;;  %v13570_v60 = vsub.f32 %v4084_v25, %v4165_v58 }
 0x565   :  { %18640 = vst [vmem:[#allocation89_spill] sm:$0xff] %v13541_v51  ;;  %18649 = vst [vmem:[#allocation15_spill] sm:$0xff] %v13557_v11  ;;  %v18651_v35 = vand.u32 4294901760, %v18546_v29  ;;  %v13573_v30 = vsub.f32 %v13520_v4, %v4163_v59  ;;  %v13575_v62 = vsub.f32 %v4083_v49, %v4167_v55  ;;  %v4092_v2 = vld [vmem:[#allocation2 + $0x6d8] sm:$0xff]  ;;  %v13577_v9 = vld [vmem:[#allocation2 + $0x6c0] sm:$0xff]  ;;  %v18657_v29 = vand.u32 4294901760, %v18549_v50  ;;  %9296 = vmatpush1.bf16.msra.mxu1 %v13526_v7 }
 0x566   :  { %v13549_v46 = vpack.c.bf16 %v18645_v15, %v18643_v38  ;;  %18650 = vst [vmem:[#allocation12_spill] sm:$0xff] %v13559_v5  ;;  %v18652_v15 = vand.u32 4294901760, %v18547_v26  ;;  %18653 = vst [vmem:[#allocation19_spill] sm:$0xff] %v13570_v60  ;;  %v13587_v26 = vpack.c.bf16 %v4159_v37, %v4155_v28  ;;  %v4169_v25 = vand.u32 4294901760, %v4086_v1  ;;  %v13589_v38 = vld [vmem:[#allocation2 + $0x6d0] sm:$0xff]  ;;  %9298 = vmatprep.subr.bf16.mxu1 %v13539_v43  ;;  %v13604_v7 = vld [vmem:[#allocation2 + $0x6e0] sm:$0xff] }
 0x567   :  { %9172 = vmatpush1.bf16.msra.mxu0 %v13464_v16  ;;  %18654 = vst [vmem:[#allocation21_spill] sm:$0xff] %v13573_v30  ;;  %18655 = vst [vmem:[#allocation22_spill] sm:$0xff] %v13575_v62  ;;  %v18656_v16 = vand.u32 4294901760, %v18548_v18  ;;  %v4173_v4 = vand.u32 4294901760, %v4088_v24  ;;  %v13592_v49 = vpack.c.bf16 %v4165_v58, %v4161_v27  ;;  %v4177_v18 = vand.u32 4294901760, %v13561_v3 }
 0x568   :  { %v13568_v6 = vpack.c.bf16 %v18652_v15, %v18651_v35  ;;  %9174 = vmatprep.subr.bf16.mxu0 %v13470_v40  ;;  %18658 = vst [vmem:[#allocation32_spill] sm:$0xff] %v13587_v26  ;;  %v4171_v35 = vand.u32 4294901760, %v4085_v53  ;;  %v4175_v40 = vand.u32 4294901760, %v4087_v61  ;;  %v13595_v15 = vld [vmem:[#allocation2 + $0x6e8] sm:$0xff]  ;;  %v13597_v50 = vsub.f32 %v4086_v1, %v4169_v25 }
 0x569   :  { %v13584_v32 = vpack.c.bf16 %v18657_v29, %v18656_v16  ;;  %18659 = vst [vmem:[#allocation39_spill] sm:$0xff] %v13592_v49  ;;  %v13599_v16 = vsub.f32 %v4088_v24, %v4173_v4  ;;  %v4181_v28 = vand.u32 4294901760, %v4092_v2  ;;  %v4179_v37 = vand.u32 4294901760, %v13577_v9  ;;  %v13602_v29 = vld [vmem:[#allocation2 + $0x6f8] sm:$0xff]  ;;  %v13615_v24 = vld [vmem:[#allocation2 + $0x6f0] sm:$0xff]  ;;  %9300 = vmatpush1.bf16.msra.mxu1 %v13587_v26 }
 0x56a   :  { %18660 = vst [vmem:[#allocation49_spill] sm:$0xff] %v13597_v50  ;;  %v13607_v27 = vsub.f32 %v4085_v53, %v4171_v35  ;;  %v13609_v58 = vsub.f32 %v4087_v61, %v4175_v40  ;;  %v13612_v43 = vsub.f32 %v13561_v3, %v4177_v18  ;;  %v4183_v1 = vand.u32 4294901760, %v13589_v38  ;;  %v13629_v61 = vld [vmem:[#allocation2 + $0x718] sm:$0xff]  ;;  %9302 = vmatprep.subr.bf16.mxu1 %v13592_v49  ;;  %v13667_v49 = vld [vmem:[#allocation2 + $0x730] sm:$0xff] }
 0x56b   :  { %18661 = vst [vmem:[#allocation57_spill] sm:$0xff] %v13599_v16  ;;  %9176 = vmatpush1.bf16.msra.mxu0 %v13476_v54  ;;  %v13617_v16 = vld [vmem:[#allocation2 + $0x708] sm:$0xff]  ;;  %v13621_v50 = vpack.c.bf16 %v4167_v55, %v4163_v59  ;;  %v13623_v54 = vsub.f32 %v4092_v2, %v4181_v28  ;;  %v13626_v53 = vsub.f32 %v13577_v9, %v4179_v37  ;;  %v4185_v3 = vand.u32 4294901760, %v13595_v15  ;;  %v13641_v2 = vld [vmem:[#allocation2 + $0x710] sm:$0xff] }
 0x56c   :  { %18662 = vst [vmem:[#allocation60_spill] sm:$0xff] %v13607_v27  ;;  %18663 = vst [vmem:[#allocation66_spill] sm:$0xff] %v13609_v58  ;;  %9178 = vmatprep.subr.bf16.mxu0 %v13483_v48  ;;  %v13634_v58 = vpack.c.bf16 %v4173_v4, %v4169_v25  ;;  %v13637_v48 = vsub.f32 %v13589_v38, %v4183_v1  ;;  %v4189_v59 = vand.u32 4294901760, %v13602_v29  ;;  %v17044_v55 = vand.u32 4294901760, %v13604_v7  ;;  %v13650_v25 = vld [vmem:[#allocation2 + $0x728] sm:$0xff]  ;;  %v13652_v4 = vld [vmem:[#allocation2 + $0x738] sm:$0xff] }
 0x56d   :  { %18664 = vst [vmem:[#allocation96_spill] sm:$0xff] %v13612_v43  ;;  %18665 = vst [vmem:[#allocation98_spill] sm:$0xff] %v13621_v50  ;;  %v13631_v43 = vld [vmem:[#allocation2 + $0x700] sm:$0xff]  ;;  %v13643_v9 = vpack.c.bf16 %v4175_v40, %v4171_v35  ;;  %v13646_v26 = vsub.f32 %v13595_v15, %v4185_v3  ;;  %9304 = vmatpush1.bf16.msra.mxu1 %v13621_v50  ;;  %v18683_v15 = vand.u32 4294901760, %v18550_v33  ;;  %v13714_v50 = vld [vmem:[#allocation2 + $0x750] sm:$0xff]  ;;  %v18702_v27 = vand.u32 4294901760, %v18555_v23 }
 0x56e   :  { %18666 = vst [vmem:[#allocation61_spill] sm:$0xff] %v13623_v54  ;;  %18667 = vst [vmem:[#allocation91_spill] sm:$0xff] %v13626_v53  ;;  %v13656_v38 = vsub.f32 %v13602_v29, %v4189_v59  ;;  %v13661_v35 = vsub.f32 %v13604_v7, %v17044_v55  ;;  %v13665_v53 = vld [vmem:[#allocation2 + $0x720] sm:$0xff]  ;;  %v18675_v29 = vand.u32 4294901760, %v13615_v24  ;;  %v18677_v55 = vand.u32 4294901760, %v13617_v16  ;;  %9306 = vmatprep.subr.bf16.mxu1 %v13634_v58 }
 0x56f   :  { %18668 = vst [vmem:[#allocation17_spill] sm:$0xff] %v13634_v58  ;;  %18669 = vst [vmem:[#allocation71_spill] sm:$0xff] %v13637_v48  ;;  %9180 = vmatpush1.bf16.msra.mxu0 %v13489_v14  ;;  %v13671_v14 = vpack.c.bf16 %v4181_v28, %v4177_v18  ;;  %v18681_v28 = vand.u32 4294901760, %v13631_v43  ;;  %v18684_v58 = vand.u32 4294901760, %v18551_v52  ;;  %v13719_v33 = vpack.c.bf16 %v4183_v1, %v4179_v37  ;;  %v4116_v48 = vld [vmem:[#allocation2 + $0x798] sm:$0xff] }
 0x570   :  { %18670 = vst [vmem:[#allocation74_spill] sm:$0xff] %v13643_v9  ;;  %18671 = vst [vmem:[#allocation76_spill] sm:$0xff] %v13646_v26  ;;  %9182 = vmatprep.subr.bf16.mxu0 %v13549_v46  ;;  %v13681_v40 = vsub.f32 %v13617_v16, %v18677_v55  ;;  %v18679_v46 = vand.u32 4294901760, %v13629_v61  ;;  %v18685_v26 = vand.u32 4294901760, %v13641_v2  ;;  %v13716_v55 = vld [vmem:[#allocation2 + $0x768] sm:$0xff]  ;;  %v18688_v52 = vand.u32 4294901760, %v13650_v25 }
 0x571   :  { %18672 = vst [vmem:[#allocation82_spill] sm:$0xff] %v13656_v38  ;;  %18673 = vst [vmem:[#allocation85_spill] sm:$0xff] %v13661_v35  ;;  %v13676_v38 = vsub.f32 %v13615_v24, %v18675_v29  ;;  %v13684_v35 = vld [vmem:[#allocation2 + $0x748] sm:$0xff]  ;;  %v13695_v29 = vsub.f32 %v13631_v43, %v18681_v28  ;;  %9308 = vmatpush1.bf16.msra.mxu1 %v13643_v9  ;;  %v18693_v37 = vand.u32 4294901760, %v13665_v53  ;;  %v4217_v9 = vand.u32 4294901760, %v13716_v55 }
 0x572   :  { %18674 = vst [vmem:[#allocation86_spill] sm:$0xff] %v13671_v14  ;;  %18678 = vst [vmem:[#allocation25_spill] sm:$0xff] %v13681_v40  ;;  %v13690_v18 = vsub.f32 %v13629_v61, %v18679_v46  ;;  %v13699_v40 = vld [vmem:[#allocation2 + $0x758] sm:$0xff]  ;;  %v13708_v46 = vsub.f32 %v13641_v2, %v18685_v26  ;;  %v18690_v26 = vand.u32 4294901760, %v13652_v4  ;;  %v4209_v28 = vand.u32 4294901760, %v13684_v35  ;;  %9310 = vmatprep.subr.bf16.mxu1 %v13671_v14 }
 0x573   :  { %18676 = vst [vmem:[#allocation24_spill] sm:$0xff] %v13676_v38  ;;  %18682 = vst [vmem:[#allocation28_spill] sm:$0xff] %v13695_v29  ;;  %v9189_v38 = vpack.c.bf16 %v18684_v58, %v18683_v15  ;;  %v13712_v29 = vld [vmem:[#allocation2 + $0x740] sm:$0xff]  ;;  %9184 = vmatpush1.bf16.msra.mxu0 %v13555_v34  ;;  %v13724_v58 = vsub.f32 %v13650_v25, %v18688_v52  ;;  %v13738_v34 = vpack.c.bf16 %v4189_v59, %v4185_v3 }
 0x574   :  { %18680 = vst [vmem:[#allocation26_spill] sm:$0xff] %v13690_v18  ;;  %18686 = vst [vmem:[#allocation83_spill] sm:$0xff] %v13708_v46  ;;  %v13729_v15 = vsub.f32 %v13652_v4, %v18690_v26  ;;  %v13732_v18 = vld [vmem:[#allocation2 + $0x778] sm:$0xff]  ;;  %v13734_v46 = vld [vmem:[#allocation2 + $0x760] sm:$0xff]  ;;  %9186 = vmatprep.subr.bf16.mxu0 %v13568_v6  ;;  %v13743_v1 = vsub.f32 %v13665_v53, %v18693_v37  ;;  %v18695_v52 = vand.u32 4294901760, %v13667_v49  ;;  %v4211_v3 = vand.u32 4294901760, %v13712_v29 }
 0x575   :  { %18687 = vst [vmem:[#allocation103_spill] sm:$0xff] %v13719_v33  ;;  %18689 = vst [vmem:[#allocation84_spill] sm:$0xff] %v13724_v58  ;;  %v13753_v6 = vsub.f32 %v13684_v35, %v4209_v28  ;;  %v4215_v59 = vand.u32 4294901760, %v13714_v50  ;;  %v4111_v37 = vld [vmem:[#allocation2 + $0x770] sm:$0xff]  ;;  %v18699_v58 = vand.u32 4294901760, %v18553_v31  ;;  %v4221_v14 = vand.u32 4294901760, %v13732_v18  ;;  %9312 = vmatpush1.bf16.msra.mxu1 %v13719_v33 }
 0x576   :  { %18691 = vst [vmem:[#allocation35_spill] sm:$0xff] %v13729_v15  ;;  %18692 = vst [vmem:[#allocation38_spill] sm:$0xff] %v13738_v34  ;;  %v13748_v26 = vsub.f32 %v13667_v49, %v18695_v52  ;;  %v4213_v15 = vand.u32 4294901760, %v13699_v40  ;;  %v4219_v35 = vand.u32 4294901760, %v13734_v46  ;;  %v18701_v54 = vand.u32 4294901760, %v18554_v8  ;;  %9314 = vmatprep.subr.bf16.mxu1 %v13738_v34 }
 0x577   :  { %18694 = vst [vmem:[#allocation36_spill] sm:$0xff] %v13743_v1  ;;  %18697 = vst [vmem:[#allocation44_spill] sm:$0xff] %v13753_v6  ;;  %v18698_v1 = vand.u32 4294901760, %v18552_v20  ;;  %v4114_v6 = vld [vmem:[#allocation2 + $0x788] sm:$0xff]  ;;  %9188 = vmatpush1.bf16.msra.mxu0 %v13584_v32  ;;  %v13773_v20 = vsub.f32 %v13712_v29, %v4211_v3  ;;  %v13776_v31 = vsub.f32 %v13714_v50, %v4215_v59  ;;  %v18705_v32 = vand.u32 4294901760, %v13604_v7 }
 0x578   :  { %18696 = vst [vmem:[#allocation43_spill] sm:$0xff] %v13748_v26  ;;  %v13763_v26 = vsub.f32 %v13699_v40, %v4213_v15  ;;  %v9193_v62 = vpack.c.bf16 %v18702_v27, %v18701_v54  ;;  %v13779_v40 = vsub.f32 %v13716_v55, %v4217_v9  ;;  %9190 = vmatprep.subr.bf16.mxu0 %v9189_v38  ;;  %v18706_v8 = vand.u32 4294901760, %v13615_v24 }
 0x579   :  { %v9191_v52 = vpack.c.bf16 %v18699_v58, %v18698_v1  ;;  %18703 = vst [vmem:[#allocation72_spill] sm:$0xff] %v13776_v31  ;;  %v4113_v58 = vld [vmem:[#allocation2 + $0x780] sm:$0xff]  ;;  %v4115_v1 = vld [vmem:[#allocation2 + $0x790] sm:$0xff]  ;;  %v13789_v27 = vsub.f32 %v13732_v18, %v4221_v14  ;;  %v4223_v54 = vand.u32 4294901760, %v4111_v37  ;;  %v13792_v50 = vsub.f32 %v13734_v46, %v4219_v35 }
 0x57a   :  { %18700 = vst [vmem:[#allocation46_spill] sm:$0xff] %v13763_v26  ;;  %18704 = vst [vmem:[#allocation20_spill] sm:$0xff] %v13779_v40  ;;  %v13786_v23 = vpack.c.bf16 %v18706_v8, %v18705_v32  ;;  %v18710_v29 = vand.u32 4294901760, %v13617_v16  ;;  %v18711_v38 = vand.u32 4294901760, %v13629_v61  ;;  %v4225_v7 = vand.u32 4294901760, %v4114_v6  ;;  %v18717_v40 = vld [vmem:[#allocation100_spill] sm:$0xff] }
 0x57b   :  { %18708 = vst [vmem:[#allocation94_spill] sm:$0xff] %v13789_v27  ;;  %18709 = vst [vmem:[#allocation70_spill] sm:$0xff] %v13792_v50  ;;  %v4229_v33 = vand.u32 4294901760, %v4116_v48  ;;  %v13801_v24 = vsub.f32 %v4111_v37, %v4223_v54  ;;  %v4227_v32 = vand.u32 4294901760, %v4113_v58  ;;  %v4231_v8 = vand.u32 4294901760, %v4115_v1  ;;  %9192 = vmatpush1.bf16.msra.mxu0 %v9191_v52  ;;  %v18714_v27 = vld [vmem:[#allocation97_spill] sm:$0xff] }
 0x57c   :  { %18707 = vst [vmem:[#allocation92_spill] sm:$0xff] %v13786_v23  ;;  %v13799_v55 = vpack.c.bf16 %v18711_v38, %v18710_v29  ;;  %v18713_v18 = vand.u32 4294901760, %v18520_v63  ;;  %v18715_v46 = vand.u32 4294901760, %v18714_v27  ;;  %v18716_v34 = vand.u32 4294901760, %v18522_v57  ;;  %9194 = vmatprep.subr.bf16.mxu0 %v9193_v62  ;;  %9316 = vmatpush1.bf16.msra.mxu1 %v13786_v23 }
 0x57d   :  { %v18718_v16 = vand.u32 4294901760, %v18717_v40  ;;  %v13811_v61 = vsub.f32 %v4114_v6, %v4225_v7  ;;  %v13813_v29 = vsub.f32 %v4116_v48, %v4229_v33  ;;  %v18719_v37 = vand.u32 4294901760, %v13631_v43  ;;  %v18728_v43 = vld [vmem:[#allocation101_spill] sm:$0xff] }
 0x57e   :  { %18712 = vst [vmem:[#allocation73_spill] sm:$0xff] %v13799_v55  ;;  %v9195_v50 = vpack.c.bf16 %v18715_v46, %v18713_v18  ;;  %v18720_v52 = vand.u32 4294901760, %v13641_v2  ;;  %v13822_v27 = vsub.f32 %v4113_v58, %v4227_v32  ;;  %v13824_v38 = vsub.f32 %v4115_v1, %v4231_v8  ;;  %9318 = vmatprep.subr.bf16.mxu1 %v13799_v55 }
 0x57f   :  { %v9197_v31 = vpack.c.bf16 %v18718_v16, %v18716_v34  ;;  %v18724_v57 = vand.u32 4294901760, %v13650_v25  ;;  %v18725_v48 = vand.u32 4294901760, %v13652_v4  ;;  %v18727_v62 = vand.u32 4294901760, %v12842_v13 }
 0x580   :  { %v13820_v63 = vpack.c.bf16 %v18720_v52, %v18719_v37  ;;  %18722 = vst [vmem:[#allocation45_spill] sm:$0xff] %v13822_v27  ;;  %18723 = vst [vmem:[#allocation105_spill] sm:$0xff] %v13824_v38  ;;  %9196 = vmatpush1.bf16.msra.mxu0 %v9195_v50  ;;  %v18729_v6 = vand.u32 4294901760, %v18728_v43  ;;  %v18730_v40 = vand.u32 4294901760, %v18525_v17  ;;  %v18731_v58 = vand.u32 4294901760, %v18526_v36  ;;  %v18757_v52 = vld [vmem:[#allocation80_spill] sm:$0xff] }
 0x581   :  { %v13831_v34 = vpack.c.bf16 %v18725_v48, %v18724_v57  ;;  %9198 = vmatprep.subr.bf16.mxu0 %v9197_v31  ;;  %v18732_v25 = vand.u32 4294901760, %v13665_v53  ;;  %v18733_v4 = vand.u32 4294901760, %v13667_v49  ;;  %v13849_v13 = vpack.c.bf16 %v4213_v15, %v4209_v28  ;;  %v18759_v48 = vld [vmem:[#allocation52_spill] sm:$0xff] }
 0x582   :  { %18721 = vst [vmem:[#allocation14_spill] sm:$0xff] %v13820_v63  ;;  %v9199_v2 = vpack.c.bf16 %v18729_v6, %v18727_v62  ;;  %v9201_v1 = vpack.c.bf16 %v18731_v58, %v18730_v40  ;;  %9320 = vmatpush1.bf16.msra.mxu1 %v13820_v63  ;;  %v18736_v31 = vand.u32 4294901760, %v18527_v39  ;;  %v18737_v17 = vand.u32 4294901760, %v12870_v45  ;;  %v18767_v40 = vld [vmem:[#allocation31_spill] sm:$0xff]  ;;  %v18768_v58 = vld [vmem:[#allocation42_spill] sm:$0xff]  ;;  %v18832_v63 = vld [vmem:[#allocation48_spill] sm:$0xff] }
 0x583   :  { %18726 = vst [vmem:[#allocation55_spill] sm:$0xff] %v13831_v34  ;;  %v13846_v18 = vpack.c.bf16 %v18733_v4, %v18732_v25  ;;  %9322 = vmatprep.subr.bf16.mxu1 %v13831_v34  ;;  %18735 = vst [vmem:[#allocation109_spill] sm:$0xff] %v13849_v13  ;;  %v18738_v36 = vand.u32 4294901760, %v12880_v19  ;;  %v18739_v46 = vand.u32 4294901760, %v12882_v22  ;;  %v13860_v49 = vpack.c.bf16 %v4215_v59, %v4211_v3  ;;  %v18770_v25 = vld [vmem:[#allocation51_spill] sm:$0xff] }
 0x584   :  { %9200 = vmatpush1.bf16.msra.mxu0 %v9199_v2  ;;  %v9203_v50 = vpack.c.bf16 %v18737_v17, %v18736_v31  ;;  %v13863_v28 = vpack.c.bf16 %v4221_v14, %v4217_v9  ;;  %v18742_v39 = vand.u32 4294901760, %v18556_v41  ;;  %v18743_v45 = vand.u32 4294901760, %v18557_v12  ;;  %v18749_v14 = vld [vmem:[#allocation27_spill] sm:$0xff]  ;;  %v18766_v2 = vld [vmem:[#allocation30_spill] sm:$0xff]  ;;  %v18772_v31 = vld [vmem:[#allocation68_spill] sm:$0xff] }
 0x585   :  { %18734 = vst [vmem:[#allocation106_spill] sm:$0xff] %v13846_v18  ;;  %9202 = vmatprep.subr.bf16.mxu0 %v9201_v1  ;;  %v9205_v53 = vpack.c.bf16 %v18739_v46, %v18738_v36  ;;  %18740 = vst [vmem:[#allocation33_spill] sm:$0xff] %v13860_v49  ;;  %v18744_v19 = vand.u32 4294901760, %v18558_v44  ;;  %v18745_v22 = vand.u32 4294901760, %v13035_v10  ;;  %v13874_v3 = vpack.c.bf16 %v4223_v54, %v4219_v35  ;;  %v18755_v54 = vld [vmem:[#allocation16_spill] sm:$0xff]  ;;  %v18769_v1 = vld [vmem:[#allocation37_spill] sm:$0xff] }
 0x586   :  { %9324 = vmatpush1.bf16.msra.mxu1 %v13846_v18  ;;  %18741 = vst [vmem:[#allocation97_spill] sm:$0xff] %v13863_v28  ;;  %v9207_v15 = vpack.c.bf16 %v18743_v45, %v18742_v39  ;;  %v13877_v9 = vpack.c.bf16 %v4229_v33, %v4225_v7  ;;  %v18748_v41 = vand.u32 4294901760, %v13037_v47  ;;  %v18750_v12 = vand.u32 4294901760, %v18749_v14  ;;  %v18771_v4 = vld [vmem:[#allocation63_spill] sm:$0xff]  ;;  %v18776_v46 = vld [vmem:[#allocation108_spill] sm:$0xff]  ;;  %v18778_v39 = vld [vmem:[#allocation34_spill] sm:$0xff] }
 0x587   :  { %9326 = vmatprep.subr.bf16.mxu1 %v13849_v13  ;;  %v9209_v16 = vpack.c.bf16 %v18745_v22, %v18744_v19  ;;  %18746 = vst [vmem:[#allocation100_spill] sm:$0xff] %v13874_v3  ;;  %v18751_v44 = vand.u32 4294901760, %v13042_v42  ;;  %v18752_v10 = vand.u32 4294901760, %v13044_v56  ;;  %v13888_v35 = vpack.c.bf16 %v4231_v8, %v4227_v32  ;;  %v18761_v56 = vld [vmem:[#allocation53_spill] sm:$0xff]  ;;  %v18763_v8 = vld [vmem:[#allocation58_spill] sm:$0xff]  ;;  %v18773_v17 = vld [vmem:[#allocation79_spill] sm:$0xff] }
 0x588   :  { %9204 = vmatpush1.bf16.msra.mxu0 %v9203_v50  ;;  %18747 = vst [vmem:[#allocation101_spill] sm:$0xff] %v13877_v9  ;;  %v9211_v59 = vpack.c.bf16 %v18750_v12, %v18748_v41  ;;  %v18754_v33 = vand.u32 4294901760, %v13046_v0  ;;  %v18756_v47 = vand.u32 4294901760, %v18755_v54  ;;  %v18758_v57 = vand.u32 4294901760, %v18757_v52  ;;  %v18765_v0 = vld [vmem:[#allocation18_spill] sm:$0xff]  ;;  %v18774_v50 = vld [vmem:[#allocation41_spill] sm:$0xff] }
 0x589   :  { %9206 = vmatprep.subr.bf16.mxu0 %v9205_v53  ;;  %v9213_v37 = vpack.c.bf16 %v18752_v10, %v18751_v44  ;;  %18753 = vst [vmem:[#allocation27_spill] sm:$0xff] %v13888_v35  ;;  %v18760_v42 = vand.u32 4294901760, %v18759_v48  ;;  %v18762_v32 = vand.u32 4294901760, %v18761_v56  ;;  %v18764_v43 = vand.u32 4294901760, %v18763_v8  ;;  %v18775_v36 = vld [vmem:[#allocation47_spill] sm:$0xff]  ;;  %v18777_v53 = vld [vmem:[#allocation29_spill] sm:$0xff] }
 0x58a   :  { %9328 = vmatpush1.bf16.msra.mxu1 %v13860_v49  ;;  %v9215_v7 = vpack.c.bf16 %v18756_v47, %v18754_v33  ;;  %v18779_v45 = vld [vmem:[#allocation40_spill] sm:$0xff]  ;;  %v18781_v19 = vld [vmem:[#allocation95_spill] sm:$0xff]  ;;  %v18782_v22 = vld [vmem:[#allocation62_spill] sm:$0xff] }
 0x58b   :  { %9330 = vmatprep.subr.bf16.mxu1 %v13863_v28  ;;  %v9217_v62 = vpack.c.bf16 %v18760_v42, %v18758_v57  ;;  %v9219_v6 = vpack.c.bf16 %v18764_v43, %v18762_v32  ;;  %v18784_v41 = vld [vmem:[#allocation67_spill] sm:$0xff]  ;;  %v18785_v14 = vld [vmem:[#allocation78_spill] sm:$0xff]  ;;  %v18786_v12 = vld [vmem:[#allocation104_spill] sm:$0xff] }
 0x58c   :  { %9208 = vmatpush1.bf16.msra.mxu0 %v9207_v15  ;;  %v18780_v15 = vld [vmem:[#allocation90_spill] sm:$0xff]  ;;  %v18788_v44 = vld [vmem:[#allocation56_spill] sm:$0xff]  ;;  %v18789_v10 = vld [vmem:[#allocation117_spill] sm:$0xff] }
 0x58d   :  { %9210 = vmatprep.subr.bf16.mxu0 %v9209_v16  ;;  %v18783_v16 = vld [vmem:[#allocation64_spill] sm:$0xff]  ;;  %v18791_v33 = vld [vmem:[#allocation119_spill] sm:$0xff]  ;;  %v18792_v54 = vld [vmem:[#allocation50_spill] sm:$0xff] }
 0x58e   :  { %9332 = vmatpush1.bf16.msra.mxu1 %v13874_v3  ;;  %v18793_v47 = vld [vmem:[#allocation8_spill] sm:$0xff]  ;;  %v18795_v52 = vld [vmem:[#allocation10_spill] sm:$0xff]  ;;  %v18796_v57 = vld [vmem:[#allocation11_spill] sm:$0xff] }
 0x58f   :  { %9334 = vmatprep.subr.bf16.mxu1 %v13877_v9  ;;  %v18797_v48 = vld [vmem:[#allocation13_spill] sm:$0xff]  ;;  %v18798_v42 = vld [vmem:[#allocation23_spill] sm:$0xff] }
 0x590   :  { %9212 = vmatpush1.bf16.msra.mxu0 %v9211_v59  ;;  %v18787_v59 = vld [vmem:[#allocation54_spill] sm:$0xff]  ;;  %v4117_v43 = vld [vmem:[#allocation2 + $0x7a0] sm:$0xff] }
 0x591   :  { %9214 = vmatprep.subr.bf16.mxu0 %v9213_v37  ;;  %v18790_v37 = vld [vmem:[#allocation118_spill] sm:$0xff]  ;;  %v18829_v49 = vld [vmem:[#allocation87_spill] sm:$0xff] }
 0x592   :  { %9336 = vmatpush1.bf16.msra.mxu1 %v13888_v35  ;;  %v4120_v56 = vld [vmem:[#allocation2 + $0x7b8] sm:$0xff] }
 0x593   :  { %v4237_v8 = vand.u32 4294901760, %v4120_v56 }
 0x594   :  { %9216 = vmatpush1.bf16.msra.mxu0 %v9215_v7  ;;  %v18794_v7 = vld [vmem:[#allocation9_spill] sm:$0xff] }
 0x595   :  { %9218 = vmatprep.subr.bf16.mxu0 %v9217_v62  ;;  %v4118_v62 = vld [vmem:[#allocation2 + $0x7a8] sm:$0xff] }
 0x596   :  { %v4233_v32 = vand.u32 4294901760, %v4118_v62 }
 0x598   :  { %9220 = vmatpush1.bf16.msra.mxu0 %v9219_v6  ;;  %v4119_v6 = vld [vmem:[#allocation2 + $0x7b0] sm:$0xff] }
 0x599   :  { %9222 = vmatprep.subr.bf16.mxu0 %v18765_v0  ;;  %v4235_v0 = vand.u32 4294901760, %v4117_v43 }
 0x59b   :  { %3921 = vmatmul.mubr.f32.vlgmr.msra.gmra.mrb[2].mxu0 %v18766_v2 }
 0x59c   :  { %9224 = vmatpush1.bf16.msra.mxu0 %v18767_v40  ;;  %4056 = vmatprep.mubr.f32.mxu0 %v18768_v58  ;;  %v4239_v40 = vand.u32 4294901760, %v4119_v6  ;;  %v13939_v58 = vpack.c.bf16 %v4237_v8, %v4233_v32 }
 0x59d   :  { %9226 = vmatprep.subr.bf16.mxu0 %v18769_v1 }
 0x59e   :  { %18799 = vst [vmem:[#allocation16_spill] sm:$0xff] %v13939_v58  ;;  %v13941_v1 = vpack.c.bf16 %v4239_v40, %v4235_v0  ;;  %9338 = vmatprep.subr.bf16.mxu1 %v13939_v58 }
 0x5a0   :  { %9228 = vmatpush1.bf16.msra.mxu0 %v18770_v25  ;;  %18800 = vst [vmem:[#allocation80_spill] sm:$0xff] %v13941_v1  ;;  %v4122_v25 = vld [vmem:[#allocation2 + $0x7c8] sm:$0xff]  ;;  %9340 = vmatpush1.bf16.msra.mxu1 %v13941_v1 }
 0x5a1   :  { %9230 = vmatprep.subr.bf16.mxu0 %v18771_v4  ;;  %v4124_v4 = vld [vmem:[#allocation2 + $0x7d8] sm:$0xff] }
 0x5a4   :  { %9232 = vmatpush1.bf16.msra.mxu0 %v18772_v31  ;;  %v4241_v31 = vand.u32 4294901760, %v4122_v25 }
 0x5a5   :  { %9234 = vmatprep.subr.bf16.mxu0 %v18773_v17  ;;  %v4245_v17 = vand.u32 4294901760, %v4124_v4 }
 0x5a7   :  { %v13975_v1 = vsub.f32 %v4124_v4, %v4245_v17 }
 0x5a8   :  { %9236 = vmatpush1.bf16.msra.mxu0 %v18774_v50  ;;  %v4121_v50 = vld [vmem:[#allocation2 + $0x7c0] sm:$0xff] }
 0x5a9   :  { %9238 = vmatprep.subr.bf16.mxu0 %v18775_v36  ;;  %v4243_v36 = vand.u32 4294901760, %v4121_v50 }
 0x5ac   :  { %9240 = vmatpush1.bf16.msra.mxu0 %v18776_v46 }
 0x5ad   :  { %9242 = vmatprep.subr.bf16.mxu0 %v18777_v53  ;;  %v13945_v53 = vpack.c.bf16 %v4245_v17, %v4241_v31 }
 0x5af   :  { %18801 = vst [vmem:[#allocation52_spill] sm:$0xff] %v13945_v53  ;;  %9342 = vmatprep.subr.bf16.mxu1 %v13945_v53  ;;  %v13970_v53 = vsub.f32 %v4119_v6, %v4239_v40 }
 0x5b0   :  { %9244 = vmatpush1.bf16.msra.mxu0 %v18778_v39 }
 0x5b1   :  { %9246 = vmatprep.subr.bf16.mxu0 %v18779_v45  ;;  %v4126_v45 = vld [vmem:[#allocation2 + $0x7e8] sm:$0xff]  ;;  %18808 = vst [vmem:[#allocation31_spill] sm:$0xff] %v13970_v53 }
 0x5b4   :  { %9248 = vmatpush1.bf16.msra.mxu0 %v18780_v15  ;;  %v4128_v15 = vld [vmem:[#allocation2 + $0x7f8] sm:$0xff] }
 0x5b5   :  { %9250 = vmatprep.subr.bf16.mxu0 %v18781_v19  ;;  %v4249_v19 = vand.u32 4294901760, %v4126_v45 }
 0x5b8   :  { %9252 = vmatpush1.bf16.msra.mxu0 %v18782_v22  ;;  %v4253_v22 = vand.u32 4294901760, %v4128_v15 }
 0x5b9   :  { %9254 = vmatprep.subr.bf16.mxu0 %v18783_v16  ;;  %v4125_v16 = vld [vmem:[#allocation2 + $0x7e0] sm:$0xff] }
 0x5bc   :  { %9256 = vmatpush1.bf16.msra.mxu0 %v18784_v41  ;;  %v4127_v41 = vld [vmem:[#allocation2 + $0x7f0] sm:$0xff] }
 0x5bd   :  { %9258 = vmatprep.subr.bf16.mxu0 %v18785_v14  ;;  %v18803_v14 = vld [vmem:[#allocation75_spill] sm:$0xff] }
 0x5c0   :  { %9260 = vmatpush1.bf16.msra.mxu0 %v18786_v12  ;;  %v17081_v12 = vand.u32 4294901760, %v18803_v14 }
 0x5c1   :  { %9262 = vmatprep.subr.bf16.mxu0 %v18787_v59  ;;  %v18804_v59 = vld [vmem:[#allocation77_spill] sm:$0xff] }
 0x5c4   :  { %9264 = vmatpush1.bf16.msra.mxu0 %v18788_v44  ;;  %v17084_v44 = vand.u32 4294901760, %v18804_v59 }
 0x5c5   :  { %9266 = vmatprep.subr.bf16.mxu0 %v18789_v10  ;;  %v4251_v10 = vand.u32 4294901760, %v4125_v16 }
 0x5c8   :  { %9268 = vmatpush1.bf16.msra.mxu0 %v18790_v37  ;;  %v4255_v37 = vand.u32 4294901760, %v4127_v41 }
 0x5c9   :  { %9270 = vmatprep.subr.bf16.mxu0 %v18791_v33  ;;  %v13953_v33 = vpack.c.bf16 %v4253_v22, %v4249_v19 }
 0x5cb   :  { %18805 = vst [vmem:[#allocation58_spill] sm:$0xff] %v13953_v33 }
 0x5cc   :  { %9272 = vmatpush1.bf16.msra.mxu0 %v18792_v54  ;;  %v4277_v54 = vsub.f32 %v18803_v14, %v17081_v12  ;;  %v13973_v12 = vsub.f32 %v4122_v25, %v4241_v31  ;;  %v18816_v31 = vld [vmem:[#allocation110_spill] sm:$0xff] }
 0x5cd   :  { %9274 = vmatprep.subr.bf16.mxu0 %v18793_v47  ;;  %v4289_v47 = vsub.f32 %v18804_v59, %v17084_v44  ;;  %v13977_v44 = vsub.f32 %v4121_v50, %v4243_v36  ;;  %v17091_v17 = vand.u32 4294901760, %v18816_v31  ;;  %v18817_v50 = vld [vmem:[#allocation59_spill] sm:$0xff] }
 0x5d0   :  { %9276 = vmatpush1.bf16.msra.mxu0 %v18794_v7  ;;  %v13961_v7 = vpack.c.bf16 %v4255_v37, %v4251_v10 }
 0x5d1   :  { %9278 = vmatprep.subr.bf16.mxu0 %v18795_v52  ;;  %v4278_v52 = vand.u32 4294901760, %v4277_v54  ;;  %v13981_v54 = vsub.f32 %v4126_v45, %v4249_v19  ;;  %v18819_v19 = vld [vmem:[#allocation65_spill] sm:$0xff] }
 0x5d2   :  { %18806 = vst [vmem:[#allocation18_spill] sm:$0xff] %v13961_v7 }
 0x5d3   :  { %18810 = vst [vmem:[#allocation37_spill] sm:$0xff] %v13981_v54 }
 0x5d4   :  { %9280 = vmatpush1.bf16.msra.mxu0 %v18796_v57  ;;  %v4290_v57 = vand.u32 4294901760, %v4289_v47 }
 0x5d5   :  { %9282 = vmatprep.subr.bf16.mxu0 %v18797_v48  ;;  %v13964_v48 = vsub.f32 %v4118_v62, %v4233_v32  ;;  %v13983_v62 = vsub.f32 %v4128_v15, %v4253_v22  ;;  %v13987_v32 = vsub.f32 %v4127_v41, %v4255_v37  ;;  %v18825_v41 = vld [vmem:[#allocation81_spill] sm:$0xff] }
 0x5d7   :  { %18807 = vst [vmem:[#allocation30_spill] sm:$0xff] %v13964_v48  ;;  %18811 = vst [vmem:[#allocation51_spill] sm:$0xff] %v13983_v62 }
 0x5d8   :  { %9284 = vmatpush1.bf16.msra.mxu0 %v18798_v42  ;;  %v13966_v42 = vsub.f32 %v4120_v56, %v4237_v8  ;;  %v13985_v56 = vsub.f32 %v4125_v16, %v4251_v10  ;;  %18813 = vst [vmem:[#allocation68_spill] sm:$0xff] %v13987_v32  ;;  %v9349_v8 = vpack.c.bf16 %v4290_v57, %v4278_v52  ;;  %v18820_v16 = vld [vmem:[#allocation112_spill] sm:$0xff]  ;;  %v18821_v10 = vld [vmem:[#allocation114_spill] sm:$0xff] }
 0x5d9   :  { %v18827_v35 = vand.u32 4294901760, %v18820_v16 }
 0x5da   :  { %18812 = vst [vmem:[#allocation63_spill] sm:$0xff] %v13985_v56 }
 0x5db   :  { %4058 = vmatmul.mubr.f32.vlgmr.msra.gmra.mrb[2].mxu0 %v18766_v2  ;;  %v4123_v2 = vld [vmem:[#allocation2 + $0x7d0] sm:$0xff] }
 0x5dc   :  { %v4247_v46 = vand.u32 4294901760, %v4123_v2 }
 0x5de   :  { %v13947_v39 = vpack.c.bf16 %v4247_v46, %v4243_v36  ;;  %v13979_v58 = vsub.f32 %v4123_v2, %v4247_v46  ;;  %v17096_v2 = vand.u32 4294901760, %v18817_v50  ;;  %v17099_v46 = vand.u32 4294901760, %v13514_v21 }
 0x5e0   :  { %18802 = vst [vmem:[#allocation53_spill] sm:$0xff] %v13947_v39  ;;  %9344 = vmatpush1.bf16.msra.mxu1 %v13947_v39  ;;  %v13968_v39 = vsub.f32 %v4117_v43, %v4235_v0  ;;  %18809 = vst [vmem:[#allocation42_spill] sm:$0xff] %v13979_v58  ;;  %v18814_v43 = vld [vmem:[#allocation93_spill] sm:$0xff]  ;;  %v18815_v0 = vld [vmem:[#allocation102_spill] sm:$0xff]  ;;  %v4307_v37 = vsub.f32 %v13514_v21, %v17099_v46 }
 0x5e1   :  { %9346 = vmatprep.subr.bf16.mxu1 %v13953_v33  ;;  %v17088_v6 = vand.u32 4294901760, %v18814_v43  ;;  %v17087_v40 = vand.u32 4294901760, %v18815_v0 }
 0x5e2   :  { %v4308_v18 = vand.u32 4294901760, %v4307_v37 }
 0x5e3   :  { %v4283_v25 = vsub.f32 %v18814_v43, %v17088_v6  ;;  %v4295_v4 = vsub.f32 %v18815_v0, %v17087_v40  ;;  %v4313_v6 = vsub.f32 %v18817_v50, %v17096_v2  ;;  %v4325_v2 = vsub.f32 %v18820_v16, %v18827_v35 }
 0x5e4   :  { %9348 = vmatpush1.bf16.msra.mxu1 %v13961_v7 }
 0x5e5   :  { %9350 = vmatprep.subr.bf16.mxu1 %v9349_v8  ;;  %v4284_v52 = vand.u32 4294901760, %v4283_v25  ;;  %v4296_v57 = vand.u32 4294901760, %v4295_v4  ;;  %v4301_v8 = vsub.f32 %v18816_v31, %v17091_v17  ;;  %v18824_v25 = vld [vmem:[#allocation116_spill] sm:$0xff]  ;;  %v4314_v28 = vand.u32 4294901760, %v4313_v6 }
 0x5e7   :  { %v9351_v3 = vpack.c.bf16 %v4296_v57, %v4284_v52  ;;  %v4302_v4 = vand.u32 4294901760, %v4301_v8  ;;  %v18831_v52 = vand.u32 4294901760, %v18825_v41 }
 0x5e9   :  { %v4343_v57 = vsub.f32 %v18825_v41, %v18831_v52  ;;  %v18834_v52 = vand.u32 4294901760, %v13541_v51 }
 0x6ae   :  { %v4059_v36 = vpop.f32.mrb[2].mxu0 }
 0x6af   :  { %v14000_v45 = vand.u32 4294901760, %v4059_v36  ;;  %v4061_v15 = vpop.f32.mrb[3].mxu0 }
 0x6b0   :  { %v14005_v47 = vand.u32 4294901760, %v4061_v15 }
 0x6b1   :  { %18818 = vst [vmem:[#allocation79_spill] sm:$0xff] %v14000_v45  ;;  %v14011_v40 = vsub.f32 %v4059_v36, %v14000_v45  ;;  %v18826_v36 = vand.u32 4294901760, %v18819_v19 }
 0x6b2   :  { %18822 = vst [vmem:[#allocation41_spill] sm:$0xff] %v14005_v47  ;;  %v14017_v22 = vsub.f32 %v4061_v15, %v14005_v47  ;;  %v18828_v15 = vand.u32 4294901760, %v18821_v10 }
 0x6b3   :  { %18823 = vst [vmem:[#allocation47_spill] sm:$0xff] %v14011_v40  ;;  %v17112_v17 = vand.u32 4294901760, %v14011_v40  ;;  %v4319_v33 = vsub.f32 %v18819_v19, %v18826_v36  ;;  %v18835_v36 = vld [vmem:[#allocation22_spill] sm:$0xff] }
 0x6b4   :  { %v4337_v9 = vsub.f32 %v18821_v10, %v18828_v15  ;;  %v17119_v46 = vand.u32 4294901760, %v14017_v22  ;;  %v18830_v15 = vand.u32 4294901760, %v18824_v25  ;;  %v17131_v13 = vand.u32 4294901760, %v18835_v36 }
 0x6b5   :  { %v4266_v7 = vsub.f32 %v14011_v40, %v17112_v17  ;;  %v4320_v8 = vand.u32 4294901760, %v4319_v33  ;;  %v4326_v17 = vand.u32 4294901760, %v4325_v2  ;;  %v9353_v40 = vpack.c.bf16 %v4314_v28, %v4302_v4  ;;  %v18837_v4 = vld [vmem:[#allocation49_spill] sm:$0xff] }
 0x6b6   :  { %v4260_v35 = vsub.f32 %v14017_v22, %v17119_v46  ;;  %v4331_v34 = vsub.f32 %v18824_v25, %v18830_v15  ;;  %v4338_v6 = vand.u32 4294901760, %v4337_v9  ;;  %v18833_v15 = vand.u32 4294901760, %v18829_v49 }
 0x6b7   :  { %v4267_v46 = vand.u32 4294901760, %v4266_v7  ;;  %v4361_v33 = vsub.f32 %v13541_v51, %v18834_v52  ;;  %v4344_v2 = vand.u32 4294901760, %v4343_v57  ;;  %v9355_v23 = vpack.c.bf16 %v4320_v8, %v4308_v18 }
 0x6b8   :  { %v4261_v55 = vand.u32 4294901760, %v4260_v35  ;;  %v4349_v25 = vsub.f32 %v18829_v49, %v18833_v15  ;;  %v4332_v9 = vand.u32 4294901760, %v4331_v34  ;;  %v17128_v35 = vand.u32 4294901760, %v13573_v30  ;;  %v18838_v15 = vld [vmem:[#allocation57_spill] sm:$0xff] }
 0x6b9   :  { %v18836_v7 = vand.u32 4294901760, %v18832_v63  ;;  %v18840_v57 = vand.u32 4294901760, %v13559_v5  ;;  %v18841_v18 = vand.u32 4294901760, %v13570_v60  ;;  %v9357_v52 = vpack.c.bf16 %v4338_v6, %v4326_v17  ;;  %v18844_v17 = vld [vmem:[#allocation60_spill] sm:$0xff]  ;;  %v18845_v6 = vld [vmem:[#allocation66_spill] sm:$0xff] }
 0x6ba   :  { %4262 = vmatprep.mubr.f32.mxu1 %v4261_v55  ;;  %v18839_v55 = vand.u32 4294901760, %v13557_v11  ;;  %v4362_v37 = vand.u32 4294901760, %v4361_v33  ;;  %v9359_v49 = vpack.c.bf16 %v4344_v2, %v4332_v9  ;;  %v17145_v33 = vand.u32 4294901760, %v18845_v6 }
 0x6bb   :  { %4268 = vmatmul.mubr.f32.vlgmr.msra.gmra.mrb[2].mxu1 %v4267_v46  ;;  %v4355_v28 = vsub.f32 %v18832_v63, %v18836_v7  ;;  %v4373_v46 = vsub.f32 %v13559_v5, %v18840_v57  ;;  %v4385_v8 = vsub.f32 %v13570_v60, %v18841_v18  ;;  %v4350_v7 = vand.u32 4294901760, %v4349_v25  ;;  %v18847_v60 = vld [vmem:[#allocation61_spill] sm:$0xff]  ;;  %v18848_v63 = vld [vmem:[#allocation91_spill] sm:$0xff] }
 0x6bc   :  { %9352 = vmatpush1.bf16.msra.mxu1 %v9351_v3  ;;  %4659 = vmatprep.mubr.f32.mxu1 %v14005_v47  ;;  %v4367_v34 = vsub.f32 %v13557_v11, %v18839_v55  ;;  %v4379_v3 = vsub.f32 %v13573_v30, %v17128_v35  ;;  %v4391_v55 = vsub.f32 %v18835_v36, %v17131_v13  ;;  %v18842_v47 = vand.u32 4294901760, %v18837_v4  ;;  %v18846_v13 = vld [vmem:[#allocation96_spill] sm:$0xff] }
 0x6bd   :  { %9354 = vmatprep.subr.bf16.mxu1 %v9353_v40  ;;  %v18843_v5 = vand.u32 4294901760, %v18838_v15  ;;  %v4356_v9 = vand.u32 4294901760, %v4355_v28  ;;  %v4374_v18 = vand.u32 4294901760, %v4373_v46  ;;  %v4386_v35 = vand.u32 4294901760, %v4385_v8 }
 0x6be   :  { %v4397_v57 = vsub.f32 %v18837_v4, %v18842_v47  ;;  %v4368_v2 = vand.u32 4294901760, %v4367_v34  ;;  %v9361_v30 = vpack.c.bf16 %v4362_v37, %v4350_v7  ;;  %v17144_v36 = vand.u32 4294901760, %v18846_v13  ;;  %v18851_v7 = vld [vmem:[#allocation76_spill] sm:$0xff] }
 0x6bf   :  { %v4409_v40 = vsub.f32 %v18838_v15, %v18843_v5  ;;  %v17143_v11 = vand.u32 4294901760, %v18847_v60  ;;  %v4380_v47 = vand.u32 4294901760, %v4379_v3  ;;  %v4392_v4 = vand.u32 4294901760, %v4391_v55  ;;  %v18849_v5 = vld [vmem:[#allocation71_spill] sm:$0xff]  ;;  %v18852_v55 = vld [vmem:[#allocation82_spill] sm:$0xff] }
 0x6c0   :  { %9356 = vmatpush1.bf16.msra.mxu1 %v9355_v23  ;;  %v17148_v51 = vand.u32 4294901760, %v18848_v63  ;;  %v17150_v15 = vand.u32 4294901760, %v18849_v5  ;;  %v4398_v25 = vand.u32 4294901760, %v4397_v57  ;;  %v18850_v23 = vand.u32 4294901760, %v18844_v17  ;;  %v18856_v57 = vld [vmem:[#allocation26_spill] sm:$0xff] }
 0x6c1   :  { %9358 = vmatprep.subr.bf16.mxu1 %v9357_v52  ;;  %v4410_v41 = vand.u32 4294901760, %v4409_v40  ;;  %v4415_v37 = vsub.f32 %v18845_v6, %v17145_v33  ;;  %v9363_v34 = vpack.c.bf16 %v4368_v2, %v4356_v9  ;;  %v9365_v46 = vpack.c.bf16 %v4386_v35, %v4374_v18  ;;  %v18853_v18 = vld [vmem:[#allocation85_spill] sm:$0xff] }
 0x6c2   :  { %v4403_v28 = vsub.f32 %v18844_v17, %v18850_v23  ;;  %v4421_v8 = vsub.f32 %v18846_v13, %v17144_v36  ;;  %v4433_v52 = vsub.f32 %v18847_v60, %v17143_v11  ;;  %v4427_v40 = vsub.f32 %v18848_v63, %v17148_v51  ;;  %v18854_v11 = vld [vmem:[#allocation24_spill] sm:$0xff]  ;;  %v18855_v33 = vld [vmem:[#allocation25_spill] sm:$0xff] }
 0x6c3   :  { %v9369_v35 = vpack.c.bf16 %v4410_v41, %v4398_v25  ;;  %v4416_v2 = vand.u32 4294901760, %v4415_v37  ;;  %v18857_v63 = vand.u32 4294901760, %v18851_v7  ;;  %v18858_v41 = vand.u32 4294901760, %v18852_v55  ;;  %v18861_v23 = vld [vmem:[#allocation84_spill] sm:$0xff] }
 0x6c4   :  { %9360 = vmatpush1.bf16.msra.mxu1 %v9359_v49  ;;  %v9367_v49 = vpack.c.bf16 %v4392_v4, %v4380_v47  ;;  %v4404_v9 = vand.u32 4294901760, %v4403_v28  ;;  %v4422_v13 = vand.u32 4294901760, %v4421_v8  ;;  %v4434_v51 = vand.u32 4294901760, %v4433_v52  ;;  %v18859_v28 = vld [vmem:[#allocation28_spill] sm:$0xff] }
 0x6c5   :  { %9362 = vmatprep.subr.bf16.mxu1 %v9361_v30  ;;  %v4439_v30 = vsub.f32 %v18849_v5, %v17150_v15  ;;  %v4445_v15 = vsub.f32 %v18851_v7, %v18857_v63  ;;  %v4457_v4 = vsub.f32 %v18852_v55, %v18858_v41  ;;  %v4428_v25 = vand.u32 4294901760, %v4427_v40 }
 0x6c6   :  { %v17155_v37 = vand.u32 4294901760, %v18859_v28  ;;  %v9371_v3 = vpack.c.bf16 %v4416_v2, %v4404_v9  ;;  %v18863_v52 = vand.u32 4294901760, %v18853_v18  ;;  %v18864_v7 = vand.u32 4294901760, %v18854_v11 }
 0x6c7   :  { %v4440_v47 = vand.u32 4294901760, %v4439_v30  ;;  %v18865_v40 = vand.u32 4294901760, %v18855_v33  ;;  %v18866_v36 = vand.u32 4294901760, %v18856_v57  ;;  %v9373_v2 = vpack.c.bf16 %v4434_v51, %v4422_v13  ;;  %v18870_v51 = vld [vmem:[#allocation36_spill] sm:$0xff] }
 0x6c8   :  { %9364 = vmatpush1.bf16.msra.mxu1 %v9363_v34  ;;  %v18860_v34 = vld [vmem:[#allocation83_spill] sm:$0xff]  ;;  %v4451_v63 = vsub.f32 %v18853_v18, %v18863_v52  ;;  %v4463_v41 = vsub.f32 %v18854_v11, %v18864_v7  ;;  %v4446_v8 = vand.u32 4294901760, %v4445_v15  ;;  %v4475_v52 = vsub.f32 %v18859_v28, %v17155_v37 }
 0x6c9   :  { %9366 = vmatprep.subr.bf16.mxu1 %v9365_v46  ;;  %v18862_v46 = vld [vmem:[#allocation35_spill] sm:$0xff]  ;;  %v4469_v30 = vsub.f32 %v18855_v33, %v18865_v40  ;;  %v4481_v9 = vsub.f32 %v18856_v57, %v18866_v36  ;;  %v9375_v60 = vpack.c.bf16 %v4440_v47, %v4428_v25  ;;  %v18867_v18 = vand.u32 4294901760, %v18860_v34 }
 0x6ca   :  { %v18868_v11 = vand.u32 4294901760, %v18861_v23  ;;  %v18869_v33 = vand.u32 4294901760, %v18862_v46  ;;  %v18871_v15 = vld [vmem:[#allocation43_spill] sm:$0xff]  ;;  %v4464_v25 = vand.u32 4294901760, %v4463_v41  ;;  %v17163_v57 = vand.u32 4294901760, %v13763_v26 }
 0x6cb   :  { %v4487_v7 = vsub.f32 %v18860_v34, %v18867_v18  ;;  %v4470_v47 = vand.u32 4294901760, %v4469_v30  ;;  %v4482_v37 = vand.u32 4294901760, %v4481_v9  ;;  %v18872_v18 = vld [vmem:[#allocation44_spill] sm:$0xff]  ;;  %v17166_v55 = vand.u32 4294901760, %v13773_v20 }
 0x6cc   :  { %9368 = vmatpush1.bf16.msra.mxu1 %v9367_v49  ;;  %v4458_v49 = vand.u32 4294901760, %v4457_v4  ;;  %v4493_v40 = vsub.f32 %v18861_v23, %v18868_v11  ;;  %v4505_v36 = vsub.f32 %v18862_v46, %v18869_v33  ;;  %v4452_v4 = vand.u32 4294901760, %v4451_v63  ;;  %v18873_v33 = vld [vmem:[#allocation72_spill] sm:$0xff] }
 0x6cd   :  { %9370 = vmatprep.subr.bf16.mxu1 %v9369_v35  ;;  %v17165_v35 = vand.u32 4294901760, %v18871_v15  ;;  %v17164_v34 = vand.u32 4294901760, %v18872_v18  ;;  %v4476_v11 = vand.u32 4294901760, %v4475_v52  ;;  %v4488_v23 = vand.u32 4294901760, %v4487_v7  ;;  %v18876_v7 = vld [vmem:[#allocation94_spill] sm:$0xff] }
 0x6ce   :  { %v9377_v28 = vpack.c.bf16 %v4458_v49, %v4446_v8  ;;  %v17167_v46 = vand.u32 4294901760, %v18873_v33  ;;  %v4494_v13 = vand.u32 4294901760, %v4493_v40  ;;  %v4506_v5 = vand.u32 4294901760, %v4505_v36  ;;  %v18875_v49 = vld [vmem:[#allocation20_spill] sm:$0xff] }
 0x6cf   :  { %v4511_v8 = vsub.f32 %v18871_v15, %v17165_v35  ;;  %v9379_v41 = vpack.c.bf16 %v4464_v25, %v4452_v4  ;;  %v9381_v30 = vpack.c.bf16 %v4482_v37, %v4470_v47  ;;  %v4517_v9 = vsub.f32 %v18872_v18, %v17164_v34  ;;  %v18877_v47 = vld [vmem:[#allocation70_spill] sm:$0xff] }
 0x6d0   :  { %9372 = vmatpush1.bf16.msra.mxu1 %v9371_v3  ;;  %v18874_v3 = vand.u32 4294901760, %v18870_v51  ;;  %v17168_v52 = vand.u32 4294901760, %v18875_v49  ;;  %v4523_v36 = vsub.f32 %v13773_v20, %v17166_v55  ;;  %v9385_v37 = vpack.c.bf16 %v4506_v5, %v4494_v13 }
 0x6d1   :  { %9374 = vmatprep.subr.bf16.mxu1 %v9373_v2  ;;  %v4529_v2 = vsub.f32 %v13763_v26, %v17163_v57  ;;  %v4512_v25 = vand.u32 4294901760, %v4511_v8  ;;  %v17170_v57 = vand.u32 4294901760, %v13801_v24  ;;  %v17171_v34 = vand.u32 4294901760, %v13811_v61 }
 0x6d2   :  { %v4499_v63 = vsub.f32 %v18870_v51, %v18874_v3  ;;  %v17169_v3 = vand.u32 4294901760, %v18877_v47  ;;  %v4518_v40 = vand.u32 4294901760, %v4517_v9  ;;  %v18878_v5 = vand.u32 4294901760, %v18876_v7 }
 0x6d3   :  { %v4530_v55 = vand.u32 4294901760, %v4529_v2  ;;  %v4524_v13 = vand.u32 4294901760, %v4523_v36  ;;  %v17172_v8 = vand.u32 4294901760, %v13824_v38  ;;  %v17174_v35 = vand.u32 4294901760, %v13964_v48 }
 0x6d4   :  { %9376 = vmatpush1.bf16.msra.mxu1 %v9375_v60  ;;  %v4535_v60 = vsub.f32 %v18873_v33, %v17167_v46  ;;  %v4500_v4 = vand.u32 4294901760, %v4499_v63  ;;  %v4541_v46 = vsub.f32 %v18875_v49, %v17168_v52  ;;  %v17173_v63 = vand.u32 4294901760, %v13822_v27 }
 0x6d5   :  { %9378 = vmatprep.subr.bf16.mxu1 %v9377_v28  ;;  %v9383_v28 = vpack.c.bf16 %v4488_v23, %v4476_v11  ;;  %v4553_v23 = vsub.f32 %v18876_v7, %v18878_v5  ;;  %v4547_v9 = vsub.f32 %v18877_v47, %v17169_v3  ;;  %v4559_v2 = vsub.f32 %v13801_v24, %v17170_v57 }
 0x6d6   :  { %v4536_v11 = vand.u32 4294901760, %v4535_v60  ;;  %v4565_v36 = vsub.f32 %v13811_v61, %v17171_v34  ;;  %v18879_v60 = vand.u32 4294901760, %v13813_v29  ;;  %v4542_v5 = vand.u32 4294901760, %v4541_v46 }
 0x6d7   :  { %v4571_v3 = vsub.f32 %v13822_v27, %v17173_v63  ;;  %v4583_v57 = vsub.f32 %v13824_v38, %v17172_v8  ;;  %v4589_v34 = vsub.f32 %v13964_v48, %v17174_v35  ;;  %v17190_v46 = vand.u32 4294901760, %v13970_v53 }
 0x6d8   :  { %9380 = vmatpush1.bf16.msra.mxu1 %v9379_v41  ;;  %v9387_v41 = vpack.c.bf16 %v4512_v25, %v4500_v4  ;;  %v4577_v4 = vsub.f32 %v13813_v29, %v18879_v60  ;;  %v9389_v25 = vpack.c.bf16 %v4530_v55, %v4518_v40  ;;  %v9391_v52 = vpack.c.bf16 %v4536_v11, %v4524_v13 }
 0x6d9   :  { %9382 = vmatprep.subr.bf16.mxu1 %v9381_v30  ;;  %v17181_v30 = vand.u32 4294901760, %v13966_v42  ;;  %v17191_v55 = vand.u32 4294901760, %v13968_v39  ;;  %v4548_v40 = vand.u32 4294901760, %v4547_v9  ;;  %v4566_v13 = vand.u32 4294901760, %v4565_v36 }
 0x6da   :  { %v4578_v11 = vand.u32 4294901760, %v4577_v4  ;;  %v17189_v8 = vand.u32 4294901760, %v13973_v12  ;;  %v17182_v63 = vand.u32 4294901760, %v13975_v1  ;;  %v4572_v35 = vand.u32 4294901760, %v4571_v3 }
 0x6db   :  { %v4584_v48 = vand.u32 4294901760, %v4583_v57  ;;  %v4590_v38 = vand.u32 4294901760, %v4589_v34  ;;  %v17188_v36 = vand.u32 4294901760, %v13977_v44  ;;  %v17184_v4 = vand.u32 4294901760, %v13979_v58 }
 0x6dc   :  { %9384 = vmatpush1.bf16.msra.mxu1 %v9383_v28  ;;  %v4554_v28 = vand.u32 4294901760, %v4553_v23  ;;  %v4560_v23 = vand.u32 4294901760, %v4559_v2  ;;  %v9397_v2 = vpack.c.bf16 %v4578_v11, %v4566_v13  ;;  %v4613_v57 = vsub.f32 %v13973_v12, %v17189_v8 }
 0x6dd   :  { %9386 = vmatprep.subr.bf16.mxu1 %v9385_v37  ;;  %v4601_v37 = vsub.f32 %v13966_v42, %v17181_v30  ;;  %v4595_v30 = vsub.f32 %v13968_v39, %v17191_v55  ;;  %v4625_v34 = vsub.f32 %v13975_v1, %v17182_v63  ;;  %v17183_v3 = vand.u32 4294901760, %v13981_v54 }
 0x6de   :  { %v9393_v60 = vpack.c.bf16 %v4554_v28, %v4542_v5  ;;  %v9395_v9 = vpack.c.bf16 %v4560_v23, %v4548_v40  ;;  %v4619_v40 = vsub.f32 %v13977_v44, %v17188_v36  ;;  %v4631_v23 = vsub.f32 %v13979_v58, %v17184_v4  ;;  %v18897_v36 = vld [vmem:[#allocation82_spill] sm:$0xff] }
 0x6df   :  { %v4602_v27 = vand.u32 4294901760, %v4601_v37  ;;  %v4596_v28 = vand.u32 4294901760, %v4595_v30  ;;  %v17187_v13 = vand.u32 4294901760, %v13985_v56  ;;  %v17186_v11 = vand.u32 4294901760, %v13987_v32 }
 0x6e0   :  { %9388 = vmatpush1.bf16.msra.mxu1 %v9387_v41  ;;  %v4607_v41 = vsub.f32 %v13970_v53, %v17190_v46  ;;  %v4626_v63 = vand.u32 4294901760, %v4625_v34  ;;  %v4632_v30 = vand.u32 4294901760, %v4631_v23  ;;  %v18899_v46 = vld [vmem:[#allocation24_spill] sm:$0xff] }
 0x6e1   :  { %9390 = vmatprep.subr.bf16.mxu1 %v9389_v25  ;;  %v17185_v25 = vand.u32 4294901760, %v13983_v62  ;;  %v9401_v5 = vpack.c.bf16 %v4602_v27, %v4590_v38  ;;  %v4637_v27 = vsub.f32 %v13981_v54, %v17183_v3 }
 0x6e2   :  { %v4608_v37 = vand.u32 4294901760, %v4607_v41  ;;  %v4643_v41 = vsub.f32 %v13985_v56, %v17187_v13 }
 0x6e3   :  { %v4649_v38 = vsub.f32 %v13983_v62, %v17185_v25 }
 0x6e4   :  { %9392 = vmatpush1.bf16.msra.mxu1 %v9391_v52  ;;  %v9399_v52 = vpack.c.bf16 %v4584_v48, %v4572_v35  ;;  %v9403_v48 = vpack.c.bf16 %v4608_v37, %v4596_v28  ;;  %v4620_v35 = vand.u32 4294901760, %v4619_v40  ;;  %v4644_v4 = vand.u32 4294901760, %v4643_v41  ;;  %v18886_v41 = vld [vmem:[#allocation12_spill] sm:$0xff] }
 0x6e5   :  { %9394 = vmatprep.subr.bf16.mxu1 %v9393_v60  ;;  %v4614_v60 = vand.u32 4294901760, %v4613_v57  ;;  %v4638_v57 = vand.u32 4294901760, %v4637_v27  ;;  %v4650_v34 = vand.u32 4294901760, %v4649_v38  ;;  %v9413_v37 = vpack.c.bf16 %v18804_v59, %v18803_v14  ;;  %v18883_v27 = vld [vmem:[#allocation89_spill] sm:$0xff] }
 0x6e6   :  { %v9407_v3 = vpack.c.bf16 %v4632_v30, %v4620_v35  ;;  %v9415_v40 = vpack.c.bf16 %v18815_v0, %v18814_v43  ;;  %v18885_v35 = vld [vmem:[#allocation15_spill] sm:$0xff] }
 0x6e8   :  { %9396 = vmatpush1.bf16.msra.mxu1 %v9395_v9  ;;  %v4655_v9 = vsub.f32 %v13987_v32, %v17186_v11  ;;  %v18895_v11 = vld [vmem:[#allocation71_spill] sm:$0xff] }
 0x6e9   :  { %9398 = vmatprep.subr.bf16.mxu1 %v9397_v2  ;;  %v9405_v2 = vpack.c.bf16 %v4626_v63, %v4614_v60  ;;  %v9417_v63 = vpack.c.bf16 %v18817_v50, %v18816_v31  ;;  %v18882_v60 = vld [vmem:[#allocation87_spill] sm:$0xff] }
 0x6ea   :  { %v4656_v25 = vand.u32 4294901760, %v4655_v9  ;;  %v9425_v38 = vpack.c.bf16 %v18883_v27, %v18882_v60  ;;  %v18887_v9 = vld [vmem:[#allocation19_spill] sm:$0xff] }
 0x6ec   :  { %9400 = vmatpush1.bf16.msra.mxu1 %v9399_v52  ;;  %v9409_v52 = vpack.c.bf16 %v4650_v34, %v4638_v57  ;;  %v9411_v28 = vpack.c.bf16 %v4656_v25, %v4644_v4  ;;  %v9419_v4 = vpack.c.bf16 %v18819_v19, %v13514_v21  ;;  %v18880_v25 = vld [vmem:[#allocation116_spill] sm:$0xff]  ;;  %v18888_v57 = vld [vmem:[#allocation21_spill] sm:$0xff]  ;;  %v18889_v34 = vld [vmem:[#allocation22_spill] sm:$0xff] }
 0x6ed   :  { %9402 = vmatprep.subr.bf16.mxu1 %v9401_v5  ;;  %v18881_v5 = vld [vmem:[#allocation81_spill] sm:$0xff] }
 0x6ee   :  { %v9423_v23 = vpack.c.bf16 %v18881_v5, %v18880_v25 }
 0x6f0   :  { %9404 = vmatpush1.bf16.msra.mxu1 %v9403_v48  ;;  %v18884_v48 = vld [vmem:[#allocation48_spill] sm:$0xff] }
 0x6f1   :  { %9406 = vmatprep.subr.bf16.mxu1 %v9405_v2  ;;  %v9427_v30 = vpack.c.bf16 %v18885_v35, %v18884_v48  ;;  %v9429_v2 = vpack.c.bf16 %v18887_v9, %v18886_v41 }
 0x6f4   :  { %9408 = vmatpush1.bf16.msra.mxu1 %v9407_v3  ;;  %v9421_v3 = vpack.c.bf16 %v18821_v10, %v18820_v16 }
 0x6f5   :  { %9410 = vmatprep.subr.bf16.mxu1 %v9409_v52  ;;  %v9431_v52 = vpack.c.bf16 %v18889_v34, %v18888_v57 }
 0x6f8   :  { %9412 = vmatpush1.bf16.msra.mxu1 %v9411_v28  ;;  %v18890_v28 = vld [vmem:[#allocation49_spill] sm:$0xff] }
 0x6f9   :  { %9414 = vmatprep.subr.bf16.mxu1 %v9413_v37  ;;  %v18891_v37 = vld [vmem:[#allocation57_spill] sm:$0xff] }
 0x6fb   :  { %4661 = vmatmul.mubr.f32.vlgmr.msra.gmra.mrb[2].mxu1 %v14000_v45  ;;  %v18901_v45 = vld [vmem:[#allocation26_spill] sm:$0xff] }
 0x6fc   :  { %9416 = vmatpush1.bf16.msra.mxu1 %v9415_v40  ;;  %4861 = vmatprep.mubr.f32.mxu1 %v14017_v22  ;;  %v9433_v40 = vpack.c.bf16 %v18891_v37, %v18890_v28 }
 0x6fd   :  { %9418 = vmatprep.subr.bf16.mxu1 %v9417_v63  ;;  %v9435_v63 = vpack.c.bf16 %v18845_v6, %v18844_v17  ;;  %v18903_v17 = vld [vmem:[#allocation83_spill] sm:$0xff] }
 0x700   :  { %9420 = vmatpush1.bf16.msra.mxu1 %v9419_v4  ;;  %v18892_v4 = vld [vmem:[#allocation96_spill] sm:$0xff] }
 0x701   :  { %9422 = vmatprep.subr.bf16.mxu1 %v9421_v3  ;;  %v18893_v3 = vld [vmem:[#allocation61_spill] sm:$0xff] }
 0x704   :  { %9424 = vmatpush1.bf16.msra.mxu1 %v9423_v23  ;;  %v9437_v23 = vpack.c.bf16 %v18893_v3, %v18892_v4  ;;  %v18905_v4 = vld [vmem:[#allocation35_spill] sm:$0xff] }
 0x705   :  { %9426 = vmatprep.subr.bf16.mxu1 %v9425_v38  ;;  %v18894_v38 = vld [vmem:[#allocation91_spill] sm:$0xff] }
 0x706   :  { %v9439_v13 = vpack.c.bf16 %v18895_v11, %v18894_v38 }
 0x708   :  { %9428 = vmatpush1.bf16.msra.mxu1 %v9427_v30  ;;  %v18896_v30 = vld [vmem:[#allocation76_spill] sm:$0xff] }
 0x709   :  { %9430 = vmatprep.subr.bf16.mxu1 %v9429_v2  ;;  %v9441_v8 = vpack.c.bf16 %v18897_v36, %v18896_v30  ;;  %v18898_v2 = vld [vmem:[#allocation85_spill] sm:$0xff] }
 0x70a   :  { %v9443_v55 = vpack.c.bf16 %v18899_v46, %v18898_v2 }
 0x70c   :  { %9432 = vmatpush1.bf16.msra.mxu1 %v9431_v52  ;;  %v18900_v52 = vld [vmem:[#allocation25_spill] sm:$0xff] }
 0x70d   :  { %9434 = vmatprep.subr.bf16.mxu1 %v9433_v40  ;;  %v9445_v6 = vpack.c.bf16 %v18901_v45, %v18900_v52  ;;  %v18902_v40 = vld [vmem:[#allocation28_spill] sm:$0xff] }
 0x70e   :  { %v9447_v3 = vpack.c.bf16 %v18903_v17, %v18902_v40 }
 0x710   :  { %9436 = vmatpush1.bf16.msra.mxu1 %v9435_v63  ;;  %v18904_v63 = vld [vmem:[#allocation84_spill] sm:$0xff] }
 0x711   :  { %9438 = vmatprep.subr.bf16.mxu1 %v9437_v23  ;;  %v9449_v11 = vpack.c.bf16 %v18905_v4, %v18904_v63  ;;  %v9451_v23 = vpack.c.bf16 %v18871_v15, %v18870_v51  ;;  %v18907_v15 = vld [vmem:[#allocation105_spill] sm:$0xff] }
 0x714   :  { %9440 = vmatpush1.bf16.msra.mxu1 %v9439_v13  ;;  %v9453_v13 = vpack.c.bf16 %v13763_v26, %v18872_v18 }
 0x715   :  { %9442 = vmatprep.subr.bf16.mxu1 %v9441_v8  ;;  %v9455_v8 = vpack.c.bf16 %v18873_v33, %v13773_v20 }
 0x718   :  { %9444 = vmatpush1.bf16.msra.mxu1 %v9443_v55  ;;  %v9457_v55 = vpack.c.bf16 %v18876_v7, %v18875_v49 }
 0x719   :  { %9446 = vmatprep.subr.bf16.mxu1 %v9445_v6  ;;  %v9459_v6 = vpack.c.bf16 %v13801_v24, %v18877_v47 }
 0x71c   :  { %9448 = vmatpush1.bf16.msra.mxu1 %v9447_v3  ;;  %v9461_v3 = vpack.c.bf16 %v13813_v29, %v13811_v61 }
 0x71d   :  { %9450 = vmatprep.subr.bf16.mxu1 %v9449_v11  ;;  %v18906_v11 = vld [vmem:[#allocation45_spill] sm:$0xff] }
 0x71e   :  { %v9463_v26 = vpack.c.bf16 %v18907_v15, %v18906_v11 }
 0x720   :  { %9452 = vmatpush1.bf16.msra.mxu1 %v9451_v23  ;;  %v18908_v23 = vld [vmem:[#allocation30_spill] sm:$0xff] }
 0x721   :  { %9454 = vmatprep.subr.bf16.mxu1 %v9453_v13  ;;  %v9465_v33 = vpack.c.bf16 %v13966_v42, %v18908_v23  ;;  %v9467_v13 = vpack.c.bf16 %v13970_v53, %v13968_v39  ;;  %v18911_v53 = vld [vmem:[#allocation99_spill] sm:$0xff] }
 0x724   :  { %9456 = vmatpush1.bf16.msra.mxu1 %v9455_v8  ;;  %v9469_v8 = vpack.c.bf16 %v13975_v1, %v13973_v12 }
 0x725   :  { %9458 = vmatprep.subr.bf16.mxu1 %v9457_v55  ;;  %v9471_v55 = vpack.c.bf16 %v13979_v58, %v13977_v44  ;;  %v18913_v58 = vld [vmem:[#allocation107_spill] sm:$0xff] }
 0x728   :  { %9460 = vmatpush1.bf16.msra.mxu1 %v9459_v6  ;;  %v9473_v6 = vpack.c.bf16 %v13983_v62, %v13981_v54  ;;  %v18915_v62 = vld [vmem:[#allocation113_spill] sm:$0xff] }
 0x729   :  { %9462 = vmatprep.subr.bf16.mxu1 %v9461_v3  ;;  %v9475_v3 = vpack.c.bf16 %v13987_v32, %v13985_v56  ;;  %v18917_v32 = vld [vmem:[#allocation88_spill] sm:$0xff] }
 0x72a   :  { %v5427_v54 = vld [vmem:[#allocation2 + $0x868] sm:$0xff] }
 0x72c   :  { %9464 = vmatpush1.bf16.msra.mxu1 %v9463_v26  ;;  %v18909_v26 = vld [vmem:[#allocation69_spill] sm:$0xff] }
 0x72d   :  { %9466 = vmatprep.subr.bf16.mxu1 %v9465_v33  ;;  %v18910_v33 = vld [vmem:[#allocation47_spill] sm:$0xff] }
 0x730   :  { %9468 = vmatpush1.bf16.msra.mxu1 %v9467_v13  ;;  %v18912_v13 = vand.u32 4294901760, %v14017_v22  ;;  %v18922_v22 = vld [vmem:[#allocation74_spill] sm:$0xff] }
 0x731   :  { %9470 = vmatprep.subr.bf16.mxu1 %v9469_v8  ;;  %v18914_v8 = vld [vmem:[#allocation111_spill] sm:$0xff] }
 0x734   :  { %9472 = vmatpush1.bf16.msra.mxu1 %v9471_v55  ;;  %v18916_v55 = vld [vmem:[#allocation115_spill] sm:$0xff] }
 0x735   :  { %9474 = vmatprep.subr.bf16.mxu1 %v9473_v6  ;;  %v18918_v6 = vld [vmem:[#allocation32_spill] sm:$0xff] }
 0x738   :  { %9476 = vmatpush1.bf16.msra.mxu1 %v9475_v3  ;;  %v18919_v3 = vld [vmem:[#allocation39_spill] sm:$0xff] }
 0x739   :  { %9478 = vmatprep.subr.bf16.mxu1 %v18909_v26  ;;  %v18920_v26 = vld [vmem:[#allocation98_spill] sm:$0xff] }
 0x73b   :  { %4864 = vmatmul.mubr.f32.vlgmr.msra.gmra.mrb[2].mxu1 %v18910_v33 }
 0x73c   :  { %9480 = vmatpush1.bf16.msra.mxu1 %v18911_v53  ;;  %5001 = vmatprep.mubr.f32.mxu1 %v18912_v13  ;;  %v18921_v53 = vld [vmem:[#allocation17_spill] sm:$0xff]  ;;  %v18923_v13 = vld [vmem:[#allocation86_spill] sm:$0xff] }
 0x73d   :  { %9482 = vmatprep.subr.bf16.mxu1 %v18913_v58  ;;  %v18924_v58 = vld [vmem:[#allocation103_spill] sm:$0xff] }
 0x740   :  { %9484 = vmatpush1.bf16.msra.mxu1 %v18914_v8  ;;  %v18925_v8 = vld [vmem:[#allocation38_spill] sm:$0xff] }
 0x741   :  { %9486 = vmatprep.subr.bf16.mxu1 %v18915_v62  ;;  %v18926_v62 = vld [vmem:[#allocation92_spill] sm:$0xff] }
 0x744   :  { %9488 = vmatpush1.bf16.msra.mxu1 %v18916_v55  ;;  %v18927_v55 = vld [vmem:[#allocation73_spill] sm:$0xff] }
 0x745   :  { %9490 = vmatprep.subr.bf16.mxu1 %v18917_v32  ;;  %v18928_v32 = vld [vmem:[#allocation14_spill] sm:$0xff] }
 0x748   :  { %9492 = vmatpush1.bf16.msra.mxu1 %v18918_v6  ;;  %v18929_v6 = vld [vmem:[#allocation55_spill] sm:$0xff] }
 0x749   :  { %9494 = vmatprep.subr.bf16.mxu1 %v18919_v3  ;;  %v18930_v3 = vld [vmem:[#allocation106_spill] sm:$0xff] }
 0x74c   :  { %9496 = vmatpush1.bf16.msra.mxu1 %v18920_v26  ;;  %v18931_v26 = vld [vmem:[#allocation109_spill] sm:$0xff] }
 0x74d   :  { %9498 = vmatprep.subr.bf16.mxu1 %v18921_v53  ;;  %v18932_v53 = vld [vmem:[#allocation33_spill] sm:$0xff] }
 0x750   :  { %9500 = vmatpush1.bf16.msra.mxu1 %v18922_v22  ;;  %v18933_v22 = vld [vmem:[#allocation97_spill] sm:$0xff] }
 0x751   :  { %9502 = vmatprep.subr.bf16.mxu1 %v18923_v13  ;;  %v18934_v13 = vld [vmem:[#allocation100_spill] sm:$0xff] }
 0x754   :  { %9504 = vmatpush1.bf16.msra.mxu1 %v18924_v58  ;;  %v18935_v58 = vld [vmem:[#allocation101_spill] sm:$0xff] }
 0x755   :  { %9506 = vmatprep.subr.bf16.mxu1 %v18925_v8  ;;  %v18936_v8 = vld [vmem:[#allocation27_spill] sm:$0xff] }
 0x758   :  { %9508 = vmatpush1.bf16.msra.mxu1 %v18926_v62  ;;  %v18937_v62 = vld [vmem:[#allocation16_spill] sm:$0xff] }
 0x759   :  { %9510 = vmatprep.subr.bf16.mxu1 %v18927_v55  ;;  %v18938_v55 = vld [vmem:[#allocation80_spill] sm:$0xff] }
 0x75c   :  { %9512 = vmatpush1.bf16.msra.mxu1 %v18928_v32  ;;  %v18939_v32 = vld [vmem:[#allocation52_spill] sm:$0xff] }
 0x75d   :  { %9514 = vmatprep.subr.bf16.mxu1 %v18929_v6  ;;  %v18940_v6 = vld [vmem:[#allocation53_spill] sm:$0xff] }
 0x760   :  { %9516 = vmatpush1.bf16.msra.mxu1 %v18930_v3  ;;  %v18941_v3 = vld [vmem:[#allocation58_spill] sm:$0xff] }
 0x761   :  { %9518 = vmatprep.subr.bf16.mxu1 %v18931_v26 }
 0x764   :  { %9520 = vmatpush1.bf16.msra.mxu1 %v18932_v53  ;;  %v18942_v53 = vand.u32 4294901760, %v18803_v14  ;;  %v18950_v14 = vand.u32 4294901760, %v18819_v19  ;;  %v18958_v19 = vand.u32 4294901760, %v18884_v48  ;;  %v18964_v48 = vld [vmem:[#allocation41_spill] sm:$0xff] }
 0x765   :  { %9522 = vmatprep.subr.bf16.mxu1 %v18933_v22  ;;  %v18943_v22 = vand.u32 4294901760, %v18804_v59  ;;  %v18952_v59 = vand.u32 4294901760, %v18821_v10 }
 0x767   :  { %v9541_v26 = vpack.c.bf16 %v18943_v22, %v18942_v53  ;;  %v18951_v53 = vand.u32 4294901760, %v18820_v16  ;;  %v18959_v16 = vand.u32 4294901760, %v18885_v35  ;;  %v18965_v35 = vand.u32 4294901760, %v18890_v28 }
 0x768   :  { %9524 = vmatpush1.bf16.msra.mxu1 %v18934_v13  ;;  %v18944_v13 = vld [vmem:[#allocation18_spill] sm:$0xff] }
 0x769   :  { %9526 = vmatprep.subr.bf16.mxu1 %v18935_v58  ;;  %v18945_v58 = vand.u32 4294901760, %v18814_v43  ;;  %v9549_v22 = vpack.c.bf16 %v18952_v59, %v18951_v53  ;;  %v18953_v43 = vand.u32 4294901760, %v18880_v25  ;;  %v14395_v10 = vpack.c.bf16 %v18959_v16, %v18958_v19  ;;  %v5416_v59 = vld [vmem:[#allocation2 + $0x810] sm:$0xff] }
 0x76a   :  { %v18960_v25 = vand.u32 4294901760, %v18886_v41  ;;  %v18966_v41 = vand.u32 4294901760, %v18891_v37  ;;  %v5484_v19 = vand.u32 4294901760, %v5416_v59  ;;  %v5420_v37 = vld [vmem:[#allocation2 + $0x830] sm:$0xff] }
 0x76c   :  { %9528 = vmatpush1.bf16.msra.mxu1 %v18936_v8  ;;  %v18946_v8 = vand.u32 4294901760, %v18815_v0 }
 0x76d   :  { %9530 = vmatprep.subr.bf16.mxu1 %v18937_v62 }
 0x76e   :  { %v9543_v62 = vpack.c.bf16 %v18946_v8, %v18945_v58  ;;  %v18954_v58 = vand.u32 4294901760, %v18881_v5  ;;  %v18961_v5 = vand.u32 4294901760, %v18887_v9 }
 0x770   :  { %9532 = vmatpush1.bf16.msra.mxu1 %v18938_v55  ;;  %v18947_v55 = vand.u32 4294901760, %v18816_v31  ;;  %v14381_v0 = vpack.c.bf16 %v18954_v58, %v18953_v43  ;;  %v18955_v31 = vand.u32 4294901760, %v18910_v33  ;;  %v18962_v33 = vand.u32 4294901760, %v18888_v57  ;;  %v5419_v43 = vld [vmem:[#allocation2 + $0x828] sm:$0xff] }
 0x771   :  { %9534 = vmatprep.subr.bf16.mxu1 %v18939_v32  ;;  %v18948_v32 = vand.u32 4294901760, %v18817_v50  ;;  %v18967_v58 = vld [vmem:[#allocation60_spill] sm:$0xff]  ;;  %v5486_v16 = vand.u32 4294901760, %v5419_v43 }
 0x774   :  { %9536 = vmatpush1.bf16.msra.mxu1 %v18940_v6  ;;  %v9545_v6 = vpack.c.bf16 %v18948_v32, %v18947_v55  ;;  %v18956_v32 = vand.u32 4294901760, %v18882_v60  ;;  %v18963_v60 = vand.u32 4294901760, %v18889_v34  ;;  %v5417_v55 = vld [vmem:[#allocation2 + $0x818] sm:$0xff] }
 0x775   :  { %9538 = vmatprep.subr.bf16.mxu1 %v18941_v3  ;;  %v18949_v3 = vand.u32 4294901760, %v13514_v21  ;;  %v18957_v21 = vand.u32 4294901760, %v18883_v27  ;;  %v5415_v27 = vld [vmem:[#allocation2 + $0x808] sm:$0xff]  ;;  %v5482_v53 = vand.u32 4294901760, %v5417_v55  ;;  %v5421_v34 = vld [vmem:[#allocation2 + $0x838] sm:$0xff] }
 0x776   :  { %v14407_v8 = vpack.c.bf16 %v18963_v60, %v18962_v33  ;;  %v5478_v9 = vand.u32 4294901760, %v5415_v27  ;;  %v5490_v28 = vand.u32 4294901760, %v5421_v34 }
 0x777   :  { %v9547_v56 = vpack.c.bf16 %v18950_v14, %v18949_v3  ;;  %v14389_v50 = vpack.c.bf16 %v18957_v21, %v18956_v32  ;;  %v5414_v3 = vld [vmem:[#allocation2 + $0x800] sm:$0xff]  ;;  %v14414_v14 = vpack.c.bf16 %v18966_v41, %v18965_v35  ;;  %v18969_v32 = vld [vmem:[#allocation66_spill] sm:$0xff]  ;;  %v14426_v35 = vsub.f32 %v5417_v55, %v5482_v53 }
 0x778   :  { %9540 = vmatpush1.bf16.msra.mxu1 %v18944_v13  ;;  %v5480_v57 = vand.u32 4294901760, %v5414_v3  ;;  %v18970_v21 = vand.u32 4294901760, %v18969_v32  ;;  %v14422_v33 = vpack.c.bf16 %v5482_v53, %v5478_v9  ;;  %v14424_v60 = vsub.f32 %v5415_v27, %v5478_v9  ;;  %v5424_v13 = vld [vmem:[#allocation2 + $0x850] sm:$0xff]  ;;  %v5429_v53 = vld [vmem:[#allocation2 + $0x878] sm:$0xff] }
 0x779   :  { %9542 = vmatprep.subr.bf16.mxu1 %v9541_v26  ;;  %v14401_v26 = vpack.c.bf16 %v18961_v5, %v18960_v25  ;;  %v5418_v25 = vld [vmem:[#allocation2 + $0x820] sm:$0xff]  ;;  %v5423_v5 = vld [vmem:[#allocation2 + $0x848] sm:$0xff]  ;;  %18973 = vst [vmem:[#allocation34_spill] sm:$0xff] %v14426_v35  ;;  %v14439_v27 = vsub.f32 %v5421_v34, %v5490_v28 }
 0x77a   :  { %18971 = vst [vmem:[#allocation108_spill] sm:$0xff] %v14422_v33  ;;  %18972 = vst [vmem:[#allocation29_spill] sm:$0xff] %v14424_v60  ;;  %v14428_v41 = vsub.f32 %v5414_v3, %v5480_v57  ;;  %v14430_v32 = vpack.c.bf16 %v5484_v19, %v5480_v57  ;;  %9670 = vmatprep.subr.bf16.mxu0 %v14422_v33  ;;  %v5488_v55 = vand.u32 4294901760, %v5418_v25  ;;  %v5492_v3 = vand.u32 4294901760, %v5420_v37  ;;  %v5431_v33 = vld [vmem:[#allocation2 + $0x888] sm:$0xff] }
 0x77b   :  { %5005 = vmatmul.mubr.f32.vlgmr.msra.gmra.mrb[2].mxu1 %v18955_v31  ;;  %v18968_v31 = vand.u32 4294901760, %v18967_v58  ;;  %v5422_v58 = vld [vmem:[#allocation2 + $0x840] sm:$0xff]  ;;  %18979 = vst [vmem:[#allocation67_spill] sm:$0xff] %v14439_v27  ;;  %v5494_v9 = vand.u32 4294901760, %v5423_v5 }
 0x77c   :  { %9544 = vmatpush1.bf16.msra.mxu1 %v9543_v62  ;;  %5268 = vmatprep.mubr.f32.mxu1 %v18964_v48  ;;  %18974 = vst [vmem:[#allocation40_spill] sm:$0xff] %v14428_v41  ;;  %18975 = vst [vmem:[#allocation90_spill] sm:$0xff] %v14430_v32  ;;  %v14436_v48 = vsub.f32 %v5419_v43, %v5486_v16  ;;  %v5426_v41 = vld [vmem:[#allocation2 + $0x860] sm:$0xff]  ;;  %v5428_v43 = vld [vmem:[#allocation2 + $0x870] sm:$0xff]  ;;  %v14447_v34 = vsub.f32 %v5420_v37, %v5492_v3  ;;  %v5506_v37 = vand.u32 4294901760, %v5429_v53 }
 0x77d   :  { %9546 = vmatprep.subr.bf16.mxu1 %v9545_v6  ;;  %v14420_v62 = vpack.c.bf16 %v18970_v21, %v18968_v31  ;;  %v5425_v6 = vld [vmem:[#allocation2 + $0x858] sm:$0xff]  ;;  %v14432_v31 = vsub.f32 %v5416_v59, %v5484_v19  ;;  %v14434_v21 = vpack.c.bf16 %v5490_v28, %v5486_v16  ;;  %9672 = vmatpush1.bf16.msra.mxu0 %v14430_v32  ;;  %v5496_v59 = vand.u32 4294901760, %v5422_v58  ;;  %v14451_v27 = vld [vmem:[#allocation2 + $0x880] sm:$0xff] }
 0x77e   :  { %18978 = vst [vmem:[#allocation64_spill] sm:$0xff] %v14436_v48  ;;  %v5498_v57 = vand.u32 4294901760, %v5425_v6  ;;  %v5500_v19 = vand.u32 4294901760, %v5424_v13  ;;  %v14445_v16 = vsub.f32 %v5418_v25, %v5488_v55  ;;  %18981 = vst [vmem:[#allocation104_spill] sm:$0xff] %v14447_v34  ;;  %v14449_v28 = vsub.f32 %v5423_v5, %v5494_v9 }
 0x77f   :  { %18976 = vst [vmem:[#allocation95_spill] sm:$0xff] %v14432_v31  ;;  %18977 = vst [vmem:[#allocation62_spill] sm:$0xff] %v14434_v21  ;;  %v5502_v31 = vand.u32 4294901760, %v5427_v54  ;;  %9674 = vmatprep.subr.bf16.mxu0 %v14434_v21  ;;  %v14459_v60 = vsub.f32 %v5422_v58, %v5496_v59  ;;  %v5432_v21 = vld [vmem:[#allocation2 + $0x890] sm:$0xff] }
 0x780   :  { %9548 = vmatpush1.bf16.msra.mxu1 %v9547_v56  ;;  %v14443_v56 = vpack.c.bf16 %v5492_v3, %v5488_v55  ;;  %18982 = vst [vmem:[#allocation54_spill] sm:$0xff] %v14449_v28  ;;  %v14453_v32 = vpack.c.bf16 %v5498_v57, %v5494_v9  ;;  %v14455_v48 = vsub.f32 %v5425_v6, %v5498_v57  ;;  %v5504_v55 = vand.u32 4294901760, %v5426_v41  ;;  %v18997_v28 = vld [vmem:[#allocation71_spill] sm:$0xff] }
 0x781   :  { %9550 = vmatprep.subr.bf16.mxu1 %v9549_v22  ;;  %v5433_v22 = vld [vmem:[#allocation2 + $0x898] sm:$0xff]  ;;  %v14457_v35 = vpack.c.bf16 %v5500_v19, %v5496_v59  ;;  %18986 = vst [vmem:[#allocation119_spill] sm:$0xff] %v14459_v60  ;;  %v14462_v25 = vsub.f32 %v5424_v13, %v5500_v19  ;;  %v14464_v5 = vsub.f32 %v5427_v54, %v5502_v31  ;;  %v5508_v3 = vand.u32 4294901760, %v5428_v43  ;;  %v5435_v59 = vld [vmem:[#allocation2 + $0x8a8] sm:$0xff] }
 0x782   :  { %18980 = vst [vmem:[#allocation78_spill] sm:$0xff] %v14443_v56  ;;  %18983 = vst [vmem:[#allocation56_spill] sm:$0xff] %v14453_v32  ;;  %9676 = vmatpush1.bf16.msra.mxu0 %v14443_v56  ;;  %v5510_v6 = vand.u32 4294901760, %v5431_v33  ;;  %v5514_v9 = vand.u32 4294901760, %v5433_v22  ;;  %v5512_v57 = vand.u32 4294901760, %v14451_v27  ;;  %v14470_v58 = vpack.c.bf16 %v5506_v37, %v5502_v31  ;;  %v5437_v19 = vld [vmem:[#allocation2 + $0x8b8] sm:$0xff] }
 0x783   :  { %18984 = vst [vmem:[#allocation117_spill] sm:$0xff] %v14455_v48  ;;  %18985 = vst [vmem:[#allocation118_spill] sm:$0xff] %v14457_v35  ;;  %9678 = vmatprep.subr.bf16.mxu0 %v14453_v32  ;;  %v14474_v13 = vsub.f32 %v5426_v41, %v5504_v55  ;;  %v5516_v54 = vand.u32 4294901760, %v5432_v21  ;;  %v18996_v48 = vand.u32 4294901760, %v18894_v38  ;;  %v18998_v34 = vand.u32 4294901760, %v18997_v28  ;;  %v5434_v41 = vld [vmem:[#allocation2 + $0x8a0] sm:$0xff] }
 0x784   :  { %9552 = vmatpush1.bf16.msra.mxu1 %v14381_v0  ;;  %18987 = vst [vmem:[#allocation50_spill] sm:$0xff] %v14462_v25  ;;  %18988 = vst [vmem:[#allocation8_spill] sm:$0xff] %v14464_v5  ;;  %v14472_v0 = vsub.f32 %v5429_v53, %v5506_v37  ;;  %v18992_v5 = vld [vmem:[#allocation96_spill] sm:$0xff]  ;;  %v18994_v25 = vld [vmem:[#allocation61_spill] sm:$0xff]  ;;  %v14488_v31 = vsub.f32 %v5428_v43, %v5508_v3  ;;  %v14490_v53 = vsub.f32 %v5431_v33, %v5510_v6 }
 0x785   :  { %9554 = vmatprep.subr.bf16.mxu1 %v14389_v50  ;;  %18989 = vst [vmem:[#allocation9_spill] sm:$0xff] %v14470_v58  ;;  %18991 = vst [vmem:[#allocation11_spill] sm:$0xff] %v14474_v13  ;;  %v18993_v50 = vand.u32 4294901760, %v18992_v5  ;;  %v18995_v56 = vand.u32 4294901760, %v18994_v25  ;;  %v14486_v32 = vpack.c.bf16 %v18998_v34, %v18996_v48  ;;  %v5436_v37 = vld [vmem:[#allocation2 + $0x8b0] sm:$0xff]  ;;  %v14492_v13 = vld [vmem:[#allocation2 + $0x8c8] sm:$0xff]  ;;  %v14501_v38 = vsub.f32 %v5433_v22, %v5514_v9 }
 0x786   :  { %18990 = vst [vmem:[#allocation10_spill] sm:$0xff] %v14472_v0  ;;  %18999 = vst [vmem:[#allocation13_spill] sm:$0xff] %v14488_v31  ;;  %v19001_v25 = vand.u32 4294901760, %v18896_v30  ;;  %v14504_v48 = vsub.f32 %v14451_v27, %v5512_v57  ;;  %v14506_v43 = vsub.f32 %v5432_v21, %v5516_v54  ;;  %v5441_v33 = vld [vmem:[#allocation2 + $0x8d8] sm:$0xff]  ;;  %v14508_v34 = vld [vmem:[#allocation2 + $0x8c0] sm:$0xff]  ;;  %v19007_v30 = vand.u32 4294901760, %v18899_v46  ;;  %9680 = vmatpush1.bf16.msra.mxu0 %v14457_v35 }
 0x787   :  { %v14480_v60 = vpack.c.bf16 %v18995_v56, %v18993_v50  ;;  %19000 = vst [vmem:[#allocation23_spill] sm:$0xff] %v14490_v53  ;;  %v19002_v56 = vand.u32 4294901760, %v18897_v36  ;;  %19003 = vst [vmem:[#allocation75_spill] sm:$0xff] %v14501_v38  ;;  %v14518_v36 = vpack.c.bf16 %v5508_v3, %v5504_v55  ;;  %v5518_v22 = vand.u32 4294901760, %v5435_v59  ;;  %v14520_v50 = vld [vmem:[#allocation2 + $0x8d0] sm:$0xff]  ;;  %9682 = vmatprep.subr.bf16.mxu0 %v14470_v58  ;;  %v14535_v35 = vld [vmem:[#allocation2 + $0x8e0] sm:$0xff] }
 0x788   :  { %9556 = vmatpush1.bf16.msra.mxu1 %v14395_v10  ;;  %19004 = vst [vmem:[#allocation77_spill] sm:$0xff] %v14504_v48  ;;  %19005 = vst [vmem:[#allocation93_spill] sm:$0xff] %v14506_v43  ;;  %v19006_v10 = vand.u32 4294901760, %v18898_v2  ;;  %v5522_v27 = vand.u32 4294901760, %v5437_v19  ;;  %v14523_v21 = vpack.c.bf16 %v5514_v9, %v5510_v6  ;;  %v5526_v2 = vand.u32 4294901760, %v14492_v13 }
 0x789   :  { %v14499_v5 = vpack.c.bf16 %v19002_v56, %v19001_v25  ;;  %9558 = vmatprep.subr.bf16.mxu1 %v14401_v26  ;;  %19008 = vst [vmem:[#allocation102_spill] sm:$0xff] %v14518_v36  ;;  %v5520_v25 = vand.u32 4294901760, %v5434_v41  ;;  %v5524_v26 = vand.u32 4294901760, %v5436_v37  ;;  %v14526_v56 = vld [vmem:[#allocation2 + $0x8e8] sm:$0xff]  ;;  %v14528_v46 = vsub.f32 %v5435_v59, %v5518_v22 }
 0x78a   :  { %v14515_v28 = vpack.c.bf16 %v19007_v30, %v19006_v10  ;;  %19009 = vst [vmem:[#allocation110_spill] sm:$0xff] %v14523_v21  ;;  %v14530_v10 = vsub.f32 %v5437_v19, %v5522_v27  ;;  %v5530_v55 = vand.u32 4294901760, %v5441_v33  ;;  %v5528_v3 = vand.u32 4294901760, %v14508_v34  ;;  %v14533_v30 = vld [vmem:[#allocation2 + $0x8f8] sm:$0xff]  ;;  %v14546_v19 = vld [vmem:[#allocation2 + $0x8f0] sm:$0xff]  ;;  %9684 = vmatpush1.bf16.msra.mxu0 %v14518_v36 }
 0x78b   :  { %19010 = vst [vmem:[#allocation59_spill] sm:$0xff] %v14528_v46  ;;  %v14538_v6 = vsub.f32 %v5434_v41, %v5520_v25  ;;  %v14540_v9 = vsub.f32 %v5436_v37, %v5524_v26  ;;  %v14543_v58 = vsub.f32 %v14492_v13, %v5526_v2  ;;  %v5532_v59 = vand.u32 4294901760, %v14520_v50  ;;  %v14560_v37 = vld [vmem:[#allocation2 + $0x918] sm:$0xff]  ;;  %9686 = vmatprep.subr.bf16.mxu0 %v14523_v21  ;;  %v14598_v21 = vld [vmem:[#allocation2 + $0x930] sm:$0xff] }
 0x78c   :  { %19011 = vst [vmem:[#allocation65_spill] sm:$0xff] %v14530_v10  ;;  %9560 = vmatpush1.bf16.msra.mxu1 %v14407_v8  ;;  %v14548_v10 = vld [vmem:[#allocation2 + $0x908] sm:$0xff]  ;;  %v14552_v46 = vpack.c.bf16 %v5516_v54, %v5512_v57  ;;  %v14554_v8 = vsub.f32 %v5441_v33, %v5530_v55  ;;  %v14557_v41 = vsub.f32 %v14508_v34, %v5528_v3  ;;  %v5534_v13 = vand.u32 4294901760, %v14526_v56  ;;  %v14572_v33 = vld [vmem:[#allocation2 + $0x910] sm:$0xff] }
 0x78d   :  { %19012 = vst [vmem:[#allocation112_spill] sm:$0xff] %v14538_v6  ;;  %19013 = vst [vmem:[#allocation114_spill] sm:$0xff] %v14540_v9  ;;  %9562 = vmatprep.subr.bf16.mxu1 %v14414_v14  ;;  %v14565_v9 = vpack.c.bf16 %v5522_v27, %v5518_v22  ;;  %v14568_v14 = vsub.f32 %v14520_v50, %v5532_v59  ;;  %v5538_v57 = vand.u32 4294901760, %v14533_v30  ;;  %v17242_v54 = vand.u32 4294901760, %v14535_v35  ;;  %v14581_v22 = vld [vmem:[#allocation2 + $0x928] sm:$0xff]  ;;  %v14583_v27 = vld [vmem:[#allocation2 + $0x938] sm:$0xff] }
 0x78e   :  { %19014 = vst [vmem:[#allocation36_spill] sm:$0xff] %v14543_v58  ;;  %19015 = vst [vmem:[#allocation44_spill] sm:$0xff] %v14552_v46  ;;  %v14562_v58 = vld [vmem:[#allocation2 + $0x900] sm:$0xff]  ;;  %v14574_v34 = vpack.c.bf16 %v5524_v26, %v5520_v25  ;;  %v14577_v36 = vsub.f32 %v14526_v56, %v5534_v13  ;;  %9688 = vmatpush1.bf16.msra.mxu0 %v14552_v46  ;;  %v19033_v56 = vand.u32 4294901760, %v18900_v52  ;;  %v14645_v46 = vld [vmem:[#allocation2 + $0x950] sm:$0xff]  ;;  %v19052_v6 = vand.u32 4294901760, %v18905_v4 }
 0x78f   :  { %19016 = vst [vmem:[#allocation20_spill] sm:$0xff] %v14554_v8  ;;  %19017 = vst [vmem:[#allocation94_spill] sm:$0xff] %v14557_v41  ;;  %v14587_v50 = vsub.f32 %v14533_v30, %v5538_v57  ;;  %v14592_v25 = vsub.f32 %v14535_v35, %v17242_v54  ;;  %v14596_v41 = vld [vmem:[#allocation2 + $0x920] sm:$0xff]  ;;  %v19025_v30 = vand.u32 4294901760, %v14546_v19  ;;  %v19027_v54 = vand.u32 4294901760, %v14548_v10  ;;  %9690 = vmatprep.subr.bf16.mxu0 %v14565_v9 }
 0x790   :  { %19018 = vst [vmem:[#allocation70_spill] sm:$0xff] %v14565_v9  ;;  %19019 = vst [vmem:[#allocation116_spill] sm:$0xff] %v14568_v14  ;;  %9564 = vmatpush1.bf16.msra.mxu1 %v14420_v62  ;;  %v14602_v62 = vpack.c.bf16 %v5530_v55, %v5526_v2  ;;  %v19031_v55 = vand.u32 4294901760, %v14562_v58  ;;  %v19034_v9 = vand.u32 4294901760, %v18901_v45  ;;  %v14650_v52 = vpack.c.bf16 %v5532_v59, %v5528_v3  ;;  %v5465_v14 = vld [vmem:[#allocation2 + $0x998] sm:$0xff] }
 0x791   :  { %19020 = vst [vmem:[#allocation81_spill] sm:$0xff] %v14574_v34  ;;  %19021 = vst [vmem:[#allocation87_spill] sm:$0xff] %v14577_v36  ;;  %9566 = vmatprep.subr.bf16.mxu1 %v14480_v60  ;;  %v14612_v26 = vsub.f32 %v14548_v10, %v19027_v54  ;;  %v19029_v60 = vand.u32 4294901760, %v14560_v37  ;;  %v19035_v36 = vand.u32 4294901760, %v14572_v33  ;;  %v14647_v54 = vld [vmem:[#allocation2 + $0x968] sm:$0xff]  ;;  %v19038_v45 = vand.u32 4294901760, %v14581_v22 }
 0x792   :  { %19022 = vst [vmem:[#allocation89_spill] sm:$0xff] %v14587_v50  ;;  %19023 = vst [vmem:[#allocation48_spill] sm:$0xff] %v14592_v25  ;;  %v14607_v50 = vsub.f32 %v14546_v19, %v19025_v30  ;;  %v14615_v25 = vld [vmem:[#allocation2 + $0x948] sm:$0xff]  ;;  %v14626_v30 = vsub.f32 %v14562_v58, %v19031_v55  ;;  %9692 = vmatpush1.bf16.msra.mxu0 %v14574_v34  ;;  %v19043_v3 = vand.u32 4294901760, %v14596_v41  ;;  %v5566_v34 = vand.u32 4294901760, %v14647_v54 }
 0x793   :  { %19024 = vst [vmem:[#allocation15_spill] sm:$0xff] %v14602_v62  ;;  %19028 = vst [vmem:[#allocation19_spill] sm:$0xff] %v14612_v26  ;;  %v14621_v2 = vsub.f32 %v14560_v37, %v19029_v60  ;;  %v14630_v26 = vld [vmem:[#allocation2 + $0x958] sm:$0xff]  ;;  %v14639_v60 = vsub.f32 %v14572_v33, %v19035_v36  ;;  %v19040_v36 = vand.u32 4294901760, %v14583_v27  ;;  %v5558_v55 = vand.u32 4294901760, %v14615_v25  ;;  %9694 = vmatprep.subr.bf16.mxu0 %v14602_v62 }
 0x794   :  { %19026 = vst [vmem:[#allocation12_spill] sm:$0xff] %v14607_v50  ;;  %19032 = vst [vmem:[#allocation22_spill] sm:$0xff] %v14626_v30  ;;  %v9573_v50 = vpack.c.bf16 %v19034_v9, %v19033_v56  ;;  %v14643_v30 = vld [vmem:[#allocation2 + $0x940] sm:$0xff]  ;;  %9568 = vmatpush1.bf16.msra.mxu1 %v14486_v32  ;;  %v14655_v9 = vsub.f32 %v14581_v22, %v19038_v45  ;;  %v14669_v32 = vpack.c.bf16 %v5538_v57, %v5534_v13 }
 0x795   :  { %19030 = vst [vmem:[#allocation21_spill] sm:$0xff] %v14621_v2  ;;  %19036 = vst [vmem:[#allocation49_spill] sm:$0xff] %v14639_v60  ;;  %v14660_v56 = vsub.f32 %v14583_v27, %v19040_v36  ;;  %v14663_v2 = vld [vmem:[#allocation2 + $0x978] sm:$0xff]  ;;  %v14665_v60 = vld [vmem:[#allocation2 + $0x960] sm:$0xff]  ;;  %9570 = vmatprep.subr.bf16.mxu1 %v14499_v5  ;;  %v14674_v59 = vsub.f32 %v14596_v41, %v19043_v3  ;;  %v19045_v45 = vand.u32 4294901760, %v14598_v21  ;;  %v5560_v13 = vand.u32 4294901760, %v14643_v30 }
 0x796   :  { %19037 = vst [vmem:[#allocation57_spill] sm:$0xff] %v14650_v52  ;;  %19039 = vst [vmem:[#allocation91_spill] sm:$0xff] %v14655_v9  ;;  %v14684_v5 = vsub.f32 %v14615_v25, %v5558_v55  ;;  %v5564_v57 = vand.u32 4294901760, %v14645_v46  ;;  %v5460_v3 = vld [vmem:[#allocation2 + $0x970] sm:$0xff]  ;;  %v19049_v9 = vand.u32 4294901760, %v18903_v17  ;;  %v5570_v62 = vand.u32 4294901760, %v14663_v2  ;;  %9696 = vmatpush1.bf16.msra.mxu0 %v14650_v52 }
 0x797   :  { %19041 = vst [vmem:[#allocation76_spill] sm:$0xff] %v14660_v56  ;;  %19042 = vst [vmem:[#allocation82_spill] sm:$0xff] %v14669_v32  ;;  %v14679_v36 = vsub.f32 %v14598_v21, %v19045_v45  ;;  %v5562_v56 = vand.u32 4294901760, %v14630_v26  ;;  %v5568_v25 = vand.u32 4294901760, %v14665_v60  ;;  %v19051_v8 = vand.u32 4294901760, %v18904_v63  ;;  %9698 = vmatprep.subr.bf16.mxu0 %v14669_v32 }
 0x798   :  { %19044 = vst [vmem:[#allocation85_spill] sm:$0xff] %v14674_v59  ;;  %19047 = vst [vmem:[#allocation25_spill] sm:$0xff] %v14684_v5  ;;  %v19048_v59 = vand.u32 4294901760, %v18902_v40  ;;  %v5463_v5 = vld [vmem:[#allocation2 + $0x988] sm:$0xff]  ;;  %9572 = vmatpush1.bf16.msra.mxu1 %v14515_v28  ;;  %v14704_v40 = vsub.f32 %v14643_v30, %v5560_v13  ;;  %v14707_v17 = vsub.f32 %v14645_v46, %v5564_v57  ;;  %v19055_v28 = vand.u32 4294901760, %v14535_v35 }
 0x799   :  { %19046 = vst [vmem:[#allocation24_spill] sm:$0xff] %v14679_v36  ;;  %v14694_v36 = vsub.f32 %v14630_v26, %v5562_v56  ;;  %v9577_v43 = vpack.c.bf16 %v19052_v6, %v19051_v8  ;;  %v14710_v26 = vsub.f32 %v14647_v54, %v5566_v34  ;;  %9574 = vmatprep.subr.bf16.mxu1 %v9573_v50  ;;  %v19056_v63 = vand.u32 4294901760, %v14546_v19 }
 0x79a   :  { %v9575_v45 = vpack.c.bf16 %v19049_v9, %v19048_v59  ;;  %19053 = vst [vmem:[#allocation28_spill] sm:$0xff] %v14707_v17  ;;  %v5462_v9 = vld [vmem:[#allocation2 + $0x980] sm:$0xff]  ;;  %v5464_v59 = vld [vmem:[#allocation2 + $0x990] sm:$0xff]  ;;  %v14720_v6 = vsub.f32 %v14663_v2, %v5570_v62  ;;  %v5572_v8 = vand.u32 4294901760, %v5460_v3  ;;  %v14723_v46 = vsub.f32 %v14665_v60, %v5568_v25 }
 0x79b   :  { %19050 = vst [vmem:[#allocation26_spill] sm:$0xff] %v14694_v36  ;;  %19054 = vst [vmem:[#allocation83_spill] sm:$0xff] %v14710_v26  ;;  %v14717_v4 = vpack.c.bf16 %v19056_v63, %v19055_v28  ;;  %v19060_v30 = vand.u32 4294901760, %v14548_v10  ;;  %v19061_v50 = vand.u32 4294901760, %v14560_v37  ;;  %v5574_v35 = vand.u32 4294901760, %v5463_v5  ;;  %v19067_v26 = vld [vmem:[#allocation46_spill] sm:$0xff] }
 0x79c   :  { %19058 = vst [vmem:[#allocation35_spill] sm:$0xff] %v14720_v6  ;;  %19059 = vst [vmem:[#allocation45_spill] sm:$0xff] %v14723_v46  ;;  %v5578_v52 = vand.u32 4294901760, %v5465_v14  ;;  %v14732_v19 = vsub.f32 %v5460_v3, %v5572_v8  ;;  %v5576_v28 = vand.u32 4294901760, %v5462_v9  ;;  %v5580_v63 = vand.u32 4294901760, %v5464_v59  ;;  %9576 = vmatpush1.bf16.msra.mxu1 %v9575_v45  ;;  %v19064_v6 = vld [vmem:[#allocation43_spill] sm:$0xff] }
 0x79d   :  { %19057 = vst [vmem:[#allocation84_spill] sm:$0xff] %v14717_v4  ;;  %v14730_v54 = vpack.c.bf16 %v19061_v50, %v19060_v30  ;;  %v19063_v2 = vand.u32 4294901760, %v18870_v51  ;;  %v19065_v60 = vand.u32 4294901760, %v19064_v6  ;;  %v19066_v32 = vand.u32 4294901760, %v18872_v18  ;;  %9578 = vmatprep.subr.bf16.mxu1 %v9577_v43  ;;  %9700 = vmatpush1.bf16.msra.mxu0 %v14717_v4 }
 0x79e   :  { %v19068_v10 = vand.u32 4294901760, %v19067_v26  ;;  %v14742_v37 = vsub.f32 %v5463_v5, %v5574_v35  ;;  %v14744_v30 = vsub.f32 %v5465_v14, %v5578_v52  ;;  %v19069_v3 = vand.u32 4294901760, %v14562_v58  ;;  %v19078_v58 = vld [vmem:[#allocation72_spill] sm:$0xff] }
 0x79f   :  { %19062 = vst [vmem:[#allocation105_spill] sm:$0xff] %v14730_v54  ;;  %v9579_v46 = vpack.c.bf16 %v19065_v60, %v19063_v2  ;;  %v19070_v45 = vand.u32 4294901760, %v14572_v33  ;;  %v14753_v6 = vsub.f32 %v5462_v9, %v5576_v28  ;;  %v14755_v50 = vsub.f32 %v5464_v59, %v5580_v63  ;;  %9702 = vmatprep.subr.bf16.mxu0 %v14730_v54 }
 0x7a0   :  { %v9581_v17 = vpack.c.bf16 %v19068_v10, %v19066_v32  ;;  %v19074_v18 = vand.u32 4294901760, %v14581_v22  ;;  %v19075_v14 = vand.u32 4294901760, %v14583_v27  ;;  %v19077_v43 = vand.u32 4294901760, %v13773_v20 }
 0x7a1   :  { %v14751_v51 = vpack.c.bf16 %v19070_v45, %v19069_v3  ;;  %19072 = vst [vmem:[#allocation47_spill] sm:$0xff] %v14753_v6  ;;  %19073 = vst [vmem:[#allocation60_spill] sm:$0xff] %v14755_v50  ;;  %9580 = vmatpush1.bf16.msra.mxu1 %v9579_v46  ;;  %v19079_v5 = vand.u32 4294901760, %v19078_v58  ;;  %v19080_v26 = vand.u32 4294901760, %v18875_v49  ;;  %v19081_v9 = vand.u32 4294901760, %v18876_v7  ;;  %v19107_v45 = vld [vmem:[#allocation37_spill] sm:$0xff] }
 0x7a2   :  { %v14762_v32 = vpack.c.bf16 %v19075_v14, %v19074_v18  ;;  %9582 = vmatprep.subr.bf16.mxu1 %v9581_v17  ;;  %v19082_v22 = vand.u32 4294901760, %v14596_v41  ;;  %v19083_v27 = vand.u32 4294901760, %v14598_v21  ;;  %v14780_v20 = vpack.c.bf16 %v5562_v56, %v5558_v55  ;;  %v19109_v14 = vld [vmem:[#allocation51_spill] sm:$0xff] }
 0x7a3   :  { %19071 = vst [vmem:[#allocation30_spill] sm:$0xff] %v14751_v51  ;;  %v9583_v33 = vpack.c.bf16 %v19079_v5, %v19077_v43  ;;  %v9585_v59 = vpack.c.bf16 %v19081_v9, %v19080_v26  ;;  %9704 = vmatpush1.bf16.msra.mxu0 %v14751_v51  ;;  %v19086_v17 = vand.u32 4294901760, %v18877_v47  ;;  %v19087_v49 = vand.u32 4294901760, %v13801_v24  ;;  %v19117_v26 = vld [vmem:[#allocation99_spill] sm:$0xff]  ;;  %v19118_v9 = vld [vmem:[#allocation41_spill] sm:$0xff] }
 0x7a4   :  { %19076 = vst [vmem:[#allocation66_spill] sm:$0xff] %v14762_v32  ;;  %v14777_v2 = vpack.c.bf16 %v19083_v27, %v19082_v22  ;;  %9706 = vmatprep.subr.bf16.mxu0 %v14762_v32  ;;  %19085 = vst [vmem:[#allocation61_spill] sm:$0xff] %v14780_v20  ;;  %v19088_v7 = vand.u32 4294901760, %v13811_v61  ;;  %v19089_v60 = vand.u32 4294901760, %v13813_v29  ;;  %v14791_v21 = vpack.c.bf16 %v5564_v57, %v5560_v13  ;;  %v19120_v22 = vld [vmem:[#allocation111_spill] sm:$0xff]  ;;  %v19121_v27 = vld [vmem:[#allocation113_spill] sm:$0xff] }
 0x7a5   :  { %9584 = vmatpush1.bf16.msra.mxu1 %v9583_v33  ;;  %v9587_v46 = vpack.c.bf16 %v19087_v49, %v19086_v17  ;;  %v14794_v55 = vpack.c.bf16 %v5570_v62, %v5566_v34  ;;  %v19092_v47 = vand.u32 4294901760, %v18906_v11  ;;  %v19093_v24 = vand.u32 4294901760, %v18907_v15  ;;  %v19099_v62 = vld [vmem:[#allocation31_spill] sm:$0xff]  ;;  %v19123_v49 = vld [vmem:[#allocation88_spill] sm:$0xff] }
 0x7a6   :  { %19084 = vst [vmem:[#allocation96_spill] sm:$0xff] %v14777_v2  ;;  %9586 = vmatprep.subr.bf16.mxu1 %v9585_v59  ;;  %v9589_v41 = vpack.c.bf16 %v19089_v60, %v19088_v7  ;;  %19090 = vst [vmem:[#allocation71_spill] sm:$0xff] %v14791_v21  ;;  %v19094_v61 = vand.u32 4294901760, %v18908_v23  ;;  %v19095_v29 = vand.u32 4294901760, %v13966_v42  ;;  %v14805_v13 = vpack.c.bf16 %v5572_v8, %v5568_v25  ;;  %v19105_v8 = vld [vmem:[#allocation42_spill] sm:$0xff]  ;;  %v19116_v33 = vld [vmem:[#allocation79_spill] sm:$0xff] }
 0x7a7   :  { %9708 = vmatpush1.bf16.msra.mxu0 %v14777_v2  ;;  %19091 = vst [vmem:[#allocation43_spill] sm:$0xff] %v14794_v55  ;;  %v9591_v56 = vpack.c.bf16 %v19093_v24, %v19092_v47  ;;  %v14808_v34 = vpack.c.bf16 %v5578_v52, %v5574_v35  ;;  %v19098_v11 = vand.u32 4294901760, %v13968_v39  ;;  %v19100_v15 = vand.u32 4294901760, %v19099_v62  ;;  %v19119_v59 = vld [vmem:[#allocation107_spill] sm:$0xff]  ;;  %v19126_v60 = vld [vmem:[#allocation98_spill] sm:$0xff] }
 0x7a8   :  { %9710 = vmatprep.subr.bf16.mxu0 %v14780_v20  ;;  %v9593_v10 = vpack.c.bf16 %v19095_v29, %v19094_v61  ;;  %19096 = vst [vmem:[#allocation46_spill] sm:$0xff] %v14805_v13  ;;  %v19101_v23 = vand.u32 4294901760, %v13973_v12  ;;  %v19102_v42 = vand.u32 4294901760, %v13975_v1  ;;  %v14819_v25 = vpack.c.bf16 %v5580_v63, %v5576_v28  ;;  %v19111_v1 = vld [vmem:[#allocation63_spill] sm:$0xff]  ;;  %v19113_v63 = vld [vmem:[#allocation68_spill] sm:$0xff]  ;;  %v19128_v47 = vld [vmem:[#allocation74_spill] sm:$0xff] }
 0x7a9   :  { %9588 = vmatpush1.bf16.msra.mxu1 %v9587_v46  ;;  %19097 = vst [vmem:[#allocation72_spill] sm:$0xff] %v14808_v34  ;;  %v9595_v57 = vpack.c.bf16 %v19100_v15, %v19098_v11  ;;  %v19104_v52 = vand.u32 4294901760, %v13977_v44  ;;  %v19106_v39 = vand.u32 4294901760, %v19105_v8  ;;  %v19108_v18 = vand.u32 4294901760, %v19107_v45  ;;  %v19115_v44 = vld [vmem:[#allocation69_spill] sm:$0xff]  ;;  %v19122_v17 = vld [vmem:[#allocation115_spill] sm:$0xff] }
 0x7aa   :  { %9590 = vmatprep.subr.bf16.mxu1 %v9589_v41  ;;  %v9597_v3 = vpack.c.bf16 %v19102_v42, %v19101_v23  ;;  %19103 = vst [vmem:[#allocation31_spill] sm:$0xff] %v14819_v25  ;;  %v19110_v12 = vand.u32 4294901760, %v19109_v14  ;;  %v19112_v28 = vand.u32 4294901760, %v19111_v1  ;;  %v19114_v58 = vand.u32 4294901760, %v19113_v63  ;;  %v19124_v46 = vld [vmem:[#allocation32_spill] sm:$0xff]  ;;  %v19125_v7 = vld [vmem:[#allocation39_spill] sm:$0xff] }
 0x7ab   :  { %9712 = vmatpush1.bf16.msra.mxu0 %v14791_v21  ;;  %v9599_v35 = vpack.c.bf16 %v19106_v39, %v19104_v52  ;;  %v19127_v41 = vld [vmem:[#allocation17_spill] sm:$0xff]  ;;  %v19129_v24 = vld [vmem:[#allocation86_spill] sm:$0xff]  ;;  %v19132_v29 = vld [vmem:[#allocation92_spill] sm:$0xff] }
 0x7ac   :  { %9714 = vmatprep.subr.bf16.mxu0 %v14794_v55  ;;  %v9601_v43 = vpack.c.bf16 %v19110_v12, %v19108_v18  ;;  %v9603_v5 = vpack.c.bf16 %v19114_v58, %v19112_v28  ;;  %v19131_v61 = vld [vmem:[#allocation38_spill] sm:$0xff]  ;;  %v19135_v62 = vld [vmem:[#allocation55_spill] sm:$0xff]  ;;  %v19138_v23 = vld [vmem:[#allocation33_spill] sm:$0xff] }
 0x7ad   :  { %9592 = vmatpush1.bf16.msra.mxu1 %v9591_v56  ;;  %v19130_v56 = vld [vmem:[#allocation103_spill] sm:$0xff]  ;;  %v19134_v11 = vld [vmem:[#allocation14_spill] sm:$0xff]  ;;  %v19139_v42 = vld [vmem:[#allocation97_spill] sm:$0xff] }
 0x7ae   :  { %9594 = vmatprep.subr.bf16.mxu1 %v9593_v10  ;;  %v19133_v10 = vld [vmem:[#allocation73_spill] sm:$0xff]  ;;  %v19136_v15 = vld [vmem:[#allocation106_spill] sm:$0xff]  ;;  %v19142_v8 = vld [vmem:[#allocation27_spill] sm:$0xff] }
 0x7af   :  { %9716 = vmatpush1.bf16.msra.mxu0 %v14805_v13  ;;  %v19141_v52 = vld [vmem:[#allocation101_spill] sm:$0xff]  ;;  %v19143_v39 = vld [vmem:[#allocation16_spill] sm:$0xff]  ;;  %v19147_v14 = vld [vmem:[#allocation58_spill] sm:$0xff] }
 0x7b0   :  { %9718 = vmatprep.subr.bf16.mxu0 %v14808_v34  ;;  %v19145_v45 = vld [vmem:[#allocation52_spill] sm:$0xff]  ;;  %v19146_v18 = vld [vmem:[#allocation53_spill] sm:$0xff]  ;;  %v19148_v12 = vld [vmem:[#allocation18_spill] sm:$0xff] }
 0x7b1   :  { %9596 = vmatpush1.bf16.msra.mxu1 %v9595_v57  ;;  %v19137_v57 = vld [vmem:[#allocation109_spill] sm:$0xff]  ;;  %v5469_v1 = vld [vmem:[#allocation2 + $0x9b8] sm:$0xff]  ;;  %v5466_v58 = vld [vmem:[#allocation2 + $0x9a0] sm:$0xff] }
 0x7b2   :  { %9598 = vmatprep.subr.bf16.mxu1 %v9597_v3  ;;  %v19140_v3 = vld [vmem:[#allocation100_spill] sm:$0xff]  ;;  %v5586_v63 = vand.u32 4294901760, %v5469_v1  ;;  %v19182_v51 = vld [vmem:[#allocation11_spill] sm:$0xff] }
 0x7b3   :  { %9720 = vmatpush1.bf16.msra.mxu0 %v14819_v25  ;;  %v19179_v21 = vld [vmem:[#allocation8_spill] sm:$0xff] }
 0x7b5   :  { %9600 = vmatpush1.bf16.msra.mxu1 %v9599_v35  ;;  %v19144_v35 = vld [vmem:[#allocation80_spill] sm:$0xff] }
 0x7b6   :  { %9602 = vmatprep.subr.bf16.mxu1 %v9601_v43  ;;  %v5467_v43 = vld [vmem:[#allocation2 + $0x9a8] sm:$0xff] }
 0x7b7   :  { %v5582_v28 = vand.u32 4294901760, %v5467_v43 }
 0x7b9   :  { %9604 = vmatpush1.bf16.msra.mxu1 %v9603_v5  ;;  %v5468_v5 = vld [vmem:[#allocation2 + $0x9b0] sm:$0xff] }
 0x7ba   :  { %9606 = vmatprep.subr.bf16.mxu1 %v19115_v44  ;;  %v5584_v44 = vand.u32 4294901760, %v5466_v58 }
 0x7bc   :  { %5270 = vmatmul.mubr.f32.vlgmr.msra.gmra.mrb[2].mxu1 %v19116_v33 }
 0x7bd   :  { %9608 = vmatpush1.bf16.msra.mxu1 %v19117_v26  ;;  %5405 = vmatprep.mubr.f32.mxu1 %v19118_v9  ;;  %v5588_v26 = vand.u32 4294901760, %v5468_v5  ;;  %v14870_v9 = vpack.c.bf16 %v5586_v63, %v5582_v28 }
 0x7be   :  { %9610 = vmatprep.subr.bf16.mxu1 %v19119_v59 }
 0x7bf   :  { %19149 = vst [vmem:[#allocation42_spill] sm:$0xff] %v14870_v9  ;;  %v14872_v59 = vpack.c.bf16 %v5588_v26, %v5584_v44  ;;  %9722 = vmatprep.subr.bf16.mxu0 %v14870_v9 }
 0x7c1   :  { %9612 = vmatpush1.bf16.msra.mxu1 %v19120_v22  ;;  %19150 = vst [vmem:[#allocation37_spill] sm:$0xff] %v14872_v59  ;;  %v5471_v22 = vld [vmem:[#allocation2 + $0x9c8] sm:$0xff]  ;;  %9724 = vmatpush1.bf16.msra.mxu0 %v14872_v59 }
 0x7c2   :  { %9614 = vmatprep.subr.bf16.mxu1 %v19121_v27  ;;  %v5473_v27 = vld [vmem:[#allocation2 + $0x9d8] sm:$0xff] }
 0x7c5   :  { %9616 = vmatpush1.bf16.msra.mxu1 %v19122_v17  ;;  %v5590_v17 = vand.u32 4294901760, %v5471_v22 }
 0x7c6   :  { %9618 = vmatprep.subr.bf16.mxu1 %v19123_v49  ;;  %v5594_v49 = vand.u32 4294901760, %v5473_v27 }
 0x7c8   :  { %v14906_v59 = vsub.f32 %v5473_v27, %v5594_v49 }
 0x7c9   :  { %9620 = vmatpush1.bf16.msra.mxu1 %v19124_v46  ;;  %v5470_v46 = vld [vmem:[#allocation2 + $0x9c0] sm:$0xff] }
 0x7ca   :  { %9622 = vmatprep.subr.bf16.mxu1 %v19125_v7  ;;  %v5592_v7 = vand.u32 4294901760, %v5470_v46 }
 0x7cd   :  { %9624 = vmatpush1.bf16.msra.mxu1 %v19126_v60 }
 0x7ce   :  { %9626 = vmatprep.subr.bf16.mxu1 %v19127_v41  ;;  %v14876_v41 = vpack.c.bf16 %v5594_v49, %v5590_v17 }
 0x7d0   :  { %19151 = vst [vmem:[#allocation51_spill] sm:$0xff] %v14876_v41  ;;  %9726 = vmatprep.subr.bf16.mxu0 %v14876_v41  ;;  %v14901_v41 = vsub.f32 %v5468_v5, %v5588_v26 }
 0x7d1   :  { %9628 = vmatpush1.bf16.msra.mxu1 %v19128_v47 }
 0x7d2   :  { %9630 = vmatprep.subr.bf16.mxu1 %v19129_v24  ;;  %v5475_v24 = vld [vmem:[#allocation2 + $0x9e8] sm:$0xff]  ;;  %19158 = vst [vmem:[#allocation99_spill] sm:$0xff] %v14901_v41 }
 0x7d5   :  { %9632 = vmatpush1.bf16.msra.mxu1 %v19130_v56  ;;  %v5477_v56 = vld [vmem:[#allocation2 + $0x9f8] sm:$0xff] }
 0x7d6   :  { %9634 = vmatprep.subr.bf16.mxu1 %v19131_v61  ;;  %v5598_v61 = vand.u32 4294901760, %v5475_v24 }
 0x7d9   :  { %9636 = vmatpush1.bf16.msra.mxu1 %v19132_v29  ;;  %v5602_v29 = vand.u32 4294901760, %v5477_v56 }
 0x7da   :  { %9638 = vmatprep.subr.bf16.mxu1 %v19133_v10  ;;  %v5474_v10 = vld [vmem:[#allocation2 + $0x9e0] sm:$0xff] }
 0x7dd   :  { %9640 = vmatpush1.bf16.msra.mxu1 %v19134_v11  ;;  %v5476_v11 = vld [vmem:[#allocation2 + $0x9f0] sm:$0xff] }
 0x7de   :  { %9642 = vmatprep.subr.bf16.mxu1 %v19135_v62  ;;  %v19153_v62 = vld [vmem:[#allocation29_spill] sm:$0xff] }
 0x7e1   :  { %9644 = vmatpush1.bf16.msra.mxu1 %v19136_v15  ;;  %v17279_v15 = vand.u32 4294901760, %v19153_v62 }
 0x7e2   :  { %9646 = vmatprep.subr.bf16.mxu1 %v19137_v57  ;;  %v19154_v57 = vld [vmem:[#allocation34_spill] sm:$0xff] }
 0x7e5   :  { %9648 = vmatpush1.bf16.msra.mxu1 %v19138_v23  ;;  %v17282_v23 = vand.u32 4294901760, %v19154_v57 }
 0x7e6   :  { %9650 = vmatprep.subr.bf16.mxu1 %v19139_v42  ;;  %v5600_v42 = vand.u32 4294901760, %v5474_v10 }
 0x7e9   :  { %9652 = vmatpush1.bf16.msra.mxu1 %v19140_v3  ;;  %v5604_v3 = vand.u32 4294901760, %v5476_v11 }
 0x7ea   :  { %9654 = vmatprep.subr.bf16.mxu1 %v19141_v52  ;;  %v14884_v52 = vpack.c.bf16 %v5602_v29, %v5598_v61 }
 0x7ec   :  { %19155 = vst [vmem:[#allocation68_spill] sm:$0xff] %v14884_v52 }
 0x7ed   :  { %9656 = vmatpush1.bf16.msra.mxu1 %v19142_v8  ;;  %v5626_v8 = vsub.f32 %v19153_v62, %v17279_v15  ;;  %v14904_v15 = vsub.f32 %v5471_v22, %v5590_v17  ;;  %v19166_v17 = vld [vmem:[#allocation64_spill] sm:$0xff] }
 0x7ee   :  { %9658 = vmatprep.subr.bf16.mxu1 %v19143_v39  ;;  %v5638_v39 = vsub.f32 %v19154_v57, %v17282_v23  ;;  %v14908_v23 = vsub.f32 %v5470_v46, %v5592_v7  ;;  %v17289_v49 = vand.u32 4294901760, %v19166_v17  ;;  %v19167_v46 = vld [vmem:[#allocation67_spill] sm:$0xff] }
 0x7f1   :  { %9660 = vmatpush1.bf16.msra.mxu1 %v19144_v35  ;;  %v14892_v35 = vpack.c.bf16 %v5604_v3, %v5600_v42 }
 0x7f2   :  { %9662 = vmatprep.subr.bf16.mxu1 %v19145_v45  ;;  %v5627_v45 = vand.u32 4294901760, %v5626_v8  ;;  %v14912_v8 = vsub.f32 %v5475_v24, %v5598_v61  ;;  %v19169_v61 = vld [vmem:[#allocation104_spill] sm:$0xff] }
 0x7f3   :  { %19156 = vst [vmem:[#allocation69_spill] sm:$0xff] %v14892_v35 }
 0x7f4   :  { %19160 = vst [vmem:[#allocation107_spill] sm:$0xff] %v14912_v8 }
 0x7f5   :  { %9664 = vmatpush1.bf16.msra.mxu1 %v19146_v18  ;;  %v5639_v18 = vand.u32 4294901760, %v5638_v39 }
 0x7f6   :  { %9666 = vmatprep.subr.bf16.mxu1 %v19147_v14  ;;  %v14895_v14 = vsub.f32 %v5467_v43, %v5582_v28  ;;  %v14914_v43 = vsub.f32 %v5477_v56, %v5602_v29  ;;  %v14918_v28 = vsub.f32 %v5476_v11, %v5604_v3  ;;  %v19175_v11 = vld [vmem:[#allocation50_spill] sm:$0xff] }
 0x7f8   :  { %19157 = vst [vmem:[#allocation79_spill] sm:$0xff] %v14895_v14  ;;  %19161 = vst [vmem:[#allocation111_spill] sm:$0xff] %v14914_v43 }
 0x7f9   :  { %9668 = vmatpush1.bf16.msra.mxu1 %v19148_v12  ;;  %v14897_v12 = vsub.f32 %v5469_v1, %v5586_v63  ;;  %v14916_v1 = vsub.f32 %v5474_v10, %v5600_v42  ;;  %19163 = vst [vmem:[#allocation115_spill] sm:$0xff] %v14918_v28  ;;  %v9733_v63 = vpack.c.bf16 %v5639_v18, %v5627_v45  ;;  %v19170_v10 = vld [vmem:[#allocation54_spill] sm:$0xff]  ;;  %v19171_v42 = vld [vmem:[#allocation117_spill] sm:$0xff] }
 0x7fa   :  { %v19177_v25 = vand.u32 4294901760, %v19170_v10 }
 0x7fb   :  { %19162 = vst [vmem:[#allocation113_spill] sm:$0xff] %v14916_v1 }
 0x7fc   :  { %5407 = vmatmul.mubr.f32.vlgmr.msra.gmra.mrb[2].mxu1 %v19116_v33  ;;  %v5472_v33 = vld [vmem:[#allocation2 + $0x9d0] sm:$0xff] }
 0x7fd   :  { %v5596_v60 = vand.u32 4294901760, %v5472_v33 }
 0x7ff   :  { %v14878_v47 = vpack.c.bf16 %v5596_v60, %v5592_v7  ;;  %v14910_v9 = vsub.f32 %v5472_v33, %v5596_v60  ;;  %v17294_v33 = vand.u32 4294901760, %v19167_v46  ;;  %v17297_v60 = vand.u32 4294901760, %v14445_v16 }
 0x801   :  { %19152 = vst [vmem:[#allocation63_spill] sm:$0xff] %v14878_v47  ;;  %9728 = vmatpush1.bf16.msra.mxu0 %v14878_v47  ;;  %v14899_v47 = vsub.f32 %v5466_v58, %v5584_v44  ;;  %19159 = vst [vmem:[#allocation41_spill] sm:$0xff] %v14910_v9  ;;  %v19164_v58 = vld [vmem:[#allocation40_spill] sm:$0xff]  ;;  %v19165_v44 = vld [vmem:[#allocation95_spill] sm:$0xff]  ;;  %v5656_v3 = vsub.f32 %v14445_v16, %v17297_v60 }
 0x802   :  { %9730 = vmatprep.subr.bf16.mxu0 %v14884_v52  ;;  %v17286_v5 = vand.u32 4294901760, %v19164_v58  ;;  %v17285_v26 = vand.u32 4294901760, %v19165_v44 }
 0x803   :  { %v5657_v2 = vand.u32 4294901760, %v5656_v3 }
 0x804   :  { %v5632_v22 = vsub.f32 %v19164_v58, %v17286_v5  ;;  %v5644_v27 = vsub.f32 %v19165_v44, %v17285_v26  ;;  %v5662_v5 = vsub.f32 %v19167_v46, %v17294_v33  ;;  %v5674_v33 = vsub.f32 %v19170_v10, %v19177_v25 }
 0x805   :  { %9732 = vmatpush1.bf16.msra.mxu0 %v14892_v35 }
 0x806   :  { %9734 = vmatprep.subr.bf16.mxu0 %v9733_v63  ;;  %v5633_v45 = vand.u32 4294901760, %v5632_v22  ;;  %v5645_v18 = vand.u32 4294901760, %v5644_v27  ;;  %v5650_v63 = vsub.f32 %v19166_v17, %v17289_v49  ;;  %v19174_v22 = vld [vmem:[#allocation119_spill] sm:$0xff]  ;;  %v5663_v55 = vand.u32 4294901760, %v5662_v5 }
 0x808   :  { %v9735_v13 = vpack.c.bf16 %v5645_v18, %v5633_v45  ;;  %v5651_v27 = vand.u32 4294901760, %v5650_v63  ;;  %v19181_v45 = vand.u32 4294901760, %v19175_v11 }
 0x80a   :  { %v5692_v18 = vsub.f32 %v19175_v11, %v19181_v45  ;;  %v19184_v45 = vand.u32 4294901760, %v14472_v0 }
 0x8cf   :  { %v5408_v7 = vpop.f32.mrb[2].mxu1 }
 0x8d0   :  { %v14931_v24 = vand.u32 4294901760, %v5408_v7  ;;  %v5410_v56 = vpop.f32.mrb[3].mxu1 }
 0x8d1   :  { %v14936_v39 = vand.u32 4294901760, %v5410_v56 }
 0x8d2   :  { %19168 = vst [vmem:[#allocation88_spill] sm:$0xff] %v14931_v24  ;;  %v14942_v26 = vsub.f32 %v5408_v7, %v14931_v24  ;;  %v19176_v7 = vand.u32 4294901760, %v19169_v61 }
 0x8d3   :  { %19172 = vst [vmem:[#allocation32_spill] sm:$0xff] %v14936_v39  ;;  %v14948_v29 = vsub.f32 %v5410_v56, %v14936_v39  ;;  %v19178_v56 = vand.u32 4294901760, %v19171_v42 }
 0x8d4   :  { %19173 = vst [vmem:[#allocation39_spill] sm:$0xff] %v14942_v26  ;;  %v17310_v49 = vand.u32 4294901760, %v14942_v26  ;;  %v5668_v52 = vsub.f32 %v19169_v61, %v19176_v7  ;;  %v19185_v7 = vld [vmem:[#allocation93_spill] sm:$0xff] }
 0x8d5   :  { %v5686_v34 = vsub.f32 %v19171_v42, %v19178_v56  ;;  %v17317_v60 = vand.u32 4294901760, %v14948_v29  ;;  %v19180_v56 = vand.u32 4294901760, %v19174_v22  ;;  %v17329_v20 = vand.u32 4294901760, %v19185_v7 }
 0x8d6   :  { %v5615_v35 = vsub.f32 %v14942_v26, %v17310_v49  ;;  %v5669_v63 = vand.u32 4294901760, %v5668_v52  ;;  %v5675_v49 = vand.u32 4294901760, %v5674_v33  ;;  %v9737_v26 = vpack.c.bf16 %v5663_v55, %v5651_v27  ;;  %v19187_v27 = vld [vmem:[#allocation59_spill] sm:$0xff] }
 0x8d7   :  { %v5609_v25 = vsub.f32 %v14948_v29, %v17317_v60  ;;  %v5680_v32 = vsub.f32 %v19174_v22, %v19180_v56  ;;  %v5687_v5 = vand.u32 4294901760, %v5686_v34  ;;  %v19183_v56 = vand.u32 4294901760, %v19179_v21 }
 0x8d8   :  { %v5616_v60 = vand.u32 4294901760, %v5615_v35  ;;  %v5710_v52 = vsub.f32 %v14472_v0, %v19184_v45  ;;  %v5693_v33 = vand.u32 4294901760, %v5692_v18  ;;  %v9739_v4 = vpack.c.bf16 %v5669_v63, %v5657_v2 }
 0x8d9   :  { %v5610_v54 = vand.u32 4294901760, %v5609_v25  ;;  %v5698_v22 = vsub.f32 %v19179_v21, %v19183_v56  ;;  %v5681_v34 = vand.u32 4294901760, %v5680_v32  ;;  %v17326_v25 = vand.u32 4294901760, %v14504_v48  ;;  %v19188_v56 = vld [vmem:[#allocation65_spill] sm:$0xff] }
 0x8da   :  { %v19186_v35 = vand.u32 4294901760, %v19182_v51  ;;  %v19190_v18 = vand.u32 4294901760, %v14490_v53  ;;  %v19191_v2 = vand.u32 4294901760, %v14501_v38  ;;  %v9741_v45 = vpack.c.bf16 %v5687_v5, %v5675_v49  ;;  %v19194_v49 = vld [vmem:[#allocation112_spill] sm:$0xff]  ;;  %v19195_v5 = vld [vmem:[#allocation114_spill] sm:$0xff] }
 0x8db   :  { %5611 = vmatprep.mubr.f32.mxu0 %v5610_v54  ;;  %v19189_v54 = vand.u32 4294901760, %v14488_v31  ;;  %v5711_v3 = vand.u32 4294901760, %v5710_v52  ;;  %v9743_v21 = vpack.c.bf16 %v5693_v33, %v5681_v34  ;;  %v17343_v52 = vand.u32 4294901760, %v19195_v5 }
 0x8dc   :  { %5617 = vmatmul.mubr.f32.vlgmr.msra.gmra.mrb[4].mxu0 %v5616_v60  ;;  %v5704_v55 = vsub.f32 %v19182_v51, %v19186_v35  ;;  %v5722_v60 = vsub.f32 %v14490_v53, %v19190_v18  ;;  %v5734_v63 = vsub.f32 %v14501_v38, %v19191_v2  ;;  %v5699_v35 = vand.u32 4294901760, %v5698_v22  ;;  %v19197_v38 = vld [vmem:[#allocation20_spill] sm:$0xff]  ;;  %v19198_v51 = vld [vmem:[#allocation94_spill] sm:$0xff] }
 0x8dd   :  { %9736 = vmatpush1.bf16.msra.mxu0 %v9735_v13  ;;  %6008 = vmatprep.mubr.f32.mxu0 %v14936_v39  ;;  %v5716_v32 = vsub.f32 %v14488_v31, %v19189_v54  ;;  %v5728_v13 = vsub.f32 %v14504_v48, %v17326_v25  ;;  %v5740_v54 = vsub.f32 %v19185_v7, %v17329_v20  ;;  %v19192_v39 = vand.u32 4294901760, %v19187_v27  ;;  %v19196_v20 = vld [vmem:[#allocation36_spill] sm:$0xff] }
 0x8de   :  { %9738 = vmatprep.subr.bf16.mxu0 %v9737_v26  ;;  %v19193_v53 = vand.u32 4294901760, %v19188_v56  ;;  %v5705_v34 = vand.u32 4294901760, %v5704_v55  ;;  %v5723_v2 = vand.u32 4294901760, %v5722_v60  ;;  %v5735_v25 = vand.u32 4294901760, %v5734_v63 }
 0x8df   :  { %v5746_v18 = vsub.f32 %v19187_v27, %v19192_v39  ;;  %v5717_v33 = vand.u32 4294901760, %v5716_v32  ;;  %v9745_v48 = vpack.c.bf16 %v5711_v3, %v5699_v35  ;;  %v17342_v7 = vand.u32 4294901760, %v19196_v20  ;;  %v19201_v35 = vld [vmem:[#allocation87_spill] sm:$0xff] }
 0x8e0   :  { %v5758_v26 = vsub.f32 %v19188_v56, %v19193_v53  ;;  %v17341_v31 = vand.u32 4294901760, %v19197_v38  ;;  %v5729_v39 = vand.u32 4294901760, %v5728_v13  ;;  %v5741_v27 = vand.u32 4294901760, %v5740_v54  ;;  %v19199_v53 = vld [vmem:[#allocation116_spill] sm:$0xff]  ;;  %v19202_v54 = vld [vmem:[#allocation89_spill] sm:$0xff] }
 0x8e1   :  { %9740 = vmatpush1.bf16.msra.mxu0 %v9739_v4  ;;  %v17346_v0 = vand.u32 4294901760, %v19198_v51  ;;  %v17348_v56 = vand.u32 4294901760, %v19199_v53  ;;  %v5747_v22 = vand.u32 4294901760, %v5746_v18  ;;  %v19200_v4 = vand.u32 4294901760, %v19194_v49  ;;  %v19206_v18 = vld [vmem:[#allocation21_spill] sm:$0xff] }
 0x8e2   :  { %9742 = vmatprep.subr.bf16.mxu0 %v9741_v45  ;;  %v5759_v11 = vand.u32 4294901760, %v5758_v26  ;;  %v5764_v3 = vsub.f32 %v19195_v5, %v17343_v52  ;;  %v9747_v32 = vpack.c.bf16 %v5717_v33, %v5705_v34  ;;  %v9749_v60 = vpack.c.bf16 %v5735_v25, %v5723_v2  ;;  %v19203_v2 = vld [vmem:[#allocation48_spill] sm:$0xff]  ;;  %v19205_v52 = vld [vmem:[#allocation19_spill] sm:$0xff] }
 0x8e3   :  { %v5752_v55 = vsub.f32 %v19194_v49, %v19200_v4  ;;  %v5770_v63 = vsub.f32 %v19196_v20, %v17342_v7  ;;  %v5782_v45 = vsub.f32 %v19197_v38, %v17341_v31  ;;  %v5776_v26 = vsub.f32 %v19198_v51, %v17346_v0  ;;  %v19204_v31 = vld [vmem:[#allocation12_spill] sm:$0xff]  ;;  %v19211_v4 = vld [vmem:[#allocation91_spill] sm:$0xff] }
 0x8e4   :  { %v9753_v25 = vpack.c.bf16 %v5759_v11, %v5747_v22  ;;  %v5765_v33 = vand.u32 4294901760, %v5764_v3  ;;  %v19207_v51 = vand.u32 4294901760, %v19201_v35  ;;  %v19208_v11 = vand.u32 4294901760, %v19202_v54 }
 0x8e5   :  { %9744 = vmatpush1.bf16.msra.mxu0 %v9743_v21  ;;  %v9751_v21 = vpack.c.bf16 %v5741_v27, %v5729_v39  ;;  %v5753_v34 = vand.u32 4294901760, %v5752_v55  ;;  %v5771_v20 = vand.u32 4294901760, %v5770_v63  ;;  %v5783_v0 = vand.u32 4294901760, %v5782_v45  ;;  %v19209_v55 = vld [vmem:[#allocation22_spill] sm:$0xff] }
 0x8e6   :  { %9746 = vmatprep.subr.bf16.mxu0 %v9745_v48  ;;  %v5788_v48 = vsub.f32 %v19199_v53, %v17348_v56  ;;  %v5794_v56 = vsub.f32 %v19201_v35, %v19207_v51  ;;  %v5806_v27 = vsub.f32 %v19202_v54, %v19208_v11  ;;  %v5777_v22 = vand.u32 4294901760, %v5776_v26 }
 0x8e7   :  { %v17353_v3 = vand.u32 4294901760, %v19209_v55  ;;  %v9755_v13 = vpack.c.bf16 %v5765_v33, %v5753_v34  ;;  %v19213_v45 = vand.u32 4294901760, %v19203_v2  ;;  %v19214_v35 = vand.u32 4294901760, %v19204_v31 }
 0x8e8   :  { %v5789_v39 = vand.u32 4294901760, %v5788_v48  ;;  %v19215_v26 = vand.u32 4294901760, %v19205_v52  ;;  %v19216_v7 = vand.u32 4294901760, %v19206_v18  ;;  %v9757_v33 = vpack.c.bf16 %v5783_v0, %v5771_v20  ;;  %v19220_v0 = vld [vmem:[#allocation85_spill] sm:$0xff] }
 0x8e9   :  { %9748 = vmatpush1.bf16.msra.mxu0 %v9747_v32  ;;  %v19210_v32 = vld [vmem:[#allocation49_spill] sm:$0xff]  ;;  %v5800_v51 = vsub.f32 %v19203_v2, %v19213_v45  ;;  %v5812_v11 = vsub.f32 %v19204_v31, %v19214_v35  ;;  %v5795_v63 = vand.u32 4294901760, %v5794_v56  ;;  %v5824_v45 = vsub.f32 %v19209_v55, %v17353_v3  ;;  %v19221_v56 = vld [vmem:[#allocation24_spill] sm:$0xff] }
 0x8ea   :  { %9750 = vmatprep.subr.bf16.mxu0 %v9749_v60  ;;  %v19212_v60 = vld [vmem:[#allocation76_spill] sm:$0xff]  ;;  %v5818_v48 = vsub.f32 %v19205_v52, %v19215_v26  ;;  %v5830_v34 = vsub.f32 %v19206_v18, %v19216_v7  ;;  %v9759_v38 = vpack.c.bf16 %v5789_v39, %v5777_v22  ;;  %v19217_v2 = vand.u32 4294901760, %v19210_v32 }
 0x8eb   :  { %v19218_v31 = vand.u32 4294901760, %v19211_v4  ;;  %v19219_v52 = vand.u32 4294901760, %v19212_v60  ;;  %v5813_v22 = vand.u32 4294901760, %v5812_v11  ;;  %v17361_v18 = vand.u32 4294901760, %v14694_v36 }
 0x8ec   :  { %v5836_v35 = vsub.f32 %v19210_v32, %v19217_v2  ;;  %v5819_v39 = vand.u32 4294901760, %v5818_v48  ;;  %v5831_v3 = vand.u32 4294901760, %v5830_v34  ;;  %v19222_v2 = vld [vmem:[#allocation25_spill] sm:$0xff]  ;;  %v17364_v54 = vand.u32 4294901760, %v14704_v40 }
 0x8ed   :  { %9752 = vmatpush1.bf16.msra.mxu0 %v9751_v21  ;;  %v5807_v21 = vand.u32 4294901760, %v5806_v27  ;;  %v5842_v26 = vsub.f32 %v19211_v4, %v19218_v31  ;;  %v5854_v7 = vsub.f32 %v19212_v60, %v19219_v52  ;;  %v5801_v27 = vand.u32 4294901760, %v5800_v51  ;;  %v19223_v52 = vld [vmem:[#allocation28_spill] sm:$0xff] }
 0x8ee   :  { %9754 = vmatprep.subr.bf16.mxu0 %v9753_v25  ;;  %v17363_v25 = vand.u32 4294901760, %v19221_v56  ;;  %v17362_v32 = vand.u32 4294901760, %v19222_v2  ;;  %v5825_v31 = vand.u32 4294901760, %v5824_v45  ;;  %v5837_v4 = vand.u32 4294901760, %v5836_v35  ;;  %v19226_v35 = vld [vmem:[#allocation35_spill] sm:$0xff] }
 0x8ef   :  { %v9761_v55 = vpack.c.bf16 %v5807_v21, %v5795_v63  ;;  %v17365_v60 = vand.u32 4294901760, %v19223_v52  ;;  %v5843_v20 = vand.u32 4294901760, %v5842_v26  ;;  %v5855_v53 = vand.u32 4294901760, %v5854_v7  ;;  %v19225_v21 = vld [vmem:[#allocation83_spill] sm:$0xff] }
 0x8f0   :  { %v5860_v63 = vsub.f32 %v19221_v56, %v17363_v25  ;;  %v9763_v11 = vpack.c.bf16 %v5813_v22, %v5801_v27  ;;  %v9765_v48 = vpack.c.bf16 %v5831_v3, %v5819_v39  ;;  %v5866_v34 = vsub.f32 %v19222_v2, %v17362_v32  ;;  %v19227_v39 = vld [vmem:[#allocation45_spill] sm:$0xff] }
 0x8f1   :  { %9756 = vmatpush1.bf16.msra.mxu0 %v9755_v13  ;;  %v19224_v13 = vand.u32 4294901760, %v19220_v0  ;;  %v17366_v45 = vand.u32 4294901760, %v19225_v21  ;;  %v5872_v7 = vsub.f32 %v14704_v40, %v17364_v54  ;;  %v9769_v3 = vpack.c.bf16 %v5855_v53, %v5843_v20 }
 0x8f2   :  { %9758 = vmatprep.subr.bf16.mxu0 %v9757_v33  ;;  %v5878_v33 = vsub.f32 %v14694_v36, %v17361_v18  ;;  %v5861_v22 = vand.u32 4294901760, %v5860_v63  ;;  %v17368_v18 = vand.u32 4294901760, %v14732_v19  ;;  %v17369_v32 = vand.u32 4294901760, %v14742_v37 }
 0x8f3   :  { %v5848_v51 = vsub.f32 %v19220_v0, %v19224_v13  ;;  %v17367_v13 = vand.u32 4294901760, %v19227_v39  ;;  %v5867_v26 = vand.u32 4294901760, %v5866_v34  ;;  %v19228_v53 = vand.u32 4294901760, %v19226_v35 }
 0x8f4   :  { %v5879_v54 = vand.u32 4294901760, %v5878_v33  ;;  %v5873_v20 = vand.u32 4294901760, %v5872_v7  ;;  %v17370_v63 = vand.u32 4294901760, %v14755_v50  ;;  %v17372_v25 = vand.u32 4294901760, %v14895_v14 }
 0x8f5   :  { %9760 = vmatpush1.bf16.msra.mxu0 %v9759_v38  ;;  %v5884_v38 = vsub.f32 %v19223_v52, %v17365_v60  ;;  %v5849_v27 = vand.u32 4294901760, %v5848_v51  ;;  %v5890_v60 = vsub.f32 %v19225_v21, %v17366_v45  ;;  %v17371_v51 = vand.u32 4294901760, %v14753_v6 }
 0x8f6   :  { %9762 = vmatprep.subr.bf16.mxu0 %v9761_v55  ;;  %v9767_v55 = vpack.c.bf16 %v5837_v4, %v5825_v31  ;;  %v5902_v4 = vsub.f32 %v19226_v35, %v19228_v53  ;;  %v5896_v34 = vsub.f32 %v19227_v39, %v17367_v13  ;;  %v5908_v33 = vsub.f32 %v14732_v19, %v17368_v18 }
 0x8f7   :  { %v5885_v31 = vand.u32 4294901760, %v5884_v38  ;;  %v5914_v7 = vsub.f32 %v14742_v37, %v17369_v32  ;;  %v19229_v38 = vand.u32 4294901760, %v14744_v30  ;;  %v5891_v53 = vand.u32 4294901760, %v5890_v60 }
 0x8f8   :  { %v5920_v13 = vsub.f32 %v14753_v6, %v17371_v51  ;;  %v5932_v18 = vsub.f32 %v14755_v50, %v17370_v63  ;;  %v5938_v32 = vsub.f32 %v14895_v14, %v17372_v25  ;;  %v17388_v60 = vand.u32 4294901760, %v14901_v41 }
 0x8f9   :  { %9764 = vmatpush1.bf16.msra.mxu0 %v9763_v11  ;;  %v9771_v11 = vpack.c.bf16 %v5861_v22, %v5849_v27  ;;  %v5926_v27 = vsub.f32 %v14744_v30, %v19229_v38  ;;  %v9773_v22 = vpack.c.bf16 %v5879_v54, %v5867_v26  ;;  %v9775_v45 = vpack.c.bf16 %v5885_v31, %v5873_v20 }
 0x8fa   :  { %9766 = vmatprep.subr.bf16.mxu0 %v9765_v48  ;;  %v17379_v48 = vand.u32 4294901760, %v14897_v12  ;;  %v17389_v54 = vand.u32 4294901760, %v14899_v47  ;;  %v5897_v26 = vand.u32 4294901760, %v5896_v34  ;;  %v5915_v20 = vand.u32 4294901760, %v5914_v7 }
 0x8fb   :  { %v5927_v31 = vand.u32 4294901760, %v5926_v27  ;;  %v17387_v63 = vand.u32 4294901760, %v14904_v15  ;;  %v17380_v51 = vand.u32 4294901760, %v14906_v59  ;;  %v5921_v25 = vand.u32 4294901760, %v5920_v13 }
 0x8fc   :  { %v5933_v14 = vand.u32 4294901760, %v5932_v18  ;;  %v5939_v50 = vand.u32 4294901760, %v5938_v32  ;;  %v17386_v7 = vand.u32 4294901760, %v14908_v23  ;;  %v17382_v27 = vand.u32 4294901760, %v14910_v9 }
 0x8fd   :  { %9768 = vmatpush1.bf16.msra.mxu0 %v9767_v55  ;;  %v5903_v55 = vand.u32 4294901760, %v5902_v4  ;;  %v5909_v4 = vand.u32 4294901760, %v5908_v33  ;;  %v9781_v33 = vpack.c.bf16 %v5927_v31, %v5915_v20  ;;  %v5962_v18 = vsub.f32 %v14904_v15, %v17387_v63 }
 0x8fe   :  { %9770 = vmatprep.subr.bf16.mxu0 %v9769_v3  ;;  %v5950_v3 = vsub.f32 %v14897_v12, %v17379_v48  ;;  %v5944_v48 = vsub.f32 %v14899_v47, %v17389_v54  ;;  %v5974_v32 = vsub.f32 %v14906_v59, %v17380_v51  ;;  %v17381_v13 = vand.u32 4294901760, %v14912_v8 }
 0x8ff   :  { %v9777_v38 = vpack.c.bf16 %v5903_v55, %v5891_v53  ;;  %v9779_v34 = vpack.c.bf16 %v5909_v4, %v5897_v26  ;;  %v5968_v26 = vsub.f32 %v14908_v23, %v17386_v7  ;;  %v5980_v4 = vsub.f32 %v14910_v9, %v17382_v27  ;;  %v19247_v7 = vld [vmem:[#allocation89_spill] sm:$0xff] }
 0x900   :  { %v5951_v6 = vand.u32 4294901760, %v5950_v3  ;;  %v5945_v55 = vand.u32 4294901760, %v5944_v48  ;;  %v17385_v20 = vand.u32 4294901760, %v14916_v1  ;;  %v17384_v31 = vand.u32 4294901760, %v14918_v28 }
 0x901   :  { %9772 = vmatpush1.bf16.msra.mxu0 %v9771_v11  ;;  %v5956_v11 = vsub.f32 %v14901_v41, %v17388_v60  ;;  %v5975_v51 = vand.u32 4294901760, %v5974_v32  ;;  %v5981_v48 = vand.u32 4294901760, %v5980_v4  ;;  %v19249_v60 = vld [vmem:[#allocation12_spill] sm:$0xff] }
 0x902   :  { %9774 = vmatprep.subr.bf16.mxu0 %v9773_v22  ;;  %v17383_v22 = vand.u32 4294901760, %v14914_v43  ;;  %v9785_v53 = vpack.c.bf16 %v5951_v6, %v5939_v50  ;;  %v5986_v6 = vsub.f32 %v14912_v8, %v17381_v13 }
 0x903   :  { %v5957_v3 = vand.u32 4294901760, %v5956_v11  ;;  %v5992_v11 = vsub.f32 %v14916_v1, %v17385_v20 }
 0x904   :  { %v5998_v50 = vsub.f32 %v14914_v43, %v17383_v22 }
 0x905   :  { %9776 = vmatpush1.bf16.msra.mxu0 %v9775_v45  ;;  %v9783_v45 = vpack.c.bf16 %v5933_v14, %v5921_v25  ;;  %v9787_v14 = vpack.c.bf16 %v5957_v3, %v5945_v55  ;;  %v5969_v25 = vand.u32 4294901760, %v5968_v26  ;;  %v5993_v27 = vand.u32 4294901760, %v5992_v11  ;;  %v19236_v11 = vld [vmem:[#allocation23_spill] sm:$0xff] }
 0x906   :  { %9778 = vmatprep.subr.bf16.mxu0 %v9777_v38  ;;  %v5963_v38 = vand.u32 4294901760, %v5962_v18  ;;  %v5987_v18 = vand.u32 4294901760, %v5986_v6  ;;  %v5999_v32 = vand.u32 4294901760, %v5998_v50  ;;  %v9797_v3 = vpack.c.bf16 %v19154_v57, %v19153_v62  ;;  %v19233_v6 = vld [vmem:[#allocation10_spill] sm:$0xff] }
 0x907   :  { %v9791_v13 = vpack.c.bf16 %v5981_v48, %v5969_v25  ;;  %v9799_v26 = vpack.c.bf16 %v19165_v44, %v19164_v58  ;;  %v19235_v25 = vld [vmem:[#allocation13_spill] sm:$0xff] }
 0x909   :  { %9780 = vmatpush1.bf16.msra.mxu0 %v9779_v34  ;;  %v6004_v34 = vsub.f32 %v14918_v28, %v17384_v31  ;;  %v19245_v31 = vld [vmem:[#allocation116_spill] sm:$0xff] }
 0x90a   :  { %9782 = vmatprep.subr.bf16.mxu0 %v9781_v33  ;;  %v9789_v33 = vpack.c.bf16 %v5975_v51, %v5963_v38  ;;  %v9801_v51 = vpack.c.bf16 %v19167_v46, %v19166_v17  ;;  %v19232_v38 = vld [vmem:[#allocation8_spill] sm:$0xff] }
 0x90b   :  { %v6005_v22 = vand.u32 4294901760, %v6004_v34  ;;  %v9809_v50 = vpack.c.bf16 %v19233_v6, %v19232_v38  ;;  %v19237_v34 = vld [vmem:[#allocation75_spill] sm:$0xff] }
 0x90d   :  { %9784 = vmatpush1.bf16.msra.mxu0 %v9783_v45  ;;  %v9793_v45 = vpack.c.bf16 %v5999_v32, %v5987_v18  ;;  %v9795_v55 = vpack.c.bf16 %v6005_v22, %v5993_v27  ;;  %v9803_v27 = vpack.c.bf16 %v19169_v61, %v14445_v16  ;;  %v19230_v22 = vld [vmem:[#allocation119_spill] sm:$0xff]  ;;  %v19238_v18 = vld [vmem:[#allocation77_spill] sm:$0xff] }
 0x90e   :  { %9786 = vmatprep.subr.bf16.mxu0 %v9785_v53  ;;  %v19231_v53 = vld [vmem:[#allocation50_spill] sm:$0xff]  ;;  %v19239_v32 = vld [vmem:[#allocation93_spill] sm:$0xff] }
 0x90f   :  { %v9807_v4 = vpack.c.bf16 %v19231_v53, %v19230_v22 }
 0x911   :  { %9788 = vmatpush1.bf16.msra.mxu0 %v9787_v14  ;;  %v19234_v14 = vld [vmem:[#allocation11_spill] sm:$0xff] }
 0x912   :  { %9790 = vmatprep.subr.bf16.mxu0 %v9789_v33  ;;  %v9811_v48 = vpack.c.bf16 %v19235_v25, %v19234_v14  ;;  %v9813_v33 = vpack.c.bf16 %v19237_v34, %v19236_v11 }
 0x915   :  { %9792 = vmatpush1.bf16.msra.mxu0 %v9791_v13  ;;  %v9805_v13 = vpack.c.bf16 %v19171_v42, %v19170_v10 }
 0x916   :  { %9794 = vmatprep.subr.bf16.mxu0 %v9793_v45  ;;  %v9815_v45 = vpack.c.bf16 %v19239_v32, %v19238_v18 }
 0x919   :  { %9796 = vmatpush1.bf16.msra.mxu0 %v9795_v55  ;;  %v19240_v55 = vld [vmem:[#allocation59_spill] sm:$0xff] }
 0x91a   :  { %9798 = vmatprep.subr.bf16.mxu0 %v9797_v3  ;;  %v19241_v3 = vld [vmem:[#allocation65_spill] sm:$0xff] }
 0x91c   :  { %6010 = vmatmul.mubr.f32.vlgmr.msra.gmra.mrb[4].mxu0 %v14931_v24  ;;  %v19251_v24 = vld [vmem:[#allocation21_spill] sm:$0xff] }
 0x91d   :  { %9800 = vmatpush1.bf16.msra.mxu0 %v9799_v26  ;;  %6210 = vmatprep.mubr.f32.mxu0 %v14948_v29  ;;  %v9817_v26 = vpack.c.bf16 %v19241_v3, %v19240_v55 }
 0x91e   :  { %9802 = vmatprep.subr.bf16.mxu0 %v9801_v51  ;;  %v9819_v51 = vpack.c.bf16 %v19195_v5, %v19194_v49  ;;  %v19253_v49 = vld [vmem:[#allocation49_spill] sm:$0xff] }
 0x921   :  { %9804 = vmatpush1.bf16.msra.mxu0 %v9803_v27  ;;  %v19242_v27 = vld [vmem:[#allocation36_spill] sm:$0xff] }
 0x922   :  { %9806 = vmatprep.subr.bf16.mxu0 %v9805_v13  ;;  %v19243_v13 = vld [vmem:[#allocation20_spill] sm:$0xff] }
 0x925   :  { %9808 = vmatpush1.bf16.msra.mxu0 %v9807_v4  ;;  %v9821_v4 = vpack.c.bf16 %v19243_v13, %v19242_v27  ;;  %v19255_v27 = vld [vmem:[#allocation76_spill] sm:$0xff] }
 0x926   :  { %9810 = vmatprep.subr.bf16.mxu0 %v9809_v50  ;;  %v19244_v50 = vld [vmem:[#allocation94_spill] sm:$0xff] }
 0x927   :  { %v9823_v20 = vpack.c.bf16 %v19245_v31, %v19244_v50 }
 0x929   :  { %9812 = vmatpush1.bf16.msra.mxu0 %v9811_v48  ;;  %v19246_v48 = vld [vmem:[#allocation87_spill] sm:$0xff] }
 0x92a   :  { %9814 = vmatprep.subr.bf16.mxu0 %v9813_v33  ;;  %v9825_v63 = vpack.c.bf16 %v19247_v7, %v19246_v48  ;;  %v19248_v33 = vld [vmem:[#allocation48_spill] sm:$0xff] }
 0x92b   :  { %v9827_v54 = vpack.c.bf16 %v19249_v60, %v19248_v33 }
 0x92d   :  { %9816 = vmatpush1.bf16.msra.mxu0 %v9815_v45  ;;  %v19250_v45 = vld [vmem:[#allocation19_spill] sm:$0xff] }
 0x92e   :  { %9818 = vmatprep.subr.bf16.mxu0 %v9817_v26  ;;  %v9829_v5 = vpack.c.bf16 %v19251_v24, %v19250_v45  ;;  %v19252_v26 = vld [vmem:[#allocation22_spill] sm:$0xff] }
 0x92f   :  { %v9831_v13 = vpack.c.bf16 %v19253_v49, %v19252_v26 }
 0x931   :  { %9820 = vmatpush1.bf16.msra.mxu0 %v9819_v51  ;;  %v19254_v51 = vld [vmem:[#allocation91_spill] sm:$0xff] }
 0x932   :  { %9822 = vmatprep.subr.bf16.mxu0 %v9821_v4  ;;  %v9833_v31 = vpack.c.bf16 %v19255_v27, %v19254_v51  ;;  %v9835_v4 = vpack.c.bf16 %v19221_v56, %v19220_v0  ;;  %v19257_v56 = vld [vmem:[#allocation60_spill] sm:$0xff] }
 0x935   :  { %9824 = vmatpush1.bf16.msra.mxu0 %v9823_v20  ;;  %v9837_v20 = vpack.c.bf16 %v14694_v36, %v19222_v2 }
 0x936   :  { %9826 = vmatprep.subr.bf16.mxu0 %v9825_v63  ;;  %v9839_v63 = vpack.c.bf16 %v19223_v52, %v14704_v40 }
 0x939   :  { %9828 = vmatpush1.bf16.msra.mxu0 %v9827_v54  ;;  %v9841_v54 = vpack.c.bf16 %v19226_v35, %v19225_v21 }
 0x93a   :  { %9830 = vmatprep.subr.bf16.mxu0 %v9829_v5  ;;  %v9843_v5 = vpack.c.bf16 %v14732_v19, %v19227_v39 }
 0x93d   :  { %9832 = vmatpush1.bf16.msra.mxu0 %v9831_v13  ;;  %v9845_v13 = vpack.c.bf16 %v14744_v30, %v14742_v37 }
 0x93e   :  { %9834 = vmatprep.subr.bf16.mxu0 %v9833_v31  ;;  %v19256_v31 = vld [vmem:[#allocation47_spill] sm:$0xff] }
 0x93f   :  { %v9847_v36 = vpack.c.bf16 %v19257_v56, %v19256_v31 }
 0x941   :  { %9836 = vmatpush1.bf16.msra.mxu0 %v9835_v4  ;;  %v19258_v4 = vld [vmem:[#allocation79_spill] sm:$0xff] }
 0x942   :  { %9838 = vmatprep.subr.bf16.mxu0 %v9837_v20  ;;  %v9849_v52 = vpack.c.bf16 %v14897_v12, %v19258_v4  ;;  %v9851_v20 = vpack.c.bf16 %v14901_v41, %v14899_v47  ;;  %v19261_v41 = vld [vmem:[#allocation90_spill] sm:$0xff] }
 0x945   :  { %9840 = vmatpush1.bf16.msra.mxu0 %v9839_v63  ;;  %v9853_v63 = vpack.c.bf16 %v14906_v59, %v14904_v15 }
 0x946   :  { %9842 = vmatprep.subr.bf16.mxu0 %v9841_v54  ;;  %v9855_v54 = vpack.c.bf16 %v14910_v9, %v14908_v23  ;;  %v19263_v9 = vld [vmem:[#allocation62_spill] sm:$0xff] }
 0x949   :  { %9844 = vmatpush1.bf16.msra.mxu0 %v9843_v5  ;;  %v9857_v5 = vpack.c.bf16 %v14914_v43, %v14912_v8  ;;  %v19265_v43 = vld [vmem:[#allocation56_spill] sm:$0xff] }
 0x94a   :  { %9846 = vmatprep.subr.bf16.mxu0 %v9845_v13  ;;  %v9859_v13 = vpack.c.bf16 %v14918_v28, %v14916_v1  ;;  %v19267_v28 = vld [vmem:[#allocation9_spill] sm:$0xff] }
 0x94b   :  { %v6776_v8 = vld [vmem:[#allocation2 + $0xa68] sm:$0xff] }
 0x94d   :  { %9848 = vmatpush1.bf16.msra.mxu0 %v9847_v36  ;;  %v19259_v36 = vld [vmem:[#allocation108_spill] sm:$0xff] }
 0x94e   :  { %9850 = vmatprep.subr.bf16.mxu0 %v9849_v52  ;;  %v19260_v52 = vld [vmem:[#allocation39_spill] sm:$0xff] }
 0x951   :  { %9852 = vmatpush1.bf16.msra.mxu0 %v9851_v20  ;;  %v19262_v20 = vand.u32 4294901760, %v14948_v29  ;;  %v19272_v29 = vld [vmem:[#allocation81_spill] sm:$0xff] }
 0x952   :  { %9854 = vmatprep.subr.bf16.mxu0 %v9853_v63  ;;  %v19264_v63 = vld [vmem:[#allocation78_spill] sm:$0xff] }
 0x955   :  { %9856 = vmatpush1.bf16.msra.mxu0 %v9855_v54  ;;  %v19266_v54 = vld [vmem:[#allocation118_spill] sm:$0xff] }
 0x956   :  { %9858 = vmatprep.subr.bf16.mxu0 %v9857_v5  ;;  %v19268_v5 = vld [vmem:[#allocation102_spill] sm:$0xff] }
 0x959   :  { %9860 = vmatpush1.bf16.msra.mxu0 %v9859_v13  ;;  %v19269_v13 = vld [vmem:[#allocation110_spill] sm:$0xff] }
 0x95a   :  { %9862 = vmatprep.subr.bf16.mxu0 %v19259_v36  ;;  %v19270_v36 = vld [vmem:[#allocation44_spill] sm:$0xff] }
 0x95c   :  { %6213 = vmatmul.mubr.f32.vlgmr.msra.gmra.mrb[4].mxu0 %v19260_v52 }
 0x95d   :  { %9864 = vmatpush1.bf16.msra.mxu0 %v19261_v41  ;;  %6350 = vmatprep.mubr.f32.mxu0 %v19262_v20  ;;  %v19271_v41 = vld [vmem:[#allocation70_spill] sm:$0xff]  ;;  %v19273_v20 = vld [vmem:[#allocation15_spill] sm:$0xff] }
 0x95e   :  { %9866 = vmatprep.subr.bf16.mxu0 %v19263_v9  ;;  %v19274_v9 = vld [vmem:[#allocation57_spill] sm:$0xff] }
 0x961   :  { %9868 = vmatpush1.bf16.msra.mxu0 %v19264_v63  ;;  %v19275_v63 = vld [vmem:[#allocation82_spill] sm:$0xff] }
 0x962   :  { %9870 = vmatprep.subr.bf16.mxu0 %v19265_v43  ;;  %v19276_v43 = vld [vmem:[#allocation84_spill] sm:$0xff] }
 0x965   :  { %9872 = vmatpush1.bf16.msra.mxu0 %v19266_v54  ;;  %v19277_v54 = vld [vmem:[#allocation105_spill] sm:$0xff] }
 0x966   :  { %9874 = vmatprep.subr.bf16.mxu0 %v19267_v28  ;;  %v19278_v28 = vld [vmem:[#allocation30_spill] sm:$0xff] }
 0x969   :  { %9876 = vmatpush1.bf16.msra.mxu0 %v19268_v5  ;;  %v19279_v5 = vld [vmem:[#allocation66_spill] sm:$0xff] }
 0x96a   :  { %9878 = vmatprep.subr.bf16.mxu0 %v19269_v13  ;;  %v19280_v13 = vld [vmem:[#allocation96_spill] sm:$0xff] }
 0x96d   :  { %9880 = vmatpush1.bf16.msra.mxu0 %v19270_v36  ;;  %v19281_v36 = vld [vmem:[#allocation61_spill] sm:$0xff] }
 0x96e   :  { %9882 = vmatprep.subr.bf16.mxu0 %v19271_v41  ;;  %v19282_v41 = vld [vmem:[#allocation71_spill] sm:$0xff] }
 0x971   :  { %9884 = vmatpush1.bf16.msra.mxu0 %v19272_v29  ;;  %v19283_v29 = vld [vmem:[#allocation43_spill] sm:$0xff] }
 0x972   :  { %9886 = vmatprep.subr.bf16.mxu0 %v19273_v20  ;;  %v19284_v20 = vld [vmem:[#allocation46_spill] sm:$0xff] }
 0x975   :  { %9888 = vmatpush1.bf16.msra.mxu0 %v19274_v9  ;;  %v19285_v9 = vld [vmem:[#allocation72_spill] sm:$0xff] }
 0x976   :  { %9890 = vmatprep.subr.bf16.mxu0 %v19275_v63  ;;  %v19286_v63 = vld [vmem:[#allocation31_spill] sm:$0xff] }
 0x979   :  { %9892 = vmatpush1.bf16.msra.mxu0 %v19276_v43  ;;  %v19287_v43 = vld [vmem:[#allocation42_spill] sm:$0xff] }
 0x97a   :  { %9894 = vmatprep.subr.bf16.mxu0 %v19277_v54  ;;  %v19288_v54 = vld [vmem:[#allocation37_spill] sm:$0xff] }
 0x97d   :  { %9896 = vmatpush1.bf16.msra.mxu0 %v19278_v28  ;;  %v19289_v28 = vld [vmem:[#allocation51_spill] sm:$0xff] }
 0x97e   :  { %9898 = vmatprep.subr.bf16.mxu0 %v19279_v5  ;;  %v19290_v5 = vld [vmem:[#allocation63_spill] sm:$0xff] }
 0x981   :  { %9900 = vmatpush1.bf16.msra.mxu0 %v19280_v13  ;;  %v19291_v13 = vld [vmem:[#allocation68_spill] sm:$0xff] }
 0x982   :  { %9902 = vmatprep.subr.bf16.mxu0 %v19281_v36 }
 0x985   :  { %9904 = vmatpush1.bf16.msra.mxu0 %v19282_v41  ;;  %v19292_v41 = vand.u32 4294901760, %v19153_v62  ;;  %v19300_v62 = vand.u32 4294901760, %v19169_v61  ;;  %v19308_v61 = vand.u32 4294901760, %v19234_v14  ;;  %v19314_v14 = vld [vmem:[#allocation32_spill] sm:$0xff] }
 0x986   :  { %9906 = vmatprep.subr.bf16.mxu0 %v19283_v29  ;;  %v19293_v29 = vand.u32 4294901760, %v19154_v57  ;;  %v19302_v57 = vand.u32 4294901760, %v19171_v42 }
 0x988   :  { %v9925_v36 = vpack.c.bf16 %v19293_v29, %v19292_v41  ;;  %v19301_v41 = vand.u32 4294901760, %v19170_v10  ;;  %v19309_v10 = vand.u32 4294901760, %v19235_v25  ;;  %v19315_v25 = vand.u32 4294901760, %v19240_v55 }
 0x989   :  { %9908 = vmatpush1.bf16.msra.mxu0 %v19284_v20  ;;  %v19294_v20 = vld [vmem:[#allocation69_spill] sm:$0xff] }
 0x98a   :  { %9910 = vmatprep.subr.bf16.mxu0 %v19285_v9  ;;  %v19295_v9 = vand.u32 4294901760, %v19164_v58  ;;  %v9933_v29 = vpack.c.bf16 %v19302_v57, %v19301_v41  ;;  %v19303_v58 = vand.u32 4294901760, %v19230_v22  ;;  %v15326_v42 = vpack.c.bf16 %v19309_v10, %v19308_v61  ;;  %v6765_v57 = vld [vmem:[#allocation2 + $0xa10] sm:$0xff] }
 0x98b   :  { %v19310_v22 = vand.u32 4294901760, %v19236_v11  ;;  %v19316_v11 = vand.u32 4294901760, %v19241_v3  ;;  %v6833_v61 = vand.u32 4294901760, %v6765_v57  ;;  %v6769_v3 = vld [vmem:[#allocation2 + $0xa30] sm:$0xff] }
 0x98d   :  { %9912 = vmatpush1.bf16.msra.mxu0 %v19286_v63  ;;  %v19296_v63 = vand.u32 4294901760, %v19165_v44 }
 0x98e   :  { %9914 = vmatprep.subr.bf16.mxu0 %v19287_v43 }
 0x98f   :  { %v9927_v43 = vpack.c.bf16 %v19296_v63, %v19295_v9  ;;  %v19304_v9 = vand.u32 4294901760, %v19231_v53  ;;  %v19311_v53 = vand.u32 4294901760, %v19237_v34 }
 0x991   :  { %9916 = vmatpush1.bf16.msra.mxu0 %v19288_v54  ;;  %v19297_v54 = vand.u32 4294901760, %v19166_v17  ;;  %v15312_v44 = vpack.c.bf16 %v19304_v9, %v19303_v58  ;;  %v19305_v17 = vand.u32 4294901760, %v19260_v52  ;;  %v19312_v52 = vand.u32 4294901760, %v19238_v18  ;;  %v6768_v58 = vld [vmem:[#allocation2 + $0xa28] sm:$0xff] }
 0x992   :  { %9918 = vmatprep.subr.bf16.mxu0 %v19289_v28  ;;  %v19298_v28 = vand.u32 4294901760, %v19167_v46  ;;  %v19317_v9 = vld [vmem:[#allocation112_spill] sm:$0xff]  ;;  %v6835_v10 = vand.u32 4294901760, %v6768_v58 }
 0x995   :  { %9920 = vmatpush1.bf16.msra.mxu0 %v19290_v5  ;;  %v9929_v5 = vpack.c.bf16 %v19298_v28, %v19297_v54  ;;  %v19306_v28 = vand.u32 4294901760, %v19232_v38  ;;  %v19313_v38 = vand.u32 4294901760, %v19239_v32  ;;  %v6766_v54 = vld [vmem:[#allocation2 + $0xa18] sm:$0xff] }
 0x996   :  { %9922 = vmatprep.subr.bf16.mxu0 %v19291_v13  ;;  %v19299_v13 = vand.u32 4294901760, %v14445_v16  ;;  %v19307_v16 = vand.u32 4294901760, %v19233_v6  ;;  %v6764_v6 = vld [vmem:[#allocation2 + $0xa08] sm:$0xff]  ;;  %v6831_v41 = vand.u32 4294901760, %v6766_v54  ;;  %v6770_v32 = vld [vmem:[#allocation2 + $0xa38] sm:$0xff] }
 0x997   :  { %v15338_v63 = vpack.c.bf16 %v19313_v38, %v19312_v52  ;;  %v6827_v34 = vand.u32 4294901760, %v6764_v6  ;;  %v6839_v55 = vand.u32 4294901760, %v6770_v32 }
 0x998   :  { %v9931_v1 = vpack.c.bf16 %v19300_v62, %v19299_v13  ;;  %v15320_v46 = vpack.c.bf16 %v19307_v16, %v19306_v28  ;;  %v6763_v13 = vld [vmem:[#allocation2 + $0xa00] sm:$0xff]  ;;  %v15345_v62 = vpack.c.bf16 %v19316_v11, %v19315_v25  ;;  %v19319_v28 = vld [vmem:[#allocation114_spill] sm:$0xff]  ;;  %v15357_v25 = vsub.f32 %v6766_v54, %v6831_v41 }
 0x999   :  { %9924 = vmatpush1.bf16.msra.mxu0 %v19294_v20  ;;  %v6829_v18 = vand.u32 4294901760, %v6763_v13  ;;  %v19320_v16 = vand.u32 4294901760, %v19319_v28  ;;  %v15353_v52 = vpack.c.bf16 %v6831_v41, %v6827_v34  ;;  %v15355_v38 = vsub.f32 %v6764_v6, %v6827_v34  ;;  %v6773_v20 = vld [vmem:[#allocation2 + $0xa50] sm:$0xff]  ;;  %v6778_v41 = vld [vmem:[#allocation2 + $0xa78] sm:$0xff] }
 0x99a   :  { %9926 = vmatprep.subr.bf16.mxu0 %v9925_v36  ;;  %v15332_v36 = vpack.c.bf16 %v19311_v53, %v19310_v22  ;;  %v6767_v22 = vld [vmem:[#allocation2 + $0xa20] sm:$0xff]  ;;  %v6772_v53 = vld [vmem:[#allocation2 + $0xa48] sm:$0xff]  ;;  %19323 = vst [vmem:[#allocation74_spill] sm:$0xff] %v15357_v25  ;;  %v15370_v6 = vsub.f32 %v6770_v32, %v6839_v55 }
 0x99b   :  { %19321 = vst [vmem:[#allocation98_spill] sm:$0xff] %v15353_v52  ;;  %19322 = vst [vmem:[#allocation17_spill] sm:$0xff] %v15355_v38  ;;  %v15359_v11 = vsub.f32 %v6763_v13, %v6829_v18  ;;  %v15361_v28 = vpack.c.bf16 %v6833_v61, %v6829_v18  ;;  %10054 = vmatprep.subr.bf16.mxu1 %v15353_v52  ;;  %v6837_v54 = vand.u32 4294901760, %v6767_v22  ;;  %v6841_v13 = vand.u32 4294901760, %v6769_v3  ;;  %v6780_v52 = vld [vmem:[#allocation2 + $0xa88] sm:$0xff] }
 0x99c   :  { %6354 = vmatmul.mubr.f32.vlgmr.msra.gmra.mrb[4].mxu0 %v19305_v17  ;;  %v19318_v17 = vand.u32 4294901760, %v19317_v9  ;;  %v6771_v9 = vld [vmem:[#allocation2 + $0xa40] sm:$0xff]  ;;  %19329 = vst [vmem:[#allocation14_spill] sm:$0xff] %v15370_v6  ;;  %v6843_v34 = vand.u32 4294901760, %v6772_v53 }
 0x99d   :  { %9928 = vmatpush1.bf16.msra.mxu0 %v9927_v43  ;;  %6617 = vmatprep.mubr.f32.mxu0 %v19314_v14  ;;  %19324 = vst [vmem:[#allocation86_spill] sm:$0xff] %v15359_v11  ;;  %19325 = vst [vmem:[#allocation103_spill] sm:$0xff] %v15361_v28  ;;  %v15367_v14 = vsub.f32 %v6768_v58, %v6835_v10  ;;  %v6775_v11 = vld [vmem:[#allocation2 + $0xa60] sm:$0xff]  ;;  %v6777_v58 = vld [vmem:[#allocation2 + $0xa70] sm:$0xff]  ;;  %v15378_v32 = vsub.f32 %v6769_v3, %v6841_v13  ;;  %v6855_v3 = vand.u32 4294901760, %v6778_v41 }
 0x99e   :  { %9930 = vmatprep.subr.bf16.mxu0 %v9929_v5  ;;  %v15351_v43 = vpack.c.bf16 %v19320_v16, %v19318_v17  ;;  %v6774_v5 = vld [vmem:[#allocation2 + $0xa58] sm:$0xff]  ;;  %v15363_v17 = vsub.f32 %v6765_v57, %v6833_v61  ;;  %v15365_v16 = vpack.c.bf16 %v6839_v55, %v6835_v10  ;;  %10056 = vmatpush1.bf16.msra.mxu1 %v15361_v28  ;;  %v6845_v57 = vand.u32 4294901760, %v6771_v9  ;;  %v15382_v6 = vld [vmem:[#allocation2 + $0xa80] sm:$0xff] }
 0x99f   :  { %19328 = vst [vmem:[#allocation73_spill] sm:$0xff] %v15367_v14  ;;  %v6847_v18 = vand.u32 4294901760, %v6774_v5  ;;  %v6849_v61 = vand.u32 4294901760, %v6773_v20  ;;  %v15376_v10 = vsub.f32 %v6767_v22, %v6837_v54  ;;  %19331 = vst [vmem:[#allocation106_spill] sm:$0xff] %v15378_v32  ;;  %v15380_v55 = vsub.f32 %v6772_v53, %v6843_v34 }
 0x9a0   :  { %19326 = vst [vmem:[#allocation38_spill] sm:$0xff] %v15363_v17  ;;  %19327 = vst [vmem:[#allocation92_spill] sm:$0xff] %v15365_v16  ;;  %v6851_v17 = vand.u32 4294901760, %v6776_v8  ;;  %10058 = vmatprep.subr.bf16.mxu1 %v15365_v16  ;;  %v15390_v38 = vsub.f32 %v6771_v9, %v6845_v57  ;;  %v6781_v16 = vld [vmem:[#allocation2 + $0xa90] sm:$0xff] }
 0x9a1   :  { %9932 = vmatpush1.bf16.msra.mxu0 %v9931_v1  ;;  %v15374_v1 = vpack.c.bf16 %v6841_v13, %v6837_v54  ;;  %19332 = vst [vmem:[#allocation109_spill] sm:$0xff] %v15380_v55  ;;  %v15384_v28 = vpack.c.bf16 %v6847_v18, %v6843_v34  ;;  %v15386_v14 = vsub.f32 %v6774_v5, %v6847_v18  ;;  %v6853_v54 = vand.u32 4294901760, %v6775_v11  ;;  %v19347_v55 = vld [vmem:[#allocation116_spill] sm:$0xff] }
 0x9a2   :  { %9934 = vmatprep.subr.bf16.mxu0 %v9933_v29  ;;  %v6782_v29 = vld [vmem:[#allocation2 + $0xa98] sm:$0xff]  ;;  %v15388_v25 = vpack.c.bf16 %v6849_v61, %v6845_v57  ;;  %19336 = vst [vmem:[#allocation101_spill] sm:$0xff] %v15390_v38  ;;  %v15393_v22 = vsub.f32 %v6773_v20, %v6849_v61  ;;  %v15395_v53 = vsub.f32 %v6776_v8, %v6851_v17  ;;  %v6857_v13 = vand.u32 4294901760, %v6777_v58  ;;  %v6784_v57 = vld [vmem:[#allocation2 + $0xaa8] sm:$0xff] }
 0x9a3   :  { %19330 = vst [vmem:[#allocation55_spill] sm:$0xff] %v15374_v1  ;;  %19333 = vst [vmem:[#allocation33_spill] sm:$0xff] %v15384_v28  ;;  %10060 = vmatpush1.bf16.msra.mxu1 %v15374_v1  ;;  %v6859_v5 = vand.u32 4294901760, %v6780_v52  ;;  %v6863_v34 = vand.u32 4294901760, %v6782_v29  ;;  %v6861_v18 = vand.u32 4294901760, %v15382_v6  ;;  %v15401_v9 = vpack.c.bf16 %v6855_v3, %v6851_v17  ;;  %v6786_v61 = vld [vmem:[#allocation2 + $0xab8] sm:$0xff] }
 0x9a4   :  { %19334 = vst [vmem:[#allocation97_spill] sm:$0xff] %v15386_v14  ;;  %19335 = vst [vmem:[#allocation100_spill] sm:$0xff] %v15388_v25  ;;  %10062 = vmatprep.subr.bf16.mxu1 %v15384_v28  ;;  %v15405_v20 = vsub.f32 %v6775_v11, %v6853_v54  ;;  %v6865_v8 = vand.u32 4294901760, %v6781_v16  ;;  %v19346_v14 = vand.u32 4294901760, %v19244_v50  ;;  %v19348_v32 = vand.u32 4294901760, %v19347_v55  ;;  %v6783_v11 = vld [vmem:[#allocation2 + $0xaa0] sm:$0xff] }
 0x9a5   :  { %9936 = vmatpush1.bf16.msra.mxu0 %v15312_v44  ;;  %19337 = vst [vmem:[#allocation27_spill] sm:$0xff] %v15393_v22  ;;  %19338 = vst [vmem:[#allocation16_spill] sm:$0xff] %v15395_v53  ;;  %v15403_v44 = vsub.f32 %v6778_v41, %v6855_v3  ;;  %v19342_v53 = vld [vmem:[#allocation36_spill] sm:$0xff]  ;;  %v15419_v17 = vsub.f32 %v6777_v58, %v6857_v13  ;;  %v15421_v41 = vsub.f32 %v6780_v52, %v6859_v5  ;;  %v6785_v3 = vld [vmem:[#allocation2 + $0xab0] sm:$0xff] }
 0x9a6   :  { %9938 = vmatprep.subr.bf16.mxu0 %v15320_v46  ;;  %19339 = vst [vmem:[#allocation80_spill] sm:$0xff] %v15401_v9  ;;  %19341 = vst [vmem:[#allocation53_spill] sm:$0xff] %v15405_v20  ;;  %v19343_v46 = vand.u32 4294901760, %v19342_v53  ;;  %v19344_v22 = vld [vmem:[#allocation20_spill] sm:$0xff]  ;;  %v15417_v28 = vpack.c.bf16 %v19348_v32, %v19346_v14  ;;  %v15432_v50 = vsub.f32 %v6782_v29, %v6863_v34  ;;  %v6790_v52 = vld [vmem:[#allocation2 + $0xad8] sm:$0xff]  ;;  %v6867_v29 = vand.u32 4294901760, %v6784_v57 }
 0x9a7   :  { %19340 = vst [vmem:[#allocation52_spill] sm:$0xff] %v15403_v44  ;;  %v19345_v1 = vand.u32 4294901760, %v19344_v22  ;;  %19349 = vst [vmem:[#allocation58_spill] sm:$0xff] %v15419_v17  ;;  %v15423_v20 = vld [vmem:[#allocation2 + $0xac8] sm:$0xff]  ;;  %v19351_v22 = vand.u32 4294901760, %v19246_v48  ;;  %v15435_v14 = vsub.f32 %v15382_v6, %v6861_v18  ;;  %v15437_v58 = vsub.f32 %v6781_v16, %v6865_v8  ;;  %v15439_v32 = vld [vmem:[#allocation2 + $0xac0] sm:$0xff]  ;;  %10064 = vmatpush1.bf16.msra.mxu1 %v15388_v25 }
 0x9a8   :  { %19350 = vst [vmem:[#allocation18_spill] sm:$0xff] %v15421_v41  ;;  %19353 = vst [vmem:[#allocation29_spill] sm:$0xff] %v15432_v50  ;;  %v19357_v48 = vand.u32 4294901760, %v19249_v60  ;;  %v6871_v6 = vand.u32 4294901760, %v6786_v61  ;;  %10066 = vmatprep.subr.bf16.mxu1 %v15401_v9  ;;  %v15454_v16 = vpack.c.bf16 %v6863_v34, %v6859_v5  ;;  %v15459_v60 = vsub.f32 %v6784_v57, %v6867_v29  ;;  %v15466_v25 = vld [vmem:[#allocation2 + $0xae0] sm:$0xff] }
 0x9a9   :  { %v15411_v38 = vpack.c.bf16 %v19345_v1, %v19343_v46  ;;  %9940 = vmatpush1.bf16.msra.mxu0 %v15326_v42  ;;  %v19352_v1 = vand.u32 4294901760, %v19247_v7  ;;  %19354 = vst [vmem:[#allocation34_spill] sm:$0xff] %v15435_v14  ;;  %19355 = vst [vmem:[#allocation40_spill] sm:$0xff] %v15437_v58  ;;  %v19356_v42 = vand.u32 4294901760, %v19248_v33  ;;  %v15449_v7 = vpack.c.bf16 %v6857_v13, %v6853_v54  ;;  %v15451_v46 = vld [vmem:[#allocation2 + $0xad0] sm:$0xff] }
 0x9aa   :  { %9942 = vmatprep.subr.bf16.mxu0 %v15332_v36  ;;  %19359 = vst [vmem:[#allocation64_spill] sm:$0xff] %v15454_v16  ;;  %v6873_v36 = vand.u32 4294901760, %v6785_v3  ;;  %v6875_v33 = vand.u32 4294901760, %v15423_v20  ;;  %19360 = vst [vmem:[#allocation67_spill] sm:$0xff] %v15459_v60  ;;  %v6879_v54 = vand.u32 4294901760, %v6790_v52  ;;  %v6877_v13 = vand.u32 4294901760, %v15439_v32 }
 0x9ab   :  { %v15430_v53 = vpack.c.bf16 %v19352_v1, %v19351_v22  ;;  %v15446_v55 = vpack.c.bf16 %v19357_v48, %v19356_v42  ;;  %19358 = vst [vmem:[#allocation95_spill] sm:$0xff] %v15449_v7  ;;  %v6869_v22 = vand.u32 4294901760, %v6783_v11  ;;  %v15457_v1 = vld [vmem:[#allocation2 + $0xae8] sm:$0xff]  ;;  %v15461_v42 = vsub.f32 %v6786_v61, %v6871_v6  ;;  %v15464_v48 = vld [vmem:[#allocation2 + $0xaf8] sm:$0xff]  ;;  %v15477_v61 = vld [vmem:[#allocation2 + $0xaf0] sm:$0xff]  ;;  %10068 = vmatpush1.bf16.msra.mxu1 %v15449_v7 }
 0x9ac   :  { %v15471_v34 = vsub.f32 %v6785_v3, %v6873_v36  ;;  %v15474_v9 = vsub.f32 %v15423_v20, %v6875_v33  ;;  %v6881_v57 = vand.u32 4294901760, %v15451_v46  ;;  %v15483_v60 = vpack.c.bf16 %v6865_v8, %v6861_v18  ;;  %v15491_v3 = vld [vmem:[#allocation2 + $0xb18] sm:$0xff]  ;;  %10070 = vmatprep.subr.bf16.mxu1 %v15454_v16  ;;  %v15529_v16 = vld [vmem:[#allocation2 + $0xb30] sm:$0xff] }
 0x9ad   :  { %19361 = vst [vmem:[#allocation104_spill] sm:$0xff] %v15461_v42  ;;  %9944 = vmatpush1.bf16.msra.mxu0 %v15338_v63  ;;  %v15469_v5 = vsub.f32 %v6783_v11, %v6869_v22  ;;  %v15479_v42 = vld [vmem:[#allocation2 + $0xb08] sm:$0xff]  ;;  %v15485_v63 = vsub.f32 %v6790_v52, %v6879_v54  ;;  %v15488_v11 = vsub.f32 %v15439_v32, %v6877_v13  ;;  %v6883_v20 = vand.u32 4294901760, %v15457_v1  ;;  %v15503_v52 = vld [vmem:[#allocation2 + $0xb10] sm:$0xff] }
 0x9ae   :  { %19363 = vst [vmem:[#allocation117_spill] sm:$0xff] %v15471_v34  ;;  %19364 = vst [vmem:[#allocation85_spill] sm:$0xff] %v15474_v9  ;;  %9946 = vmatprep.subr.bf16.mxu0 %v15345_v62  ;;  %v15493_v9 = vld [vmem:[#allocation2 + $0xb00] sm:$0xff]  ;;  %v15496_v34 = vpack.c.bf16 %v6871_v6, %v6867_v29  ;;  %v15499_v62 = vsub.f32 %v15451_v46, %v6881_v57  ;;  %v6887_v18 = vand.u32 4294901760, %v15464_v48  ;;  %v17440_v8 = vand.u32 4294901760, %v15466_v25  ;;  %v15512_v29 = vld [vmem:[#allocation2 + $0xb28] sm:$0xff] }
 0x9af   :  { %19362 = vst [vmem:[#allocation54_spill] sm:$0xff] %v15469_v5  ;;  %19365 = vst [vmem:[#allocation25_spill] sm:$0xff] %v15483_v60  ;;  %v15505_v32 = vpack.c.bf16 %v6873_v36, %v6869_v22  ;;  %v15508_v7 = vsub.f32 %v15457_v1, %v6883_v20  ;;  %v15514_v6 = vld [vmem:[#allocation2 + $0xb38] sm:$0xff]  ;;  %10072 = vmatpush1.bf16.msra.mxu1 %v15483_v60  ;;  %v19383_v1 = vand.u32 4294901760, %v19250_v45  ;;  %v15576_v60 = vld [vmem:[#allocation2 + $0xb50] sm:$0xff]  ;;  %v19402_v5 = vand.u32 4294901760, %v19255_v27 }
 0x9b0   :  { %19366 = vst [vmem:[#allocation83_spill] sm:$0xff] %v15485_v63  ;;  %19367 = vst [vmem:[#allocation35_spill] sm:$0xff] %v15488_v11  ;;  %v15518_v46 = vsub.f32 %v15464_v48, %v6887_v18  ;;  %v15523_v22 = vsub.f32 %v15466_v25, %v17440_v8  ;;  %v15527_v11 = vld [vmem:[#allocation2 + $0xb20] sm:$0xff]  ;;  %v19375_v48 = vand.u32 4294901760, %v15477_v61  ;;  %v19377_v8 = vand.u32 4294901760, %v15479_v42  ;;  %10074 = vmatprep.subr.bf16.mxu1 %v15496_v34 }
 0x9b1   :  { %19368 = vst [vmem:[#allocation45_spill] sm:$0xff] %v15496_v34  ;;  %19369 = vst [vmem:[#allocation119_spill] sm:$0xff] %v15499_v62  ;;  %9948 = vmatpush1.bf16.msra.mxu0 %v15351_v43  ;;  %v15533_v43 = vpack.c.bf16 %v6879_v54, %v6875_v33  ;;  %v19381_v54 = vand.u32 4294901760, %v15493_v9  ;;  %v19384_v34 = vand.u32 4294901760, %v19251_v24  ;;  %v15581_v45 = vpack.c.bf16 %v6881_v57, %v6877_v13  ;;  %v6814_v62 = vld [vmem:[#allocation2 + $0xb98] sm:$0xff] }
 0x9b2   :  { %19370 = vst [vmem:[#allocation50_spill] sm:$0xff] %v15505_v32  ;;  %19371 = vst [vmem:[#allocation8_spill] sm:$0xff] %v15508_v7  ;;  %9950 = vmatprep.subr.bf16.mxu0 %v15411_v38  ;;  %v15543_v36 = vsub.f32 %v15479_v42, %v19377_v8  ;;  %v19379_v38 = vand.u32 4294901760, %v15491_v3  ;;  %v19385_v7 = vand.u32 4294901760, %v15503_v52  ;;  %v15578_v8 = vld [vmem:[#allocation2 + $0xb68] sm:$0xff]  ;;  %v19388_v24 = vand.u32 4294901760, %v15512_v29 }
 0x9b3   :  { %19372 = vst [vmem:[#allocation10_spill] sm:$0xff] %v15518_v46  ;;  %19373 = vst [vmem:[#allocation11_spill] sm:$0xff] %v15523_v22  ;;  %v15538_v46 = vsub.f32 %v15477_v61, %v19375_v48  ;;  %v15546_v22 = vld [vmem:[#allocation2 + $0xb48] sm:$0xff]  ;;  %v15557_v48 = vsub.f32 %v15493_v9, %v19381_v54  ;;  %10076 = vmatpush1.bf16.msra.mxu1 %v15505_v32  ;;  %v19393_v13 = vand.u32 4294901760, %v15527_v11  ;;  %v6915_v32 = vand.u32 4294901760, %v15578_v8 }
 0x9b4   :  { %19374 = vst [vmem:[#allocation13_spill] sm:$0xff] %v15533_v43  ;;  %19378 = vst [vmem:[#allocation75_spill] sm:$0xff] %v15543_v36  ;;  %v15552_v33 = vsub.f32 %v15491_v3, %v19379_v38  ;;  %v15561_v36 = vld [vmem:[#allocation2 + $0xb58] sm:$0xff]  ;;  %v15570_v38 = vsub.f32 %v15503_v52, %v19385_v7  ;;  %v19390_v7 = vand.u32 4294901760, %v15514_v6  ;;  %v6907_v54 = vand.u32 4294901760, %v15546_v22  ;;  %10078 = vmatprep.subr.bf16.mxu1 %v15533_v43 }
 0x9b5   :  { %19376 = vst [vmem:[#allocation23_spill] sm:$0xff] %v15538_v46  ;;  %19382 = vst [vmem:[#allocation93_spill] sm:$0xff] %v15557_v48  ;;  %v9957_v46 = vpack.c.bf16 %v19384_v34, %v19383_v1  ;;  %v15574_v48 = vld [vmem:[#allocation2 + $0xb40] sm:$0xff]  ;;  %9952 = vmatpush1.bf16.msra.mxu0 %v15417_v28  ;;  %v15586_v34 = vsub.f32 %v15512_v29, %v19388_v24  ;;  %v15600_v28 = vpack.c.bf16 %v6887_v18, %v6883_v20 }
 0x9b6   :  { %19380 = vst [vmem:[#allocation77_spill] sm:$0xff] %v15552_v33  ;;  %19386 = vst [vmem:[#allocation59_spill] sm:$0xff] %v15570_v38  ;;  %v15591_v1 = vsub.f32 %v15514_v6, %v19390_v7  ;;  %v15594_v33 = vld [vmem:[#allocation2 + $0xb78] sm:$0xff]  ;;  %v15596_v38 = vld [vmem:[#allocation2 + $0xb60] sm:$0xff]  ;;  %9954 = vmatprep.subr.bf16.mxu0 %v15430_v53  ;;  %v15605_v57 = vsub.f32 %v15527_v11, %v19393_v13  ;;  %v19395_v24 = vand.u32 4294901760, %v15529_v16  ;;  %v6909_v20 = vand.u32 4294901760, %v15574_v48 }
 0x9b7   :  { %19387 = vst [vmem:[#allocation65_spill] sm:$0xff] %v15581_v45  ;;  %19389 = vst [vmem:[#allocation94_spill] sm:$0xff] %v15586_v34  ;;  %v15615_v53 = vsub.f32 %v15546_v22, %v6907_v54  ;;  %v6913_v18 = vand.u32 4294901760, %v15576_v60  ;;  %v6809_v13 = vld [vmem:[#allocation2 + $0xb70] sm:$0xff]  ;;  %v19399_v34 = vand.u32 4294901760, %v19253_v49  ;;  %v6919_v43 = vand.u32 4294901760, %v15594_v33  ;;  %10080 = vmatpush1.bf16.msra.mxu1 %v15581_v45 }
 0x9b8   :  { %19391 = vst [vmem:[#allocation87_spill] sm:$0xff] %v15591_v1  ;;  %19392 = vst [vmem:[#allocation89_spill] sm:$0xff] %v15600_v28  ;;  %v15610_v7 = vsub.f32 %v15529_v16, %v19395_v24  ;;  %v6911_v1 = vand.u32 4294901760, %v15561_v36  ;;  %v6917_v22 = vand.u32 4294901760, %v15596_v38  ;;  %v19401_v63 = vand.u32 4294901760, %v19254_v51  ;;  %10082 = vmatprep.subr.bf16.mxu1 %v15600_v28 }
 0x9b9   :  { %19394 = vst [vmem:[#allocation48_spill] sm:$0xff] %v15605_v57  ;;  %19397 = vst [vmem:[#allocation19_spill] sm:$0xff] %v15615_v53  ;;  %v19398_v57 = vand.u32 4294901760, %v19252_v26  ;;  %v6812_v53 = vld [vmem:[#allocation2 + $0xb88] sm:$0xff]  ;;  %9956 = vmatpush1.bf16.msra.mxu0 %v15446_v55  ;;  %v15635_v26 = vsub.f32 %v15574_v48, %v6909_v20  ;;  %v15638_v49 = vsub.f32 %v15576_v60, %v6913_v18  ;;  %v19405_v55 = vand.u32 4294901760, %v15466_v25 }
 0x9ba   :  { %19396 = vst [vmem:[#allocation12_spill] sm:$0xff] %v15610_v7  ;;  %v15625_v7 = vsub.f32 %v15561_v36, %v6911_v1  ;;  %v9961_v58 = vpack.c.bf16 %v19402_v5, %v19401_v63  ;;  %v15641_v36 = vsub.f32 %v15578_v8, %v6915_v32  ;;  %9958 = vmatprep.subr.bf16.mxu0 %v9957_v46  ;;  %v19406_v51 = vand.u32 4294901760, %v15477_v61 }
 0x9bb   :  { %v9959_v24 = vpack.c.bf16 %v19399_v34, %v19398_v57  ;;  %19403 = vst [vmem:[#allocation22_spill] sm:$0xff] %v15638_v49  ;;  %v6811_v34 = vld [vmem:[#allocation2 + $0xb80] sm:$0xff]  ;;  %v6813_v57 = vld [vmem:[#allocation2 + $0xb90] sm:$0xff]  ;;  %v15651_v5 = vsub.f32 %v15594_v33, %v6919_v43  ;;  %v6921_v63 = vand.u32 4294901760, %v6809_v13  ;;  %v15654_v60 = vsub.f32 %v15596_v38, %v6917_v22 }
 0x9bc   :  { %19400 = vst [vmem:[#allocation21_spill] sm:$0xff] %v15625_v7  ;;  %19404 = vst [vmem:[#allocation49_spill] sm:$0xff] %v15641_v36  ;;  %v15648_v27 = vpack.c.bf16 %v19406_v51, %v19405_v55  ;;  %v19410_v48 = vand.u32 4294901760, %v15479_v42  ;;  %v19411_v46 = vand.u32 4294901760, %v15491_v3  ;;  %v6923_v25 = vand.u32 4294901760, %v6812_v53  ;;  %v19417_v36 = vld [vmem:[#allocation26_spill] sm:$0xff] }
 0x9bd   :  { %19408 = vst [vmem:[#allocation76_spill] sm:$0xff] %v15651_v5  ;;  %19409 = vst [vmem:[#allocation47_spill] sm:$0xff] %v15654_v60  ;;  %v6927_v45 = vand.u32 4294901760, %v6814_v62  ;;  %v15663_v61 = vsub.f32 %v6809_v13, %v6921_v63  ;;  %v6925_v55 = vand.u32 4294901760, %v6811_v34  ;;  %v6929_v51 = vand.u32 4294901760, %v6813_v57  ;;  %9960 = vmatpush1.bf16.msra.mxu0 %v9959_v24  ;;  %v19414_v5 = vld [vmem:[#allocation24_spill] sm:$0xff] }
 0x9be   :  { %19407 = vst [vmem:[#allocation91_spill] sm:$0xff] %v15648_v27  ;;  %v15661_v8 = vpack.c.bf16 %v19411_v46, %v19410_v48  ;;  %v19413_v33 = vand.u32 4294901760, %v19220_v0  ;;  %v19415_v38 = vand.u32 4294901760, %v19414_v5  ;;  %v19416_v28 = vand.u32 4294901760, %v19222_v2  ;;  %9962 = vmatprep.subr.bf16.mxu0 %v9961_v58  ;;  %10084 = vmatpush1.bf16.msra.mxu1 %v15648_v27 }
 0x9bf   :  { %v19418_v42 = vand.u32 4294901760, %v19417_v36  ;;  %v15673_v3 = vsub.f32 %v6812_v53, %v6923_v25  ;;  %v15675_v48 = vsub.f32 %v6814_v62, %v6927_v45  ;;  %v19419_v13 = vand.u32 4294901760, %v15493_v9  ;;  %v19428_v9 = vld [vmem:[#allocation28_spill] sm:$0xff] }
 0x9c0   :  { %19412 = vst [vmem:[#allocation60_spill] sm:$0xff] %v15661_v8  ;;  %v9963_v60 = vpack.c.bf16 %v19415_v38, %v19413_v33  ;;  %v19420_v24 = vand.u32 4294901760, %v15503_v52  ;;  %v15684_v5 = vsub.f32 %v6811_v34, %v6925_v55  ;;  %v15686_v46 = vsub.f32 %v6813_v57, %v6929_v51  ;;  %10086 = vmatprep.subr.bf16.mxu1 %v15661_v8 }
 0x9c1   :  { %v9965_v49 = vpack.c.bf16 %v19418_v42, %v19416_v28  ;;  %v19424_v2 = vand.u32 4294901760, %v15512_v29  ;;  %v19425_v62 = vand.u32 4294901760, %v15514_v6  ;;  %v19427_v58 = vand.u32 4294901760, %v14704_v40 }
 0x9c2   :  { %v15682_v0 = vpack.c.bf16 %v19420_v24, %v19419_v13  ;;  %19422 = vst [vmem:[#allocation39_spill] sm:$0xff] %v15684_v5  ;;  %19423 = vst [vmem:[#allocation112_spill] sm:$0xff] %v15686_v46  ;;  %9964 = vmatpush1.bf16.msra.mxu0 %v9963_v60  ;;  %v19429_v53 = vand.u32 4294901760, %v19428_v9  ;;  %v19430_v36 = vand.u32 4294901760, %v19225_v21  ;;  %v19431_v34 = vand.u32 4294901760, %v19226_v35  ;;  %v19457_v24 = vld [vmem:[#allocation107_spill] sm:$0xff] }
 0x9c3   :  { %v15693_v28 = vpack.c.bf16 %v19425_v62, %v19424_v2  ;;  %9966 = vmatprep.subr.bf16.mxu0 %v9965_v49  ;;  %v19432_v29 = vand.u32 4294901760, %v15527_v11  ;;  %v19433_v6 = vand.u32 4294901760, %v15529_v16  ;;  %v15711_v40 = vpack.c.bf16 %v6911_v1, %v6907_v54  ;;  %v19459_v62 = vld [vmem:[#allocation111_spill] sm:$0xff] }
 0x9c4   :  { %19421 = vst [vmem:[#allocation79_spill] sm:$0xff] %v15682_v0  ;;  %v9967_v52 = vpack.c.bf16 %v19429_v53, %v19427_v58  ;;  %v9969_v57 = vpack.c.bf16 %v19431_v34, %v19430_v36  ;;  %10088 = vmatpush1.bf16.msra.mxu1 %v15682_v0  ;;  %v19436_v49 = vand.u32 4294901760, %v19227_v39  ;;  %v19437_v21 = vand.u32 4294901760, %v14732_v19  ;;  %v19467_v36 = vld [vmem:[#allocation90_spill] sm:$0xff]  ;;  %v19468_v34 = vld [vmem:[#allocation32_spill] sm:$0xff]  ;;  %v19530_v0 = vld [vmem:[#allocation53_spill] sm:$0xff] }
 0x9c5   :  { %19426 = vst [vmem:[#allocation114_spill] sm:$0xff] %v15693_v28  ;;  %v15708_v33 = vpack.c.bf16 %v19433_v6, %v19432_v29  ;;  %10090 = vmatprep.subr.bf16.mxu1 %v15693_v28  ;;  %19435 = vst [vmem:[#allocation20_spill] sm:$0xff] %v15711_v40  ;;  %v19438_v35 = vand.u32 4294901760, %v14742_v37  ;;  %v19439_v38 = vand.u32 4294901760, %v14744_v30  ;;  %v15722_v16 = vpack.c.bf16 %v6913_v18, %v6909_v20  ;;  %v19470_v29 = vld [vmem:[#allocation78_spill] sm:$0xff]  ;;  %v19471_v6 = vld [vmem:[#allocation56_spill] sm:$0xff] }
 0x9c6   :  { %9968 = vmatpush1.bf16.msra.mxu0 %v9967_v52  ;;  %v9971_v60 = vpack.c.bf16 %v19437_v21, %v19436_v49  ;;  %v15725_v54 = vpack.c.bf16 %v6919_v43, %v6915_v32  ;;  %v19442_v39 = vand.u32 4294901760, %v19256_v31  ;;  %v19443_v19 = vand.u32 4294901760, %v19257_v56  ;;  %v19449_v43 = vld [vmem:[#allocation99_spill] sm:$0xff]  ;;  %v19466_v52 = vld [vmem:[#allocation88_spill] sm:$0xff]  ;;  %v19472_v49 = vld [vmem:[#allocation118_spill] sm:$0xff] }
 0x9c7   :  { %19434 = vst [vmem:[#allocation36_spill] sm:$0xff] %v15708_v33  ;;  %9970 = vmatprep.subr.bf16.mxu0 %v9969_v57  ;;  %v9973_v11 = vpack.c.bf16 %v19439_v38, %v19438_v35  ;;  %19440 = vst [vmem:[#allocation116_spill] sm:$0xff] %v15722_v16  ;;  %v19444_v37 = vand.u32 4294901760, %v19258_v4  ;;  %v19445_v30 = vand.u32 4294901760, %v14897_v12  ;;  %v15736_v20 = vpack.c.bf16 %v6921_v63, %v6917_v22  ;;  %v19455_v63 = vld [vmem:[#allocation41_spill] sm:$0xff]  ;;  %v19469_v57 = vld [vmem:[#allocation62_spill] sm:$0xff] }
 0x9c8   :  { %10092 = vmatpush1.bf16.msra.mxu1 %v15708_v33  ;;  %19441 = vst [vmem:[#allocation24_spill] sm:$0xff] %v15725_v54  ;;  %v9975_v1 = vpack.c.bf16 %v19443_v19, %v19442_v39  ;;  %v15739_v32 = vpack.c.bf16 %v6927_v45, %v6923_v25  ;;  %v19448_v31 = vand.u32 4294901760, %v14899_v47  ;;  %v19450_v56 = vand.u32 4294901760, %v19449_v43  ;;  %v19473_v21 = vld [vmem:[#allocation9_spill] sm:$0xff]  ;;  %v19475_v35 = vld [vmem:[#allocation110_spill] sm:$0xff]  ;;  %v19476_v38 = vld [vmem:[#allocation44_spill] sm:$0xff] }
 0x9c9   :  { %10094 = vmatprep.subr.bf16.mxu1 %v15711_v40  ;;  %v9977_v42 = vpack.c.bf16 %v19445_v30, %v19444_v37  ;;  %19446 = vst [vmem:[#allocation26_spill] sm:$0xff] %v15736_v20  ;;  %v19451_v4 = vand.u32 4294901760, %v14904_v15  ;;  %v19452_v12 = vand.u32 4294901760, %v14906_v59  ;;  %v15750_v22 = vpack.c.bf16 %v6929_v51, %v6925_v55  ;;  %v19461_v59 = vld [vmem:[#allocation113_spill] sm:$0xff]  ;;  %v19463_v51 = vld [vmem:[#allocation115_spill] sm:$0xff]  ;;  %v19481_v37 = vld [vmem:[#allocation82_spill] sm:$0xff] }
 0x9ca   :  { %9972 = vmatpush1.bf16.msra.mxu0 %v9971_v60  ;;  %19447 = vst [vmem:[#allocation28_spill] sm:$0xff] %v15739_v32  ;;  %v9979_v18 = vpack.c.bf16 %v19450_v56, %v19448_v31  ;;  %v19454_v45 = vand.u32 4294901760, %v14908_v23  ;;  %v19456_v47 = vand.u32 4294901760, %v19455_v63  ;;  %v19458_v2 = vand.u32 4294901760, %v19457_v24  ;;  %v19465_v23 = vld [vmem:[#allocation108_spill] sm:$0xff]  ;;  %v19474_v60 = vld [vmem:[#allocation102_spill] sm:$0xff] }
 0x9cb   :  { %9974 = vmatprep.subr.bf16.mxu0 %v9973_v11  ;;  %v9981_v13 = vpack.c.bf16 %v19452_v12, %v19451_v4  ;;  %19453 = vst [vmem:[#allocation99_spill] sm:$0xff] %v15750_v22  ;;  %v19460_v15 = vand.u32 4294901760, %v19459_v62  ;;  %v19462_v55 = vand.u32 4294901760, %v19461_v59  ;;  %v19464_v9 = vand.u32 4294901760, %v19463_v51  ;;  %v19477_v11 = vld [vmem:[#allocation70_spill] sm:$0xff]  ;;  %v19478_v39 = vld [vmem:[#allocation81_spill] sm:$0xff] }
 0x9cc   :  { %10096 = vmatpush1.bf16.msra.mxu1 %v15722_v16  ;;  %v9983_v25 = vpack.c.bf16 %v19456_v47, %v19454_v45  ;;  %v19479_v19 = vld [vmem:[#allocation15_spill] sm:$0xff]  ;;  %v19482_v30 = vld [vmem:[#allocation84_spill] sm:$0xff]  ;;  %v19484_v31 = vld [vmem:[#allocation30_spill] sm:$0xff] }
 0x9cd   :  { %10098 = vmatprep.subr.bf16.mxu1 %v15725_v54  ;;  %v9985_v58 = vpack.c.bf16 %v19460_v15, %v19458_v2  ;;  %v9987_v53 = vpack.c.bf16 %v19464_v9, %v19462_v55  ;;  %v19485_v43 = vld [vmem:[#allocation66_spill] sm:$0xff]  ;;  %v19486_v56 = vld [vmem:[#allocation96_spill] sm:$0xff]  ;;  %v19488_v4 = vld [vmem:[#allocation71_spill] sm:$0xff] }
 0x9ce   :  { %9976 = vmatpush1.bf16.msra.mxu0 %v9975_v1  ;;  %v19480_v1 = vld [vmem:[#allocation57_spill] sm:$0xff]  ;;  %v19489_v12 = vld [vmem:[#allocation43_spill] sm:$0xff]  ;;  %v19491_v45 = vld [vmem:[#allocation72_spill] sm:$0xff] }
 0x9cf   :  { %9978 = vmatprep.subr.bf16.mxu0 %v9977_v42  ;;  %v19483_v42 = vld [vmem:[#allocation105_spill] sm:$0xff]  ;;  %v19492_v63 = vld [vmem:[#allocation31_spill] sm:$0xff]  ;;  %v19493_v47 = vld [vmem:[#allocation42_spill] sm:$0xff] }
 0x9d0   :  { %10100 = vmatpush1.bf16.msra.mxu1 %v15736_v20  ;;  %v19495_v24 = vld [vmem:[#allocation51_spill] sm:$0xff]  ;;  %v19497_v62 = vld [vmem:[#allocation68_spill] sm:$0xff]  ;;  %v19498_v15 = vld [vmem:[#allocation69_spill] sm:$0xff] }
 0x9d1   :  { %10102 = vmatprep.subr.bf16.mxu1 %v15739_v32  ;;  %v19496_v2 = vld [vmem:[#allocation63_spill] sm:$0xff]  ;;  %v19527_v16 = vld [vmem:[#allocation16_spill] sm:$0xff] }
 0x9d2   :  { %9980 = vmatpush1.bf16.msra.mxu0 %v9979_v18  ;;  %v19487_v18 = vld [vmem:[#allocation61_spill] sm:$0xff]  ;;  %v6818_v59 = vld [vmem:[#allocation2 + $0xbb8] sm:$0xff]  ;;  %v6815_v9 = vld [vmem:[#allocation2 + $0xba0] sm:$0xff] }
 0x9d3   :  { %9982 = vmatprep.subr.bf16.mxu0 %v9981_v13  ;;  %v19490_v13 = vld [vmem:[#allocation46_spill] sm:$0xff]  ;;  %v6935_v51 = vand.u32 4294901760, %v6818_v59 }
 0x9d4   :  { %10104 = vmatpush1.bf16.msra.mxu1 %v15750_v22 }
 0x9d6   :  { %9984 = vmatpush1.bf16.msra.mxu0 %v9983_v25  ;;  %v19494_v25 = vld [vmem:[#allocation37_spill] sm:$0xff] }
 0x9d7   :  { %9986 = vmatprep.subr.bf16.mxu0 %v9985_v58  ;;  %v6816_v58 = vld [vmem:[#allocation2 + $0xba8] sm:$0xff] }
 0x9d8   :  { %v6931_v55 = vand.u32 4294901760, %v6816_v58 }
 0x9da   :  { %9988 = vmatpush1.bf16.msra.mxu0 %v9987_v53  ;;  %v6817_v53 = vld [vmem:[#allocation2 + $0xbb0] sm:$0xff] }
 0x9db   :  { %9990 = vmatprep.subr.bf16.mxu0 %v19465_v23  ;;  %v6933_v23 = vand.u32 4294901760, %v6815_v9 }
 0x9dd   :  { %6619 = vmatmul.mubr.f32.vlgmr.msra.gmra.mrb[4].mxu0 %v19466_v52 }
 0x9de   :  { %9992 = vmatpush1.bf16.msra.mxu0 %v19467_v36  ;;  %6754 = vmatprep.mubr.f32.mxu0 %v19468_v34  ;;  %v6937_v36 = vand.u32 4294901760, %v6817_v53  ;;  %v15801_v34 = vpack.c.bf16 %v6935_v51, %v6931_v55 }
 0x9df   :  { %9994 = vmatprep.subr.bf16.mxu0 %v19469_v57 }
 0x9e0   :  { %19499 = vst [vmem:[#allocation41_spill] sm:$0xff] %v15801_v34  ;;  %v15803_v57 = vpack.c.bf16 %v6937_v36, %v6933_v23  ;;  %10106 = vmatprep.subr.bf16.mxu1 %v15801_v34 }
 0x9e2   :  { %9996 = vmatpush1.bf16.msra.mxu0 %v19470_v29  ;;  %19500 = vst [vmem:[#allocation107_spill] sm:$0xff] %v15803_v57  ;;  %v6820_v29 = vld [vmem:[#allocation2 + $0xbc8] sm:$0xff]  ;;  %10108 = vmatpush1.bf16.msra.mxu1 %v15803_v57 }
 0x9e3   :  { %9998 = vmatprep.subr.bf16.mxu0 %v19471_v6  ;;  %v6822_v6 = vld [vmem:[#allocation2 + $0xbd8] sm:$0xff] }
 0x9e6   :  { %10000 = vmatpush1.bf16.msra.mxu0 %v19472_v49  ;;  %v6939_v49 = vand.u32 4294901760, %v6820_v29 }
 0x9e7   :  { %10002 = vmatprep.subr.bf16.mxu0 %v19473_v21  ;;  %v6943_v21 = vand.u32 4294901760, %v6822_v6 }
 0x9e9   :  { %v15837_v57 = vsub.f32 %v6822_v6, %v6943_v21 }
 0x9ea   :  { %10004 = vmatpush1.bf16.msra.mxu0 %v19474_v60  ;;  %v6819_v60 = vld [vmem:[#allocation2 + $0xbc0] sm:$0xff] }
 0x9eb   :  { %10006 = vmatprep.subr.bf16.mxu0 %v19475_v35  ;;  %v6941_v35 = vand.u32 4294901760, %v6819_v60 }
 0x9ee   :  { %10008 = vmatpush1.bf16.msra.mxu0 %v19476_v38 }
 0x9ef   :  { %10010 = vmatprep.subr.bf16.mxu0 %v19477_v11  ;;  %v15807_v11 = vpack.c.bf16 %v6943_v21, %v6939_v49 }
 0x9f1   :  { %19501 = vst [vmem:[#allocation111_spill] sm:$0xff] %v15807_v11  ;;  %10110 = vmatprep.subr.bf16.mxu1 %v15807_v11  ;;  %v15832_v11 = vsub.f32 %v6817_v53, %v6937_v36 }
 0x9f2   :  { %10012 = vmatpush1.bf16.msra.mxu0 %v19478_v39 }
 0x9f3   :  { %10014 = vmatprep.subr.bf16.mxu0 %v19479_v19  ;;  %v6824_v19 = vld [vmem:[#allocation2 + $0xbe8] sm:$0xff]  ;;  %19508 = vst [vmem:[#allocation90_spill] sm:$0xff] %v15832_v11 }
 0x9f6   :  { %10016 = vmatpush1.bf16.msra.mxu0 %v19480_v1  ;;  %v6826_v1 = vld [vmem:[#allocation2 + $0xbf8] sm:$0xff] }
 0x9f7   :  { %10018 = vmatprep.subr.bf16.mxu0 %v19481_v37  ;;  %v6947_v37 = vand.u32 4294901760, %v6824_v19 }
 0x9fa   :  { %10020 = vmatpush1.bf16.msra.mxu0 %v19482_v30  ;;  %v6951_v30 = vand.u32 4294901760, %v6826_v1 }
 0x9fb   :  { %10022 = vmatprep.subr.bf16.mxu0 %v19483_v42  ;;  %v6823_v42 = vld [vmem:[#allocation2 + $0xbe0] sm:$0xff] }
 0x9fe   :  { %10024 = vmatpush1.bf16.msra.mxu0 %v19484_v31  ;;  %v6825_v31 = vld [vmem:[#allocation2 + $0xbf0] sm:$0xff] }
 0x9ff   :  { %10026 = vmatprep.subr.bf16.mxu0 %v19485_v43  ;;  %v19503_v43 = vld [vmem:[#allocation17_spill] sm:$0xff] }
 0xa02   :  { %10028 = vmatpush1.bf16.msra.mxu0 %v19486_v56  ;;  %v17477_v56 = vand.u32 4294901760, %v19503_v43 }
 0xa03   :  { %10030 = vmatprep.subr.bf16.mxu0 %v19487_v18  ;;  %v19504_v18 = vld [vmem:[#allocation74_spill] sm:$0xff] }
 0xa06   :  { %10032 = vmatpush1.bf16.msra.mxu0 %v19488_v4  ;;  %v17480_v4 = vand.u32 4294901760, %v19504_v18 }
 0xa07   :  { %10034 = vmatprep.subr.bf16.mxu0 %v19489_v12  ;;  %v6949_v12 = vand.u32 4294901760, %v6823_v42 }
 0xa0a   :  { %10036 = vmatpush1.bf16.msra.mxu0 %v19490_v13  ;;  %v6953_v13 = vand.u32 4294901760, %v6825_v31 }
 0xa0b   :  { %10038 = vmatprep.subr.bf16.mxu0 %v19491_v45  ;;  %v15815_v45 = vpack.c.bf16 %v6951_v30, %v6947_v37 }
 0xa0d   :  { %19505 = vst [vmem:[#allocation115_spill] sm:$0xff] %v15815_v45 }
 0xa0e   :  { %10040 = vmatpush1.bf16.msra.mxu0 %v19492_v63  ;;  %v6975_v63 = vsub.f32 %v19503_v43, %v17477_v56  ;;  %v15835_v56 = vsub.f32 %v6820_v29, %v6939_v49  ;;  %v19514_v49 = vld [vmem:[#allocation73_spill] sm:$0xff] }
 0xa0f   :  { %10042 = vmatprep.subr.bf16.mxu0 %v19493_v47  ;;  %v6987_v47 = vsub.f32 %v19504_v18, %v17480_v4  ;;  %v15839_v4 = vsub.f32 %v6819_v60, %v6941_v35  ;;  %v17487_v21 = vand.u32 4294901760, %v19514_v49  ;;  %v19515_v60 = vld [vmem:[#allocation14_spill] sm:$0xff] }
 0xa12   :  { %10044 = vmatpush1.bf16.msra.mxu0 %v19494_v25  ;;  %v15823_v25 = vpack.c.bf16 %v6953_v13, %v6949_v12 }
 0xa13   :  { %10046 = vmatprep.subr.bf16.mxu0 %v19495_v24  ;;  %v6976_v24 = vand.u32 4294901760, %v6975_v63  ;;  %v15843_v63 = vsub.f32 %v6824_v19, %v6947_v37  ;;  %v19517_v37 = vld [vmem:[#allocation106_spill] sm:$0xff] }
 0xa14   :  { %19506 = vst [vmem:[#allocation108_spill] sm:$0xff] %v15823_v25 }
 0xa16   :  { %10048 = vmatpush1.bf16.msra.mxu0 %v19496_v2  ;;  %v6988_v2 = vand.u32 4294901760, %v6987_v47 }
 0xa17   :  { %10050 = vmatprep.subr.bf16.mxu0 %v19497_v62  ;;  %v15826_v62 = vsub.f32 %v6816_v58, %v6931_v55  ;;  %v15845_v58 = vsub.f32 %v6826_v1, %v6951_v30  ;;  %v15849_v55 = vsub.f32 %v6825_v31, %v6953_v13  ;;  %v19523_v31 = vld [vmem:[#allocation27_spill] sm:$0xff] }
 0xa19   :  { %19507 = vst [vmem:[#allocation88_spill] sm:$0xff] %v15826_v62  ;;  %19510 = vst [vmem:[#allocation62_spill] sm:$0xff] %v15845_v58 }
 0xa1a   :  { %10052 = vmatpush1.bf16.msra.mxu0 %v19498_v15  ;;  %v15828_v15 = vsub.f32 %v6818_v59, %v6935_v51  ;;  %v15847_v59 = vsub.f32 %v6823_v42, %v6949_v12  ;;  %19511 = vst [vmem:[#allocation78_spill] sm:$0xff] %v15849_v55  ;;  %v10117_v51 = vpack.c.bf16 %v6988_v2, %v6976_v24  ;;  %v19518_v42 = vld [vmem:[#allocation109_spill] sm:$0xff] }
 0xa1b   :  { %v19519_v12 = vld [vmem:[#allocation97_spill] sm:$0xff]  ;;  %v19525_v22 = vand.u32 4294901760, %v19518_v42 }
 0xa1d   :  { %6756 = vmatmul.mubr.f32.vlgmr.msra.gmra.mrb[4].mxu0 %v19466_v52  ;;  %v6821_v52 = vld [vmem:[#allocation2 + $0xbd0] sm:$0xff] }
 0xa1e   :  { %v6945_v38 = vand.u32 4294901760, %v6821_v52 }
 0xa20   :  { %v15809_v39 = vpack.c.bf16 %v6945_v38, %v6941_v35  ;;  %v15841_v34 = vsub.f32 %v6821_v52, %v6945_v38  ;;  %v17492_v52 = vand.u32 4294901760, %v19515_v60  ;;  %v17495_v38 = vand.u32 4294901760, %v15376_v10 }
 0xa22   :  { %19502 = vst [vmem:[#allocation113_spill] sm:$0xff] %v15809_v39  ;;  %10112 = vmatpush1.bf16.msra.mxu1 %v15809_v39  ;;  %v15830_v39 = vsub.f32 %v6815_v9, %v6933_v23  ;;  %19509 = vst [vmem:[#allocation32_spill] sm:$0xff] %v15841_v34  ;;  %v19512_v9 = vld [vmem:[#allocation86_spill] sm:$0xff]  ;;  %v7005_v13 = vsub.f32 %v15376_v10, %v17495_v38 }
 0xa23   :  { %10114 = vmatprep.subr.bf16.mxu1 %v15815_v45  ;;  %v17484_v53 = vand.u32 4294901760, %v19512_v9  ;;  %v19513_v23 = vld [vmem:[#allocation38_spill] sm:$0xff] }
 0xa24   :  { %v17483_v36 = vand.u32 4294901760, %v19513_v23  ;;  %v7006_v33 = vand.u32 4294901760, %v7005_v13 }
 0xa25   :  { %v6981_v29 = vsub.f32 %v19512_v9, %v17484_v53  ;;  %v7011_v53 = vsub.f32 %v19515_v60, %v17492_v52  ;;  %v7023_v52 = vsub.f32 %v19518_v42, %v19525_v22 }
 0xa26   :  { %10116 = vmatpush1.bf16.msra.mxu1 %v15823_v25  ;;  %v6993_v6 = vsub.f32 %v19513_v23, %v17483_v36 }
 0xa27   :  { %10118 = vmatprep.subr.bf16.mxu1 %v10117_v51  ;;  %v6982_v24 = vand.u32 4294901760, %v6981_v29  ;;  %v6999_v51 = vsub.f32 %v19514_v49, %v17487_v21  ;;  %v19522_v29 = vld [vmem:[#allocation101_spill] sm:$0xff]  ;;  %v7012_v54 = vand.u32 4294901760, %v7011_v53 }
 0xa28   :  { %v6994_v2 = vand.u32 4294901760, %v6993_v6 }
 0xa29   :  { %v7000_v6 = vand.u32 4294901760, %v6999_v51 }
 0xa2a   :  { %v10119_v20 = vpack.c.bf16 %v6994_v2, %v6982_v24  ;;  %v19529_v24 = vand.u32 4294901760, %v19523_v31 }
 0xa2c   :  { %v7041_v2 = vsub.f32 %v19523_v31, %v19529_v24  ;;  %v19532_v24 = vand.u32 4294901760, %v15403_v44 }
 0xaf0   :  { %v6757_v35 = vpop.f32.mrb[4].mxu0 }
 0xaf1   :  { %v15862_v19 = vand.u32 4294901760, %v6757_v35  ;;  %v6759_v1 = vpop.f32.mrb[5].mxu0 }
 0xaf2   :  { %v15867_v47 = vand.u32 4294901760, %v6759_v1 }
 0xaf3   :  { %19516 = vst [vmem:[#allocation56_spill] sm:$0xff] %v15862_v19  ;;  %v15873_v36 = vsub.f32 %v6757_v35, %v15862_v19  ;;  %v19524_v35 = vand.u32 4294901760, %v19517_v37 }
 0xaf4   :  { %19520 = vst [vmem:[#allocation118_spill] sm:$0xff] %v15867_v47  ;;  %v15879_v30 = vsub.f32 %v6759_v1, %v15867_v47  ;;  %v19526_v1 = vand.u32 4294901760, %v19519_v12 }
 0xaf5   :  { %19521 = vst [vmem:[#allocation9_spill] sm:$0xff] %v15873_v36  ;;  %v17508_v21 = vand.u32 4294901760, %v15873_v36  ;;  %v7017_v45 = vsub.f32 %v19517_v37, %v19524_v35  ;;  %v19533_v35 = vld [vmem:[#allocation40_spill] sm:$0xff] }
 0xaf6   :  { %v7035_v32 = vsub.f32 %v19519_v12, %v19526_v1  ;;  %v17515_v38 = vand.u32 4294901760, %v15879_v30  ;;  %v19528_v1 = vand.u32 4294901760, %v19522_v29  ;;  %v17527_v40 = vand.u32 4294901760, %v19533_v35 }
 0xaf7   :  { %v6964_v25 = vsub.f32 %v15873_v36, %v17508_v21  ;;  %v7018_v51 = vand.u32 4294901760, %v7017_v45  ;;  %v7024_v21 = vand.u32 4294901760, %v7023_v52  ;;  %v10121_v36 = vpack.c.bf16 %v7012_v54, %v7000_v6  ;;  %v19535_v6 = vld [vmem:[#allocation67_spill] sm:$0xff] }
 0xaf8   :  { %v6958_v22 = vsub.f32 %v15879_v30, %v17515_v38  ;;  %v7029_v28 = vsub.f32 %v19522_v29, %v19528_v1  ;;  %v7036_v53 = vand.u32 4294901760, %v7035_v32  ;;  %v19531_v1 = vand.u32 4294901760, %v19527_v16 }
 0xaf9   :  { %v6965_v38 = vand.u32 4294901760, %v6964_v25  ;;  %v7059_v45 = vsub.f32 %v15403_v44, %v19532_v24  ;;  %v7042_v52 = vand.u32 4294901760, %v7041_v2  ;;  %v10123_v27 = vpack.c.bf16 %v7018_v51, %v7006_v33 }
 0xafa   :  { %v6959_v8 = vand.u32 4294901760, %v6958_v22  ;;  %v7047_v29 = vsub.f32 %v19527_v16, %v19531_v1  ;;  %v7030_v32 = vand.u32 4294901760, %v7029_v28  ;;  %v17524_v22 = vand.u32 4294901760, %v15435_v14  ;;  %v19536_v1 = vld [vmem:[#allocation104_spill] sm:$0xff] }
 0xafb   :  { %v19534_v25 = vand.u32 4294901760, %v19530_v0  ;;  %v19538_v2 = vand.u32 4294901760, %v15421_v41  ;;  %v19539_v33 = vand.u32 4294901760, %v15432_v50  ;;  %v10125_v24 = vpack.c.bf16 %v7036_v53, %v7024_v21  ;;  %v19542_v21 = vld [vmem:[#allocation54_spill] sm:$0xff]  ;;  %v19543_v53 = vld [vmem:[#allocation117_spill] sm:$0xff] }
 0xafc   :  { %6960 = vmatprep.mubr.f32.mxu1 %v6959_v8  ;;  %v19537_v8 = vand.u32 4294901760, %v15419_v17  ;;  %v7060_v13 = vand.u32 4294901760, %v7059_v45  ;;  %v10127_v16 = vpack.c.bf16 %v7042_v52, %v7030_v32  ;;  %v17541_v45 = vand.u32 4294901760, %v19543_v53 }
 0xafd   :  { %6966 = vmatmul.mubr.f32.vlgmr.msra.gmra.mrb[4].mxu1 %v6965_v38  ;;  %v7053_v54 = vsub.f32 %v19530_v0, %v19534_v25  ;;  %v7071_v38 = vsub.f32 %v15421_v41, %v19538_v2  ;;  %v7083_v51 = vsub.f32 %v15432_v50, %v19539_v33  ;;  %v7048_v25 = vand.u32 4294901760, %v7047_v29  ;;  %v19545_v50 = vld [vmem:[#allocation83_spill] sm:$0xff] }
 0xafe   :  { %10120 = vmatpush1.bf16.msra.mxu1 %v10119_v20  ;;  %7357 = vmatprep.mubr.f32.mxu1 %v15867_v47  ;;  %v7065_v28 = vsub.f32 %v15419_v17, %v19537_v8  ;;  %v7077_v20 = vsub.f32 %v15435_v14, %v17524_v22  ;;  %v7089_v8 = vsub.f32 %v19533_v35, %v17527_v40  ;;  %v19540_v47 = vand.u32 4294901760, %v19535_v6  ;;  %v19544_v40 = vld [vmem:[#allocation85_spill] sm:$0xff]  ;;  %v19546_v0 = vld [vmem:[#allocation35_spill] sm:$0xff] }
 0xaff   :  { %10122 = vmatprep.subr.bf16.mxu1 %v10121_v36  ;;  %v19541_v41 = vand.u32 4294901760, %v19536_v1  ;;  %v7054_v32 = vand.u32 4294901760, %v7053_v54  ;;  %v7072_v33 = vand.u32 4294901760, %v7071_v38  ;;  %v7084_v22 = vand.u32 4294901760, %v7083_v51 }
 0xb00   :  { %v7095_v2 = vsub.f32 %v19535_v6, %v19540_v47  ;;  %v7066_v52 = vand.u32 4294901760, %v7065_v28  ;;  %v10129_v14 = vpack.c.bf16 %v7060_v13, %v7048_v25  ;;  %v17540_v35 = vand.u32 4294901760, %v19544_v40  ;;  %v19549_v25 = vld [vmem:[#allocation8_spill] sm:$0xff] }
 0xb01   :  { %v7107_v36 = vsub.f32 %v19536_v1, %v19541_v41  ;;  %v17539_v17 = vand.u32 4294901760, %v19545_v50  ;;  %v7078_v47 = vand.u32 4294901760, %v7077_v20  ;;  %v7090_v6 = vand.u32 4294901760, %v7089_v8  ;;  %v19547_v41 = vld [vmem:[#allocation119_spill] sm:$0xff]  ;;  %v19550_v8 = vld [vmem:[#allocation10_spill] sm:$0xff] }
 0xb02   :  { %10124 = vmatpush1.bf16.msra.mxu1 %v10123_v27  ;;  %v17544_v44 = vand.u32 4294901760, %v19546_v0  ;;  %v17546_v1 = vand.u32 4294901760, %v19547_v41  ;;  %v7096_v29 = vand.u32 4294901760, %v7095_v2  ;;  %v19548_v27 = vand.u32 4294901760, %v19542_v21  ;;  %v19554_v2 = vld [vmem:[#allocation77_spill] sm:$0xff] }
 0xb03   :  { %10126 = vmatprep.subr.bf16.mxu1 %v10125_v24  ;;  %v7108_v31 = vand.u32 4294901760, %v7107_v36  ;;  %v7113_v13 = vsub.f32 %v19543_v53, %v17541_v45  ;;  %v10131_v28 = vpack.c.bf16 %v7066_v52, %v7054_v32  ;;  %v10133_v38 = vpack.c.bf16 %v7084_v22, %v7072_v33  ;;  %v19551_v33 = vld [vmem:[#allocation11_spill] sm:$0xff] }
 0xb04   :  { %v7101_v54 = vsub.f32 %v19542_v21, %v19548_v27  ;;  %v7119_v51 = vsub.f32 %v19544_v40, %v17540_v35  ;;  %v7131_v24 = vsub.f32 %v19545_v50, %v17539_v17  ;;  %v7125_v36 = vsub.f32 %v19546_v0, %v17544_v44  ;;  %v19552_v17 = vld [vmem:[#allocation23_spill] sm:$0xff]  ;;  %v19559_v27 = vld [vmem:[#allocation94_spill] sm:$0xff] }
 0xb05   :  { %v10137_v22 = vpack.c.bf16 %v7108_v31, %v7096_v29  ;;  %v7114_v52 = vand.u32 4294901760, %v7113_v13  ;;  %v19553_v45 = vld [vmem:[#allocation75_spill] sm:$0xff]  ;;  %v19555_v0 = vand.u32 4294901760, %v19549_v25  ;;  %v19556_v31 = vand.u32 4294901760, %v19550_v8 }
 0xb06   :  { %10128 = vmatpush1.bf16.msra.mxu1 %v10127_v16  ;;  %v10135_v16 = vpack.c.bf16 %v7090_v6, %v7078_v47  ;;  %v7102_v32 = vand.u32 4294901760, %v7101_v54  ;;  %v7120_v40 = vand.u32 4294901760, %v7119_v51  ;;  %v7132_v44 = vand.u32 4294901760, %v7131_v24  ;;  %v19557_v54 = vld [vmem:[#allocation93_spill] sm:$0xff] }
 0xb07   :  { %10130 = vmatprep.subr.bf16.mxu1 %v10129_v14  ;;  %v7137_v14 = vsub.f32 %v19547_v41, %v17546_v1  ;;  %v7143_v1 = vsub.f32 %v19549_v25, %v19555_v0  ;;  %v7155_v6 = vsub.f32 %v19550_v8, %v19556_v31  ;;  %v7126_v29 = vand.u32 4294901760, %v7125_v36 }
 0xb08   :  { %v17551_v13 = vand.u32 4294901760, %v19557_v54  ;;  %v10139_v20 = vpack.c.bf16 %v7114_v52, %v7102_v32  ;;  %v19561_v24 = vand.u32 4294901760, %v19551_v33  ;;  %v19562_v25 = vand.u32 4294901760, %v19552_v17 }
 0xb09   :  { %v7138_v47 = vand.u32 4294901760, %v7137_v14  ;;  %v19563_v36 = vand.u32 4294901760, %v19553_v45  ;;  %v19564_v35 = vand.u32 4294901760, %v19554_v2  ;;  %v10141_v52 = vpack.c.bf16 %v7132_v44, %v7120_v40  ;;  %v19568_v44 = vld [vmem:[#allocation48_spill] sm:$0xff] }
 0xb0a   :  { %10132 = vmatpush1.bf16.msra.mxu1 %v10131_v28  ;;  %v19558_v28 = vld [vmem:[#allocation59_spill] sm:$0xff]  ;;  %v7149_v0 = vsub.f32 %v19551_v33, %v19561_v24  ;;  %v7161_v31 = vsub.f32 %v19552_v17, %v19562_v25  ;;  %v7144_v51 = vand.u32 4294901760, %v7143_v1  ;;  %v7173_v24 = vsub.f32 %v19557_v54, %v17551_v13  ;;  %v19569_v1 = vld [vmem:[#allocation12_spill] sm:$0xff] }
 0xb0b   :  { %10134 = vmatprep.subr.bf16.mxu1 %v10133_v38  ;;  %v19560_v38 = vld [vmem:[#allocation87_spill] sm:$0xff]  ;;  %v7167_v14 = vsub.f32 %v19553_v45, %v19563_v36  ;;  %v7179_v32 = vsub.f32 %v19554_v2, %v19564_v35  ;;  %v10143_v50 = vpack.c.bf16 %v7138_v47, %v7126_v29  ;;  %v19565_v33 = vand.u32 4294901760, %v19558_v28 }
 0xb0c   :  { %v19566_v17 = vand.u32 4294901760, %v19559_v27  ;;  %v19567_v45 = vand.u32 4294901760, %v19560_v38  ;;  %v7162_v29 = vand.u32 4294901760, %v7161_v31  ;;  %v17559_v2 = vand.u32 4294901760, %v15625_v7 }
 0xb0d   :  { %v7185_v25 = vsub.f32 %v19558_v28, %v19565_v33  ;;  %v7168_v47 = vand.u32 4294901760, %v7167_v14  ;;  %v7180_v13 = vand.u32 4294901760, %v7179_v32  ;;  %v19570_v33 = vld [vmem:[#allocation19_spill] sm:$0xff]  ;;  %v17562_v8 = vand.u32 4294901760, %v15635_v26 }
 0xb0e   :  { %10136 = vmatpush1.bf16.msra.mxu1 %v10135_v16  ;;  %v7156_v16 = vand.u32 4294901760, %v7155_v6  ;;  %v7191_v36 = vsub.f32 %v19559_v27, %v19566_v17  ;;  %v7203_v35 = vsub.f32 %v19560_v38, %v19567_v45  ;;  %v7150_v6 = vand.u32 4294901760, %v7149_v0  ;;  %v19571_v45 = vld [vmem:[#allocation22_spill] sm:$0xff] }
 0xb0f   :  { %10138 = vmatprep.subr.bf16.mxu1 %v10137_v22  ;;  %v17561_v22 = vand.u32 4294901760, %v19569_v1  ;;  %v17560_v28 = vand.u32 4294901760, %v19570_v33  ;;  %v7174_v17 = vand.u32 4294901760, %v7173_v24  ;;  %v7186_v27 = vand.u32 4294901760, %v7185_v25  ;;  %v19574_v25 = vld [vmem:[#allocation76_spill] sm:$0xff] }
 0xb10   :  { %v10145_v54 = vpack.c.bf16 %v7156_v16, %v7144_v51  ;;  %v17563_v38 = vand.u32 4294901760, %v19571_v45  ;;  %v7192_v40 = vand.u32 4294901760, %v7191_v36  ;;  %v7204_v41 = vand.u32 4294901760, %v7203_v35  ;;  %v19573_v16 = vld [vmem:[#allocation49_spill] sm:$0xff] }
 0xb11   :  { %v7209_v51 = vsub.f32 %v19569_v1, %v17561_v22  ;;  %v10147_v31 = vpack.c.bf16 %v7162_v29, %v7150_v6  ;;  %v10149_v14 = vpack.c.bf16 %v7180_v13, %v7168_v47  ;;  %v7215_v32 = vsub.f32 %v19570_v33, %v17560_v28  ;;  %v19575_v47 = vld [vmem:[#allocation47_spill] sm:$0xff] }
 0xb12   :  { %10140 = vmatpush1.bf16.msra.mxu1 %v10139_v20  ;;  %v19572_v20 = vand.u32 4294901760, %v19568_v44  ;;  %v17564_v24 = vand.u32 4294901760, %v19573_v16  ;;  %v7221_v35 = vsub.f32 %v15635_v26, %v17562_v8  ;;  %v10153_v13 = vpack.c.bf16 %v7204_v41, %v7192_v40 }
 0xb13   :  { %10142 = vmatprep.subr.bf16.mxu1 %v10141_v52  ;;  %v7227_v52 = vsub.f32 %v15625_v7, %v17559_v2  ;;  %v7210_v29 = vand.u32 4294901760, %v7209_v51  ;;  %v17566_v2 = vand.u32 4294901760, %v15663_v61  ;;  %v17567_v28 = vand.u32 4294901760, %v15673_v3 }
 0xb14   :  { %v7197_v0 = vsub.f32 %v19568_v44, %v19572_v20  ;;  %v17565_v20 = vand.u32 4294901760, %v19575_v47  ;;  %v7216_v36 = vand.u32 4294901760, %v7215_v32  ;;  %v19576_v41 = vand.u32 4294901760, %v19574_v25 }
 0xb15   :  { %v7228_v8 = vand.u32 4294901760, %v7227_v52  ;;  %v7222_v40 = vand.u32 4294901760, %v7221_v35  ;;  %v17568_v51 = vand.u32 4294901760, %v15686_v46  ;;  %v17570_v22 = vand.u32 4294901760, %v15826_v62 }
 0xb16   :  { %10144 = vmatpush1.bf16.msra.mxu1 %v10143_v50  ;;  %v7233_v50 = vsub.f32 %v19571_v45, %v17563_v38  ;;  %v7198_v6 = vand.u32 4294901760, %v7197_v0  ;;  %v7239_v38 = vsub.f32 %v19573_v16, %v17564_v24  ;;  %v17569_v0 = vand.u32 4294901760, %v15684_v5 }
 0xb17   :  { %10146 = vmatprep.subr.bf16.mxu1 %v10145_v54  ;;  %v10151_v54 = vpack.c.bf16 %v7186_v27, %v7174_v17  ;;  %v7251_v27 = vsub.f32 %v19574_v25, %v19576_v41  ;;  %v7245_v32 = vsub.f32 %v19575_v47, %v17565_v20  ;;  %v7257_v52 = vsub.f32 %v15663_v61, %v17566_v2 }
 0xb18   :  { %v7234_v17 = vand.u32 4294901760, %v7233_v50  ;;  %v7263_v35 = vsub.f32 %v15673_v3, %v17567_v28  ;;  %v19577_v50 = vand.u32 4294901760, %v15675_v48  ;;  %v7240_v41 = vand.u32 4294901760, %v7239_v38 }
 0xb19   :  { %v7269_v20 = vsub.f32 %v15684_v5, %v17569_v0  ;;  %v7281_v2 = vsub.f32 %v15686_v46, %v17568_v51  ;;  %v7287_v28 = vsub.f32 %v15826_v62, %v17570_v22  ;;  %v17586_v38 = vand.u32 4294901760, %v15832_v11 }
 0xb1a   :  { %10148 = vmatpush1.bf16.msra.mxu1 %v10147_v31  ;;  %v10155_v31 = vpack.c.bf16 %v7210_v29, %v7198_v6  ;;  %v7275_v6 = vsub.f32 %v15675_v48, %v19577_v50  ;;  %v10157_v29 = vpack.c.bf16 %v7228_v8, %v7216_v36  ;;  %v10159_v24 = vpack.c.bf16 %v7234_v17, %v7222_v40 }
 0xb1b   :  { %10150 = vmatprep.subr.bf16.mxu1 %v10149_v14  ;;  %v17577_v14 = vand.u32 4294901760, %v15828_v15  ;;  %v17587_v8 = vand.u32 4294901760, %v15830_v39  ;;  %v7246_v36 = vand.u32 4294901760, %v7245_v32  ;;  %v7264_v40 = vand.u32 4294901760, %v7263_v35 }
 0xb1c   :  { %v7276_v17 = vand.u32 4294901760, %v7275_v6  ;;  %v17585_v51 = vand.u32 4294901760, %v15835_v56  ;;  %v17578_v0 = vand.u32 4294901760, %v15837_v57  ;;  %v7270_v22 = vand.u32 4294901760, %v7269_v20 }
 0xb1d   :  { %v7282_v62 = vand.u32 4294901760, %v7281_v2  ;;  %v7288_v46 = vand.u32 4294901760, %v7287_v28  ;;  %v17584_v35 = vand.u32 4294901760, %v15839_v4  ;;  %v17580_v6 = vand.u32 4294901760, %v15841_v34 }
 0xb1e   :  { %10152 = vmatpush1.bf16.msra.mxu1 %v10151_v54  ;;  %v7252_v54 = vand.u32 4294901760, %v7251_v27  ;;  %v7258_v27 = vand.u32 4294901760, %v7257_v52  ;;  %v10165_v52 = vpack.c.bf16 %v7276_v17, %v7264_v40  ;;  %v7311_v2 = vsub.f32 %v15835_v56, %v17585_v51 }
 0xb1f   :  { %10154 = vmatprep.subr.bf16.mxu1 %v10153_v13  ;;  %v7299_v13 = vsub.f32 %v15828_v15, %v17577_v14  ;;  %v7293_v14 = vsub.f32 %v15830_v39, %v17587_v8  ;;  %v7323_v28 = vsub.f32 %v15837_v57, %v17578_v0  ;;  %v17579_v20 = vand.u32 4294901760, %v15843_v63 }
 0xb20   :  { %v10161_v50 = vpack.c.bf16 %v7252_v54, %v7240_v41  ;;  %v10163_v32 = vpack.c.bf16 %v7258_v27, %v7246_v36  ;;  %v7317_v36 = vsub.f32 %v15839_v4, %v17584_v35  ;;  %v7329_v27 = vsub.f32 %v15841_v34, %v17580_v6  ;;  %v19595_v35 = vld [vmem:[#allocation10_spill] sm:$0xff] }
 0xb21   :  { %v7300_v5 = vand.u32 4294901760, %v7299_v13  ;;  %v7294_v54 = vand.u32 4294901760, %v7293_v14  ;;  %v17583_v40 = vand.u32 4294901760, %v15847_v59  ;;  %v17582_v17 = vand.u32 4294901760, %v15849_v55 }
 0xb22   :  { %10156 = vmatpush1.bf16.msra.mxu1 %v10155_v31  ;;  %v7305_v31 = vsub.f32 %v15832_v11, %v17586_v38  ;;  %v7324_v0 = vand.u32 4294901760, %v7323_v28  ;;  %v7330_v14 = vand.u32 4294901760, %v7329_v27  ;;  %v19597_v38 = vld [vmem:[#allocation23_spill] sm:$0xff] }
 0xb23   :  { %10158 = vmatprep.subr.bf16.mxu1 %v10157_v29  ;;  %v17581_v29 = vand.u32 4294901760, %v15845_v58  ;;  %v10169_v41 = vpack.c.bf16 %v7300_v5, %v7288_v46  ;;  %v7335_v5 = vsub.f32 %v15843_v63, %v17579_v20 }
 0xb24   :  { %v7306_v13 = vand.u32 4294901760, %v7305_v31  ;;  %v7341_v31 = vsub.f32 %v15847_v59, %v17583_v40 }
 0xb25   :  { %v7347_v46 = vsub.f32 %v15845_v58, %v17581_v29 }
 0xb26   :  { %10160 = vmatpush1.bf16.msra.mxu1 %v10159_v24  ;;  %v10167_v24 = vpack.c.bf16 %v7282_v62, %v7270_v22  ;;  %v10171_v62 = vpack.c.bf16 %v7306_v13, %v7294_v54  ;;  %v7318_v22 = vand.u32 4294901760, %v7317_v36  ;;  %v7342_v6 = vand.u32 4294901760, %v7341_v31  ;;  %v19584_v31 = vld [vmem:[#allocation18_spill] sm:$0xff] }
 0xb27   :  { %10162 = vmatprep.subr.bf16.mxu1 %v10161_v50  ;;  %v7312_v50 = vand.u32 4294901760, %v7311_v2  ;;  %v7336_v2 = vand.u32 4294901760, %v7335_v5  ;;  %v7348_v28 = vand.u32 4294901760, %v7347_v46  ;;  %v10181_v13 = vpack.c.bf16 %v19504_v18, %v19503_v43  ;;  %v19581_v5 = vld [vmem:[#allocation52_spill] sm:$0xff] }
 0xb28   :  { %v10175_v20 = vpack.c.bf16 %v7330_v14, %v7318_v22  ;;  %v10183_v36 = vpack.c.bf16 %v19513_v23, %v19512_v9  ;;  %v19583_v22 = vld [vmem:[#allocation58_spill] sm:$0xff] }
 0xb2a   :  { %10164 = vmatpush1.bf16.msra.mxu1 %v10163_v32  ;;  %v7353_v32 = vsub.f32 %v15849_v55, %v17582_v17  ;;  %v19593_v17 = vld [vmem:[#allocation119_spill] sm:$0xff] }
 0xb2b   :  { %10166 = vmatprep.subr.bf16.mxu1 %v10165_v52  ;;  %v10173_v52 = vpack.c.bf16 %v7324_v0, %v7312_v50  ;;  %v10185_v0 = vpack.c.bf16 %v19515_v60, %v19514_v49  ;;  %v19580_v50 = vld [vmem:[#allocation16_spill] sm:$0xff] }
 0xb2c   :  { %v7354_v29 = vand.u32 4294901760, %v7353_v32  ;;  %v10193_v46 = vpack.c.bf16 %v19581_v5, %v19580_v50  ;;  %v19585_v32 = vld [vmem:[#allocation29_spill] sm:$0xff] }
 0xb2e   :  { %10168 = vmatpush1.bf16.msra.mxu1 %v10167_v24  ;;  %v10177_v24 = vpack.c.bf16 %v7348_v28, %v7336_v2  ;;  %v10179_v54 = vpack.c.bf16 %v7354_v29, %v7342_v6  ;;  %v10187_v6 = vpack.c.bf16 %v19517_v37, %v15376_v10  ;;  %v19578_v29 = vld [vmem:[#allocation101_spill] sm:$0xff]  ;;  %v19586_v2 = vld [vmem:[#allocation34_spill] sm:$0xff]  ;;  %v19587_v28 = vld [vmem:[#allocation40_spill] sm:$0xff] }
 0xb2f   :  { %10170 = vmatprep.subr.bf16.mxu1 %v10169_v41  ;;  %v19579_v41 = vld [vmem:[#allocation27_spill] sm:$0xff] }
 0xb30   :  { %v10191_v27 = vpack.c.bf16 %v19579_v41, %v19578_v29 }
 0xb32   :  { %10172 = vmatpush1.bf16.msra.mxu1 %v10171_v62  ;;  %v19582_v62 = vld [vmem:[#allocation53_spill] sm:$0xff] }
 0xb33   :  { %10174 = vmatprep.subr.bf16.mxu1 %v10173_v52  ;;  %v10195_v14 = vpack.c.bf16 %v19583_v22, %v19582_v62  ;;  %v10197_v52 = vpack.c.bf16 %v19585_v32, %v19584_v31 }
 0xb36   :  { %10176 = vmatpush1.bf16.msra.mxu1 %v10175_v20  ;;  %v10189_v20 = vpack.c.bf16 %v19519_v12, %v19518_v42 }
 0xb37   :  { %10178 = vmatprep.subr.bf16.mxu1 %v10177_v24  ;;  %v10199_v24 = vpack.c.bf16 %v19587_v28, %v19586_v2 }
 0xb3a   :  { %10180 = vmatpush1.bf16.msra.mxu1 %v10179_v54  ;;  %v19588_v54 = vld [vmem:[#allocation67_spill] sm:$0xff] }
 0xb3b   :  { %10182 = vmatprep.subr.bf16.mxu1 %v10181_v13  ;;  %v19589_v13 = vld [vmem:[#allocation104_spill] sm:$0xff] }
 0xb3d   :  { %7359 = vmatmul.mubr.f32.vlgmr.msra.gmra.mrb[4].mxu1 %v15862_v19  ;;  %v19599_v19 = vld [vmem:[#allocation77_spill] sm:$0xff] }
 0xb3e   :  { %10184 = vmatpush1.bf16.msra.mxu1 %v10183_v36  ;;  %7559 = vmatprep.mubr.f32.mxu1 %v15879_v30  ;;  %v10201_v36 = vpack.c.bf16 %v19589_v13, %v19588_v54 }
 0xb3f   :  { %10186 = vmatprep.subr.bf16.mxu1 %v10185_v0  ;;  %v10203_v0 = vpack.c.bf16 %v19543_v53, %v19542_v21  ;;  %v19601_v21 = vld [vmem:[#allocation59_spill] sm:$0xff] }
 0xb42   :  { %10188 = vmatpush1.bf16.msra.mxu1 %v10187_v6  ;;  %v19590_v6 = vld [vmem:[#allocation85_spill] sm:$0xff] }
 0xb43   :  { %10190 = vmatprep.subr.bf16.mxu1 %v10189_v20  ;;  %v19591_v20 = vld [vmem:[#allocation83_spill] sm:$0xff] }
 0xb46   :  { %10192 = vmatpush1.bf16.msra.mxu1 %v10191_v27  ;;  %v10205_v27 = vpack.c.bf16 %v19591_v20, %v19590_v6  ;;  %v19603_v6 = vld [vmem:[#allocation87_spill] sm:$0xff] }
 0xb47   :  { %10194 = vmatprep.subr.bf16.mxu1 %v10193_v46  ;;  %v19592_v46 = vld [vmem:[#allocation35_spill] sm:$0xff] }
 0xb48   :  { %v10207_v40 = vpack.c.bf16 %v19593_v17, %v19592_v46 }
 0xb4a   :  { %10196 = vmatpush1.bf16.msra.mxu1 %v10195_v14  ;;  %v19594_v14 = vld [vmem:[#allocation8_spill] sm:$0xff] }
 0xb4b   :  { %10198 = vmatprep.subr.bf16.mxu1 %v10197_v52  ;;  %v10209_v51 = vpack.c.bf16 %v19595_v35, %v19594_v14  ;;  %v19596_v52 = vld [vmem:[#allocation11_spill] sm:$0xff] }
 0xb4c   :  { %v10211_v8 = vpack.c.bf16 %v19597_v38, %v19596_v52 }
 0xb4e   :  { %10200 = vmatpush1.bf16.msra.mxu1 %v10199_v24  ;;  %v19598_v24 = vld [vmem:[#allocation75_spill] sm:$0xff] }
 0xb4f   :  { %10202 = vmatprep.subr.bf16.mxu1 %v10201_v36  ;;  %v10213_v53 = vpack.c.bf16 %v19599_v19, %v19598_v24  ;;  %v19600_v36 = vld [vmem:[#allocation93_spill] sm:$0xff] }
 0xb50   :  { %v10215_v20 = vpack.c.bf16 %v19601_v21, %v19600_v36 }
 0xb52   :  { %10204 = vmatpush1.bf16.msra.mxu1 %v10203_v0  ;;  %v19602_v0 = vld [vmem:[#allocation94_spill] sm:$0xff] }
 0xb53   :  { %10206 = vmatprep.subr.bf16.mxu1 %v10205_v27  ;;  %v10217_v17 = vpack.c.bf16 %v19603_v6, %v19602_v0  ;;  %v10219_v27 = vpack.c.bf16 %v19569_v1, %v19568_v44  ;;  %v19605_v1 = vld [vmem:[#allocation112_spill] sm:$0xff] }
 0xb56   :  { %10208 = vmatpush1.bf16.msra.mxu1 %v10207_v40  ;;  %v10221_v40 = vpack.c.bf16 %v15625_v7, %v19570_v33 }
 0xb57   :  { %10210 = vmatprep.subr.bf16.mxu1 %v10209_v51  ;;  %v10223_v51 = vpack.c.bf16 %v19571_v45, %v15635_v26 }
 0xb5a   :  { %10212 = vmatpush1.bf16.msra.mxu1 %v10211_v8  ;;  %v10225_v8 = vpack.c.bf16 %v19574_v25, %v19573_v16 }
 0xb5b   :  { %10214 = vmatprep.subr.bf16.mxu1 %v10213_v53  ;;  %v10227_v53 = vpack.c.bf16 %v15663_v61, %v19575_v47 }
 0xb5e   :  { %10216 = vmatpush1.bf16.msra.mxu1 %v10215_v20  ;;  %v10229_v20 = vpack.c.bf16 %v15675_v48, %v15673_v3 }
 0xb5f   :  { %10218 = vmatprep.subr.bf16.mxu1 %v10217_v17  ;;  %v19604_v17 = vld [vmem:[#allocation39_spill] sm:$0xff] }
 0xb60   :  { %v10231_v7 = vpack.c.bf16 %v19605_v1, %v19604_v17 }
 0xb62   :  { %10220 = vmatpush1.bf16.msra.mxu1 %v10219_v27  ;;  %v19606_v27 = vld [vmem:[#allocation88_spill] sm:$0xff] }
 0xb63   :  { %10222 = vmatprep.subr.bf16.mxu1 %v10221_v40  ;;  %v10233_v45 = vpack.c.bf16 %v15828_v15, %v19606_v27  ;;  %v10235_v40 = vpack.c.bf16 %v15832_v11, %v15830_v39  ;;  %v19609_v11 = vld [vmem:[#allocation103_spill] sm:$0xff] }
 0xb66   :  { %10224 = vmatpush1.bf16.msra.mxu1 %v10223_v51  ;;  %v10237_v51 = vpack.c.bf16 %v15837_v57, %v15835_v56 }
 0xb67   :  { %10226 = vmatprep.subr.bf16.mxu1 %v10225_v8  ;;  %v10239_v8 = vpack.c.bf16 %v15841_v34, %v15839_v4  ;;  %v19611_v34 = vld [vmem:[#allocation92_spill] sm:$0xff] }
 0xb6a   :  { %10228 = vmatpush1.bf16.msra.mxu1 %v10227_v53  ;;  %v10241_v53 = vpack.c.bf16 %v15845_v58, %v15843_v63  ;;  %v19613_v58 = vld [vmem:[#allocation33_spill] sm:$0xff] }
 0xb6b   :  { %10230 = vmatprep.subr.bf16.mxu1 %v10229_v20  ;;  %v10243_v20 = vpack.c.bf16 %v15849_v55, %v15847_v59  ;;  %v19615_v55 = vld [vmem:[#allocation80_spill] sm:$0xff] }
 0xb6e   :  { %10232 = vmatpush1.bf16.msra.mxu1 %v10231_v7  ;;  %v19607_v7 = vld [vmem:[#allocation98_spill] sm:$0xff] }
 0xb6f   :  { %10234 = vmatprep.subr.bf16.mxu1 %v10233_v45  ;;  %v19608_v45 = vld [vmem:[#allocation9_spill] sm:$0xff] }
 0xb72   :  { %10236 = vmatpush1.bf16.msra.mxu1 %v10235_v40  ;;  %v19610_v40 = vand.u32 4294901760, %v15879_v30  ;;  %v19620_v30 = vld [vmem:[#allocation50_spill] sm:$0xff] }
 0xb73   :  { %10238 = vmatprep.subr.bf16.mxu1 %v10237_v51  ;;  %v19612_v51 = vld [vmem:[#allocation55_spill] sm:$0xff] }
 0xb76   :  { %10240 = vmatpush1.bf16.msra.mxu1 %v10239_v8  ;;  %v19614_v8 = vld [vmem:[#allocation100_spill] sm:$0xff] }
 0xb77   :  { %10242 = vmatprep.subr.bf16.mxu1 %v10241_v53  ;;  %v19616_v53 = vld [vmem:[#allocation95_spill] sm:$0xff] }
 0xb7a   :  { %10244 = vmatpush1.bf16.msra.mxu1 %v10243_v20  ;;  %v19617_v20 = vld [vmem:[#allocation64_spill] sm:$0xff] }
 0xb7b   :  { %10246 = vmatprep.subr.bf16.mxu1 %v19607_v7  ;;  %v19618_v7 = vld [vmem:[#allocation25_spill] sm:$0xff] }
 0xb7d   :  { %7562 = vmatmul.mubr.f32.vlgmr.msra.gmra.mrb[4].mxu1 %v19608_v45 }
 0xb7e   :  { %10248 = vmatpush1.bf16.msra.mxu1 %v19609_v11  ;;  %7699 = vmatprep.mubr.f32.mxu1 %v19610_v40  ;;  %v19619_v11 = vld [vmem:[#allocation45_spill] sm:$0xff] }
 0xb7f   :  { %10250 = vmatprep.subr.bf16.mxu1 %v19611_v34  ;;  %v19621_v40 = vld [vmem:[#allocation13_spill] sm:$0xff] }
 0xb80   :  { %v19622_v34 = vld [vmem:[#allocation65_spill] sm:$0xff] }
 0xb82   :  { %10252 = vmatpush1.bf16.msra.mxu1 %v19612_v51  ;;  %v19623_v51 = vld [vmem:[#allocation89_spill] sm:$0xff] }
 0xb83   :  { %10254 = vmatprep.subr.bf16.mxu1 %v19613_v58  ;;  %v19624_v58 = vld [vmem:[#allocation91_spill] sm:$0xff] }
 0xb86   :  { %10256 = vmatpush1.bf16.msra.mxu1 %v19614_v8  ;;  %v19625_v8 = vld [vmem:[#allocation60_spill] sm:$0xff] }
 0xb87   :  { %10258 = vmatprep.subr.bf16.mxu1 %v19615_v55  ;;  %v19626_v55 = vld [vmem:[#allocation79_spill] sm:$0xff] }
 0xb8a   :  { %10260 = vmatpush1.bf16.msra.mxu1 %v19616_v53  ;;  %v19627_v53 = vld [vmem:[#allocation114_spill] sm:$0xff] }
 0xb8b   :  { %10262 = vmatprep.subr.bf16.mxu1 %v19617_v20  ;;  %v19628_v20 = vld [vmem:[#allocation36_spill] sm:$0xff] }
 0xb8e   :  { %10264 = vmatpush1.bf16.msra.mxu1 %v19618_v7  ;;  %v19629_v7 = vld [vmem:[#allocation20_spill] sm:$0xff] }
 0xb8f   :  { %10266 = vmatprep.subr.bf16.mxu1 %v19619_v11  ;;  %v19630_v11 = vld [vmem:[#allocation116_spill] sm:$0xff] }
 0xb92   :  { %10268 = vmatpush1.bf16.msra.mxu1 %v19620_v30  ;;  %v19631_v30 = vld [vmem:[#allocation24_spill] sm:$0xff] }
 0xb93   :  { %10270 = vmatprep.subr.bf16.mxu1 %v19621_v40  ;;  %v19632_v40 = vld [vmem:[#allocation26_spill] sm:$0xff] }
 0xb96   :  { %10272 = vmatpush1.bf16.msra.mxu1 %v19622_v34  ;;  %v19633_v34 = vld [vmem:[#allocation28_spill] sm:$0xff] }
 0xb97   :  { %10274 = vmatprep.subr.bf16.mxu1 %v19623_v51  ;;  %v19634_v51 = vld [vmem:[#allocation99_spill] sm:$0xff] }
 0xb9a   :  { %10276 = vmatpush1.bf16.msra.mxu1 %v19624_v58  ;;  %v19635_v58 = vld [vmem:[#allocation41_spill] sm:$0xff] }
 0xb9b   :  { %10278 = vmatprep.subr.bf16.mxu1 %v19625_v8  ;;  %v19636_v8 = vld [vmem:[#allocation107_spill] sm:$0xff] }
 0xb9e   :  { %10280 = vmatpush1.bf16.msra.mxu1 %v19626_v55  ;;  %v19637_v55 = vld [vmem:[#allocation111_spill] sm:$0xff] }
 0xb9f   :  { %10282 = vmatprep.subr.bf16.mxu1 %v19627_v53  ;;  %v19638_v53 = vld [vmem:[#allocation113_spill] sm:$0xff] }
 0xba2   :  { %10284 = vmatpush1.bf16.msra.mxu1 %v19628_v20  ;;  %v19639_v20 = vld [vmem:[#allocation115_spill] sm:$0xff] }
 0xba3   :  { %10286 = vmatprep.subr.bf16.mxu1 %v19629_v7 }
 0xba6   :  { %10288 = vmatpush1.bf16.msra.mxu1 %v19630_v11  ;;  %v19640_v11 = vand.u32 4294901760, %v19503_v43  ;;  %v19648_v43 = vld [vmem:[#allocation118_spill] sm:$0xff] }
 0xba7   :  { %10290 = vmatprep.subr.bf16.mxu1 %v19631_v30  ;;  %v19641_v30 = vand.u32 4294901760, %v19504_v18  ;;  %v19650_v18 = vand.u32 4294901760, %v19517_v37  ;;  %v19657_v37 = vand.u32 4294901760, %v19582_v62  ;;  %v19664_v62 = vand.u32 4294901760, %v19589_v13 }
 0xba8   :  { %v19676_v13 = vand.u32 4294901760, %v19594_v14  ;;  %v19683_v14 = vand.u32 4294901760, %v19601_v21  ;;  %v19692_v21 = vand.u32 4294901760, %v15635_v26  ;;  %v19700_v26 = vand.u32 4294901760, %v15675_v48 }
 0xba9   :  { %v10309_v7 = vpack.c.bf16 %v19641_v30, %v19640_v11  ;;  %v19649_v11 = vand.u32 4294901760, %v15376_v10  ;;  %v19656_v10 = vand.u32 4294901760, %v19581_v5  ;;  %v19663_v5 = vand.u32 4294901760, %v19588_v54 }
 0xbaa   :  { %10292 = vmatpush1.bf16.msra.mxu1 %v19632_v40  ;;  %v19642_v40 = vld [vmem:[#allocation108_spill] sm:$0xff]  ;;  %v19708_v48 = vand.u32 4294901760, %v15835_v56 }
 0xbab   :  { %10294 = vmatprep.subr.bf16.mxu1 %v19633_v34  ;;  %v19643_v34 = vand.u32 4294901760, %v19512_v9  ;;  %v10315_v9 = vpack.c.bf16 %v19650_v18, %v19649_v11  ;;  %v19667_v11 = vld [vmem:[#allocation117_spill] sm:$0xff] }
 0xbae   :  { %10296 = vmatpush1.bf16.msra.mxu1 %v19634_v51  ;;  %v19644_v51 = vand.u32 4294901760, %v19513_v23  ;;  %v19652_v23 = vand.u32 4294901760, %v19519_v12  ;;  %v19659_v12 = vand.u32 4294901760, %v19584_v31  ;;  %v19668_v31 = vand.u32 4294901760, %v19667_v11 }
 0xbaf   :  { %10298 = vmatprep.subr.bf16.mxu1 %v19635_v58  ;;  %v19699_v11 = vand.u32 4294901760, %v15673_v3 }
 0xbb0   :  { %v10311_v58 = vpack.c.bf16 %v19644_v51, %v19643_v34  ;;  %v19651_v34 = vand.u32 4294901760, %v19518_v42  ;;  %v19658_v42 = vand.u32 4294901760, %v19583_v22  ;;  %v19665_v22 = vld [vmem:[#allocation54_spill] sm:$0xff] }
 0xbb1   :  { %v19666_v30 = vand.u32 4294901760, %v19665_v22  ;;  %v19697_v22 = vand.u32 4294901760, %v19575_v47  ;;  %v19704_v47 = vand.u32 4294901760, %v15828_v15  ;;  %v19713_v15 = vand.u32 4294901760, %v15843_v63  ;;  %v19722_v63 = vld [vmem:[#allocation92_spill] sm:$0xff] }
 0xbb2   :  { %10300 = vmatpush1.bf16.msra.mxu1 %v19636_v8  ;;  %v19645_v8 = vand.u32 4294901760, %v19514_v49  ;;  %v10317_v49 = vpack.c.bf16 %v19652_v23, %v19651_v34  ;;  %v10323_v51 = vpack.c.bf16 %v19658_v42, %v19657_v37  ;;  %v19671_v34 = vld [vmem:[#allocation83_spill] sm:$0xff]  ;;  %v19680_v37 = vand.u32 4294901760, %v19598_v24 }
 0xbb3   :  { %10302 = vmatprep.subr.bf16.mxu1 %v19637_v55  ;;  %v19646_v55 = vand.u32 4294901760, %v19515_v60  ;;  %v19654_v60 = vand.u32 4294901760, %v19579_v41  ;;  %v19661_v41 = vand.u32 4294901760, %v19586_v2  ;;  %v10331_v18 = vpack.c.bf16 %v19668_v31, %v19666_v30 }
 0xbb4   :  { %v19672_v2 = vand.u32 4294901760, %v19671_v34  ;;  %v10357_v31 = vpack.c.bf16 %v19700_v26, %v19699_v11  ;;  %v19706_v34 = vld [vmem:[#allocation90_spill] sm:$0xff] }
 0xbb5   :  { %v19707_v3 = vand.u32 4294901760, %v19706_v34 }
 0xbb6   :  { %10304 = vmatpush1.bf16.msra.mxu1 %v19638_v53  ;;  %v10313_v53 = vpack.c.bf16 %v19646_v55, %v19645_v8  ;;  %v19653_v55 = vand.u32 4294901760, %v19578_v29  ;;  %v19660_v29 = vand.u32 4294901760, %v19585_v32  ;;  %v19669_v32 = vld [vmem:[#allocation85_spill] sm:$0xff] }
 0xbb7   :  { %10306 = vmatprep.subr.bf16.mxu1 %v19639_v20  ;;  %v19647_v20 = vand.u32 4294901760, %v19608_v45 }
 0xbb8   :  { %v10325_v8 = vpack.c.bf16 %v19660_v29, %v19659_v12 }
 0xbba   :  { %10308 = vmatpush1.bf16.msra.mxu1 %v19642_v40 }
 0xbbb   :  { %10310 = vmatprep.subr.bf16.mxu1 %v10309_v7  ;;  %v10319_v7 = vpack.c.bf16 %v19654_v60, %v19653_v55  ;;  %v19677_v60 = vand.u32 4294901760, %v19595_v35  ;;  %v19684_v35 = vand.u32 4294901760, %v19602_v0 }
 0xbbd   :  { %7703 = vmatmul.mubr.f32.vlgmr.msra.gmra.mrb[4].mxu1 %v19647_v20  ;;  %v10329_v20 = vpack.c.bf16 %v19664_v62, %v19663_v5  ;;  %v19693_v5 = vld [vmem:[#allocation22_spill] sm:$0xff] }
 0xbbe   :  { %10312 = vmatpush1.bf16.msra.mxu1 %v10311_v58  ;;  %7966 = vmatprep.mubr.f32.mxu1 %v19648_v43  ;;  %v19655_v58 = vand.u32 4294901760, %v19580_v50  ;;  %v19662_v50 = vand.u32 4294901760, %v19587_v28  ;;  %v19673_v28 = vand.u32 4294901760, %v19592_v46  ;;  %v19681_v46 = vand.u32 4294901760, %v19599_v19 }
 0xbbf   :  { %10314 = vmatprep.subr.bf16.mxu1 %v10313_v53  ;;  %v19689_v19 = vand.u32 4294901760, %v19570_v33  ;;  %v19694_v0 = vand.u32 4294901760, %v19693_v5  ;;  %v19698_v33 = vand.u32 4294901760, %v15663_v61  ;;  %v19705_v61 = vand.u32 4294901760, %v15830_v39  ;;  %v19745_v5 = vld [vmem:[#allocation99_spill] sm:$0xff] }
 0xbc0   :  { %v10321_v45 = vpack.c.bf16 %v19656_v10, %v19655_v58  ;;  %v10327_v53 = vpack.c.bf16 %v19662_v50, %v19661_v41  ;;  %v19678_v58 = vand.u32 4294901760, %v19596_v52  ;;  %v19679_v10 = vand.u32 4294901760, %v19597_v38  ;;  %v19690_v50 = vld [vmem:[#allocation21_spill] sm:$0xff] }
 0xbc1   :  { %v10341_v42 = vpack.c.bf16 %v19681_v46, %v19680_v37  ;;  %v19685_v52 = vand.u32 4294901760, %v19603_v6  ;;  %v19686_v38 = vand.u32 4294901760, %v19568_v44  ;;  %v10351_v62 = vpack.c.bf16 %v19694_v0, %v19692_v21  ;;  %v19726_v37 = vld [vmem:[#allocation80_spill] sm:$0xff]  ;;  %v19727_v46 = vld [vmem:[#allocation95_spill] sm:$0xff]  ;;  %v19746_v0 = vld [vmem:[#allocation41_spill] sm:$0xff] }
 0xbc2   :  { %10316 = vmatpush1.bf16.msra.mxu1 %v10315_v9  ;;  %v19670_v9 = vand.u32 4294901760, %v19669_v32  ;;  %v19695_v6 = vand.u32 4294901760, %v19573_v16  ;;  %v19696_v44 = vand.u32 4294901760, %v19574_v25  ;;  %v10355_v30 = vpack.c.bf16 %v19698_v33, %v19697_v22  ;;  %v19744_v21 = vld [vmem:[#allocation28_spill] sm:$0xff] }
 0xbc3   :  { %10318 = vmatprep.subr.bf16.mxu1 %v10317_v49  ;;  %v19674_v49 = vld [vmem:[#allocation119_spill] sm:$0xff]  ;;  %v10345_v29 = vpack.c.bf16 %v19685_v52, %v19684_v35  ;;  %v19702_v16 = vand.u32 4294901760, %v19605_v1  ;;  %v19703_v25 = vand.u32 4294901760, %v19606_v27  ;;  %v19710_v1 = vand.u32 4294901760, %v15839_v4  ;;  %v19720_v4 = vld [vmem:[#allocation56_spill] sm:$0xff]  ;;  %v19733_v35 = vld [vmem:[#allocation65_spill] sm:$0xff] }
 0xbc4   :  { %v10333_v23 = vpack.c.bf16 %v19672_v2, %v19670_v9  ;;  %v19675_v54 = vand.u32 4294901760, %v19674_v49  ;;  %v10363_v2 = vpack.c.bf16 %v19707_v3, %v19705_v61  ;;  %v19734_v52 = vld [vmem:[#allocation89_spill] sm:$0xff] }
 0xbc5   :  { %v10361_v9 = vpack.c.bf16 %v19704_v47, %v19703_v25 }
 0xbc6   :  { %10320 = vmatpush1.bf16.msra.mxu1 %v10319_v7  ;;  %v10335_v55 = vpack.c.bf16 %v19675_v54, %v19673_v28  ;;  %v10337_v7 = vpack.c.bf16 %v19677_v60, %v19676_v13  ;;  %v19711_v28 = vld [vmem:[#allocation32_spill] sm:$0xff]  ;;  %v19714_v54 = vld [vmem:[#allocation62_spill] sm:$0xff]  ;;  %v19716_v13 = vand.u32 4294901760, %v15847_v59 }
 0xbc7   :  { %10322 = vmatprep.subr.bf16.mxu1 %v10321_v45  ;;  %v10339_v45 = vpack.c.bf16 %v19679_v10, %v19678_v58  ;;  %v19712_v27 = vand.u32 4294901760, %v19711_v28  ;;  %v19715_v39 = vand.u32 4294901760, %v19714_v54  ;;  %v19717_v60 = vld [vmem:[#allocation78_spill] sm:$0xff]  ;;  %v19721_v58 = vld [vmem:[#allocation103_spill] sm:$0xff]  ;;  %v19725_v59 = vld [vmem:[#allocation100_spill] sm:$0xff] }
 0xbc8   :  { %v19718_v56 = vand.u32 4294901760, %v19717_v60  ;;  %v19723_v10 = vld [vmem:[#allocation55_spill] sm:$0xff] }
 0xbc9   :  { %v10367_v49 = vpack.c.bf16 %v19712_v27, %v19710_v1 }
 0xbca   :  { %10324 = vmatpush1.bf16.msra.mxu1 %v10323_v51  ;;  %v19682_v51 = vand.u32 4294901760, %v19600_v36  ;;  %v19691_v36 = vand.u32 4294901760, %v19690_v50  ;;  %v19741_v50 = vld [vmem:[#allocation116_spill] sm:$0xff] }
 0xbcb   :  { %10326 = vmatprep.subr.bf16.mxu1 %v10325_v8  ;;  %v19687_v8 = vld [vmem:[#allocation12_spill] sm:$0xff] }
 0xbcc   :  { %v10343_v12 = vpack.c.bf16 %v19683_v14, %v19682_v51  ;;  %v19688_v24 = vand.u32 4294901760, %v19687_v8  ;;  %v19729_v51 = vld [vmem:[#allocation25_spill] sm:$0xff]  ;;  %v19737_v8 = vld [vmem:[#allocation79_spill] sm:$0xff] }
 0xbcd   :  { %v19730_v14 = vld [vmem:[#allocation45_spill] sm:$0xff] }
 0xbce   :  { %10328 = vmatpush1.bf16.msra.mxu1 %v10327_v53  ;;  %v10347_v41 = vpack.c.bf16 %v19688_v24, %v19686_v38  ;;  %v10349_v53 = vpack.c.bf16 %v19691_v36, %v19689_v19  ;;  %v19736_v38 = vld [vmem:[#allocation60_spill] sm:$0xff]  ;;  %v19738_v24 = vld [vmem:[#allocation114_spill] sm:$0xff] }
 0xbcf   :  { %10330 = vmatprep.subr.bf16.mxu1 %v10329_v20  ;;  %v10353_v20 = vpack.c.bf16 %v19696_v44, %v19695_v6  ;;  %v19740_v19 = vld [vmem:[#allocation20_spill] sm:$0xff]  ;;  %v19748_v6 = vld [vmem:[#allocation111_spill] sm:$0xff]  ;;  %v19749_v44 = vld [vmem:[#allocation113_spill] sm:$0xff] }
 0xbd0   :  { %v19742_v36 = vld [vmem:[#allocation24_spill] sm:$0xff] }
 0xbd2   :  { %10332 = vmatpush1.bf16.msra.mxu1 %v10331_v18  ;;  %v19701_v18 = vand.u32 4294901760, %v19604_v17  ;;  %v19709_v17 = vand.u32 4294901760, %v15837_v57  ;;  %v19719_v57 = vld [vmem:[#allocation98_spill] sm:$0xff] }
 0xbd3   :  { %10334 = vmatprep.subr.bf16.mxu1 %v10333_v23 }
 0xbd4   :  { %v10359_v32 = vpack.c.bf16 %v19702_v16, %v19701_v18  ;;  %v10365_v23 = vpack.c.bf16 %v19709_v17, %v19708_v48 }
 0xbd6   :  { %10336 = vmatpush1.bf16.msra.mxu1 %v10335_v55  ;;  %v10369_v55 = vpack.c.bf16 %v19715_v39, %v19713_v15 }
 0xbd7   :  { %10338 = vmatprep.subr.bf16.mxu1 %v10337_v7  ;;  %v10371_v7 = vpack.c.bf16 %v19718_v56, %v19716_v13 }
 0xbda   :  { %10340 = vmatpush1.bf16.msra.mxu1 %v10339_v45  ;;  %v19724_v45 = vld [vmem:[#allocation33_spill] sm:$0xff] }
 0xbdb   :  { %10342 = vmatprep.subr.bf16.mxu1 %v10341_v42  ;;  %v19728_v42 = vld [vmem:[#allocation64_spill] sm:$0xff] }
 0xbde   :  { %10344 = vmatpush1.bf16.msra.mxu1 %v10343_v12  ;;  %v19731_v12 = vld [vmem:[#allocation50_spill] sm:$0xff] }
 0xbdf   :  { %10346 = vmatprep.subr.bf16.mxu1 %v10345_v29  ;;  %v19735_v29 = vld [vmem:[#allocation91_spill] sm:$0xff] }
 0xbe2   :  { %10348 = vmatpush1.bf16.msra.mxu1 %v10347_v41  ;;  %v19739_v41 = vld [vmem:[#allocation36_spill] sm:$0xff] }
 0xbe3   :  { %10350 = vmatprep.subr.bf16.mxu1 %v10349_v53  ;;  %v19743_v53 = vld [vmem:[#allocation26_spill] sm:$0xff] }
 0xbe6   :  { %10352 = vmatpush1.bf16.msra.mxu1 %v10351_v62  ;;  %v19747_v62 = vld [vmem:[#allocation107_spill] sm:$0xff] }
 0xbe7   :  { %10354 = vmatprep.subr.bf16.mxu1 %v10353_v20  ;;  %v19750_v20 = vld [vmem:[#allocation115_spill] sm:$0xff] }
 0xbea   :  { %10356 = vmatpush1.bf16.msra.mxu1 %v10355_v30 }
 0xbeb   :  { %10358 = vmatprep.subr.bf16.mxu1 %v10357_v31 }
 0xbee   :  { %10360 = vmatpush1.bf16.msra.mxu1 %v10359_v32 }
 0xbef   :  { %10362 = vmatprep.subr.bf16.mxu1 %v10361_v9 }
 0xbf2   :  { %10364 = vmatpush1.bf16.msra.mxu1 %v10363_v2 }
 0xbf3   :  { %10366 = vmatprep.subr.bf16.mxu1 %v10365_v23 }
 0xbf6   :  { %10368 = vmatpush1.bf16.msra.mxu1 %v10367_v49 }
 0xbf7   :  { %10370 = vmatprep.subr.bf16.mxu1 %v10369_v55 }
 0xbfa   :  { %10372 = vmatpush1.bf16.msra.mxu1 %v10371_v7 }
 0xbfb   :  { %10374 = vmatprep.subr.bf16.mxu1 %v19719_v57 }
 0xbfd   :  { %7968 = vmatmul.mubr.f32.vlgmr.msra.gmra.mrb[4].mxu1 %v19720_v4 }
 0xbfe   :  { %10376 = vmatpush1.bf16.msra.mxu1 %v19721_v58  ;;  %8103 = vmatprep.mubr.f32.mxu1 %v19648_v43  ;;  %v19732_v43 = vld [vmem:[#allocation13_spill] sm:$0xff] }
 0xbff   :  { %10378 = vmatprep.subr.bf16.mxu1 %v19722_v63 }
 0xc02   :  { %10380 = vmatpush1.bf16.msra.mxu1 %v19723_v10 }
 0xc03   :  { %10382 = vmatprep.subr.bf16.mxu1 %v19724_v45 }
 0xc06   :  { %10384 = vmatpush1.bf16.msra.mxu1 %v19725_v59 }
 0xc07   :  { %10386 = vmatprep.subr.bf16.mxu1 %v19726_v37 }
 0xc0a   :  { %10388 = vmatpush1.bf16.msra.mxu1 %v19727_v46 }
 0xc0b   :  { %10390 = vmatprep.subr.bf16.mxu1 %v19728_v42 }
 0xc0e   :  { %10392 = vmatpush1.bf16.msra.mxu1 %v19729_v51 }
 0xc0f   :  { %10394 = vmatprep.subr.bf16.mxu1 %v19730_v14 }
 0xc12   :  { %10396 = vmatpush1.bf16.msra.mxu1 %v19731_v12 }
 0xc13   :  { %10398 = vmatprep.subr.bf16.mxu1 %v19732_v43 }
 0xc16   :  { %10400 = vmatpush1.bf16.msra.mxu1 %v19733_v35 }
 0xc17   :  { %10402 = vmatprep.subr.bf16.mxu1 %v19734_v52 }
 0xc1a   :  { %10404 = vmatpush1.bf16.msra.mxu1 %v19735_v29 }
 0xc1b   :  { %10406 = vmatprep.subr.bf16.mxu1 %v19736_v38 }
 0xc1e   :  { %10408 = vmatpush1.bf16.msra.mxu1 %v19737_v8 }
 0xc1f   :  { %10410 = vmatprep.subr.bf16.mxu1 %v19738_v24 }
 0xc22   :  { %10412 = vmatpush1.bf16.msra.mxu1 %v19739_v41 }
 0xc23   :  { %10414 = vmatprep.subr.bf16.mxu1 %v19740_v19 }
 0xc26   :  { %10416 = vmatpush1.bf16.msra.mxu1 %v19741_v50 }
 0xc27   :  { %10418 = vmatprep.subr.bf16.mxu1 %v19742_v36 }
 0xc2a   :  { %10420 = vmatpush1.bf16.msra.mxu1 %v19743_v53 }
 0xc2b   :  { %10422 = vmatprep.subr.bf16.mxu1 %v19744_v21 }
 0xc2e   :  { %10424 = vmatpush1.bf16.msra.mxu1 %v19745_v5 }
 0xc2f   :  { %10426 = vmatprep.subr.bf16.mxu1 %v19746_v0 }
 0xc32   :  { %10428 = vmatpush1.bf16.msra.mxu1 %v19747_v62 }
 0xc33   :  { %10430 = vmatprep.subr.bf16.mxu1 %v19748_v6 }
 0xc36   :  { %10432 = vmatpush1.bf16.msra.mxu1 %v19749_v44 }
 0xc37   :  { %10434 = vmatprep.subr.bf16.mxu1 %v19750_v20 }
 0xc3a   :  { %10436 = vmatpush1.bf16.msra.mxu1 %v19642_v40 }
 0xc3d   :  { %8105 = vmatmul.mubr.f32.vlgmr.msra.gmra.mrb[4].mxu1 %v19720_v4 }
 0xd10   :  { %v8106_v22 = vpop.f32.mrb[4].mxu1 }
 0xd11   :  { %v8111_v33 = vmul.f32 %v8106_v22, %v8106_v22  ;;  %v8108_v30 = vpop.f32.mrb[5].mxu1 }
 0xd12   :  { %v8112_v11 = vmul.f32 %v8108_v30, %v8108_v30 }
 0xd14   :  { %v8113_v26 = vadd.f32 %v8112_v11, %v8111_v33 }
 0xd16   :  { %8114 = vst [vmem:[#allocation5] sm:$0x1] %v8113_v26 }
 0xd17   :  { %10536 = shalt.err (!%p10533_p12)
}
 0xd18   :  { %s10537_s25 = scalar_lea.hbm %s16398_s1, 16 }
 0xd19   :  { %p10538_p13 = scmp.ne.s32.totalorder %s16398_s1, %s10537_s25  ;;  %p10541_p0 = scmp.lt.u32.totalorder %s10537_s25, %s16398_s1 }
 0xd1b   :  { %p10543_p1 = pnand %p10541_p0, %p10538_p13 }
 0xd1d   :  { %10546 = shalt.err (!%p10543_p1)
}
 0xd1e   :  { %8124 = dma.vmem_to_hbm [thread:$0]  %s8122_s20, 16, %s16398_s1, [#allocation4]  }
 0xd1f   :  { %10549 = dma.done.wait [#allocation4], 16  }
 0xd20   :  { %10550 = vsyncadd [#allocation4], 4294967280 }
 0xd21   :  { %8128 = vsyncpa [#allocation3], 1 }
 0xd22   :  { %8129 = vsyncpa [#allocation4], 1 }

</bundles_post_ra>
